<compile_context>
chip_gen: v5e
topology: v5e:2x2
jax: 0.10.0
libtpu: 0.0.40
codegen_flags: <defaults>
</compile_context>

<pallas_src>
import functools

import jax
import jax.numpy as jnp
from jax.experimental import pallas as pl
from jax.experimental.pallas import tpu as pltpu

_LEAKY_SLOPE = 0.1
_CDT = jnp.bfloat16                    # compute dtype streamed to the MXU
_VMEM_LIMIT = 32 * 1024 * 1024         # safe scoped-VMEM budget on v5e/v6e/v7x


def _compiler_params():
    return pltpu.CompilerParams(
        dimension_semantics=("parallel",),
        vmem_limit_bytes=_VMEM_LIMIT,
    )


def _prep_weight(w):
    """[3, 3, Cin, Cout] (HWIO) -> [9, Cout, Cin] bf16 for (Cout,Cin)x(Cin,M)."""
    kh, kw, cin, cout = w.shape
    return jnp.transpose(w.reshape(kh * kw, cin, cout), (0, 2, 1)).astype(_CDT)


# ----------------------------------------------------------------------------
# Kernel 1: generic 3x3 conv + bias + LeakyReLU (stride 1 or 2 via phase split)
# ----------------------------------------------------------------------------
def _conv3x3_kernel(x_ref, w_ref, b_ref, o_ref, *, taps, slope):
    # x_ref: [P, Cin, FLAT] zero-padded, flattened (phase-split) input, bf16
    # w_ref: [9, Cout, Cin] bf16     b_ref: [Cout, 1] f32
    # o_ref: [Cout, M]  with M = Ho * row_stride  (lane-dense)
    cout, m = o_ref.shape
    acc = jnp.zeros((cout, m), jnp.float32)
    for t, (phase, off) in enumerate(taps):
        xs = x_ref[phase, :, pl.ds(off, m)]                     # [Cin, M]
        acc = acc + jnp.dot(w_ref[t], xs, preferred_element_type=jnp.float32)
    y = acc + b_ref[...]
    y = jnp.where(y >= 0, y, y * jnp.float32(slope))
    o_ref[...] = y.astype(o_ref.dtype)


def conv3x3(x, w, b, *, stride, negative_slope=_LEAKY_SLOPE, out_dtype=_CDT):
    """3x3 conv, padding=1, NCHW channel-major, fused bias + LeakyReLU.

    x: [B, Cin, H, W]; w: [3, 3, Cin, Cout]; b: [Cout].
    """
    B, Cin, H, W = x.shape
    Cout = w.shape[-1]
    Ho = (H + 2 - 3) // stride + 1
    Wo = (W + 2 - 3) // stride + 1
    xp = jnp.pad(x.astype(_CDT), ((0, 0), (0, 0), (1, 1), (1, 1)))
    Hp, Wp = H + 2, W + 2

    if stride == 1:
        row = Wp
        flat = xp.reshape(B, 1, Cin, Hp * Wp)
        taps = tuple((0, kh * Wp + kw) for kh in range(3) for kw in range(3))
    else:
        # Split the padded input into its 4 (row, col) parity phases; a stride-2
        # conv then becomes 9 stride-1 taps on the phase planes, so the kernel
        # only takes contiguous slices (no strided in-kernel loads).
        Hp2, Wp2 = Hp + (Hp % 2), Wp + (Wp % 2)
        xp = jnp.pad(xp, ((0, 0), (0, 0), (0, Hp2 - Hp), (0, Wp2 - Wp)))
        Hh, Wh = Hp2 // 2, Wp2 // 2
        phases = jnp.stack(
            [xp[:, :, ph::2, pw::2] for ph in (0, 1) for pw in (0, 1)], axis=1)
        row = Wh
        flat = phases.reshape(B, 4, Cin, Hh * Wh)
        taps = tuple(((kh % 2) * 2 + (kw % 2), (kh // 2) * row + (kw // 2))
                     for kh in range(3) for kw in range(3))

    M = Ho * row                                   # flat output (row-strided)
    max_start = max(off for _, off in taps)
    FLAT = max(flat.shape[-1], max_start + M) + 8  # tail pad for the tap slices
    flat = jnp.pad(flat, ((0, 0), (0, 0), (0, 0), (0, FLAT - flat.shape[-1])))
    P = flat.shape[1]

    out_flat = pl.pallas_call(
        functools.partial(_conv3x3_kernel, taps=taps, slope=negative_slope),
        grid=(B,),
        in_specs=[
            pl.BlockSpec((None, P, Cin, FLAT), lambda i: (i, 0, 0, 0)),
            pl.BlockSpec((9, Cout, Cin), lambda i: (0, 0, 0)),
            pl.BlockSpec((Cout, 1), lambda i: (0, 0)),
        ],
        out_specs=pl.BlockSpec((None, Cout, M), lambda i: (i, 0, 0)),
        out_shape=jax.ShapeDtypeStruct((B, Cout, M), out_dtype),
        compiler_params=_compiler_params(),
    )(flat, _prep_weight(w), b.reshape(Cout, 1).astype(jnp.float32))
    # Drop the per-row garbage columns of the flat layout.
    return out_flat.reshape(B, Cout, Ho, row)[:, :, :, :Wo]


# ----------------------------------------------------------------------------
# Kernel 2: fused flow head  (3x3 conv -> LeakyReLU -> 3x3 conv -> 2-ch flow)
# ----------------------------------------------------------------------------
def _head_kernel(x_ref, w1_ref, b1_ref, w2_ref, b2_ref, mask_ref, o_ref, h_ref,
                 *, wp, slope):
    # x_ref : [Cin, FLAT]  zero-padded flattened input (bf16)
    # w1_ref: [9, C1, Cin] bf16   w2_ref: [9, Cout, C1] bf16   b*: [*, 1] f32
    # mask  : [1, M] f32 (1.0 on real columns, 0.0 on the inter-row garbage)
    # o_ref : [Cout, M] f32       h_ref (VMEM scratch): [C1, FLAT] bf16
    c1 = h_ref.shape[0]
    cout, m = o_ref.shape
    offs = tuple(kh * wp + kw for kh in range(3) for kw in range(3))

    # --- conv1 (Cin -> C1) + bias + LeakyReLU -------------------------------
    acc1 = jnp.zeros((c1, m), jnp.float32)
    for t, off in enumerate(offs):
        xs = x_ref[:, pl.ds(off, m)]                            # [Cin, M]
        acc1 = acc1 + jnp.dot(w1_ref[t], xs, preferred_element_type=jnp.float32)
    h = acc1 + b1_ref[...]
    h = jnp.where(h >= 0, h, h * jnp.float32(slope))
    # Zero the garbage columns so they double as conv2's horizontal zero
    # padding, then drop the row block between zeroed top/bottom pad rows.
    h = h * mask_ref[...]
    h_ref[...] = jnp.zeros(h_ref.shape, h_ref.dtype)
    h_ref[:, pl.ds(wp + 1, m)] = h.astype(h_ref.dtype)

    # --- conv2 (C1 -> 2 flow channels), intermediate never leaves VMEM ------
    acc2 = jnp.zeros((cout, m), jnp.float32)
    for t, off in enumerate(offs):
        hs = h_ref[:, pl.ds(off, m)]
        acc2 = acc2 + jnp.dot(w2_ref[t], hs, preferred_element_type=jnp.float32)
    o_ref[...] = (acc2 + b2_ref[...]).astype(o_ref.dtype)


def fused_head(x, w1, b1, w2, b2, *, negative_slope=_LEAKY_SLOPE):
    """Two chained 3x3 stride-1 convs (pad 1); x: [B, Cin, H, W] -> [B, 2, H, W]."""
    B, Cin, H, W = x.shape
    C1 = w1.shape[-1]
    Cout = w2.shape[-1]
    Hp, Wp = H + 2, W + 2
    Ho, Wo = H, W
    M = Ho * Wp
    FLAT = Hp * Wp + 8
    xp = jnp.pad(x.astype(_CDT), ((0, 0), (0, 0), (1, 1), (1, 1)))
    xf = jnp.pad(xp.reshape(B, Cin, Hp * Wp),
                 ((0, 0), (0, 0), (0, FLAT - Hp * Wp)))
    mask = ((jnp.arange(M, dtype=jnp.int32) % Wp) < Wo)
    mask = mask.astype(jnp.float32).reshape(1, M)

    out = pl.pallas_call(
        functools.partial(_head_kernel, wp=Wp, slope=negative_slope),
        grid=(B,),
        in_specs=[
            pl.BlockSpec((None, Cin, FLAT), lambda i: (i, 0, 0)),
            pl.BlockSpec((9, C1, Cin), lambda i: (0, 0, 0)),
            pl.BlockSpec((C1, 1), lambda i: (0, 0)),
            pl.BlockSpec((9, Cout, C1), lambda i: (0, 0, 0)),
            pl.BlockSpec((Cout, 1), lambda i: (0, 0)),
            pl.BlockSpec((1, M), lambda i: (0, 0)),
        ],
        out_specs=pl.BlockSpec((None, Cout, M), lambda i: (i, 0, 0)),
        out_shape=jax.ShapeDtypeStruct((B, Cout, M), jnp.float32),
        scratch_shapes=[pltpu.VMEM((C1, FLAT), _CDT)],
        compiler_params=_compiler_params(),
    )(xf, _prep_weight(w1), b1.reshape(C1, 1).astype(jnp.float32),
      _prep_weight(w2), b2.reshape(Cout, 1).astype(jnp.float32), mask)
    return out.reshape(B, Cout, Ho, Wp)[:, :, :, :Wo]


# ----------------------------------------------------------------------------
# Kernel 3: cost-volume correlation (max displacement md, window (2md+1)^2)
# ----------------------------------------------------------------------------
def _corr_kernel(f1_ref, f2_ref, o_ref, *, md, slope):
    f1 = f1_ref[...].astype(jnp.float32)         # [C, H, W]
    f2 = f2_ref[...].astype(jnp.float32)         # [C, H+2md, W+2md]
    C, H, W = f1.shape
    inv_c = jnp.float32(1.0 / C)
    d = 2 * md + 1
    for dy in range(d):
        for dx in range(d):
            sh = f2[:, dy:dy + H, dx:dx + W]     # [C, H, W]
            # Channel reduction over the *leading* axis: unrolled VPU mul-adds,
            # no cross-lane XLU reduce.
            acc = f1[0] * sh[0]
            for ci in range(1, C):
                acc = acc + f1[ci] * sh[ci]
            c = acc * inv_c
            c = jnp.where(c >= 0, c, c * jnp.float32(slope))
            o_ref[dy * d + dx] = c.astype(o_ref.dtype)   # lane-dense [H, W]


def correlation(f1, f2, *, md=1, negative_slope=_LEAKY_SLOPE):
    """f1, f2: [B, C, H, W] -> [B, (2md+1)^2, H, W] (channel-major)."""
    B, C, H, W = f1.shape
    D = 2 * md + 1
    f2p = jnp.pad(f2.astype(_CDT), ((0, 0), (0, 0), (md, md), (md, md)))
    return pl.pallas_call(
        functools.partial(_corr_kernel, md=md, slope=negative_slope),
        grid=(B,),
        in_specs=[
            pl.BlockSpec((None, C, H, W), lambda i: (i, 0, 0, 0)),
            pl.BlockSpec((None, C, H + 2 * md, W + 2 * md),
                         lambda i: (i, 0, 0, 0)),
        ],
        out_specs=pl.BlockSpec((None, D * D, H, W), lambda i: (i, 0, 0, 0)),
        out_shape=jax.ShapeDtypeStruct((B, D * D, H, W), _CDT),
        compiler_params=_compiler_params(),
    )(f1.astype(_CDT), f2p)


# ----------------------------------------------------------------------------
# Parameters (deterministic, synthetic)
# ----------------------------------------------------------------------------
def init_params(key):
    def conv_init(k, kh, kw, cin, cout):
        kw_key, kb_key = jax.random.split(k)
        fan_in = kh * kw * cin
        w = jax.random.normal(kw_key, (kh, kw, cin, cout), jnp.float32)
        w = w * (1.0 / jnp.sqrt(jnp.float32(fan_in)))
        b = 0.01 * jax.random.normal(kb_key, (cout,), jnp.float32)
        return w, b

    keys = jax.random.split(key, 6)
    p = {}
    # backbone (shared across the image pair)
    p["c1_w"], p["c1_b"] = conv_init(keys[0], 3, 3, 3, 8)     # level 1: /2
    p["c2_w"], p["c2_b"] = conv_init(keys[1], 3, 3, 8, 16)    # level 2: /4
    # head, level 2 (coarse): in = corr(9) + feat(16) = 25
    p["h2_w"], p["h2_b"] = conv_init(keys[2], 3, 3, 25, 16)
    p["p2_w"], p["p2_b"] = conv_init(keys[3], 3, 3, 16, 2)
    # head, level 1 (fine): in = corr(9) + feat(8) + up_flow(2) = 19
    p["h1_w"], p["h1_b"] = conv_init(keys[4], 3, 3, 19, 16)
    p["p1_w"], p["p1_b"] = conv_init(keys[5], 3, 3, 16, 2)
    return p


# ----------------------------------------------------------------------------
# PwcNet forward (eval mode: returns list of pyramid flows, coarse-to-fine)
# ----------------------------------------------------------------------------
def pwcnet_forward(params, img):
    """img: [B, 6, H, W] NCHW (image pair concatenated on channels)."""
    img1 = img[:, :3]     # channel-major already: W sits on the 128-lane axis
    img2 = img[:, 3:]

    # --- backbone (shared weights, applied to each image) ---
    def pyramid(x):
        f_l1 = conv3x3(x, params["c1_w"], params["c1_b"], stride=2)
        f_l2 = conv3x3(f_l1, params["c2_w"], params["c2_b"], stride=2)
        return f_l1, f_l2

    f1_l1, f1_l2 = pyramid(img1)
    f2_l1, f2_l2 = pyramid(img2)

    # --- neck: identity (None in this configuration) ---

    # --- head: level 2 (coarse) ---
    corr2 = correlation(f1_l2, f2_l2, md=1)
    x2 = jnp.concatenate([corr2, f1_l2], axis=1)
    flow2 = fused_head(x2, params["h2_w"], params["h2_b"],
                       params["p2_w"], params["p2_b"])

    # --- head: level 1 (fine) ---
    up_flow2 = jnp.repeat(jnp.repeat(flow2, 2, axis=2), 2, axis=3) * 2.0
    corr1 = correlation(f1_l1, f2_l1, md=1)
    x1 = jnp.concatenate([corr1, f1_l1, up_flow2.astype(_CDT)], axis=1)
    flow1 = fused_head(x1, params["h1_w"], params["h1_b"],
                       params["p1_w"], params["p1_b"])

    # flows are already NCHW (channel-major), coarse-to-fine
    return [flow2, flow1]


if __name__ == "__main__":
    key = jax.random.PRNGKey(0)
    pkey, ikey = jax.random.split(key)
    params = init_params(pkey)

    B, H, W = 2, 16, 16
    img = jax.random.normal(ikey, (B, 6, H, W), jnp.float32)  # image pair, NCHW

    fwd = jax.jit(pwcnet_forward)
    flows = jax.block_until_ready(fwd(params, img))

    assert flows[0].shape == (B, 2, H // 4, W // 4), flows[0].shape
    assert flows[1].shape == (B, 2, H // 2, W // 2), flows[1].shape
    assert all(bool(jnp.all(jnp.isfinite(f))) for f in flows)
    print("KERNEL_OK")
</pallas_src>

<mosaic_0001>
module attributes {stable_mosaic.version = 11 : i64} {
  func.func @_conv3x3_kernel(%arg0: i32, %arg1: memref<1x4x3x90xbf16, #tpu.memory_space<vmem>>, %arg2: memref<9x8x3xbf16, #tpu.memory_space<vmem>>, %arg3: memref<8x1xf32, #tpu.memory_space<vmem>>, %arg4: memref<1x8x72xbf16, #tpu.memory_space<vmem>>) attributes {dimension_semantics = [#tpu.dimension_semantics<parallel>], iteration_bounds = array<i64: 2>, scalar_prefetch = 0 : i64, scratch_operands = 0 : i64, tpu.core_type = #tpu.core_type<tc>, window_params = [{transform_indices = @transform_0, window_bounds = array<i64: 1, 4, 3, 90>}, {pipeline_mode = #tpu.pipeline_mode<synchronous>, transform_indices = @transform_1, window_bounds = array<i64: 9, 8, 3>}, {pipeline_mode = #tpu.pipeline_mode<synchronous>, transform_indices = @transform_2, window_bounds = array<i64: 8, 1>}, {transform_indices = @transform_3, window_bounds = array<i64: 1, 8, 72>}]} {
    %cst = arith.constant 0.000000e+00 : f32
    %0 = vector.broadcast %cst : f32 to vector<8x72xf32>
    %c0 = arith.constant 0 : index
    %c0_0 = arith.constant 0 : index
    %c0_1 = arith.constant 0 : index
    %c0_2 = arith.constant 0 : index
    %1 = vector.load %arg1[%c0, %c0_0, %c0_1, %c0_2] : memref<1x4x3x90xbf16, #tpu.memory_space<vmem>>, vector<1x1x3x72xbf16>
    %2 = vector.shape_cast %1 : vector<1x1x3x72xbf16> to vector<3x72xbf16>
    %c0_3 = arith.constant 0 : index
    %c0_4 = arith.constant 0 : index
    %c0_5 = arith.constant 0 : index
    %3 = vector.load %arg2[%c0_3, %c0_4, %c0_5] : memref<9x8x3xbf16, #tpu.memory_space<vmem>>, vector<1x8x3xbf16>
    %4 = vector.shape_cast %3 : vector<1x8x3xbf16> to vector<8x3xbf16>
    %cst_6 = arith.constant dense<0.000000e+00> : vector<8x72xf32>
    %5 = tpu.matmul %4, %2, %cst_6 {dimension_numbers = #tpu.dot_dimension_numbers<[1], [0], [0], [1], [0, 0, 1, 1], [], []>} : vector<8x3xbf16>, vector<3x72xbf16>, vector<8x72xf32> -> vector<8x72xf32>
    %6 = arith.addf %0, %5 : vector<8x72xf32>
    %c0_7 = arith.constant 0 : index
    %c1 = arith.constant 1 : index
    %c0_8 = arith.constant 0 : index
    %c0_9 = arith.constant 0 : index
    %7 = vector.load %arg1[%c0_7, %c1, %c0_8, %c0_9] : memref<1x4x3x90xbf16, #tpu.memory_space<vmem>>, vector<1x1x3x72xbf16>
    %8 = vector.shape_cast %7 : vector<1x1x3x72xbf16> to vector<3x72xbf16>
    %c1_10 = arith.constant 1 : index
    %c0_11 = arith.constant 0 : index
    %c0_12 = arith.constant 0 : index
    %9 = vector.load %arg2[%c1_10, %c0_11, %c0_12] : memref<9x8x3xbf16, #tpu.memory_space<vmem>>, vector<1x8x3xbf16>
    %10 = vector.shape_cast %9 : vector<1x8x3xbf16> to vector<8x3xbf16>
    %cst_13 = arith.constant dense<0.000000e+00> : vector<8x72xf32>
    %11 = tpu.matmul %10, %8, %cst_13 {dimension_numbers = #tpu.dot_dimension_numbers<[1], [0], [0], [1], [0, 0, 1, 1], [], []>} : vector<8x3xbf16>, vector<3x72xbf16>, vector<8x72xf32> -> vector<8x72xf32>
    %12 = arith.addf %6, %11 : vector<8x72xf32>
    %c0_14 = arith.constant 0 : index
    %c0_15 = arith.constant 0 : index
    %c0_16 = arith.constant 0 : index
    %c1_17 = arith.constant 1 : index
    %13 = vector.load %arg1[%c0_14, %c0_15, %c0_16, %c1_17] : memref<1x4x3x90xbf16, #tpu.memory_space<vmem>>, vector<1x1x3x72xbf16>
    %14 = vector.shape_cast %13 : vector<1x1x3x72xbf16> to vector<3x72xbf16>
    %c2 = arith.constant 2 : index
    %c0_18 = arith.constant 0 : index
    %c0_19 = arith.constant 0 : index
    %15 = vector.load %arg2[%c2, %c0_18, %c0_19] : memref<9x8x3xbf16, #tpu.memory_space<vmem>>, vector<1x8x3xbf16>
    %16 = vector.shape_cast %15 : vector<1x8x3xbf16> to vector<8x3xbf16>
    %cst_20 = arith.constant dense<0.000000e+00> : vector<8x72xf32>
    %17 = tpu.matmul %16, %14, %cst_20 {dimension_numbers = #tpu.dot_dimension_numbers<[1], [0], [0], [1], [0, 0, 1, 1], [], []>} : vector<8x3xbf16>, vector<3x72xbf16>, vector<8x72xf32> -> vector<8x72xf32>
    %18 = arith.addf %12, %17 : vector<8x72xf32>
    %c0_21 = arith.constant 0 : index
    %c2_22 = arith.constant 2 : index
    %c0_23 = arith.constant 0 : index
    %c0_24 = arith.constant 0 : index
    %19 = vector.load %arg1[%c0_21, %c2_22, %c0_23, %c0_24] : memref<1x4x3x90xbf16, #tpu.memory_space<vmem>>, vector<1x1x3x72xbf16>
    %20 = vector.shape_cast %19 : vector<1x1x3x72xbf16> to vector<3x72xbf16>
    %c3 = arith.constant 3 : index
    %c0_25 = arith.constant 0 : index
    %c0_26 = arith.constant 0 : index
    %21 = vector.load %arg2[%c3, %c0_25, %c0_26] : memref<9x8x3xbf16, #tpu.memory_space<vmem>>, vector<1x8x3xbf16>
    %22 = vector.shape_cast %21 : vector<1x8x3xbf16> to vector<8x3xbf16>
    %cst_27 = arith.constant dense<0.000000e+00> : vector<8x72xf32>
    %23 = tpu.matmul %22, %20, %cst_27 {dimension_numbers = #tpu.dot_dimension_numbers<[1], [0], [0], [1], [0, 0, 1, 1], [], []>} : vector<8x3xbf16>, vector<3x72xbf16>, vector<8x72xf32> -> vector<8x72xf32>
    %24 = arith.addf %18, %23 : vector<8x72xf32>
    %c0_28 = arith.constant 0 : index
    %c3_29 = arith.constant 3 : index
    %c0_30 = arith.constant 0 : index
    %c0_31 = arith.constant 0 : index
    %25 = vector.load %arg1[%c0_28, %c3_29, %c0_30, %c0_31] : memref<1x4x3x90xbf16, #tpu.memory_space<vmem>>, vector<1x1x3x72xbf16>
    %26 = vector.shape_cast %25 : vector<1x1x3x72xbf16> to vector<3x72xbf16>
    %c4 = arith.constant 4 : index
    %c0_32 = arith.constant 0 : index
    %c0_33 = arith.constant 0 : index
    %27 = vector.load %arg2[%c4, %c0_32, %c0_33] : memref<9x8x3xbf16, #tpu.memory_space<vmem>>, vector<1x8x3xbf16>
    %28 = vector.shape_cast %27 : vector<1x8x3xbf16> to vector<8x3xbf16>
    %cst_34 = arith.constant dense<0.000000e+00> : vector<8x72xf32>
    %29 = tpu.matmul %28, %26, %cst_34 {dimension_numbers = #tpu.dot_dimension_numbers<[1], [0], [0], [1], [0, 0, 1, 1], [], []>} : vector<8x3xbf16>, vector<3x72xbf16>, vector<8x72xf32> -> vector<8x72xf32>
    %30 = arith.addf %24, %29 : vector<8x72xf32>
    %c0_35 = arith.constant 0 : index
    %c2_36 = arith.constant 2 : index
    %c0_37 = arith.constant 0 : index
    %c1_38 = arith.constant 1 : index
    %31 = vector.load %arg1[%c0_35, %c2_36, %c0_37, %c1_38] : memref<1x4x3x90xbf16, #tpu.memory_space<vmem>>, vector<1x1x3x72xbf16>
    %32 = vector.shape_cast %31 : vector<1x1x3x72xbf16> to vector<3x72xbf16>
    %c5 = arith.constant 5 : index
    %c0_39 = arith.constant 0 : index
    %c0_40 = arith.constant 0 : index
    %33 = vector.load %arg2[%c5, %c0_39, %c0_40] : memref<9x8x3xbf16, #tpu.memory_space<vmem>>, vector<1x8x3xbf16>
    %34 = vector.shape_cast %33 : vector<1x8x3xbf16> to vector<8x3xbf16>
    %cst_41 = arith.constant dense<0.000000e+00> : vector<8x72xf32>
    %35 = tpu.matmul %34, %32, %cst_41 {dimension_numbers = #tpu.dot_dimension_numbers<[1], [0], [0], [1], [0, 0, 1, 1], [], []>} : vector<8x3xbf16>, vector<3x72xbf16>, vector<8x72xf32> -> vector<8x72xf32>
    %36 = arith.addf %30, %35 : vector<8x72xf32>
    %c0_42 = arith.constant 0 : index
    %c0_43 = arith.constant 0 : index
    %c0_44 = arith.constant 0 : index
    %c9 = arith.constant 9 : index
    %37 = vector.load %arg1[%c0_42, %c0_43, %c0_44, %c9] : memref<1x4x3x90xbf16, #tpu.memory_space<vmem>>, vector<1x1x3x72xbf16>
    %38 = vector.shape_cast %37 : vector<1x1x3x72xbf16> to vector<3x72xbf16>
    %c6 = arith.constant 6 : index
    %c0_45 = arith.constant 0 : index
    %c0_46 = arith.constant 0 : index
    %39 = vector.load %arg2[%c6, %c0_45, %c0_46] : memref<9x8x3xbf16, #tpu.memory_space<vmem>>, vector<1x8x3xbf16>
    %40 = vector.shape_cast %39 : vector<1x8x3xbf16> to vector<8x3xbf16>
    %cst_47 = arith.constant dense<0.000000e+00> : vector<8x72xf32>
    %41 = tpu.matmul %40, %38, %cst_47 {dimension_numbers = #tpu.dot_dimension_numbers<[1], [0], [0], [1], [0, 0, 1, 1], [], []>} : vector<8x3xbf16>, vector<3x72xbf16>, vector<8x72xf32> -> vector<8x72xf32>
    %42 = arith.addf %36, %41 : vector<8x72xf32>
    %c0_48 = arith.constant 0 : index
    %c1_49 = arith.constant 1 : index
    %c0_50 = arith.constant 0 : index
    %c9_51 = arith.constant 9 : index
    %43 = vector.load %arg1[%c0_48, %c1_49, %c0_50, %c9_51] : memref<1x4x3x90xbf16, #tpu.memory_space<vmem>>, vector<1x1x3x72xbf16>
    %44 = vector.shape_cast %43 : vector<1x1x3x72xbf16> to vector<3x72xbf16>
    %c7 = arith.constant 7 : index
    %c0_52 = arith.constant 0 : index
    %c0_53 = arith.constant 0 : index
    %45 = vector.load %arg2[%c7, %c0_52, %c0_53] : memref<9x8x3xbf16, #tpu.memory_space<vmem>>, vector<1x8x3xbf16>
    %46 = vector.shape_cast %45 : vector<1x8x3xbf16> to vector<8x3xbf16>
    %cst_54 = arith.constant dense<0.000000e+00> : vector<8x72xf32>
    %47 = tpu.matmul %46, %44, %cst_54 {dimension_numbers = #tpu.dot_dimension_numbers<[1], [0], [0], [1], [0, 0, 1, 1], [], []>} : vector<8x3xbf16>, vector<3x72xbf16>, vector<8x72xf32> -> vector<8x72xf32>
    %48 = arith.addf %42, %47 : vector<8x72xf32>
    %c0_55 = arith.constant 0 : index
    %c0_56 = arith.constant 0 : index
    %c0_57 = arith.constant 0 : index
    %c10 = arith.constant 10 : index
    %49 = vector.load %arg1[%c0_55, %c0_56, %c0_57, %c10] : memref<1x4x3x90xbf16, #tpu.memory_space<vmem>>, vector<1x1x3x72xbf16>
    %50 = vector.shape_cast %49 : vector<1x1x3x72xbf16> to vector<3x72xbf16>
    %c8 = arith.constant 8 : index
    %c0_58 = arith.constant 0 : index
    %c0_59 = arith.constant 0 : index
    %51 = vector.load %arg2[%c8, %c0_58, %c0_59] : memref<9x8x3xbf16, #tpu.memory_space<vmem>>, vector<1x8x3xbf16>
    %52 = vector.shape_cast %51 : vector<1x8x3xbf16> to vector<8x3xbf16>
    %cst_60 = arith.constant dense<0.000000e+00> : vector<8x72xf32>
    %53 = tpu.matmul %52, %50, %cst_60 {dimension_numbers = #tpu.dot_dimension_numbers<[1], [0], [0], [1], [0, 0, 1, 1], [], []>} : vector<8x3xbf16>, vector<3x72xbf16>, vector<8x72xf32> -> vector<8x72xf32>
    %54 = arith.addf %48, %53 : vector<8x72xf32>
    %c0_61 = arith.constant 0 : index
    %c0_62 = arith.constant 0 : index
    %55 = vector.load %arg3[%c0_61, %c0_62] : memref<8x1xf32, #tpu.memory_space<vmem>>, vector<8x1xf32>
    %56 = vector.broadcast %55 : vector<8x1xf32> to vector<8x72xf32>
    %57 = arith.addf %54, %56 : vector<8x72xf32>
    %cst_63 = arith.constant 0.000000e+00 : f32
    %58 = vector.broadcast %cst_63 : f32 to vector<8x72xf32>
    %59 = arith.cmpf oge, %57, %58 : vector<8x72xf32>
    %cst_64 = arith.constant 1.000000e-01 : f32
    %60 = vector.broadcast %cst_64 : f32 to vector<8x72xf32>
    %61 = arith.mulf %57, %60 : vector<8x72xf32>
    %62 = arith.select %59, %57, %61 : vector<8x72xi1>, vector<8x72xf32>
    %63 = arith.truncf %62 : vector<8x72xf32> to vector<8x72xbf16>
    %c0_65 = arith.constant 0 : index
    %c0_66 = arith.constant 0 : index
    %c0_67 = arith.constant 0 : index
    %64 = vector.load %arg4[%c0_65, %c0_66, %c0_67] : memref<1x8x72xbf16, #tpu.memory_space<vmem>>, vector<1x8x72xbf16>
    %65 = vector.shape_cast %64 : vector<1x8x72xbf16> to vector<8x72xbf16>
    %66 = vector.shape_cast %63 : vector<8x72xbf16> to vector<1x8x72xbf16>
    tpu.vector_store %arg4[%c0_65, %c0_66, %c0_67], %66 {strides = array<i32>} : memref<1x8x72xbf16, #tpu.memory_space<vmem>>, vector<1x8x72xbf16>,
    return
  }
  func.func @transform_0(%arg0: i32) -> (i32, i32, i32, i32) {
    %c0_i32 = arith.constant 0 : i32
    %c0_i32_0 = arith.constant 0 : i32
    %c0_i32_1 = arith.constant 0 : i32
    %c0_i32_2 = arith.constant 0 : i32
    return %arg0, %c0_i32, %c0_i32_0, %c0_i32_1 : i32, i32, i32, i32
  }
  func.func @transform_1(%arg0: i32) -> (i32, i32, i32) {
    %c0_i32 = arith.constant 0 : i32
    %c0_i32_0 = arith.constant 0 : i32
    %c0_i32_1 = arith.constant 0 : i32
    %c0_i32_2 = arith.constant 0 : i32
    return %c0_i32, %c0_i32_0, %c0_i32_1 : i32, i32, i32
  }
  func.func @transform_2(%arg0: i32) -> (i32, i32) {
    %c0_i32 = arith.constant 0 : i32
    %c0_i32_0 = arith.constant 0 : i32
    %c0_i32_1 = arith.constant 0 : i32
    return %c0_i32, %c0_i32_0 : i32, i32
  }
  func.func @transform_3(%arg0: i32) -> (i32, i32, i32) {
    %c0_i32 = arith.constant 0 : i32
    %c0_i32_0 = arith.constant 0 : i32
    %c0_i32_1 = arith.constant 0 : i32
    return %arg0, %c0_i32, %c0_i32_0 : i32, i32, i32
  }
}

module attributes {stable_mosaic.version = 11 : i64} {
  func.func @_conv3x3_kernel(%arg0: i32, %arg1: memref<1x4x8x34xbf16, #tpu.memory_space<vmem>>, %arg2: memref<9x16x8xbf16, #tpu.memory_space<vmem>>, %arg3: memref<16x1xf32, #tpu.memory_space<vmem>>, %arg4: memref<1x16x20xbf16, #tpu.memory_space<vmem>>) attributes {dimension_semantics = [#tpu.dimension_semantics<parallel>], iteration_bounds = array<i64: 2>, scalar_prefetch = 0 : i64, scratch_operands = 0 : i64, tpu.core_type = #tpu.core_type<tc>, window_params = [{transform_indices = @transform_0, window_bounds = array<i64: 1, 4, 8, 34>}, {pipeline_mode = #tpu.pipeline_mode<synchronous>, transform_indices = @transform_1, window_bounds = array<i64: 9, 16, 8>}, {pipeline_mode = #tpu.pipeline_mode<synchronous>, transform_indices = @transform_2, window_bounds = array<i64: 16, 1>}, {transform_indices = @transform_3, window_bounds = array<i64: 1, 16, 20>}]} {
    %cst = arith.constant 0.000000e+00 : f32
    %0 = vector.broadcast %cst : f32 to vector<16x20xf32>
    %c0 = arith.constant 0 : index
    %c0_0 = arith.constant 0 : index
    %c0_1 = arith.constant 0 : index
    %c0_2 = arith.constant 0 : index
    %1 = vector.load %arg1[%c0, %c0_0, %c0_1, %c0_2] : memref<1x4x8x34xbf16, #tpu.memory_space<vmem>>, vector<1x1x8x20xbf16>
    %2 = vector.shape_cast %1 : vector<1x1x8x20xbf16> to vector<8x20xbf16>
    %c0_3 = arith.constant 0 : index
    %c0_4 = arith.constant 0 : index
    %c0_5 = arith.constant 0 : index
    %3 = vector.load %arg2[%c0_3, %c0_4, %c0_5] : memref<9x16x8xbf16, #tpu.memory_space<vmem>>, vector<1x16x8xbf16>
    %4 = vector.shape_cast %3 : vector<1x16x8xbf16> to vector<16x8xbf16>
    %cst_6 = arith.constant dense<0.000000e+00> : vector<16x20xf32>
    %5 = tpu.matmul %4, %2, %cst_6 {dimension_numbers = #tpu.dot_dimension_numbers<[1], [0], [0], [1], [0, 0, 1, 1], [], []>} : vector<16x8xbf16>, vector<8x20xbf16>, vector<16x20xf32> -> vector<16x20xf32>
    %6 = arith.addf %0, %5 : vector<16x20xf32>
    %c0_7 = arith.constant 0 : index
    %c1 = arith.constant 1 : index
    %c0_8 = arith.constant 0 : index
    %c0_9 = arith.constant 0 : index
    %7 = vector.load %arg1[%c0_7, %c1, %c0_8, %c0_9] : memref<1x4x8x34xbf16, #tpu.memory_space<vmem>>, vector<1x1x8x20xbf16>
    %8 = vector.shape_cast %7 : vector<1x1x8x20xbf16> to vector<8x20xbf16>
    %c1_10 = arith.constant 1 : index
    %c0_11 = arith.constant 0 : index
    %c0_12 = arith.constant 0 : index
    %9 = vector.load %arg2[%c1_10, %c0_11, %c0_12] : memref<9x16x8xbf16, #tpu.memory_space<vmem>>, vector<1x16x8xbf16>
    %10 = vector.shape_cast %9 : vector<1x16x8xbf16> to vector<16x8xbf16>
    %cst_13 = arith.constant dense<0.000000e+00> : vector<16x20xf32>
    %11 = tpu.matmul %10, %8, %cst_13 {dimension_numbers = #tpu.dot_dimension_numbers<[1], [0], [0], [1], [0, 0, 1, 1], [], []>} : vector<16x8xbf16>, vector<8x20xbf16>, vector<16x20xf32> -> vector<16x20xf32>
    %12 = arith.addf %6, %11 : vector<16x20xf32>
    %c0_14 = arith.constant 0 : index
    %c0_15 = arith.constant 0 : index
    %c0_16 = arith.constant 0 : index
    %c1_17 = arith.constant 1 : index
    %13 = vector.load %arg1[%c0_14, %c0_15, %c0_16, %c1_17] : memref<1x4x8x34xbf16, #tpu.memory_space<vmem>>, vector<1x1x8x20xbf16>
    %14 = vector.shape_cast %13 : vector<1x1x8x20xbf16> to vector<8x20xbf16>
    %c2 = arith.constant 2 : index
    %c0_18 = arith.constant 0 : index
    %c0_19 = arith.constant 0 : index
    %15 = vector.load %arg2[%c2, %c0_18, %c0_19] : memref<9x16x8xbf16, #tpu.memory_space<vmem>>, vector<1x16x8xbf16>
    %16 = vector.shape_cast %15 : vector<1x16x8xbf16> to vector<16x8xbf16>
    %cst_20 = arith.constant dense<0.000000e+00> : vector<16x20xf32>
    %17 = tpu.matmul %16, %14, %cst_20 {dimension_numbers = #tpu.dot_dimension_numbers<[1], [0], [0], [1], [0, 0, 1, 1], [], []>} : vector<16x8xbf16>, vector<8x20xbf16>, vector<16x20xf32> -> vector<16x20xf32>
    %18 = arith.addf %12, %17 : vector<16x20xf32>
    %c0_21 = arith.constant 0 : index
    %c2_22 = arith.constant 2 : index
    %c0_23 = arith.constant 0 : index
    %c0_24 = arith.constant 0 : index
    %19 = vector.load %arg1[%c0_21, %c2_22, %c0_23, %c0_24] : memref<1x4x8x34xbf16, #tpu.memory_space<vmem>>, vector<1x1x8x20xbf16>
    %20 = vector.shape_cast %19 : vector<1x1x8x20xbf16> to vector<8x20xbf16>
    %c3 = arith.constant 3 : index
    %c0_25 = arith.constant 0 : index
    %c0_26 = arith.constant 0 : index
    %21 = vector.load %arg2[%c3, %c0_25, %c0_26] : memref<9x16x8xbf16, #tpu.memory_space<vmem>>, vector<1x16x8xbf16>
    %22 = vector.shape_cast %21 : vector<1x16x8xbf16> to vector<16x8xbf16>
    %cst_27 = arith.constant dense<0.000000e+00> : vector<16x20xf32>
    %23 = tpu.matmul %22, %20, %cst_27 {dimension_numbers = #tpu.dot_dimension_numbers<[1], [0], [0], [1], [0, 0, 1, 1], [], []>} : vector<16x8xbf16>, vector<8x20xbf16>, vector<16x20xf32> -> vector<16x20xf32>
    %24 = arith.addf %18, %23 : vector<16x20xf32>
    %c0_28 = arith.constant 0 : index
    %c3_29 = arith.constant 3 : index
    %c0_30 = arith.constant 0 : index
    %c0_31 = arith.constant 0 : index
    %25 = vector.load %arg1[%c0_28, %c3_29, %c0_30, %c0_31] : memref<1x4x8x34xbf16, #tpu.memory_space<vmem>>, vector<1x1x8x20xbf16>
    %26 = vector.shape_cast %25 : vector<1x1x8x20xbf16> to vector<8x20xbf16>
    %c4 = arith.constant 4 : index
    %c0_32 = arith.constant 0 : index
    %c0_33 = arith.constant 0 : index
    %27 = vector.load %arg2[%c4, %c0_32, %c0_33] : memref<9x16x8xbf16, #tpu.memory_space<vmem>>, vector<1x16x8xbf16>
    %28 = vector.shape_cast %27 : vector<1x16x8xbf16> to vector<16x8xbf16>
    %cst_34 = arith.constant dense<0.000000e+00> : vector<16x20xf32>
    %29 = tpu.matmul %28, %26, %cst_34 {dimension_numbers = #tpu.dot_dimension_numbers<[1], [0], [0], [1], [0, 0, 1, 1], [], []>} : vector<16x8xbf16>, vector<8x20xbf16>, vector<16x20xf32> -> vector<16x20xf32>
    %30 = arith.addf %24, %29 : vector<16x20xf32>
    %c0_35 = arith.constant 0 : index
    %c2_36 = arith.constant 2 : index
    %c0_37 = arith.constant 0 : index
    %c1_38 = arith.constant 1 : index
    %31 = vector.load %arg1[%c0_35, %c2_36, %c0_37, %c1_38] : memref<1x4x8x34xbf16, #tpu.memory_space<vmem>>, vector<1x1x8x20xbf16>
    %32 = vector.shape_cast %31 : vector<1x1x8x20xbf16> to vector<8x20xbf16>
    %c5 = arith.constant 5 : index
    %c0_39 = arith.constant 0 : index
    %c0_40 = arith.constant 0 : index
    %33 = vector.load %arg2[%c5, %c0_39, %c0_40] : memref<9x16x8xbf16, #tpu.memory_space<vmem>>, vector<1x16x8xbf16>
    %34 = vector.shape_cast %33 : vector<1x16x8xbf16> to vector<16x8xbf16>
    %cst_41 = arith.constant dense<0.000000e+00> : vector<16x20xf32>
    %35 = tpu.matmul %34, %32, %cst_41 {dimension_numbers = #tpu.dot_dimension_numbers<[1], [0], [0], [1], [0, 0, 1, 1], [], []>} : vector<16x8xbf16>, vector<8x20xbf16>, vector<16x20xf32> -> vector<16x20xf32>
    %36 = arith.addf %30, %35 : vector<16x20xf32>
    %c0_42 = arith.constant 0 : index
    %c0_43 = arith.constant 0 : index
    %c0_44 = arith.constant 0 : index
    %c5_45 = arith.constant 5 : index
    %37 = vector.load %arg1[%c0_42, %c0_43, %c0_44, %c5_45] : memref<1x4x8x34xbf16, #tpu.memory_space<vmem>>, vector<1x1x8x20xbf16>
    %38 = vector.shape_cast %37 : vector<1x1x8x20xbf16> to vector<8x20xbf16>
    %c6 = arith.constant 6 : index
    %c0_46 = arith.constant 0 : index
    %c0_47 = arith.constant 0 : index
    %39 = vector.load %arg2[%c6, %c0_46, %c0_47] : memref<9x16x8xbf16, #tpu.memory_space<vmem>>, vector<1x16x8xbf16>
    %40 = vector.shape_cast %39 : vector<1x16x8xbf16> to vector<16x8xbf16>
    %cst_48 = arith.constant dense<0.000000e+00> : vector<16x20xf32>
    %41 = tpu.matmul %40, %38, %cst_48 {dimension_numbers = #tpu.dot_dimension_numbers<[1], [0], [0], [1], [0, 0, 1, 1], [], []>} : vector<16x8xbf16>, vector<8x20xbf16>, vector<16x20xf32> -> vector<16x20xf32>
    %42 = arith.addf %36, %41 : vector<16x20xf32>
    %c0_49 = arith.constant 0 : index
    %c1_50 = arith.constant 1 : index
    %c0_51 = arith.constant 0 : index
    %c5_52 = arith.constant 5 : index
    %43 = vector.load %arg1[%c0_49, %c1_50, %c0_51, %c5_52] : memref<1x4x8x34xbf16, #tpu.memory_space<vmem>>, vector<1x1x8x20xbf16>
    %44 = vector.shape_cast %43 : vector<1x1x8x20xbf16> to vector<8x20xbf16>
    %c7 = arith.constant 7 : index
    %c0_53 = arith.constant 0 : index
    %c0_54 = arith.constant 0 : index
    %45 = vector.load %arg2[%c7, %c0_53, %c0_54] : memref<9x16x8xbf16, #tpu.memory_space<vmem>>, vector<1x16x8xbf16>
    %46 = vector.shape_cast %45 : vector<1x16x8xbf16> to vector<16x8xbf16>
    %cst_55 = arith.constant dense<0.000000e+00> : vector<16x20xf32>
    %47 = tpu.matmul %46, %44, %cst_55 {dimension_numbers = #tpu.dot_dimension_numbers<[1], [0], [0], [1], [0, 0, 1, 1], [], []>} : vector<16x8xbf16>, vector<8x20xbf16>, vector<16x20xf32> -> vector<16x20xf32>
    %48 = arith.addf %42, %47 : vector<16x20xf32>
    %c0_56 = arith.constant 0 : index
    %c0_57 = arith.constant 0 : index
    %c0_58 = arith.constant 0 : index
    %c6_59 = arith.constant 6 : index
    %49 = vector.load %arg1[%c0_56, %c0_57, %c0_58, %c6_59] : memref<1x4x8x34xbf16, #tpu.memory_space<vmem>>, vector<1x1x8x20xbf16>
    %50 = vector.shape_cast %49 : vector<1x1x8x20xbf16> to vector<8x20xbf16>
    %c8 = arith.constant 8 : index
    %c0_60 = arith.constant 0 : index
    %c0_61 = arith.constant 0 : index
    %51 = vector.load %arg2[%c8, %c0_60, %c0_61] : memref<9x16x8xbf16, #tpu.memory_space<vmem>>, vector<1x16x8xbf16>
    %52 = vector.shape_cast %51 : vector<1x16x8xbf16> to vector<16x8xbf16>
    %cst_62 = arith.constant dense<0.000000e+00> : vector<16x20xf32>
    %53 = tpu.matmul %52, %50, %cst_62 {dimension_numbers = #tpu.dot_dimension_numbers<[1], [0], [0], [1], [0, 0, 1, 1], [], []>} : vector<16x8xbf16>, vector<8x20xbf16>, vector<16x20xf32> -> vector<16x20xf32>
    %54 = arith.addf %48, %53 : vector<16x20xf32>
    %c0_63 = arith.constant 0 : index
    %c0_64 = arith.constant 0 : index
    %55 = vector.load %arg3[%c0_63, %c0_64] : memref<16x1xf32, #tpu.memory_space<vmem>>, vector<16x1xf32>
    %56 = vector.broadcast %55 : vector<16x1xf32> to vector<16x20xf32>
    %57 = arith.addf %54, %56 : vector<16x20xf32>
    %cst_65 = arith.constant 0.000000e+00 : f32
    %58 = vector.broadcast %cst_65 : f32 to vector<16x20xf32>
    %59 = arith.cmpf oge, %57, %58 : vector<16x20xf32>
    %cst_66 = arith.constant 1.000000e-01 : f32
    %60 = vector.broadcast %cst_66 : f32 to vector<16x20xf32>
    %61 = arith.mulf %57, %60 : vector<16x20xf32>
    %62 = arith.select %59, %57, %61 : vector<16x20xi1>, vector<16x20xf32>
    %63 = arith.truncf %62 : vector<16x20xf32> to vector<16x20xbf16>
    %c0_67 = arith.constant 0 : index
    %c0_68 = arith.constant 0 : index
    %c0_69 = arith.constant 0 : index
    %64 = vector.load %arg4[%c0_67, %c0_68, %c0_69] : memref<1x16x20xbf16, #tpu.memory_space<vmem>>, vector<1x16x20xbf16>
    %65 = vector.shape_cast %64 : vector<1x16x20xbf16> to vector<16x20xbf16>
    %66 = vector.shape_cast %63 : vector<16x20xbf16> to vector<1x16x20xbf16>
    tpu.vector_store %arg4[%c0_67, %c0_68, %c0_69], %66 {strides = array<i32>} : memref<1x16x20xbf16, #tpu.memory_space<vmem>>, vector<1x16x20xbf16>,
    return
  }
  func.func @transform_0(%arg0: i32) -> (i32, i32, i32, i32) {
    %c0_i32 = arith.constant 0 : i32
    %c0_i32_0 = arith.constant 0 : i32
    %c0_i32_1 = arith.constant 0 : i32
    %c0_i32_2 = arith.constant 0 : i32
    return %arg0, %c0_i32, %c0_i32_0, %c0_i32_1 : i32, i32, i32, i32
  }
  func.func @transform_1(%arg0: i32) -> (i32, i32, i32) {
    %c0_i32 = arith.constant 0 : i32
    %c0_i32_0 = arith.constant 0 : i32
    %c0_i32_1 = arith.constant 0 : i32
    %c0_i32_2 = arith.constant 0 : i32
    return %c0_i32, %c0_i32_0, %c0_i32_1 : i32, i32, i32
  }
  func.func @transform_2(%arg0: i32) -> (i32, i32) {
    %c0_i32 = arith.constant 0 : i32
    %c0_i32_0 = arith.constant 0 : i32
    %c0_i32_1 = arith.constant 0 : i32
    return %c0_i32, %c0_i32_0 : i32, i32
  }
  func.func @transform_3(%arg0: i32) -> (i32, i32, i32) {
    %c0_i32 = arith.constant 0 : i32
    %c0_i32_0 = arith.constant 0 : i32
    %c0_i32_1 = arith.constant 0 : i32
    return %arg0, %c0_i32, %c0_i32_0 : i32, i32, i32
  }
}

module attributes {stable_mosaic.version = 11 : i64} {
  func.func @_corr_kernel(%arg0: i32, %arg1: memref<1x16x4x4xbf16, #tpu.memory_space<vmem>>, %arg2: memref<1x16x6x6xbf16, #tpu.memory_space<vmem>>, %arg3: memref<1x9x4x4xbf16, #tpu.memory_space<vmem>>) attributes {dimension_semantics = [#tpu.dimension_semantics<parallel>], iteration_bounds = array<i64: 2>, scalar_prefetch = 0 : i64, scratch_operands = 0 : i64, tpu.core_type = #tpu.core_type<tc>, window_params = [{transform_indices = @transform_0, window_bounds = array<i64: 1, 16, 4, 4>}, {transform_indices = @transform_1, window_bounds = array<i64: 1, 16, 6, 6>}, {transform_indices = @transform_2, window_bounds = array<i64: 1, 9, 4, 4>}]} {
    %c0 = arith.constant 0 : index
    %c0_0 = arith.constant 0 : index
    %c0_1 = arith.constant 0 : index
    %c0_2 = arith.constant 0 : index
    %0 = vector.load %arg1[%c0, %c0_0, %c0_1, %c0_2] : memref<1x16x4x4xbf16, #tpu.memory_space<vmem>>, vector<1x16x4x4xbf16>
    %1 = vector.shape_cast %0 : vector<1x16x4x4xbf16> to vector<16x4x4xbf16>
    %2 = arith.extf %1 : vector<16x4x4xbf16> to vector<16x4x4xf32>
    %c0_3 = arith.constant 0 : index
    %c0_4 = arith.constant 0 : index
    %c0_5 = arith.constant 0 : index
    %c0_6 = arith.constant 0 : index
    %3 = vector.load %arg2[%c0_3, %c0_4, %c0_5, %c0_6] : memref<1x16x6x6xbf16, #tpu.memory_space<vmem>>, vector<1x16x6x6xbf16>
    %4 = vector.shape_cast %3 : vector<1x16x6x6xbf16> to vector<16x6x6xbf16>
    %5 = arith.extf %4 : vector<16x6x6xbf16> to vector<16x6x6xf32>
    %6 = vector.extract_strided_slice %5 {offsets = [0, 0, 0], sizes = [16, 4, 4], strides = [1, 1, 1]} : vector<16x6x6xf32> to vector<16x4x4xf32>
    %7 = vector.extract_strided_slice %2 {offsets = [0, 0, 0], sizes = [1, 4, 4], strides = [1, 1, 1]} : vector<16x4x4xf32> to vector<1x4x4xf32>
    %8 = vector.shape_cast %7 : vector<1x4x4xf32> to vector<4x4xf32>
    %9 = vector.extract_strided_slice %6 {offsets = [0, 0, 0], sizes = [1, 4, 4], strides = [1, 1, 1]} : vector<16x4x4xf32> to vector<1x4x4xf32>
    %10 = vector.shape_cast %9 : vector<1x4x4xf32> to vector<4x4xf32>
    %11 = arith.mulf %8, %10 : vector<4x4xf32>
    %12 = vector.extract_strided_slice %2 {offsets = [1, 0, 0], sizes = [1, 4, 4], strides = [1, 1, 1]} : vector<16x4x4xf32> to vector<1x4x4xf32>
    %13 = vector.shape_cast %12 : vector<1x4x4xf32> to vector<4x4xf32>
    %14 = vector.extract_strided_slice %6 {offsets = [1, 0, 0], sizes = [1, 4, 4], strides = [1, 1, 1]} : vector<16x4x4xf32> to vector<1x4x4xf32>
    %15 = vector.shape_cast %14 : vector<1x4x4xf32> to vector<4x4xf32>
    %16 = arith.mulf %13, %15 : vector<4x4xf32>
    %17 = arith.addf %11, %16 : vector<4x4xf32>
    %18 = vector.extract_strided_slice %2 {offsets = [2, 0, 0], sizes = [1, 4, 4], strides = [1, 1, 1]} : vector<16x4x4xf32> to vector<1x4x4xf32>
    %19 = vector.shape_cast %18 : vector<1x4x4xf32> to vector<4x4xf32>
    %20 = vector.extract_strided_slice %6 {offsets = [2, 0, 0], sizes = [1, 4, 4], strides = [1, 1, 1]} : vector<16x4x4xf32> to vector<1x4x4xf32>
    %21 = vector.shape_cast %20 : vector<1x4x4xf32> to vector<4x4xf32>
    %22 = arith.mulf %19, %21 : vector<4x4xf32>
    %23 = arith.addf %17, %22 : vector<4x4xf32>
    %24 = vector.extract_strided_slice %2 {offsets = [3, 0, 0], sizes = [1, 4, 4], strides = [1, 1, 1]} : vector<16x4x4xf32> to vector<1x4x4xf32>
    %25 = vector.shape_cast %24 : vector<1x4x4xf32> to vector<4x4xf32>
    %26 = vector.extract_strided_slice %6 {offsets = [3, 0, 0], sizes = [1, 4, 4], strides = [1, 1, 1]} : vector<16x4x4xf32> to vector<1x4x4xf32>
    %27 = vector.shape_cast %26 : vector<1x4x4xf32> to vector<4x4xf32>
    %28 = arith.mulf %25, %27 : vector<4x4xf32>
    %29 = arith.addf %23, %28 : vector<4x4xf32>
    %30 = vector.extract_strided_slice %2 {offsets = [4, 0, 0], sizes = [1, 4, 4], strides = [1, 1, 1]} : vector<16x4x4xf32> to vector<1x4x4xf32>
    %31 = vector.shape_cast %30 : vector<1x4x4xf32> to vector<4x4xf32>
    %32 = vector.extract_strided_slice %6 {offsets = [4, 0, 0], sizes = [1, 4, 4], strides = [1, 1, 1]} : vector<16x4x4xf32> to vector<1x4x4xf32>
    %33 = vector.shape_cast %32 : vector<1x4x4xf32> to vector<4x4xf32>
    %34 = arith.mulf %31, %33 : vector<4x4xf32>
    %35 = arith.addf %29, %34 : vector<4x4xf32>
    %36 = vector.extract_strided_slice %2 {offsets = [5, 0, 0], sizes = [1, 4, 4], strides = [1, 1, 1]} : vector<16x4x4xf32> to vector<1x4x4xf32>
    %37 = vector.shape_cast %36 : vector<1x4x4xf32> to vector<4x4xf32>
    %38 = vector.extract_strided_slice %6 {offsets = [5, 0, 0], sizes = [1, 4, 4], strides = [1, 1, 1]} : vector<16x4x4xf32> to vector<1x4x4xf32>
    %39 = vector.shape_cast %38 : vector<1x4x4xf32> to vector<4x4xf32>
    %40 = arith.mulf %37, %39 : vector<4x4xf32>
    %41 = arith.addf %35, %40 : vector<4x4xf32>
    %42 = vector.extract_strided_slice %2 {offsets = [6, 0, 0], sizes = [1, 4, 4], strides = [1, 1, 1]} : vector<16x4x4xf32> to vector<1x4x4xf32>
    %43 = vector.shape_cast %42 : vector<1x4x4xf32> to vector<4x4xf32>
    %44 = vector.extract_strided_slice %6 {offsets = [6, 0, 0], sizes = [1, 4, 4], strides = [1, 1, 1]} : vector<16x4x4xf32> to vector<1x4x4xf32>
    %45 = vector.shape_cast %44 : vector<1x4x4xf32> to vector<4x4xf32>
    %46 = arith.mulf %43, %45 : vector<4x4xf32>
    %47 = arith.addf %41, %46 : vector<4x4xf32>
    %48 = vector.extract_strided_slice %2 {offsets = [7, 0, 0], sizes = [1, 4, 4], strides = [1, 1, 1]} : vector<16x4x4xf32> to vector<1x4x4xf32>
    %49 = vector.shape_cast %48 : vector<1x4x4xf32> to vector<4x4xf32>
    %50 = vector.extract_strided_slice %6 {offsets = [7, 0, 0], sizes = [1, 4, 4], strides = [1, 1, 1]} : vector<16x4x4xf32> to vector<1x4x4xf32>
    %51 = vector.shape_cast %50 : vector<1x4x4xf32> to vector<4x4xf32>
    %52 = arith.mulf %49, %51 : vector<4x4xf32>
    %53 = arith.addf %47, %52 : vector<4x4xf32>
    %54 = vector.extract_strided_slice %2 {offsets = [8, 0, 0], sizes = [1, 4, 4], strides = [1, 1, 1]} : vector<16x4x4xf32> to vector<1x4x4xf32>
    %55 = vector.shape_cast %54 : vector<1x4x4xf32> to vector<4x4xf32>
    %56 = vector.extract_strided_slice %6 {offsets = [8, 0, 0], sizes = [1, 4, 4], strides = [1, 1, 1]} : vector<16x4x4xf32> to vector<1x4x4xf32>
    %57 = vector.shape_cast %56 : vector<1x4x4xf32> to vector<4x4xf32>
    %58 = arith.mulf %55, %57 : vector<4x4xf32>
    %59 = arith.addf %53, %58 : vector<4x4xf32>
    %60 = vector.extract_strided_slice %2 {offsets = [9, 0, 0], sizes = [1, 4, 4], strides = [1, 1, 1]} : vector<16x4x4xf32> to vector<1x4x4xf32>
    %61 = vector.shape_cast %60 : vector<1x4x4xf32> to vector<4x4xf32>
    %62 = vector.extract_strided_slice %6 {offsets = [9, 0, 0], sizes = [1, 4, 4], strides = [1, 1, 1]} : vector<16x4x4xf32> to vector<1x4x4xf32>
    %63 = vector.shape_cast %62 : vector<1x4x4xf32> to vector<4x4xf32>
    %64 = arith.mulf %61, %63 : vector<4x4xf32>
    %65 = arith.addf %59, %64 : vector<4x4xf32>
    %66 = vector.extract_strided_slice %2 {offsets = [10, 0, 0], sizes = [1, 4, 4], strides = [1, 1, 1]} : vector<16x4x4xf32> to vector<1x4x4xf32>
    %67 = vector.shape_cast %66 : vector<1x4x4xf32> to vector<4x4xf32>
    %68 = vector.extract_strided_slice %6 {offsets = [10, 0, 0], sizes = [1, 4, 4], strides = [1, 1, 1]} : vector<16x4x4xf32> to vector<1x4x4xf32>
    %69 = vector.shape_cast %68 : vector<1x4x4xf32> to vector<4x4xf32>
    %70 = arith.mulf %67, %69 : vector<4x4xf32>
    %71 = arith.addf %65, %70 : vector<4x4xf32>
    %72 = vector.extract_strided_slice %2 {offsets = [11, 0, 0], sizes = [1, 4, 4], strides = [1, 1, 1]} : vector<16x4x4xf32> to vector<1x4x4xf32>
    %73 = vector.shape_cast %72 : vector<1x4x4xf32> to vector<4x4xf32>
    %74 = vector.extract_strided_slice %6 {offsets = [11, 0, 0], sizes = [1, 4, 4], strides = [1, 1, 1]} : vector<16x4x4xf32> to vector<1x4x4xf32>
    %75 = vector.shape_cast %74 : vector<1x4x4xf32> to vector<4x4xf32>
    %76 = arith.mulf %73, %75 : vector<4x4xf32>
    %77 = arith.addf %71, %76 : vector<4x4xf32>
    %78 = vector.extract_strided_slice %2 {offsets = [12, 0, 0], sizes = [1, 4, 4], strides = [1, 1, 1]} : vector<16x4x4xf32> to vector<1x4x4xf32>
    %79 = vector.shape_cast %78 : vector<1x4x4xf32> to vector<4x4xf32>
    %80 = vector.extract_strided_slice %6 {offsets = [12, 0, 0], sizes = [1, 4, 4], strides = [1, 1, 1]} : vector<16x4x4xf32> to vector<1x4x4xf32>
    %81 = vector.shape_cast %80 : vector<1x4x4xf32> to vector<4x4xf32>
    %82 = arith.mulf %79, %81 : vector<4x4xf32>
    %83 = arith.addf %77, %82 : vector<4x4xf32>
    %84 = vector.extract_strided_slice %2 {offsets = [13, 0, 0], sizes = [1, 4, 4], strides = [1, 1, 1]} : vector<16x4x4xf32> to vector<1x4x4xf32>
    %85 = vector.shape_cast %84 : vector<1x4x4xf32> to vector<4x4xf32>
    %86 = vector.extract_strided_slice %6 {offsets = [13, 0, 0], sizes = [1, 4, 4], strides = [1, 1, 1]} : vector<16x4x4xf32> to vector<1x4x4xf32>
    %87 = vector.shape_cast %86 : vector<1x4x4xf32> to vector<4x4xf32>
    %88 = arith.mulf %85, %87 : vector<4x4xf32>
    %89 = arith.addf %83, %88 : vector<4x4xf32>
    %90 = vector.extract_strided_slice %2 {offsets = [14, 0, 0], sizes = [1, 4, 4], strides = [1, 1, 1]} : vector<16x4x4xf32> to vector<1x4x4xf32>
    %91 = vector.shape_cast %90 : vector<1x4x4xf32> to vector<4x4xf32>
    %92 = vector.extract_strided_slice %6 {offsets = [14, 0, 0], sizes = [1, 4, 4], strides = [1, 1, 1]} : vector<16x4x4xf32> to vector<1x4x4xf32>
    %93 = vector.shape_cast %92 : vector<1x4x4xf32> to vector<4x4xf32>
    %94 = arith.mulf %91, %93 : vector<4x4xf32>
    %95 = arith.addf %89, %94 : vector<4x4xf32>
    %96 = vector.extract_strided_slice %2 {offsets = [15, 0, 0], sizes = [1, 4, 4], strides = [1, 1, 1]} : vector<16x4x4xf32> to vector<1x4x4xf32>
    %97 = vector.shape_cast %96 : vector<1x4x4xf32> to vector<4x4xf32>
    %98 = vector.extract_strided_slice %6 {offsets = [15, 0, 0], sizes = [1, 4, 4], strides = [1, 1, 1]} : vector<16x4x4xf32> to vector<1x4x4xf32>
    %99 = vector.shape_cast %98 : vector<1x4x4xf32> to vector<4x4xf32>
    %100 = arith.mulf %97, %99 : vector<4x4xf32>
    %101 = arith.addf %95, %100 : vector<4x4xf32>
    %cst = arith.constant 6.250000e-02 : f32
    %102 = vector.broadcast %cst : f32 to vector<4x4xf32>
    %103 = arith.mulf %101, %102 : vector<4x4xf32>
    %cst_7 = arith.constant 0.000000e+00 : f32
    %104 = vector.broadcast %cst_7 : f32 to vector<4x4xf32>
    %105 = arith.cmpf oge, %103, %104 : vector<4x4xf32>
    %cst_8 = arith.constant 1.000000e-01 : f32
    %106 = vector.broadcast %cst_8 : f32 to vector<4x4xf32>
    %107 = arith.mulf %103, %106 : vector<4x4xf32>
    %108 = arith.select %105, %103, %107 : vector<4x4xi1>, vector<4x4xf32>
    %109 = arith.truncf %108 : vector<4x4xf32> to vector<4x4xbf16>
    %c0_9 = arith.constant 0 : index
    %c0_10 = arith.constant 0 : index
    %c0_11 = arith.constant 0 : index
    %c0_12 = arith.constant 0 : index
    %110 = vector.load %arg3[%c0_9, %c0_10, %c0_11, %c0_12] : memref<1x9x4x4xbf16, #tpu.memory_space<vmem>>, vector<1x1x4x4xbf16>
    %111 = vector.shape_cast %110 : vector<1x1x4x4xbf16> to vector<4x4xbf16>
    %112 = vector.shape_cast %109 : vector<4x4xbf16> to vector<1x1x4x4xbf16>
    tpu.vector_store %arg3[%c0_9, %c0_10, %c0_11, %c0_12], %112 {strides = array<i32>} : memref<1x9x4x4xbf16, #tpu.memory_space<vmem>>, vector<1x1x4x4xbf16>,
    %113 = vector.extract_strided_slice %5 {offsets = [0, 0, 1], sizes = [16, 4, 4], strides = [1, 1, 1]} : vector<16x6x6xf32> to vector<16x4x4xf32>
    %114 = vector.extract_strided_slice %2 {offsets = [0, 0, 0], sizes = [1, 4, 4], strides = [1, 1, 1]} : vector<16x4x4xf32> to vector<1x4x4xf32>
    %115 = vector.shape_cast %114 : vector<1x4x4xf32> to vector<4x4xf32>
    %116 = vector.extract_strided_slice %113 {offsets = [0, 0, 0], sizes = [1, 4, 4], strides = [1, 1, 1]} : vector<16x4x4xf32> to vector<1x4x4xf32>
    %117 = vector.shape_cast %116 : vector<1x4x4xf32> to vector<4x4xf32>
    %118 = arith.mulf %115, %117 : vector<4x4xf32>
    %119 = vector.extract_strided_slice %2 {offsets = [1, 0, 0], sizes = [1, 4, 4], strides = [1, 1, 1]} : vector<16x4x4xf32> to vector<1x4x4xf32>
    %120 = vector.shape_cast %119 : vector<1x4x4xf32> to vector<4x4xf32>
    %121 = vector.extract_strided_slice %113 {offsets = [1, 0, 0], sizes = [1, 4, 4], strides = [1, 1, 1]} : vector<16x4x4xf32> to vector<1x4x4xf32>
    %122 = vector.shape_cast %121 : vector<1x4x4xf32> to vector<4x4xf32>
    %123 = arith.mulf %120, %122 : vector<4x4xf32>
    %124 = arith.addf %118, %123 : vector<4x4xf32>
    %125 = vector.extract_strided_slice %2 {offsets = [2, 0, 0], sizes = [1, 4, 4], strides = [1, 1, 1]} : vector<16x4x4xf32> to vector<1x4x4xf32>
    %126 = vector.shape_cast %125 : vector<1x4x4xf32> to vector<4x4xf32>
    %127 = vector.extract_strided_slice %113 {offsets = [2, 0, 0], sizes = [1, 4, 4], strides = [1, 1, 1]} : vector<16x4x4xf32> to vector<1x4x4xf32>
    %128 = vector.shape_cast %127 : vector<1x4x4xf32> to vector<4x4xf32>
    %129 = arith.mulf %126, %128 : vector<4x4xf32>
    %130 = arith.addf %124, %129 : vector<4x4xf32>
    %131 = vector.extract_strided_slice %2 {offsets = [3, 0, 0], sizes = [1, 4, 4], strides = [1, 1, 1]} : vector<16x4x4xf32> to vector<1x4x4xf32>
    %132 = vector.shape_cast %131 : vector<1x4x4xf32> to vector<4x4xf32>
    %133 = vector.extract_strided_slice %113 {offsets = [3, 0, 0], sizes = [1, 4, 4], strides = [1, 1, 1]} : vector<16x4x4xf32> to vector<1x4x4xf32>
    %134 = vector.shape_cast %133 : vector<1x4x4xf32> to vector<4x4xf32>
    %135 = arith.mulf %132, %134 : vector<4x4xf32>
    %136 = arith.addf %130, %135 : vector<4x4xf32>
    %137 = vector.extract_strided_slice %2 {offsets = [4, 0, 0], sizes = [1, 4, 4], strides = [1, 1, 1]} : vector<16x4x4xf32> to vector<1x4x4xf32>
    %138 = vector.shape_cast %137 : vector<1x4x4xf32> to vector<4x4xf32>
    %139 = vector.extract_strided_slice %113 {offsets = [4, 0, 0], sizes = [1, 4, 4], strides = [1, 1, 1]} : vector<16x4x4xf32> to vector<1x4x4xf32>
    %140 = vector.shape_cast %139 : vector<1x4x4xf32> to vector<4x4xf32>
    %141 = arith.mulf %138, %140 : vector<4x4xf32>
    %142 = arith.addf %136, %141 : vector<4x4xf32>
    %143 = vector.extract_strided_slice %2 {offsets = [5, 0, 0], sizes = [1, 4, 4], strides = [1, 1, 1]} : vector<16x4x4xf32> to vector<1x4x4xf32>
    %144 = vector.shape_cast %143 : vector<1x4x4xf32> to vector<4x4xf32>
    %145 = vector.extract_strided_slice %113 {offsets = [5, 0, 0], sizes = [1, 4, 4], strides = [1, 1, 1]} : vector<16x4x4xf32> to vector<1x4x4xf32>
    %146 = vector.shape_cast %145 : vector<1x4x4xf32> to vector<4x4xf32>
    %147 = arith.mulf %144, %146 : vector<4x4xf32>
    %148 = arith.addf %142, %147 : vector<4x4xf32>
    %149 = vector.extract_strided_slice %2 {offsets = [6, 0, 0], sizes = [1, 4, 4], strides = [1, 1, 1]} : vector<16x4x4xf32> to vector<1x4x4xf32>
    %150 = vector.shape_cast %149 : vector<1x4x4xf32> to vector<4x4xf32>
    %151 = vector.extract_strided_slice %113 {offsets = [6, 0, 0], sizes = [1, 4, 4], strides = [1, 1, 1]} : vector<16x4x4xf32> to vector<1x4x4xf32>
    %152 = vector.shape_cast %151 : vector<1x4x4xf32> to vector<4x4xf32>
    %153 = arith.mulf %150, %152 : vector<4x4xf32>
    %154 = arith.addf %148, %153 : vector<4x4xf32>
    %155 = vector.extract_strided_slice %2 {offsets = [7, 0, 0], sizes = [1, 4, 4], strides = [1, 1, 1]} : vector<16x4x4xf32> to vector<1x4x4xf32>
    %156 = vector.shape_cast %155 : vector<1x4x4xf32> to vector<4x4xf32>
    %157 = vector.extract_strided_slice %113 {offsets = [7, 0, 0], sizes = [1, 4, 4], strides = [1, 1, 1]} : vector<16x4x4xf32> to vector<1x4x4xf32>
    %158 = vector.shape_cast %157 : vector<1x4x4xf32> to vector<4x4xf32>
    %159 = arith.mulf %156, %158 : vector<4x4xf32>
    %160 = arith.addf %154, %159 : vector<4x4xf32>
    %161 = vector.extract_strided_slice %2 {offsets = [8, 0, 0], sizes = [1, 4, 4], strides = [1, 1, 1]} : vector<16x4x4xf32> to vector<1x4x4xf32>
    %162 = vector.shape_cast %161 : vector<1x4x4xf32> to vector<4x4xf32>
    %163 = vector.extract_strided_slice %113 {offsets = [8, 0, 0], sizes = [1, 4, 4], strides = [1, 1, 1]} : vector<16x4x4xf32> to vector<1x4x4xf32>
    %164 = vector.shape_cast %163 : vector<1x4x4xf32> to vector<4x4xf32>
    %165 = arith.mulf %162, %164 : vector<4x4xf32>
    %166 = arith.addf %160, %165 : vector<4x4xf32>
    %167 = vector.extract_strided_slice %2 {offsets = [9, 0, 0], sizes = [1, 4, 4], strides = [1, 1, 1]} : vector<16x4x4xf32> to vector<1x4x4xf32>
    %168 = vector.shape_cast %167 : vector<1x4x4xf32> to vector<4x4xf32>
    %169 = vector.extract_strided_slice %113 {offsets = [9, 0, 0], sizes = [1, 4, 4], strides = [1, 1, 1]} : vector<16x4x4xf32> to vector<1x4x4xf32>
    %170 = vector.shape_cast %169 : vector<1x4x4xf32> to vector<4x4xf32>
    %171 = arith.mulf %168, %170 : vector<4x4xf32>
    %172 = arith.addf %166, %171 : vector<4x4xf32>
    %173 = vector.extract_strided_slice %2 {offsets = [10, 0, 0], sizes = [1, 4, 4], strides = [1, 1, 1]} : vector<16x4x4xf32> to vector<1x4x4xf32>
    %174 = vector.shape_cast %173 : vector<1x4x4xf32> to vector<4x4xf32>
    %175 = vector.extract_strided_slice %113 {offsets = [10, 0, 0], sizes = [1, 4, 4], strides = [1, 1, 1]} : vector<16x4x4xf32> to vector<1x4x4xf32>
    %176 = vector.shape_cast %175 : vector<1x4x4xf32> to vector<4x4xf32>
    %177 = arith.mulf %174, %176 : vector<4x4xf32>
    %178 = arith.addf %172, %177 : vector<4x4xf32>
    %179 = vector.extract_strided_slice %2 {offsets = [11, 0, 0], sizes = [1, 4, 4], strides = [1, 1, 1]} : vector<16x4x4xf32> to vector<1x4x4xf32>
    %180 = vector.shape_cast %179 : vector<1x4x4xf32> to vector<4x4xf32>
    %181 = vector.extract_strided_slice %113 {offsets = [11, 0, 0], sizes = [1, 4, 4], strides = [1, 1, 1]} : vector<16x4x4xf32> to vector<1x4x4xf32>
    %182 = vector.shape_cast %181 : vector<1x4x4xf32> to vector<4x4xf32>
    %183 = arith.mulf %180, %182 : vector<4x4xf32>
    %184 = arith.addf %178, %183 : vector<4x4xf32>
    %185 = vector.extract_strided_slice %2 {offsets = [12, 0, 0], sizes = [1, 4, 4], strides = [1, 1, 1]} : vector<16x4x4xf32> to vector<1x4x4xf32>
    %186 = vector.shape_cast %185 : vector<1x4x4xf32> to vector<4x4xf32>
    %187 = vector.extract_strided_slice %113 {offsets = [12, 0, 0], sizes = [1, 4, 4], strides = [1, 1, 1]} : vector<16x4x4xf32> to vector<1x4x4xf32>
    %188 = vector.shape_cast %187 : vector<1x4x4xf32> to vector<4x4xf32>
    %189 = arith.mulf %186, %188 : vector<4x4xf32>
    %190 = arith.addf %184, %189 : vector<4x4xf32>
    %191 = vector.extract_strided_slice %2 {offsets = [13, 0, 0], sizes = [1, 4, 4], strides = [1, 1, 1]} : vector<16x4x4xf32> to vector<1x4x4xf32>
    %192 = vector.shape_cast %191 : vector<1x4x4xf32> to vector<4x4xf32>
    %193 = vector.extract_strided_slice %113 {offsets = [13, 0, 0], sizes = [1, 4, 4], strides = [1, 1, 1]} : vector<16x4x4xf32> to vector<1x4x4xf32>
    %194 = vector.shape_cast %193 : vector<1x4x4xf32> to vector<4x4xf32>
    %195 = arith.mulf %192, %194 : vector<4x4xf32>
    %196 = arith.addf %190, %195 : vector<4x4xf32>
    %197 = vector.extract_strided_slice %2 {offsets = [14, 0, 0], sizes = [1, 4, 4], strides = [1, 1, 1]} : vector<16x4x4xf32> to vector<1x4x4xf32>
    %198 = vector.shape_cast %197 : vector<1x4x4xf32> to vector<4x4xf32>
    %199 = vector.extract_strided_slice %113 {offsets = [14, 0, 0], sizes = [1, 4, 4], strides = [1, 1, 1]} : vector<16x4x4xf32> to vector<1x4x4xf32>
    %200 = vector.shape_cast %199 : vector<1x4x4xf32> to vector<4x4xf32>
    %201 = arith.mulf %198, %200 : vector<4x4xf32>
    %202 = arith.addf %196, %201 : vector<4x4xf32>
    %203 = vector.extract_strided_slice %2 {offsets = [15, 0, 0], sizes = [1, 4, 4], strides = [1, 1, 1]} : vector<16x4x4xf32> to vector<1x4x4xf32>
    %204 = vector.shape_cast %203 : vector<1x4x4xf32> to vector<4x4xf32>
    %205 = vector.extract_strided_slice %113 {offsets = [15, 0, 0], sizes = [1, 4, 4], strides = [1, 1, 1]} : vector<16x4x4xf32> to vector<1x4x4xf32>
    %206 = vector.shape_cast %205 : vector<1x4x4xf32> to vector<4x4xf32>
    %207 = arith.mulf %204, %206 : vector<4x4xf32>
    %208 = arith.addf %202, %207 : vector<4x4xf32>
    %cst_13 = arith.constant 6.250000e-02 : f32
    %209 = vector.broadcast %cst_13 : f32 to vector<4x4xf32>
    %210 = arith.mulf %208, %209 : vector<4x4xf32>
    %cst_14 = arith.constant 0.000000e+00 : f32
    %211 = vector.broadcast %cst_14 : f32 to vector<4x4xf32>
    %212 = arith.cmpf oge, %210, %211 : vector<4x4xf32>
    %cst_15 = arith.constant 1.000000e-01 : f32
    %213 = vector.broadcast %cst_15 : f32 to vector<4x4xf32>
    %214 = arith.mulf %210, %213 : vector<4x4xf32>
    %215 = arith.select %212, %210, %214 : vector<4x4xi1>, vector<4x4xf32>
    %216 = arith.truncf %215 : vector<4x4xf32> to vector<4x4xbf16>
    %c0_16 = arith.constant 0 : index
    %c1 = arith.constant 1 : index
    %c0_17 = arith.constant 0 : index
    %c0_18 = arith.constant 0 : index
    %217 = vector.load %arg3[%c0_16, %c1, %c0_17, %c0_18] : memref<1x9x4x4xbf16, #tpu.memory_space<vmem>>, vector<1x1x4x4xbf16>
    %218 = vector.shape_cast %217 : vector<1x1x4x4xbf16> to vector<4x4xbf16>
    %219 = vector.shape_cast %216 : vector<4x4xbf16> to vector<1x1x4x4xbf16>
    tpu.vector_store %arg3[%c0_16, %c1, %c0_17, %c0_18], %219 {strides = array<i32>} : memref<1x9x4x4xbf16, #tpu.memory_space<vmem>>, vector<1x1x4x4xbf16>,
    %220 = vector.extract_strided_slice %5 {offsets = [0, 0, 2], sizes = [16, 4, 4], strides = [1, 1, 1]} : vector<16x6x6xf32> to vector<16x4x4xf32>
    %221 = vector.extract_strided_slice %2 {offsets = [0, 0, 0], sizes = [1, 4, 4], strides = [1, 1, 1]} : vector<16x4x4xf32> to vector<1x4x4xf32>
    %222 = vector.shape_cast %221 : vector<1x4x4xf32> to vector<4x4xf32>
    %223 = vector.extract_strided_slice %220 {offsets = [0, 0, 0], sizes = [1, 4, 4], strides = [1, 1, 1]} : vector<16x4x4xf32> to vector<1x4x4xf32>
    %224 = vector.shape_cast %223 : vector<1x4x4xf32> to vector<4x4xf32>
    %225 = arith.mulf %222, %224 : vector<4x4xf32>
    %226 = vector.extract_strided_slice %2 {offsets = [1, 0, 0], sizes = [1, 4, 4], strides = [1, 1, 1]} : vector<16x4x4xf32> to vector<1x4x4xf32>
    %227 = vector.shape_cast %226 : vector<1x4x4xf32> to vector<4x4xf32>
    %228 = vector.extract_strided_slice %220 {offsets = [1, 0, 0], sizes = [1, 4, 4], strides = [1, 1, 1]} : vector<16x4x4xf32> to vector<1x4x4xf32>
    %229 = vector.shape_cast %228 : vector<1x4x4xf32> to vector<4x4xf32>
    %230 = arith.mulf %227, %229 : vector<4x4xf32>
    %231 = arith.addf %225, %230 : vector<4x4xf32>
    %232 = vector.extract_strided_slice %2 {offsets = [2, 0, 0], sizes = [1, 4, 4], strides = [1, 1, 1]} : vector<16x4x4xf32> to vector<1x4x4xf32>
    %233 = vector.shape_cast %232 : vector<1x4x4xf32> to vector<4x4xf32>
    %234 = vector.extract_strided_slice %220 {offsets = [2, 0, 0], sizes = [1, 4, 4], strides = [1, 1, 1]} : vector<16x4x4xf32> to vector<1x4x4xf32>
    %235 = vector.shape_cast %234 : vector<1x4x4xf32> to vector<4x4xf32>
    %236 = arith.mulf %233, %235 : vector<4x4xf32>
    %237 = arith.addf %231, %236 : vector<4x4xf32>
    %238 = vector.extract_strided_slice %2 {offsets = [3, 0, 0], sizes = [1, 4, 4], strides = [1, 1, 1]} : vector<16x4x4xf32> to vector<1x4x4xf32>
    %239 = vector.shape_cast %238 : vector<1x4x4xf32> to vector<4x4xf32>
    %240 = vector.extract_strided_slice %220 {offsets = [3, 0, 0], sizes = [1, 4, 4], strides = [1, 1, 1]} : vector<16x4x4xf32> to vector<1x4x4xf32>
    %241 = vector.shape_cast %240 : vector<1x4x4xf32> to vector<4x4xf32>
    %242 = arith.mulf %239, %241 : vector<4x4xf32>
    %243 = arith.addf %237, %242 : vector<4x4xf32>
    %244 = vector.extract_strided_slice %2 {offsets = [4, 0, 0], sizes = [1, 4, 4], strides = [1, 1, 1]} : vector<16x4x4xf32> to vector<1x4x4xf32>
    %245 = vector.shape_cast %244 : vector<1x4x4xf32> to vector<4x4xf32>
    %246 = vector.extract_strided_slice %220 {offsets = [4, 0, 0], sizes = [1, 4, 4], strides = [1, 1, 1]} : vector<16x4x4xf32> to vector<1x4x4xf32>
    %247 = vector.shape_cast %246 : vector<1x4x4xf32> to vector<4x4xf32>
    %248 = arith.mulf %245, %247 : vector<4x4xf32>
    %249 = arith.addf %243, %248 : vector<4x4xf32>
    %250 = vector.extract_strided_slice %2 {offsets = [5, 0, 0], sizes = [1, 4, 4], strides = [1, 1, 1]} : vector<16x4x4xf32> to vector<1x4x4xf32>
    %251 = vector.shape_cast %250 : vector<1x4x4xf32> to vector<4x4xf32>
    %252 = vector.extract_strided_slice %220 {offsets = [5, 0, 0], sizes = [1, 4, 4], strides = [1, 1, 1]} : vector<16x4x4xf32> to vector<1x4x4xf32>
    %253 = vector.shape_cast %252 : vector<1x4x4xf32> to vector<4x4xf32>
    %254 = arith.mulf %251, %253 : vector<4x4xf32>
    %255 = arith.addf %249, %254 : vector<4x4xf32>
    %256 = vector.extract_strided_slice %2 {offsets = [6, 0, 0], sizes = [1, 4, 4], strides = [1, 1, 1]} : vector<16x4x4xf32> to vector<1x4x4xf32>
    %257 = vector.shape_cast %256 : vector<1x4x4xf32> to vector<4x4xf32>
    %258 = vector.extract_strided_slice %220 {offsets = [6, 0, 0], sizes = [1, 4, 4], strides = [1, 1, 1]} : vector<16x4x4xf32> to vector<1x4x4xf32>
    %259 = vector.shape_cast %258 : vector<1x4x4xf32> to vector<4x4xf32>
    %260 = arith.mulf %257, %259 : vector<4x4xf32>
    %261 = arith.addf %255, %260 : vector<4x4xf32>
    %262 = vector.extract_strided_slice %2 {offsets = [7, 0, 0], sizes = [1, 4, 4], strides = [1, 1, 1]} : vector<16x4x4xf32> to vector<1x4x4xf32>
    %263 = vector.shape_cast %262 : vector<1x4x4xf32> to vector<4x4xf32>
    %264 = vector.extract_strided_slice %220 {offsets = [7, 0, 0], sizes = [1, 4, 4], strides = [1, 1, 1]} : vector<16x4x4xf32> to vector<1x4x4xf32>
    %265 = vector.shape_cast %264 : vector<1x4x4xf32> to vector<4x4xf32>
    %266 = arith.mulf %263, %265 : vector<4x4xf32>
    %267 = arith.addf %261, %266 : vector<4x4xf32>
    %268 = vector.extract_strided_slice %2 {offsets = [8, 0, 0], sizes = [1, 4, 4], strides = [1, 1, 1]} : vector<16x4x4xf32> to vector<1x4x4xf32>
    %269 = vector.shape_cast %268 : vector<1x4x4xf32> to vector<4x4xf32>
    %270 = vector.extract_strided_slice %220 {offsets = [8, 0, 0], sizes = [1, 4, 4], strides = [1, 1, 1]} : vector<16x4x4xf32> to vector<1x4x4xf32>
    %271 = vector.shape_cast %270 : vector<1x4x4xf32> to vector<4x4xf32>
    %272 = arith.mulf %269, %271 : vector<4x4xf32>
    %273 = arith.addf %267, %272 : vector<4x4xf32>
    %274 = vector.extract_strided_slice %2 {offsets = [9, 0, 0], sizes = [1, 4, 4], strides = [1, 1, 1]} : vector<16x4x4xf32> to vector<1x4x4xf32>
    %275 = vector.shape_cast %274 : vector<1x4x4xf32> to vector<4x4xf32>
    %276 = vector.extract_strided_slice %220 {offsets = [9, 0, 0], sizes = [1, 4, 4], strides = [1, 1, 1]} : vector<16x4x4xf32> to vector<1x4x4xf32>
    %277 = vector.shape_cast %276 : vector<1x4x4xf32> to vector<4x4xf32>
    %278 = arith.mulf %275, %277 : vector<4x4xf32>
    %279 = arith.addf %273, %278 : vector<4x4xf32>
    %280 = vector.extract_strided_slice %2 {offsets = [10, 0, 0], sizes = [1, 4, 4], strides = [1, 1, 1]} : vector<16x4x4xf32> to vector<1x4x4xf32>
    %281 = vector.shape_cast %280 : vector<1x4x4xf32> to vector<4x4xf32>
    %282 = vector.extract_strided_slice %220 {offsets = [10, 0, 0], sizes = [1, 4, 4], strides = [1, 1, 1]} : vector<16x4x4xf32> to vector<1x4x4xf32>
    %283 = vector.shape_cast %282 : vector<1x4x4xf32> to vector<4x4xf32>
    %284 = arith.mulf %281, %283 : vector<4x4xf32>
    %285 = arith.addf %279, %284 : vector<4x4xf32>
    %286 = vector.extract_strided_slice %2 {offsets = [11, 0, 0], sizes = [1, 4, 4], strides = [1, 1, 1]} : vector<16x4x4xf32> to vector<1x4x4xf32>
    %287 = vector.shape_cast %286 : vector<1x4x4xf32> to vector<4x4xf32>
    %288 = vector.extract_strided_slice %220 {offsets = [11, 0, 0], sizes = [1, 4, 4], strides = [1, 1, 1]} : vector<16x4x4xf32> to vector<1x4x4xf32>
    %289 = vector.shape_cast %288 : vector<1x4x4xf32> to vector<4x4xf32>
    %290 = arith.mulf %287, %289 : vector<4x4xf32>
    %291 = arith.addf %285, %290 : vector<4x4xf32>
    %292 = vector.extract_strided_slice %2 {offsets = [12, 0, 0], sizes = [1, 4, 4], strides = [1, 1, 1]} : vector<16x4x4xf32> to vector<1x4x4xf32>
    %293 = vector.shape_cast %292 : vector<1x4x4xf32> to vector<4x4xf32>
    %294 = vector.extract_strided_slice %220 {offsets = [12, 0, 0], sizes = [1, 4, 4], strides = [1, 1, 1]} : vector<16x4x4xf32> to vector<1x4x4xf32>
    %295 = vector.shape_cast %294 : vector<1x4x4xf32> to vector<4x4xf32>
    %296 = arith.mulf %293, %295 : vector<4x4xf32>
    %297 = arith.addf %291, %296 : vector<4x4xf32>
    %298 = vector.extract_strided_slice %2 {offsets = [13, 0, 0], sizes = [1, 4, 4], strides = [1, 1, 1]} : vector<16x4x4xf32> to vector<1x4x4xf32>
    %299 = vector.shape_cast %298 : vector<1x4x4xf32> to vector<4x4xf32>
    %300 = vector.extract_strided_slice %220 {offsets = [13, 0, 0], sizes = [1, 4, 4], strides = [1, 1, 1]} : vector<16x4x4xf32> to vector<1x4x4xf32>
    %301 = vector.shape_cast %300 : vector<1x4x4xf32> to vector<4x4xf32>
    %302 = arith.mulf %299, %301 : vector<4x4xf32>
    %303 = arith.addf %297, %302 : vector<4x4xf32>
    %304 = vector.extract_strided_slice %2 {offsets = [14, 0, 0], sizes = [1, 4, 4], strides = [1, 1, 1]} : vector<16x4x4xf32> to vector<1x4x4xf32>
    %305 = vector.shape_cast %304 : vector<1x4x4xf32> to vector<4x4xf32>
    %306 = vector.extract_strided_slice %220 {offsets = [14, 0, 0], sizes = [1, 4, 4], strides = [1, 1, 1]} : vector<16x4x4xf32> to vector<1x4x4xf32>
    %307 = vector.shape_cast %306 : vector<1x4x4xf32> to vector<4x4xf32>
    %308 = arith.mulf %305, %307 : vector<4x4xf32>
    %309 = arith.addf %303, %308 : vector<4x4xf32>
    %310 = vector.extract_strided_slice %2 {offsets = [15, 0, 0], sizes = [1, 4, 4], strides = [1, 1, 1]} : vector<16x4x4xf32> to vector<1x4x4xf32>
    %311 = vector.shape_cast %310 : vector<1x4x4xf32> to vector<4x4xf32>
    %312 = vector.extract_strided_slice %220 {offsets = [15, 0, 0], sizes = [1, 4, 4], strides = [1, 1, 1]} : vector<16x4x4xf32> to vector<1x4x4xf32>
    %313 = vector.shape_cast %312 : vector<1x4x4xf32> to vector<4x4xf32>
    %314 = arith.mulf %311, %313 : vector<4x4xf32>
    %315 = arith.addf %309, %314 : vector<4x4xf32>
    %cst_19 = arith.constant 6.250000e-02 : f32
    %316 = vector.broadcast %cst_19 : f32 to vector<4x4xf32>
    %317 = arith.mulf %315, %316 : vector<4x4xf32>
    %cst_20 = arith.constant 0.000000e+00 : f32
    %318 = vector.broadcast %cst_20 : f32 to vector<4x4xf32>
    %319 = arith.cmpf oge, %317, %318 : vector<4x4xf32>
    %cst_21 = arith.constant 1.000000e-01 : f32
    %320 = vector.broadcast %cst_21 : f32 to vector<4x4xf32>
    %321 = arith.mulf %317, %320 : vector<4x4xf32>
    %322 = arith.select %319, %317, %321 : vector<4x4xi1>, vector<4x4xf32>
    %323 = arith.truncf %322 : vector<4x4xf32> to vector<4x4xbf16>
    %c0_22 = arith.constant 0 : index
    %c2 = arith.constant 2 : index
    %c0_23 = arith.constant 0 : index
    %c0_24 = arith.constant 0 : index
    %324 = vector.load %arg3[%c0_22, %c2, %c0_23, %c0_24] : memref<1x9x4x4xbf16, #tpu.memory_space<vmem>>, vector<1x1x4x4xbf16>
    %325 = vector.shape_cast %324 : vector<1x1x4x4xbf16> to vector<4x4xbf16>
    %326 = vector.shape_cast %323 : vector<4x4xbf16> to vector<1x1x4x4xbf16>
    tpu.vector_store %arg3[%c0_22, %c2, %c0_23, %c0_24], %326 {strides = array<i32>} : memref<1x9x4x4xbf16, #tpu.memory_space<vmem>>, vector<1x1x4x4xbf16>,
    %327 = vector.extract_strided_slice %5 {offsets = [0, 1, 0], sizes = [16, 4, 4], strides = [1, 1, 1]} : vector<16x6x6xf32> to vector<16x4x4xf32>
    %328 = vector.extract_strided_slice %2 {offsets = [0, 0, 0], sizes = [1, 4, 4], strides = [1, 1, 1]} : vector<16x4x4xf32> to vector<1x4x4xf32>
    %329 = vector.shape_cast %328 : vector<1x4x4xf32> to vector<4x4xf32>
    %330 = vector.extract_strided_slice %327 {offsets = [0, 0, 0], sizes = [1, 4, 4], strides = [1, 1, 1]} : vector<16x4x4xf32> to vector<1x4x4xf32>
    %331 = vector.shape_cast %330 : vector<1x4x4xf32> to vector<4x4xf32>
    %332 = arith.mulf %329, %331 : vector<4x4xf32>
    %333 = vector.extract_strided_slice %2 {offsets = [1, 0, 0], sizes = [1, 4, 4], strides = [1, 1, 1]} : vector<16x4x4xf32> to vector<1x4x4xf32>
    %334 = vector.shape_cast %333 : vector<1x4x4xf32> to vector<4x4xf32>
    %335 = vector.extract_strided_slice %327 {offsets = [1, 0, 0], sizes = [1, 4, 4], strides = [1, 1, 1]} : vector<16x4x4xf32> to vector<1x4x4xf32>
    %336 = vector.shape_cast %335 : vector<1x4x4xf32> to vector<4x4xf32>
    %337 = arith.mulf %334, %336 : vector<4x4xf32>
    %338 = arith.addf %332, %337 : vector<4x4xf32>
    %339 = vector.extract_strided_slice %2 {offsets = [2, 0, 0], sizes = [1, 4, 4], strides = [1, 1, 1]} : vector<16x4x4xf32> to vector<1x4x4xf32>
    %340 = vector.shape_cast %339 : vector<1x4x4xf32> to vector<4x4xf32>
    %341 = vector.extract_strided_slice %327 {offsets = [2, 0, 0], sizes = [1, 4, 4], strides = [1, 1, 1]} : vector<16x4x4xf32> to vector<1x4x4xf32>
    %342 = vector.shape_cast %341 : vector<1x4x4xf32> to vector<4x4xf32>
    %343 = arith.mulf %340, %342 : vector<4x4xf32>
    %344 = arith.addf %338, %343 : vector<4x4xf32>
    %345 = vector.extract_strided_slice %2 {offsets = [3, 0, 0], sizes = [1, 4, 4], strides = [1, 1, 1]} : vector<16x4x4xf32> to vector<1x4x4xf32>
    %346 = vector.shape_cast %345 : vector<1x4x4xf32> to vector<4x4xf32>
    %347 = vector.extract_strided_slice %327 {offsets = [3, 0, 0], sizes = [1, 4, 4], strides = [1, 1, 1]} : vector<16x4x4xf32> to vector<1x4x4xf32>
    %348 = vector.shape_cast %347 : vector<1x4x4xf32> to vector<4x4xf32>
    %349 = arith.mulf %346, %348 : vector<4x4xf32>
    %350 = arith.addf %344, %349 : vector<4x4xf32>
    %351 = vector.extract_strided_slice %2 {offsets = [4, 0, 0], sizes = [1, 4, 4], strides = [1, 1, 1]} : vector<16x4x4xf32> to vector<1x4x4xf32>
    %352 = vector.shape_cast %351 : vector<1x4x4xf32> to vector<4x4xf32>
    %353 = vector.extract_strided_slice %327 {offsets = [4, 0, 0], sizes = [1, 4, 4], strides = [1, 1, 1]} : vector<16x4x4xf32> to vector<1x4x4xf32>
    %354 = vector.shape_cast %353 : vector<1x4x4xf32> to vector<4x4xf32>
    %355 = arith.mulf %352, %354 : vector<4x4xf32>
    %356 = arith.addf %350, %355 : vector<4x4xf32>
    %357 = vector.extract_strided_slice %2 {offsets = [5, 0, 0], sizes = [1, 4, 4], strides = [1, 1, 1]} : vector<16x4x4xf32> to vector<1x4x4xf32>
    %358 = vector.shape_cast %357 : vector<1x4x4xf32> to vector<4x4xf32>
    %359 = vector.extract_strided_slice %327 {offsets = [5, 0, 0], sizes = [1, 4, 4], strides = [1, 1, 1]} : vector<16x4x4xf32> to vector<1x4x4xf32>
    %360 = vector.shape_cast %359 : vector<1x4x4xf32> to vector<4x4xf32>
    %361 = arith.mulf %358, %360 : vector<4x4xf32>
    %362 = arith.addf %356, %361 : vector<4x4xf32>
    %363 = vector.extract_strided_slice %2 {offsets = [6, 0, 0], sizes = [1, 4, 4], strides = [1, 1, 1]} : vector<16x4x4xf32> to vector<1x4x4xf32>
    %364 = vector.shape_cast %363 : vector<1x4x4xf32> to vector<4x4xf32>
    %365 = vector.extract_strided_slice %327 {offsets = [6, 0, 0], sizes = [1, 4, 4], strides = [1, 1, 1]} : vector<16x4x4xf32> to vector<1x4x4xf32>
    %366 = vector.shape_cast %365 : vector<1x4x4xf32> to vector<4x4xf32>
    %367 = arith.mulf %364, %366 : vector<4x4xf32>
    %368 = arith.addf %362, %367 : vector<4x4xf32>
    %369 = vector.extract_strided_slice %2 {offsets = [7, 0, 0], sizes = [1, 4, 4], strides = [1, 1, 1]} : vector<16x4x4xf32> to vector<1x4x4xf32>
    %370 = vector.shape_cast %369 : vector<1x4x4xf32> to vector<4x4xf32>
    %371 = vector.extract_strided_slice %327 {offsets = [7, 0, 0], sizes = [1, 4, 4], strides = [1, 1, 1]} : vector<16x4x4xf32> to vector<1x4x4xf32>
    %372 = vector.shape_cast %371 : vector<1x4x4xf32> to vector<4x4xf32>
    %373 = arith.mulf %370, %372 : vector<4x4xf32>
    %374 = arith.addf %368, %373 : vector<4x4xf32>
    %375 = vector.extract_strided_slice %2 {offsets = [8, 0, 0], sizes = [1, 4, 4], strides = [1, 1, 1]} : vector<16x4x4xf32> to vector<1x4x4xf32>
    %376 = vector.shape_cast %375 : vector<1x4x4xf32> to vector<4x4xf32>
    %377 = vector.extract_strided_slice %327 {offsets = [8, 0, 0], sizes = [1, 4, 4], strides = [1, 1, 1]} : vector<16x4x4xf32> to vector<1x4x4xf32>
    %378 = vector.shape_cast %377 : vector<1x4x4xf32> to vector<4x4xf32>
    %379 = arith.mulf %376, %378 : vector<4x4xf32>
    %380 = arith.addf %374, %379 : vector<4x4xf32>
    %381 = vector.extract_strided_slice %2 {offsets = [9, 0, 0], sizes = [1, 4, 4], strides = [1, 1, 1]} : vector<16x4x4xf32> to vector<1x4x4xf32>
    %382 = vector.shape_cast %381 : vector<1x4x4xf32> to vector<4x4xf32>
    %383 = vector.extract_strided_slice %327 {offsets = [9, 0, 0], sizes = [1, 4, 4], strides = [1, 1, 1]} : vector<16x4x4xf32> to vector<1x4x4xf32>
    %384 = vector.shape_cast %383 : vector<1x4x4xf32> to vector<4x4xf32>
    %385 = arith.mulf %382, %384 : vector<4x4xf32>
    %386 = arith.addf %380, %385 : vector<4x4xf32>
    %387 = vector.extract_strided_slice %2 {offsets = [10, 0, 0], sizes = [1, 4, 4], strides = [1, 1, 1]} : vector<16x4x4xf32> to vector<1x4x4xf32>
    %388 = vector.shape_cast %387 : vector<1x4x4xf32> to vector<4x4xf32>
    %389 = vector.extract_strided_slice %327 {offsets = [10, 0, 0], sizes = [1, 4, 4], strides = [1, 1, 1]} : vector<16x4x4xf32> to vector<1x4x4xf32>
    %390 = vector.shape_cast %389 : vector<1x4x4xf32> to vector<4x4xf32>
    %391 = arith.mulf %388, %390 : vector<4x4xf32>
    %392 = arith.addf %386, %391 : vector<4x4xf32>
    %393 = vector.extract_strided_slice %2 {offsets = [11, 0, 0], sizes = [1, 4, 4], strides = [1, 1, 1]} : vector<16x4x4xf32> to vector<1x4x4xf32>
    %394 = vector.shape_cast %393 : vector<1x4x4xf32> to vector<4x4xf32>
    %395 = vector.extract_strided_slice %327 {offsets = [11, 0, 0], sizes = [1, 4, 4], strides = [1, 1, 1]} : vector<16x4x4xf32> to vector<1x4x4xf32>
    %396 = vector.shape_cast %395 : vector<1x4x4xf32> to vector<4x4xf32>
    %397 = arith.mulf %394, %396 : vector<4x4xf32>
    %398 = arith.addf %392, %397 : vector<4x4xf32>
    %399 = vector.extract_strided_slice %2 {offsets = [12, 0, 0], sizes = [1, 4, 4], strides = [1, 1, 1]} : vector<16x4x4xf32> to vector<1x4x4xf32>
    %400 = vector.shape_cast %399 : vector<1x4x4xf32> to vector<4x4xf32>
    %401 = vector.extract_strided_slice %327 {offsets = [12, 0, 0], sizes = [1, 4, 4], strides = [1, 1, 1]} : vector<16x4x4xf32> to vector<1x4x4xf32>
    %402 = vector.shape_cast %401 : vector<1x4x4xf32> to vector<4x4xf32>
    %403 = arith.mulf %400, %402 : vector<4x4xf32>
    %404 = arith.addf %398, %403 : vector<4x4xf32>
    %405 = vector.extract_strided_slice %2 {offsets = [13, 0, 0], sizes = [1, 4, 4], strides = [1, 1, 1]} : vector<16x4x4xf32> to vector<1x4x4xf32>
    %406 = vector.shape_cast %405 : vector<1x4x4xf32> to vector<4x4xf32>
    %407 = vector.extract_strided_slice %327 {offsets = [13, 0, 0], sizes = [1, 4, 4], strides = [1, 1, 1]} : vector<16x4x4xf32> to vector<1x4x4xf32>
    %408 = vector.shape_cast %407 : vector<1x4x4xf32> to vector<4x4xf32>
    %409 = arith.mulf %406, %408 : vector<4x4xf32>
    %410 = arith.addf %404, %409 : vector<4x4xf32>
    %411 = vector.extract_strided_slice %2 {offsets = [14, 0, 0], sizes = [1, 4, 4], strides = [1, 1, 1]} : vector<16x4x4xf32> to vector<1x4x4xf32>
    %412 = vector.shape_cast %411 : vector<1x4x4xf32> to vector<4x4xf32>
    %413 = vector.extract_strided_slice %327 {offsets = [14, 0, 0], sizes = [1, 4, 4], strides = [1, 1, 1]} : vector<16x4x4xf32> to vector<1x4x4xf32>
    %414 = vector.shape_cast %413 : vector<1x4x4xf32> to vector<4x4xf32>
    %415 = arith.mulf %412, %414 : vector<4x4xf32>
    %416 = arith.addf %410, %415 : vector<4x4xf32>
    %417 = vector.extract_strided_slice %2 {offsets = [15, 0, 0], sizes = [1, 4, 4], strides = [1, 1, 1]} : vector<16x4x4xf32> to vector<1x4x4xf32>
    %418 = vector.shape_cast %417 : vector<1x4x4xf32> to vector<4x4xf32>
    %419 = vector.extract_strided_slice %327 {offsets = [15, 0, 0], sizes = [1, 4, 4], strides = [1, 1, 1]} : vector<16x4x4xf32> to vector<1x4x4xf32>
    %420 = vector.shape_cast %419 : vector<1x4x4xf32> to vector<4x4xf32>
    %421 = arith.mulf %418, %420 : vector<4x4xf32>
    %422 = arith.addf %416, %421 : vector<4x4xf32>
    %cst_25 = arith.constant 6.250000e-02 : f32
    %423 = vector.broadcast %cst_25 : f32 to vector<4x4xf32>
    %424 = arith.mulf %422, %423 : vector<4x4xf32>
    %cst_26 = arith.constant 0.000000e+00 : f32
    %425 = vector.broadcast %cst_26 : f32 to vector<4x4xf32>
    %426 = arith.cmpf oge, %424, %425 : vector<4x4xf32>
    %cst_27 = arith.constant 1.000000e-01 : f32
    %427 = vector.broadcast %cst_27 : f32 to vector<4x4xf32>
    %428 = arith.mulf %424, %427 : vector<4x4xf32>
    %429 = arith.select %426, %424, %428 : vector<4x4xi1>, vector<4x4xf32>
    %430 = arith.truncf %429 : vector<4x4xf32> to vector<4x4xbf16>
    %c0_28 = arith.constant 0 : index
    %c3 = arith.constant 3 : index
    %c0_29 = arith.constant 0 : index
    %c0_30 = arith.constant 0 : index
    %431 = vector.load %arg3[%c0_28, %c3, %c0_29, %c0_30] : memref<1x9x4x4xbf16, #tpu.memory_space<vmem>>, vector<1x1x4x4xbf16>
    %432 = vector.shape_cast %431 : vector<1x1x4x4xbf16> to vector<4x4xbf16>
    %433 = vector.shape_cast %430 : vector<4x4xbf16> to vector<1x1x4x4xbf16>
    tpu.vector_store %arg3[%c0_28, %c3, %c0_29, %c0_30], %433 {strides = array<i32>} : memref<1x9x4x4xbf16, #tpu.memory_space<vmem>>, vector<1x1x4x4xbf16>,
    %434 = vector.extract_strided_slice %5 {offsets = [0, 1, 1], sizes = [16, 4, 4], strides = [1, 1, 1]} : vector<16x6x6xf32> to vector<16x4x4xf32>
    %435 = vector.extract_strided_slice %2 {offsets = [0, 0, 0], sizes = [1, 4, 4], strides = [1, 1, 1]} : vector<16x4x4xf32> to vector<1x4x4xf32>
    %436 = vector.shape_cast %435 : vector<1x4x4xf32> to vector<4x4xf32>
    %437 = vector.extract_strided_slice %434 {offsets = [0, 0, 0], sizes = [1, 4, 4], strides = [1, 1, 1]} : vector<16x4x4xf32> to vector<1x4x4xf32>
    %438 = vector.shape_cast %437 : vector<1x4x4xf32> to vector<4x4xf32>
    %439 = arith.mulf %436, %438 : vector<4x4xf32>
    %440 = vector.extract_strided_slice %2 {offsets = [1, 0, 0], sizes = [1, 4, 4], strides = [1, 1, 1]} : vector<16x4x4xf32> to vector<1x4x4xf32>
    %441 = vector.shape_cast %440 : vector<1x4x4xf32> to vector<4x4xf32>
    %442 = vector.extract_strided_slice %434 {offsets = [1, 0, 0], sizes = [1, 4, 4], strides = [1, 1, 1]} : vector<16x4x4xf32> to vector<1x4x4xf32>
    %443 = vector.shape_cast %442 : vector<1x4x4xf32> to vector<4x4xf32>
    %444 = arith.mulf %441, %443 : vector<4x4xf32>
    %445 = arith.addf %439, %444 : vector<4x4xf32>
    %446 = vector.extract_strided_slice %2 {offsets = [2, 0, 0], sizes = [1, 4, 4], strides = [1, 1, 1]} : vector<16x4x4xf32> to vector<1x4x4xf32>
    %447 = vector.shape_cast %446 : vector<1x4x4xf32> to vector<4x4xf32>
    %448 = vector.extract_strided_slice %434 {offsets = [2, 0, 0], sizes = [1, 4, 4], strides = [1, 1, 1]} : vector<16x4x4xf32> to vector<1x4x4xf32>
    %449 = vector.shape_cast %448 : vector<1x4x4xf32> to vector<4x4xf32>
    %450 = arith.mulf %447, %449 : vector<4x4xf32>
    %451 = arith.addf %445, %450 : vector<4x4xf32>
    %452 = vector.extract_strided_slice %2 {offsets = [3, 0, 0], sizes = [1, 4, 4], strides = [1, 1, 1]} : vector<16x4x4xf32> to vector<1x4x4xf32>
    %453 = vector.shape_cast %452 : vector<1x4x4xf32> to vector<4x4xf32>
    %454 = vector.extract_strided_slice %434 {offsets = [3, 0, 0], sizes = [1, 4, 4], strides = [1, 1, 1]} : vector<16x4x4xf32> to vector<1x4x4xf32>
    %455 = vector.shape_cast %454 : vector<1x4x4xf32> to vector<4x4xf32>
    %456 = arith.mulf %453, %455 : vector<4x4xf32>
    %457 = arith.addf %451, %456 : vector<4x4xf32>
    %458 = vector.extract_strided_slice %2 {offsets = [4, 0, 0], sizes = [1, 4, 4], strides = [1, 1, 1]} : vector<16x4x4xf32> to vector<1x4x4xf32>
    %459 = vector.shape_cast %458 : vector<1x4x4xf32> to vector<4x4xf32>
    %460 = vector.extract_strided_slice %434 {offsets = [4, 0, 0], sizes = [1, 4, 4], strides = [1, 1, 1]} : vector<16x4x4xf32> to vector<1x4x4xf32>
    %461 = vector.shape_cast %460 : vector<1x4x4xf32> to vector<4x4xf32>
    %462 = arith.mulf %459, %461 : vector<4x4xf32>
    %463 = arith.addf %457, %462 : vector<4x4xf32>
    %464 = vector.extract_strided_slice %2 {offsets = [5, 0, 0], sizes = [1, 4, 4], strides = [1, 1, 1]} : vector<16x4x4xf32> to vector<1x4x4xf32>
    %465 = vector.shape_cast %464 : vector<1x4x4xf32> to vector<4x4xf32>
    %466 = vector.extract_strided_slice %434 {offsets = [5, 0, 0], sizes = [1, 4, 4], strides = [1, 1, 1]} : vector<16x4x4xf32> to vector<1x4x4xf32>
    %467 = vector.shape_cast %466 : vector<1x4x4xf32> to vector<4x4xf32>
    %468 = arith.mulf %465, %467 : vector<4x4xf32>
    %469 = arith.addf %463, %468 : vector<4x4xf32>
    %470 = vector.extract_strided_slice %2 {offsets = [6, 0, 0], sizes = [1, 4, 4], strides = [1, 1, 1]} : vector<16x4x4xf32> to vector<1x4x4xf32>
    %471 = vector.shape_cast %470 : vector<1x4x4xf32> to vector<4x4xf32>
    %472 = vector.extract_strided_slice %434 {offsets = [6, 0, 0], sizes = [1, 4, 4], strides = [1, 1, 1]} : vector<16x4x4xf32> to vector<1x4x4xf32>
    %473 = vector.shape_cast %472 : vector<1x4x4xf32> to vector<4x4xf32>
    %474 = arith.mulf %471, %473 : vector<4x4xf32>
    %475 = arith.addf %469, %474 : vector<4x4xf32>
    %476 = vector.extract_strided_slice %2 {offsets = [7, 0, 0], sizes = [1, 4, 4], strides = [1, 1, 1]} : vector<16x4x4xf32> to vector<1x4x4xf32>
    %477 = vector.shape_cast %476 : vector<1x4x4xf32> to vector<4x4xf32>
    %478 = vector.extract_strided_slice %434 {offsets = [7, 0, 0], sizes = [1, 4, 4], strides = [1, 1, 1]} : vector<16x4x4xf32> to vector<1x4x4xf32>
    %479 = vector.shape_cast %478 : vector<1x4x4xf32> to vector<4x4xf32>
    %480 = arith.mulf %477, %479 : vector<4x4xf32>
    %481 = arith.addf %475, %480 : vector<4x4xf32>
    %482 = vector.extract_strided_slice %2 {offsets = [8, 0, 0], sizes = [1, 4, 4], strides = [1, 1, 1]} : vector<16x4x4xf32> to vector<1x4x4xf32>
    %483 = vector.shape_cast %482 : vector<1x4x4xf32> to vector<4x4xf32>
    %484 = vector.extract_strided_slice %434 {offsets = [8, 0, 0], sizes = [1, 4, 4], strides = [1, 1, 1]} : vector<16x4x4xf32> to vector<1x4x4xf32>
    %485 = vector.shape_cast %484 : vector<1x4x4xf32> to vector<4x4xf32>
    %486 = arith.mulf %483, %485 : vector<4x4xf32>
    %487 = arith.addf %481, %486 : vector<4x4xf32>
    %488 = vector.extract_strided_slice %2 {offsets = [9, 0, 0], sizes = [1, 4, 4], strides = [1, 1, 1]} : vector<16x4x4xf32> to vector<1x4x4xf32>
    %489 = vector.shape_cast %488 : vector<1x4x4xf32> to vector<4x4xf32>
    %490 = vector.extract_strided_slice %434 {offsets = [9, 0, 0], sizes = [1, 4, 4], strides = [1, 1, 1]} : vector<16x4x4xf32> to vector<1x4x4xf32>
    %491 = vector.shape_cast %490 : vector<1x4x4xf32> to vector<4x4xf32>
    %492 = arith.mulf %489, %491 : vector<4x4xf32>
    %493 = arith.addf %487, %492 : vector<4x4xf32>
    %494 = vector.extract_strided_slice %2 {offsets = [10, 0, 0], sizes = [1, 4, 4], strides = [1, 1, 1]} : vector<16x4x4xf32> to vector<1x4x4xf32>
    %495 = vector.shape_cast %494 : vector<1x4x4xf32> to vector<4x4xf32>
    %496 = vector.extract_strided_slice %434 {offsets = [10, 0, 0], sizes = [1, 4, 4], strides = [1, 1, 1]} : vector<16x4x4xf32> to vector<1x4x4xf32>
    %497 = vector.shape_cast %496 : vector<1x4x4xf32> to vector<4x4xf32>
    %498 = arith.mulf %495, %497 : vector<4x4xf32>
    %499 = arith.addf %493, %498 : vector<4x4xf32>
    %500 = vector.extract_strided_slice %2 {offsets = [11, 0, 0], sizes = [1, 4, 4], strides = [1, 1, 1]} : vector<16x4x4xf32> to vector<1x4x4xf32>
    %501 = vector.shape_cast %500 : vector<1x4x4xf32> to vector<4x4xf32>
    %502 = vector.extract_strided_slice %434 {offsets = [11, 0, 0], sizes = [1, 4, 4], strides = [1, 1, 1]} : vector<16x4x4xf32> to vector<1x4x4xf32>
    %503 = vector.shape_cast %502 : vector<1x4x4xf32> to vector<4x4xf32>
    %504 = arith.mulf %501, %503 : vector<4x4xf32>
    %505 = arith.addf %499, %504 : vector<4x4xf32>
    %506 = vector.extract_strided_slice %2 {offsets = [12, 0, 0], sizes = [1, 4, 4], strides = [1, 1, 1]} : vector<16x4x4xf32> to vector<1x4x4xf32>
    %507 = vector.shape_cast %506 : vector<1x4x4xf32> to vector<4x4xf32>
    %508 = vector.extract_strided_slice %434 {offsets = [12, 0, 0], sizes = [1, 4, 4], strides = [1, 1, 1]} : vector<16x4x4xf32> to vector<1x4x4xf32>
    %509 = vector.shape_cast %508 : vector<1x4x4xf32> to vector<4x4xf32>
    %510 = arith.mulf %507, %509 : vector<4x4xf32>
    %511 = arith.addf %505, %510 : vector<4x4xf32>
    %512 = vector.extract_strided_slice %2 {offsets = [13, 0, 0], sizes = [1, 4, 4], strides = [1, 1, 1]} : vector<16x4x4xf32> to vector<1x4x4xf32>
    %513 = vector.shape_cast %512 : vector<1x4x4xf32> to vector<4x4xf32>
    %514 = vector.extract_strided_slice %434 {offsets = [13, 0, 0], sizes = [1, 4, 4], strides = [1, 1, 1]} : vector<16x4x4xf32> to vector<1x4x4xf32>
    %515 = vector.shape_cast %514 : vector<1x4x4xf32> to vector<4x4xf32>
    %516 = arith.mulf %513, %515 : vector<4x4xf32>
    %517 = arith.addf %511, %516 : vector<4x4xf32>
    %518 = vector.extract_strided_slice %2 {offsets = [14, 0, 0], sizes = [1, 4, 4], strides = [1, 1, 1]} : vector<16x4x4xf32> to vector<1x4x4xf32>
    %519 = vector.shape_cast %518 : vector<1x4x4xf32> to vector<4x4xf32>
    %520 = vector.extract_strided_slice %434 {offsets = [14, 0, 0], sizes = [1, 4, 4], strides = [1, 1, 1]} : vector<16x4x4xf32> to vector<1x4x4xf32>
    %521 = vector.shape_cast %520 : vector<1x4x4xf32> to vector<4x4xf32>
    %522 = arith.mulf %519, %521 : vector<4x4xf32>
    %523 = arith.addf %517, %522 : vector<4x4xf32>
    %524 = vector.extract_strided_slice %2 {offsets = [15, 0, 0], sizes = [1, 4, 4], strides = [1, 1, 1]} : vector<16x4x4xf32> to vector<1x4x4xf32>
    %525 = vector.shape_cast %524 : vector<1x4x4xf32> to vector<4x4xf32>
    %526 = vector.extract_strided_slice %434 {offsets = [15, 0, 0], sizes = [1, 4, 4], strides = [1, 1, 1]} : vector<16x4x4xf32> to vector<1x4x4xf32>
    %527 = vector.shape_cast %526 : vector<1x4x4xf32> to vector<4x4xf32>
    %528 = arith.mulf %525, %527 : vector<4x4xf32>
    %529 = arith.addf %523, %528 : vector<4x4xf32>
    %cst_31 = arith.constant 6.250000e-02 : f32
    %530 = vector.broadcast %cst_31 : f32 to vector<4x4xf32>
    %531 = arith.mulf %529, %530 : vector<4x4xf32>
    %cst_32 = arith.constant 0.000000e+00 : f32
    %532 = vector.broadcast %cst_32 : f32 to vector<4x4xf32>
    %533 = arith.cmpf oge, %531, %532 : vector<4x4xf32>
    %cst_33 = arith.constant 1.000000e-01 : f32
    %534 = vector.broadcast %cst_33 : f32 to vector<4x4xf32>
    %535 = arith.mulf %531, %534 : vector<4x4xf32>
    %536 = arith.select %533, %531, %535 : vector<4x4xi1>, vector<4x4xf32>
    %537 = arith.truncf %536 : vector<4x4xf32> to vector<4x4xbf16>
    %c0_34 = arith.constant 0 : index
    %c4 = arith.constant 4 : index
    %c0_35 = arith.constant 0 : index
    %c0_36 = arith.constant 0 : index
    %538 = vector.load %arg3[%c0_34, %c4, %c0_35, %c0_36] : memref<1x9x4x4xbf16, #tpu.memory_space<vmem>>, vector<1x1x4x4xbf16>
    %539 = vector.shape_cast %538 : vector<1x1x4x4xbf16> to vector<4x4xbf16>
    %540 = vector.shape_cast %537 : vector<4x4xbf16> to vector<1x1x4x4xbf16>
    tpu.vector_store %arg3[%c0_34, %c4, %c0_35, %c0_36], %540 {strides = array<i32>} : memref<1x9x4x4xbf16, #tpu.memory_space<vmem>>, vector<1x1x4x4xbf16>,
    %541 = vector.extract_strided_slice %5 {offsets = [0, 1, 2], sizes = [16, 4, 4], strides = [1, 1, 1]} : vector<16x6x6xf32> to vector<16x4x4xf32>
    %542 = vector.extract_strided_slice %2 {offsets = [0, 0, 0], sizes = [1, 4, 4], strides = [1, 1, 1]} : vector<16x4x4xf32> to vector<1x4x4xf32>
    %543 = vector.shape_cast %542 : vector<1x4x4xf32> to vector<4x4xf32>
    %544 = vector.extract_strided_slice %541 {offsets = [0, 0, 0], sizes = [1, 4, 4], strides = [1, 1, 1]} : vector<16x4x4xf32> to vector<1x4x4xf32>
    %545 = vector.shape_cast %544 : vector<1x4x4xf32> to vector<4x4xf32>
    %546 = arith.mulf %543, %545 : vector<4x4xf32>
    %547 = vector.extract_strided_slice %2 {offsets = [1, 0, 0], sizes = [1, 4, 4], strides = [1, 1, 1]} : vector<16x4x4xf32> to vector<1x4x4xf32>
    %548 = vector.shape_cast %547 : vector<1x4x4xf32> to vector<4x4xf32>
    %549 = vector.extract_strided_slice %541 {offsets = [1, 0, 0], sizes = [1, 4, 4], strides = [1, 1, 1]} : vector<16x4x4xf32> to vector<1x4x4xf32>
    %550 = vector.shape_cast %549 : vector<1x4x4xf32> to vector<4x4xf32>
    %551 = arith.mulf %548, %550 : vector<4x4xf32>
    %552 = arith.addf %546, %551 : vector<4x4xf32>
    %553 = vector.extract_strided_slice %2 {offsets = [2, 0, 0], sizes = [1, 4, 4], strides = [1, 1, 1]} : vector<16x4x4xf32> to vector<1x4x4xf32>
    %554 = vector.shape_cast %553 : vector<1x4x4xf32> to vector<4x4xf32>
    %555 = vector.extract_strided_slice %541 {offsets = [2, 0, 0], sizes = [1, 4, 4], strides = [1, 1, 1]} : vector<16x4x4xf32> to vector<1x4x4xf32>
    %556 = vector.shape_cast %555 : vector<1x4x4xf32> to vector<4x4xf32>
    %557 = arith.mulf %554, %556 : vector<4x4xf32>
    %558 = arith.addf %552, %557 : vector<4x4xf32>
    %559 = vector.extract_strided_slice %2 {offsets = [3, 0, 0], sizes = [1, 4, 4], strides = [1, 1, 1]} : vector<16x4x4xf32> to vector<1x4x4xf32>
    %560 = vector.shape_cast %559 : vector<1x4x4xf32> to vector<4x4xf32>
    %561 = vector.extract_strided_slice %541 {offsets = [3, 0, 0], sizes = [1, 4, 4], strides = [1, 1, 1]} : vector<16x4x4xf32> to vector<1x4x4xf32>
    %562 = vector.shape_cast %561 : vector<1x4x4xf32> to vector<4x4xf32>
    %563 = arith.mulf %560, %562 : vector<4x4xf32>
    %564 = arith.addf %558, %563 : vector<4x4xf32>
    %565 = vector.extract_strided_slice %2 {offsets = [4, 0, 0], sizes = [1, 4, 4], strides = [1, 1, 1]} : vector<16x4x4xf32> to vector<1x4x4xf32>
    %566 = vector.shape_cast %565 : vector<1x4x4xf32> to vector<4x4xf32>
    %567 = vector.extract_strided_slice %541 {offsets = [4, 0, 0], sizes = [1, 4, 4], strides = [1, 1, 1]} : vector<16x4x4xf32> to vector<1x4x4xf32>
    %568 = vector.shape_cast %567 : vector<1x4x4xf32> to vector<4x4xf32>
    %569 = arith.mulf %566, %568 : vector<4x4xf32>
    %570 = arith.addf %564, %569 : vector<4x4xf32>
    %571 = vector.extract_strided_slice %2 {offsets = [5, 0, 0], sizes = [1, 4, 4], strides = [1, 1, 1]} : vector<16x4x4xf32> to vector<1x4x4xf32>
    %572 = vector.shape_cast %571 : vector<1x4x4xf32> to vector<4x4xf32>
    %573 = vector.extract_strided_slice %541 {offsets = [5, 0, 0], sizes = [1, 4, 4], strides = [1, 1, 1]} : vector<16x4x4xf32> to vector<1x4x4xf32>
    %574 = vector.shape_cast %573 : vector<1x4x4xf32> to vector<4x4xf32>
    %575 = arith.mulf %572, %574 : vector<4x4xf32>
    %576 = arith.addf %570, %575 : vector<4x4xf32>
    %577 = vector.extract_strided_slice %2 {offsets = [6, 0, 0], sizes = [1, 4, 4], strides = [1, 1, 1]} : vector<16x4x4xf32> to vector<1x4x4xf32>
    %578 = vector.shape_cast %577 : vector<1x4x4xf32> to vector<4x4xf32>
    %579 = vector.extract_strided_slice %541 {offsets = [6, 0, 0], sizes = [1, 4, 4], strides = [1, 1, 1]} : vector<16x4x4xf32> to vector<1x4x4xf32>
    %580 = vector.shape_cast %579 : vector<1x4x4xf32> to vector<4x4xf32>
    %581 = arith.mulf %578, %580 : vector<4x4xf32>
    %582 = arith.addf %576, %581 : vector<4x4xf32>
    %583 = vector.extract_strided_slice %2 {offsets = [7, 0, 0], sizes = [1, 4, 4], strides = [1, 1, 1]} : vector<16x4x4xf32> to vector<1x4x4xf32>
    %584 = vector.shape_cast %583 : vector<1x4x4xf32> to vector<4x4xf32>
    %585 = vector.extract_strided_slice %541 {offsets = [7, 0, 0], sizes = [1, 4, 4], strides = [1, 1, 1]} : vector<16x4x4xf32> to vector<1x4x4xf32>
    %586 = vector.shape_cast %585 : vector<1x4x4xf32> to vector<4x4xf32>
    %587 = arith.mulf %584, %586 : vector<4x4xf32>
    %588 = arith.addf %582, %587 : vector<4x4xf32>
    %589 = vector.extract_strided_slice %2 {offsets = [8, 0, 0], sizes = [1, 4, 4], strides = [1, 1, 1]} : vector<16x4x4xf32> to vector<1x4x4xf32>
    %590 = vector.shape_cast %589 : vector<1x4x4xf32> to vector<4x4xf32>
    %591 = vector.extract_strided_slice %541 {offsets = [8, 0, 0], sizes = [1, 4, 4], strides = [1, 1, 1]} : vector<16x4x4xf32> to vector<1x4x4xf32>
    %592 = vector.shape_cast %591 : vector<1x4x4xf32> to vector<4x4xf32>
    %593 = arith.mulf %590, %592 : vector<4x4xf32>
    %594 = arith.addf %588, %593 : vector<4x4xf32>
    %595 = vector.extract_strided_slice %2 {offsets = [9, 0, 0], sizes = [1, 4, 4], strides = [1, 1, 1]} : vector<16x4x4xf32> to vector<1x4x4xf32>
    %596 = vector.shape_cast %595 : vector<1x4x4xf32> to vector<4x4xf32>
    %597 = vector.extract_strided_slice %541 {offsets = [9, 0, 0], sizes = [1, 4, 4], strides = [1, 1, 1]} : vector<16x4x4xf32> to vector<1x4x4xf32>
    %598 = vector.shape_cast %597 : vector<1x4x4xf32> to vector<4x4xf32>
    %599 = arith.mulf %596, %598 : vector<4x4xf32>
    %600 = arith.addf %594, %599 : vector<4x4xf32>
    %601 = vector.extract_strided_slice %2 {offsets = [10, 0, 0], sizes = [1, 4, 4], strides = [1, 1, 1]} : vector<16x4x4xf32> to vector<1x4x4xf32>
    %602 = vector.shape_cast %601 : vector<1x4x4xf32> to vector<4x4xf32>
    %603 = vector.extract_strided_slice %541 {offsets = [10, 0, 0], sizes = [1, 4, 4], strides = [1, 1, 1]} : vector<16x4x4xf32> to vector<1x4x4xf32>
    %604 = vector.shape_cast %603 : vector<1x4x4xf32> to vector<4x4xf32>
    %605 = arith.mulf %602, %604 : vector<4x4xf32>
    %606 = arith.addf %600, %605 : vector<4x4xf32>
    %607 = vector.extract_strided_slice %2 {offsets = [11, 0, 0], sizes = [1, 4, 4], strides = [1, 1, 1]} : vector<16x4x4xf32> to vector<1x4x4xf32>
    %608 = vector.shape_cast %607 : vector<1x4x4xf32> to vector<4x4xf32>
    %609 = vector.extract_strided_slice %541 {offsets = [11, 0, 0], sizes = [1, 4, 4], strides = [1, 1, 1]} : vector<16x4x4xf32> to vector<1x4x4xf32>
    %610 = vector.shape_cast %609 : vector<1x4x4xf32> to vector<4x4xf32>
    %611 = arith.mulf %608, %610 : vector<4x4xf32>
    %612 = arith.addf %606, %611 : vector<4x4xf32>
    %613 = vector.extract_strided_slice %2 {offsets = [12, 0, 0], sizes = [1, 4, 4], strides = [1, 1, 1]} : vector<16x4x4xf32> to vector<1x4x4xf32>
    %614 = vector.shape_cast %613 : vector<1x4x4xf32> to vector<4x4xf32>
    %615 = vector.extract_strided_slice %541 {offsets = [12, 0, 0], sizes = [1, 4, 4], strides = [1, 1, 1]} : vector<16x4x4xf32> to vector<1x4x4xf32>
    %616 = vector.shape_cast %615 : vector<1x4x4xf32> to vector<4x4xf32>
    %617 = arith.mulf %614, %616 : vector<4x4xf32>
    %618 = arith.addf %612, %617 : vector<4x4xf32>
    %619 = vector.extract_strided_slice %2 {offsets = [13, 0, 0], sizes = [1, 4, 4], strides = [1, 1, 1]} : vector<16x4x4xf32> to vector<1x4x4xf32>
    %620 = vector.shape_cast %619 : vector<1x4x4xf32> to vector<4x4xf32>
    %621 = vector.extract_strided_slice %541 {offsets = [13, 0, 0], sizes = [1, 4, 4], strides = [1, 1, 1]} : vector<16x4x4xf32> to vector<1x4x4xf32>
    %622 = vector.shape_cast %621 : vector<1x4x4xf32> to vector<4x4xf32>
    %623 = arith.mulf %620, %622 : vector<4x4xf32>
    %624 = arith.addf %618, %623 : vector<4x4xf32>
    %625 = vector.extract_strided_slice %2 {offsets = [14, 0, 0], sizes = [1, 4, 4], strides = [1, 1, 1]} : vector<16x4x4xf32> to vector<1x4x4xf32>
    %626 = vector.shape_cast %625 : vector<1x4x4xf32> to vector<4x4xf32>
    %627 = vector.extract_strided_slice %541 {offsets = [14, 0, 0], sizes = [1, 4, 4], strides = [1, 1, 1]} : vector<16x4x4xf32> to vector<1x4x4xf32>
    %628 = vector.shape_cast %627 : vector<1x4x4xf32> to vector<4x4xf32>
    %629 = arith.mulf %626, %628 : vector<4x4xf32>
    %630 = arith.addf %624, %629 : vector<4x4xf32>
    %631 = vector.extract_strided_slice %2 {offsets = [15, 0, 0], sizes = [1, 4, 4], strides = [1, 1, 1]} : vector<16x4x4xf32> to vector<1x4x4xf32>
    %632 = vector.shape_cast %631 : vector<1x4x4xf32> to vector<4x4xf32>
    %633 = vector.extract_strided_slice %541 {offsets = [15, 0, 0], sizes = [1, 4, 4], strides = [1, 1, 1]} : vector<16x4x4xf32> to vector<1x4x4xf32>
    %634 = vector.shape_cast %633 : vector<1x4x4xf32> to vector<4x4xf32>
    %635 = arith.mulf %632, %634 : vector<4x4xf32>
    %636 = arith.addf %630, %635 : vector<4x4xf32>
    %cst_37 = arith.constant 6.250000e-02 : f32
    %637 = vector.broadcast %cst_37 : f32 to vector<4x4xf32>
    %638 = arith.mulf %636, %637 : vector<4x4xf32>
    %cst_38 = arith.constant 0.000000e+00 : f32
    %639 = vector.broadcast %cst_38 : f32 to vector<4x4xf32>
    %640 = arith.cmpf oge, %638, %639 : vector<4x4xf32>
    %cst_39 = arith.constant 1.000000e-01 : f32
    %641 = vector.broadcast %cst_39 : f32 to vector<4x4xf32>
    %642 = arith.mulf %638, %641 : vector<4x4xf32>
    %643 = arith.select %640, %638, %642 : vector<4x4xi1>, vector<4x4xf32>
    %644 = arith.truncf %643 : vector<4x4xf32> to vector<4x4xbf16>
    %c0_40 = arith.constant 0 : index
    %c5 = arith.constant 5 : index
    %c0_41 = arith.constant 0 : index
    %c0_42 = arith.constant 0 : index
    %645 = vector.load %arg3[%c0_40, %c5, %c0_41, %c0_42] : memref<1x9x4x4xbf16, #tpu.memory_space<vmem>>, vector<1x1x4x4xbf16>
    %646 = vector.shape_cast %645 : vector<1x1x4x4xbf16> to vector<4x4xbf16>
    %647 = vector.shape_cast %644 : vector<4x4xbf16> to vector<1x1x4x4xbf16>
    tpu.vector_store %arg3[%c0_40, %c5, %c0_41, %c0_42], %647 {strides = array<i32>} : memref<1x9x4x4xbf16, #tpu.memory_space<vmem>>, vector<1x1x4x4xbf16>,
    %648 = vector.extract_strided_slice %5 {offsets = [0, 2, 0], sizes = [16, 4, 4], strides = [1, 1, 1]} : vector<16x6x6xf32> to vector<16x4x4xf32>
    %649 = vector.extract_strided_slice %2 {offsets = [0, 0, 0], sizes = [1, 4, 4], strides = [1, 1, 1]} : vector<16x4x4xf32> to vector<1x4x4xf32>
    %650 = vector.shape_cast %649 : vector<1x4x4xf32> to vector<4x4xf32>
    %651 = vector.extract_strided_slice %648 {offsets = [0, 0, 0], sizes = [1, 4, 4], strides = [1, 1, 1]} : vector<16x4x4xf32> to vector<1x4x4xf32>
    %652 = vector.shape_cast %651 : vector<1x4x4xf32> to vector<4x4xf32>
    %653 = arith.mulf %650, %652 : vector<4x4xf32>
    %654 = vector.extract_strided_slice %2 {offsets = [1, 0, 0], sizes = [1, 4, 4], strides = [1, 1, 1]} : vector<16x4x4xf32> to vector<1x4x4xf32>
    %655 = vector.shape_cast %654 : vector<1x4x4xf32> to vector<4x4xf32>
    %656 = vector.extract_strided_slice %648 {offsets = [1, 0, 0], sizes = [1, 4, 4], strides = [1, 1, 1]} : vector<16x4x4xf32> to vector<1x4x4xf32>
    %657 = vector.shape_cast %656 : vector<1x4x4xf32> to vector<4x4xf32>
    %658 = arith.mulf %655, %657 : vector<4x4xf32>
    %659 = arith.addf %653, %658 : vector<4x4xf32>
    %660 = vector.extract_strided_slice %2 {offsets = [2, 0, 0], sizes = [1, 4, 4], strides = [1, 1, 1]} : vector<16x4x4xf32> to vector<1x4x4xf32>
    %661 = vector.shape_cast %660 : vector<1x4x4xf32> to vector<4x4xf32>
    %662 = vector.extract_strided_slice %648 {offsets = [2, 0, 0], sizes = [1, 4, 4], strides = [1, 1, 1]} : vector<16x4x4xf32> to vector<1x4x4xf32>
    %663 = vector.shape_cast %662 : vector<1x4x4xf32> to vector<4x4xf32>
    %664 = arith.mulf %661, %663 : vector<4x4xf32>
    %665 = arith.addf %659, %664 : vector<4x4xf32>
    %666 = vector.extract_strided_slice %2 {offsets = [3, 0, 0], sizes = [1, 4, 4], strides = [1, 1, 1]} : vector<16x4x4xf32> to vector<1x4x4xf32>
    %667 = vector.shape_cast %666 : vector<1x4x4xf32> to vector<4x4xf32>
    %668 = vector.extract_strided_slice %648 {offsets = [3, 0, 0], sizes = [1, 4, 4], strides = [1, 1, 1]} : vector<16x4x4xf32> to vector<1x4x4xf32>
    %669 = vector.shape_cast %668 : vector<1x4x4xf32> to vector<4x4xf32>
    %670 = arith.mulf %667, %669 : vector<4x4xf32>
    %671 = arith.addf %665, %670 : vector<4x4xf32>
    %672 = vector.extract_strided_slice %2 {offsets = [4, 0, 0], sizes = [1, 4, 4], strides = [1, 1, 1]} : vector<16x4x4xf32> to vector<1x4x4xf32>
    %673 = vector.shape_cast %672 : vector<1x4x4xf32> to vector<4x4xf32>
    %674 = vector.extract_strided_slice %648 {offsets = [4, 0, 0], sizes = [1, 4, 4], strides = [1, 1, 1]} : vector<16x4x4xf32> to vector<1x4x4xf32>
    %675 = vector.shape_cast %674 : vector<1x4x4xf32> to vector<4x4xf32>
    %676 = arith.mulf %673, %675 : vector<4x4xf32>
    %677 = arith.addf %671, %676 : vector<4x4xf32>
    %678 = vector.extract_strided_slice %2 {offsets = [5, 0, 0], sizes = [1, 4, 4], strides = [1, 1, 1]} : vector<16x4x4xf32> to vector<1x4x4xf32>
    %679 = vector.shape_cast %678 : vector<1x4x4xf32> to vector<4x4xf32>
    %680 = vector.extract_strided_slice %648 {offsets = [5, 0, 0], sizes = [1, 4, 4], strides = [1, 1, 1]} : vector<16x4x4xf32> to vector<1x4x4xf32>
    %681 = vector.shape_cast %680 : vector<1x4x4xf32> to vector<4x4xf32>
    %682 = arith.mulf %679, %681 : vector<4x4xf32>
    %683 = arith.addf %677, %682 : vector<4x4xf32>
    %684 = vector.extract_strided_slice %2 {offsets = [6, 0, 0], sizes = [1, 4, 4], strides = [1, 1, 1]} : vector<16x4x4xf32> to vector<1x4x4xf32>
    %685 = vector.shape_cast %684 : vector<1x4x4xf32> to vector<4x4xf32>
    %686 = vector.extract_strided_slice %648 {offsets = [6, 0, 0], sizes = [1, 4, 4], strides = [1, 1, 1]} : vector<16x4x4xf32> to vector<1x4x4xf32>
    %687 = vector.shape_cast %686 : vector<1x4x4xf32> to vector<4x4xf32>
    %688 = arith.mulf %685, %687 : vector<4x4xf32>
    %689 = arith.addf %683, %688 : vector<4x4xf32>
    %690 = vector.extract_strided_slice %2 {offsets = [7, 0, 0], sizes = [1, 4, 4], strides = [1, 1, 1]} : vector<16x4x4xf32> to vector<1x4x4xf32>
    %691 = vector.shape_cast %690 : vector<1x4x4xf32> to vector<4x4xf32>
    %692 = vector.extract_strided_slice %648 {offsets = [7, 0, 0], sizes = [1, 4, 4], strides = [1, 1, 1]} : vector<16x4x4xf32> to vector<1x4x4xf32>
    %693 = vector.shape_cast %692 : vector<1x4x4xf32> to vector<4x4xf32>
    %694 = arith.mulf %691, %693 : vector<4x4xf32>
    %695 = arith.addf %689, %694 : vector<4x4xf32>
    %696 = vector.extract_strided_slice %2 {offsets = [8, 0, 0], sizes = [1, 4, 4], strides = [1, 1, 1]} : vector<16x4x4xf32> to vector<1x4x4xf32>
    %697 = vector.shape_cast %696 : vector<1x4x4xf32> to vector<4x4xf32>
    %698 = vector.extract_strided_slice %648 {offsets = [8, 0, 0], sizes = [1, 4, 4], strides = [1, 1, 1]} : vector<16x4x4xf32> to vector<1x4x4xf32>
    %699 = vector.shape_cast %698 : vector<1x4x4xf32> to vector<4x4xf32>
    %700 = arith.mulf %697, %699 : vector<4x4xf32>
    %701 = arith.addf %695, %700 : vector<4x4xf32>
    %702 = vector.extract_strided_slice %2 {offsets = [9, 0, 0], sizes = [1, 4, 4], strides = [1, 1, 1]} : vector<16x4x4xf32> to vector<1x4x4xf32>
    %703 = vector.shape_cast %702 : vector<1x4x4xf32> to vector<4x4xf32>
    %704 = vector.extract_strided_slice %648 {offsets = [9, 0, 0], sizes = [1, 4, 4], strides = [1, 1, 1]} : vector<16x4x4xf32> to vector<1x4x4xf32>
    %705 = vector.shape_cast %704 : vector<1x4x4xf32> to vector<4x4xf32>
    %706 = arith.mulf %703, %705 : vector<4x4xf32>
    %707 = arith.addf %701, %706 : vector<4x4xf32>
    %708 = vector.extract_strided_slice %2 {offsets = [10, 0, 0], sizes = [1, 4, 4], strides = [1, 1, 1]} : vector<16x4x4xf32> to vector<1x4x4xf32>
    %709 = vector.shape_cast %708 : vector<1x4x4xf32> to vector<4x4xf32>
    %710 = vector.extract_strided_slice %648 {offsets = [10, 0, 0], sizes = [1, 4, 4], strides = [1, 1, 1]} : vector<16x4x4xf32> to vector<1x4x4xf32>
    %711 = vector.shape_cast %710 : vector<1x4x4xf32> to vector<4x4xf32>
    %712 = arith.mulf %709, %711 : vector<4x4xf32>
    %713 = arith.addf %707, %712 : vector<4x4xf32>
    %714 = vector.extract_strided_slice %2 {offsets = [11, 0, 0], sizes = [1, 4, 4], strides = [1, 1, 1]} : vector<16x4x4xf32> to vector<1x4x4xf32>
    %715 = vector.shape_cast %714 : vector<1x4x4xf32> to vector<4x4xf32>
    %716 = vector.extract_strided_slice %648 {offsets = [11, 0, 0], sizes = [1, 4, 4], strides = [1, 1, 1]} : vector<16x4x4xf32> to vector<1x4x4xf32>
    %717 = vector.shape_cast %716 : vector<1x4x4xf32> to vector<4x4xf32>
    %718 = arith.mulf %715, %717 : vector<4x4xf32>
    %719 = arith.addf %713, %718 : vector<4x4xf32>
    %720 = vector.extract_strided_slice %2 {offsets = [12, 0, 0], sizes = [1, 4, 4], strides = [1, 1, 1]} : vector<16x4x4xf32> to vector<1x4x4xf32>
    %721 = vector.shape_cast %720 : vector<1x4x4xf32> to vector<4x4xf32>
    %722 = vector.extract_strided_slice %648 {offsets = [12, 0, 0], sizes = [1, 4, 4], strides = [1, 1, 1]} : vector<16x4x4xf32> to vector<1x4x4xf32>
    %723 = vector.shape_cast %722 : vector<1x4x4xf32> to vector<4x4xf32>
    %724 = arith.mulf %721, %723 : vector<4x4xf32>
    %725 = arith.addf %719, %724 : vector<4x4xf32>
    %726 = vector.extract_strided_slice %2 {offsets = [13, 0, 0], sizes = [1, 4, 4], strides = [1, 1, 1]} : vector<16x4x4xf32> to vector<1x4x4xf32>
    %727 = vector.shape_cast %726 : vector<1x4x4xf32> to vector<4x4xf32>
    %728 = vector.extract_strided_slice %648 {offsets = [13, 0, 0], sizes = [1, 4, 4], strides = [1, 1, 1]} : vector<16x4x4xf32> to vector<1x4x4xf32>
    %729 = vector.shape_cast %728 : vector<1x4x4xf32> to vector<4x4xf32>
    %730 = arith.mulf %727, %729 : vector<4x4xf32>
    %731 = arith.addf %725, %730 : vector<4x4xf32>
    %732 = vector.extract_strided_slice %2 {offsets = [14, 0, 0], sizes = [1, 4, 4], strides = [1, 1, 1]} : vector<16x4x4xf32> to vector<1x4x4xf32>
    %733 = vector.shape_cast %732 : vector<1x4x4xf32> to vector<4x4xf32>
    %734 = vector.extract_strided_slice %648 {offsets = [14, 0, 0], sizes = [1, 4, 4], strides = [1, 1, 1]} : vector<16x4x4xf32> to vector<1x4x4xf32>
    %735 = vector.shape_cast %734 : vector<1x4x4xf32> to vector<4x4xf32>
    %736 = arith.mulf %733, %735 : vector<4x4xf32>
    %737 = arith.addf %731, %736 : vector<4x4xf32>
    %738 = vector.extract_strided_slice %2 {offsets = [15, 0, 0], sizes = [1, 4, 4], strides = [1, 1, 1]} : vector<16x4x4xf32> to vector<1x4x4xf32>
    %739 = vector.shape_cast %738 : vector<1x4x4xf32> to vector<4x4xf32>
    %740 = vector.extract_strided_slice %648 {offsets = [15, 0, 0], sizes = [1, 4, 4], strides = [1, 1, 1]} : vector<16x4x4xf32> to vector<1x4x4xf32>
    %741 = vector.shape_cast %740 : vector<1x4x4xf32> to vector<4x4xf32>
    %742 = arith.mulf %739, %741 : vector<4x4xf32>
    %743 = arith.addf %737, %742 : vector<4x4xf32>
    %cst_43 = arith.constant 6.250000e-02 : f32
    %744 = vector.broadcast %cst_43 : f32 to vector<4x4xf32>
    %745 = arith.mulf %743, %744 : vector<4x4xf32>
    %cst_44 = arith.constant 0.000000e+00 : f32
    %746 = vector.broadcast %cst_44 : f32 to vector<4x4xf32>
    %747 = arith.cmpf oge, %745, %746 : vector<4x4xf32>
    %cst_45 = arith.constant 1.000000e-01 : f32
    %748 = vector.broadcast %cst_45 : f32 to vector<4x4xf32>
    %749 = arith.mulf %745, %748 : vector<4x4xf32>
    %750 = arith.select %747, %745, %749 : vector<4x4xi1>, vector<4x4xf32>
    %751 = arith.truncf %750 : vector<4x4xf32> to vector<4x4xbf16>
    %c0_46 = arith.constant 0 : index
    %c6 = arith.constant 6 : index
    %c0_47 = arith.constant 0 : index
    %c0_48 = arith.constant 0 : index
    %752 = vector.load %arg3[%c0_46, %c6, %c0_47, %c0_48] : memref<1x9x4x4xbf16, #tpu.memory_space<vmem>>, vector<1x1x4x4xbf16>
    %753 = vector.shape_cast %752 : vector<1x1x4x4xbf16> to vector<4x4xbf16>
    %754 = vector.shape_cast %751 : vector<4x4xbf16> to vector<1x1x4x4xbf16>
    tpu.vector_store %arg3[%c0_46, %c6, %c0_47, %c0_48], %754 {strides = array<i32>} : memref<1x9x4x4xbf16, #tpu.memory_space<vmem>>, vector<1x1x4x4xbf16>,
    %755 = vector.extract_strided_slice %5 {offsets = [0, 2, 1], sizes = [16, 4, 4], strides = [1, 1, 1]} : vector<16x6x6xf32> to vector<16x4x4xf32>
    %756 = vector.extract_strided_slice %2 {offsets = [0, 0, 0], sizes = [1, 4, 4], strides = [1, 1, 1]} : vector<16x4x4xf32> to vector<1x4x4xf32>
    %757 = vector.shape_cast %756 : vector<1x4x4xf32> to vector<4x4xf32>
    %758 = vector.extract_strided_slice %755 {offsets = [0, 0, 0], sizes = [1, 4, 4], strides = [1, 1, 1]} : vector<16x4x4xf32> to vector<1x4x4xf32>
    %759 = vector.shape_cast %758 : vector<1x4x4xf32> to vector<4x4xf32>
    %760 = arith.mulf %757, %759 : vector<4x4xf32>
    %761 = vector.extract_strided_slice %2 {offsets = [1, 0, 0], sizes = [1, 4, 4], strides = [1, 1, 1]} : vector<16x4x4xf32> to vector<1x4x4xf32>
    %762 = vector.shape_cast %761 : vector<1x4x4xf32> to vector<4x4xf32>
    %763 = vector.extract_strided_slice %755 {offsets = [1, 0, 0], sizes = [1, 4, 4], strides = [1, 1, 1]} : vector<16x4x4xf32> to vector<1x4x4xf32>
    %764 = vector.shape_cast %763 : vector<1x4x4xf32> to vector<4x4xf32>
    %765 = arith.mulf %762, %764 : vector<4x4xf32>
    %766 = arith.addf %760, %765 : vector<4x4xf32>
    %767 = vector.extract_strided_slice %2 {offsets = [2, 0, 0], sizes = [1, 4, 4], strides = [1, 1, 1]} : vector<16x4x4xf32> to vector<1x4x4xf32>
    %768 = vector.shape_cast %767 : vector<1x4x4xf32> to vector<4x4xf32>
    %769 = vector.extract_strided_slice %755 {offsets = [2, 0, 0], sizes = [1, 4, 4], strides = [1, 1, 1]} : vector<16x4x4xf32> to vector<1x4x4xf32>
    %770 = vector.shape_cast %769 : vector<1x4x4xf32> to vector<4x4xf32>
    %771 = arith.mulf %768, %770 : vector<4x4xf32>
    %772 = arith.addf %766, %771 : vector<4x4xf32>
    %773 = vector.extract_strided_slice %2 {offsets = [3, 0, 0], sizes = [1, 4, 4], strides = [1, 1, 1]} : vector<16x4x4xf32> to vector<1x4x4xf32>
    %774 = vector.shape_cast %773 : vector<1x4x4xf32> to vector<4x4xf32>
    %775 = vector.extract_strided_slice %755 {offsets = [3, 0, 0], sizes = [1, 4, 4], strides = [1, 1, 1]} : vector<16x4x4xf32> to vector<1x4x4xf32>
    %776 = vector.shape_cast %775 : vector<1x4x4xf32> to vector<4x4xf32>
    %777 = arith.mulf %774, %776 : vector<4x4xf32>
    %778 = arith.addf %772, %777 : vector<4x4xf32>
    %779 = vector.extract_strided_slice %2 {offsets = [4, 0, 0], sizes = [1, 4, 4], strides = [1, 1, 1]} : vector<16x4x4xf32> to vector<1x4x4xf32>
    %780 = vector.shape_cast %779 : vector<1x4x4xf32> to vector<4x4xf32>
    %781 = vector.extract_strided_slice %755 {offsets = [4, 0, 0], sizes = [1, 4, 4], strides = [1, 1, 1]} : vector<16x4x4xf32> to vector<1x4x4xf32>
    %782 = vector.shape_cast %781 : vector<1x4x4xf32> to vector<4x4xf32>
    %783 = arith.mulf %780, %782 : vector<4x4xf32>
    %784 = arith.addf %778, %783 : vector<4x4xf32>
    %785 = vector.extract_strided_slice %2 {offsets = [5, 0, 0], sizes = [1, 4, 4], strides = [1, 1, 1]} : vector<16x4x4xf32> to vector<1x4x4xf32>
    %786 = vector.shape_cast %785 : vector<1x4x4xf32> to vector<4x4xf32>
    %787 = vector.extract_strided_slice %755 {offsets = [5, 0, 0], sizes = [1, 4, 4], strides = [1, 1, 1]} : vector<16x4x4xf32> to vector<1x4x4xf32>
    %788 = vector.shape_cast %787 : vector<1x4x4xf32> to vector<4x4xf32>
    %789 = arith.mulf %786, %788 : vector<4x4xf32>
    %790 = arith.addf %784, %789 : vector<4x4xf32>
    %791 = vector.extract_strided_slice %2 {offsets = [6, 0, 0], sizes = [1, 4, 4], strides = [1, 1, 1]} : vector<16x4x4xf32> to vector<1x4x4xf32>
    %792 = vector.shape_cast %791 : vector<1x4x4xf32> to vector<4x4xf32>
    %793 = vector.extract_strided_slice %755 {offsets = [6, 0, 0], sizes = [1, 4, 4], strides = [1, 1, 1]} : vector<16x4x4xf32> to vector<1x4x4xf32>
    %794 = vector.shape_cast %793 : vector<1x4x4xf32> to vector<4x4xf32>
    %795 = arith.mulf %792, %794 : vector<4x4xf32>
    %796 = arith.addf %790, %795 : vector<4x4xf32>
    %797 = vector.extract_strided_slice %2 {offsets = [7, 0, 0], sizes = [1, 4, 4], strides = [1, 1, 1]} : vector<16x4x4xf32> to vector<1x4x4xf32>
    %798 = vector.shape_cast %797 : vector<1x4x4xf32> to vector<4x4xf32>
    %799 = vector.extract_strided_slice %755 {offsets = [7, 0, 0], sizes = [1, 4, 4], strides = [1, 1, 1]} : vector<16x4x4xf32> to vector<1x4x4xf32>
    %800 = vector.shape_cast %799 : vector<1x4x4xf32> to vector<4x4xf32>
    %801 = arith.mulf %798, %800 : vector<4x4xf32>
    %802 = arith.addf %796, %801 : vector<4x4xf32>
    %803 = vector.extract_strided_slice %2 {offsets = [8, 0, 0], sizes = [1, 4, 4], strides = [1, 1, 1]} : vector<16x4x4xf32> to vector<1x4x4xf32>
    %804 = vector.shape_cast %803 : vector<1x4x4xf32> to vector<4x4xf32>
    %805 = vector.extract_strided_slice %755 {offsets = [8, 0, 0], sizes = [1, 4, 4], strides = [1, 1, 1]} : vector<16x4x4xf32> to vector<1x4x4xf32>
    %806 = vector.shape_cast %805 : vector<1x4x4xf32> to vector<4x4xf32>
    %807 = arith.mulf %804, %806 : vector<4x4xf32>
    %808 = arith.addf %802, %807 : vector<4x4xf32>
    %809 = vector.extract_strided_slice %2 {offsets = [9, 0, 0], sizes = [1, 4, 4], strides = [1, 1, 1]} : vector<16x4x4xf32> to vector<1x4x4xf32>
    %810 = vector.shape_cast %809 : vector<1x4x4xf32> to vector<4x4xf32>
    %811 = vector.extract_strided_slice %755 {offsets = [9, 0, 0], sizes = [1, 4, 4], strides = [1, 1, 1]} : vector<16x4x4xf32> to vector<1x4x4xf32>
    %812 = vector.shape_cast %811 : vector<1x4x4xf32> to vector<4x4xf32>
    %813 = arith.mulf %810, %812 : vector<4x4xf32>
    %814 = arith.addf %808, %813 : vector<4x4xf32>
    %815 = vector.extract_strided_slice %2 {offsets = [10, 0, 0], sizes = [1, 4, 4], strides = [1, 1, 1]} : vector<16x4x4xf32> to vector<1x4x4xf32>
    %816 = vector.shape_cast %815 : vector<1x4x4xf32> to vector<4x4xf32>
    %817 = vector.extract_strided_slice %755 {offsets = [10, 0, 0], sizes = [1, 4, 4], strides = [1, 1, 1]} : vector<16x4x4xf32> to vector<1x4x4xf32>
    %818 = vector.shape_cast %817 : vector<1x4x4xf32> to vector<4x4xf32>
    %819 = arith.mulf %816, %818 : vector<4x4xf32>
    %820 = arith.addf %814, %819 : vector<4x4xf32>
    %821 = vector.extract_strided_slice %2 {offsets = [11, 0, 0], sizes = [1, 4, 4], strides = [1, 1, 1]} : vector<16x4x4xf32> to vector<1x4x4xf32>
    %822 = vector.shape_cast %821 : vector<1x4x4xf32> to vector<4x4xf32>
    %823 = vector.extract_strided_slice %755 {offsets = [11, 0, 0], sizes = [1, 4, 4], strides = [1, 1, 1]} : vector<16x4x4xf32> to vector<1x4x4xf32>
    %824 = vector.shape_cast %823 : vector<1x4x4xf32> to vector<4x4xf32>
    %825 = arith.mulf %822, %824 : vector<4x4xf32>
    %826 = arith.addf %820, %825 : vector<4x4xf32>
    %827 = vector.extract_strided_slice %2 {offsets = [12, 0, 0], sizes = [1, 4, 4], strides = [1, 1, 1]} : vector<16x4x4xf32> to vector<1x4x4xf32>
    %828 = vector.shape_cast %827 : vector<1x4x4xf32> to vector<4x4xf32>
    %829 = vector.extract_strided_slice %755 {offsets = [12, 0, 0], sizes = [1, 4, 4], strides = [1, 1, 1]} : vector<16x4x4xf32> to vector<1x4x4xf32>
    %830 = vector.shape_cast %829 : vector<1x4x4xf32> to vector<4x4xf32>
    %831 = arith.mulf %828, %830 : vector<4x4xf32>
    %832 = arith.addf %826, %831 : vector<4x4xf32>
    %833 = vector.extract_strided_slice %2 {offsets = [13, 0, 0], sizes = [1, 4, 4], strides = [1, 1, 1]} : vector<16x4x4xf32> to vector<1x4x4xf32>
    %834 = vector.shape_cast %833 : vector<1x4x4xf32> to vector<4x4xf32>
    %835 = vector.extract_strided_slice %755 {offsets = [13, 0, 0], sizes = [1, 4, 4], strides = [1, 1, 1]} : vector<16x4x4xf32> to vector<1x4x4xf32>
    %836 = vector.shape_cast %835 : vector<1x4x4xf32> to vector<4x4xf32>
    %837 = arith.mulf %834, %836 : vector<4x4xf32>
    %838 = arith.addf %832, %837 : vector<4x4xf32>
    %839 = vector.extract_strided_slice %2 {offsets = [14, 0, 0], sizes = [1, 4, 4], strides = [1, 1, 1]} : vector<16x4x4xf32> to vector<1x4x4xf32>
    %840 = vector.shape_cast %839 : vector<1x4x4xf32> to vector<4x4xf32>
    %841 = vector.extract_strided_slice %755 {offsets = [14, 0, 0], sizes = [1, 4, 4], strides = [1, 1, 1]} : vector<16x4x4xf32> to vector<1x4x4xf32>
    %842 = vector.shape_cast %841 : vector<1x4x4xf32> to vector<4x4xf32>
    %843 = arith.mulf %840, %842 : vector<4x4xf32>
    %844 = arith.addf %838, %843 : vector<4x4xf32>
    %845 = vector.extract_strided_slice %2 {offsets = [15, 0, 0], sizes = [1, 4, 4], strides = [1, 1, 1]} : vector<16x4x4xf32> to vector<1x4x4xf32>
    %846 = vector.shape_cast %845 : vector<1x4x4xf32> to vector<4x4xf32>
    %847 = vector.extract_strided_slice %755 {offsets = [15, 0, 0], sizes = [1, 4, 4], strides = [1, 1, 1]} : vector<16x4x4xf32> to vector<1x4x4xf32>
    %848 = vector.shape_cast %847 : vector<1x4x4xf32> to vector<4x4xf32>
    %849 = arith.mulf %846, %848 : vector<4x4xf32>
    %850 = arith.addf %844, %849 : vector<4x4xf32>
    %cst_49 = arith.constant 6.250000e-02 : f32
    %851 = vector.broadcast %cst_49 : f32 to vector<4x4xf32>
    %852 = arith.mulf %850, %851 : vector<4x4xf32>
    %cst_50 = arith.constant 0.000000e+00 : f32
    %853 = vector.broadcast %cst_50 : f32 to vector<4x4xf32>
    %854 = arith.cmpf oge, %852, %853 : vector<4x4xf32>
    %cst_51 = arith.constant 1.000000e-01 : f32
    %855 = vector.broadcast %cst_51 : f32 to vector<4x4xf32>
    %856 = arith.mulf %852, %855 : vector<4x4xf32>
    %857 = arith.select %854, %852, %856 : vector<4x4xi1>, vector<4x4xf32>
    %858 = arith.truncf %857 : vector<4x4xf32> to vector<4x4xbf16>
    %c0_52 = arith.constant 0 : index
    %c7 = arith.constant 7 : index
    %c0_53 = arith.constant 0 : index
    %c0_54 = arith.constant 0 : index
    %859 = vector.load %arg3[%c0_52, %c7, %c0_53, %c0_54] : memref<1x9x4x4xbf16, #tpu.memory_space<vmem>>, vector<1x1x4x4xbf16>
    %860 = vector.shape_cast %859 : vector<1x1x4x4xbf16> to vector<4x4xbf16>
    %861 = vector.shape_cast %858 : vector<4x4xbf16> to vector<1x1x4x4xbf16>
    tpu.vector_store %arg3[%c0_52, %c7, %c0_53, %c0_54], %861 {strides = array<i32>} : memref<1x9x4x4xbf16, #tpu.memory_space<vmem>>, vector<1x1x4x4xbf16>,
    %862 = vector.extract_strided_slice %5 {offsets = [0, 2, 2], sizes = [16, 4, 4], strides = [1, 1, 1]} : vector<16x6x6xf32> to vector<16x4x4xf32>
    %863 = vector.extract_strided_slice %2 {offsets = [0, 0, 0], sizes = [1, 4, 4], strides = [1, 1, 1]} : vector<16x4x4xf32> to vector<1x4x4xf32>
    %864 = vector.shape_cast %863 : vector<1x4x4xf32> to vector<4x4xf32>
    %865 = vector.extract_strided_slice %862 {offsets = [0, 0, 0], sizes = [1, 4, 4], strides = [1, 1, 1]} : vector<16x4x4xf32> to vector<1x4x4xf32>
    %866 = vector.shape_cast %865 : vector<1x4x4xf32> to vector<4x4xf32>
    %867 = arith.mulf %864, %866 : vector<4x4xf32>
    %868 = vector.extract_strided_slice %2 {offsets = [1, 0, 0], sizes = [1, 4, 4], strides = [1, 1, 1]} : vector<16x4x4xf32> to vector<1x4x4xf32>
    %869 = vector.shape_cast %868 : vector<1x4x4xf32> to vector<4x4xf32>
    %870 = vector.extract_strided_slice %862 {offsets = [1, 0, 0], sizes = [1, 4, 4], strides = [1, 1, 1]} : vector<16x4x4xf32> to vector<1x4x4xf32>
    %871 = vector.shape_cast %870 : vector<1x4x4xf32> to vector<4x4xf32>
    %872 = arith.mulf %869, %871 : vector<4x4xf32>
    %873 = arith.addf %867, %872 : vector<4x4xf32>
    %874 = vector.extract_strided_slice %2 {offsets = [2, 0, 0], sizes = [1, 4, 4], strides = [1, 1, 1]} : vector<16x4x4xf32> to vector<1x4x4xf32>
    %875 = vector.shape_cast %874 : vector<1x4x4xf32> to vector<4x4xf32>
    %876 = vector.extract_strided_slice %862 {offsets = [2, 0, 0], sizes = [1, 4, 4], strides = [1, 1, 1]} : vector<16x4x4xf32> to vector<1x4x4xf32>
    %877 = vector.shape_cast %876 : vector<1x4x4xf32> to vector<4x4xf32>
    %878 = arith.mulf %875, %877 : vector<4x4xf32>
    %879 = arith.addf %873, %878 : vector<4x4xf32>
    %880 = vector.extract_strided_slice %2 {offsets = [3, 0, 0], sizes = [1, 4, 4], strides = [1, 1, 1]} : vector<16x4x4xf32> to vector<1x4x4xf32>
    %881 = vector.shape_cast %880 : vector<1x4x4xf32> to vector<4x4xf32>
    %882 = vector.extract_strided_slice %862 {offsets = [3, 0, 0], sizes = [1, 4, 4], strides = [1, 1, 1]} : vector<16x4x4xf32> to vector<1x4x4xf32>
    %883 = vector.shape_cast %882 : vector<1x4x4xf32> to vector<4x4xf32>
    %884 = arith.mulf %881, %883 : vector<4x4xf32>
    %885 = arith.addf %879, %884 : vector<4x4xf32>
    %886 = vector.extract_strided_slice %2 {offsets = [4, 0, 0], sizes = [1, 4, 4], strides = [1, 1, 1]} : vector<16x4x4xf32> to vector<1x4x4xf32>
    %887 = vector.shape_cast %886 : vector<1x4x4xf32> to vector<4x4xf32>
    %888 = vector.extract_strided_slice %862 {offsets = [4, 0, 0], sizes = [1, 4, 4], strides = [1, 1, 1]} : vector<16x4x4xf32> to vector<1x4x4xf32>
    %889 = vector.shape_cast %888 : vector<1x4x4xf32> to vector<4x4xf32>
    %890 = arith.mulf %887, %889 : vector<4x4xf32>
    %891 = arith.addf %885, %890 : vector<4x4xf32>
    %892 = vector.extract_strided_slice %2 {offsets = [5, 0, 0], sizes = [1, 4, 4], strides = [1, 1, 1]} : vector<16x4x4xf32> to vector<1x4x4xf32>
    %893 = vector.shape_cast %892 : vector<1x4x4xf32> to vector<4x4xf32>
    %894 = vector.extract_strided_slice %862 {offsets = [5, 0, 0], sizes = [1, 4, 4], strides = [1, 1, 1]} : vector<16x4x4xf32> to vector<1x4x4xf32>
    %895 = vector.shape_cast %894 : vector<1x4x4xf32> to vector<4x4xf32>
    %896 = arith.mulf %893, %895 : vector<4x4xf32>
    %897 = arith.addf %891, %896 : vector<4x4xf32>
    %898 = vector.extract_strided_slice %2 {offsets = [6, 0, 0], sizes = [1, 4, 4], strides = [1, 1, 1]} : vector<16x4x4xf32> to vector<1x4x4xf32>
    %899 = vector.shape_cast %898 : vector<1x4x4xf32> to vector<4x4xf32>
    %900 = vector.extract_strided_slice %862 {offsets = [6, 0, 0], sizes = [1, 4, 4], strides = [1, 1, 1]} : vector<16x4x4xf32> to vector<1x4x4xf32>
    %901 = vector.shape_cast %900 : vector<1x4x4xf32> to vector<4x4xf32>
    %902 = arith.mulf %899, %901 : vector<4x4xf32>
    %903 = arith.addf %897, %902 : vector<4x4xf32>
    %904 = vector.extract_strided_slice %2 {offsets = [7, 0, 0], sizes = [1, 4, 4], strides = [1, 1, 1]} : vector<16x4x4xf32> to vector<1x4x4xf32>
    %905 = vector.shape_cast %904 : vector<1x4x4xf32> to vector<4x4xf32>
    %906 = vector.extract_strided_slice %862 {offsets = [7, 0, 0], sizes = [1, 4, 4], strides = [1, 1, 1]} : vector<16x4x4xf32> to vector<1x4x4xf32>
    %907 = vector.shape_cast %906 : vector<1x4x4xf32> to vector<4x4xf32>
    %908 = arith.mulf %905, %907 : vector<4x4xf32>
    %909 = arith.addf %903, %908 : vector<4x4xf32>
    %910 = vector.extract_strided_slice %2 {offsets = [8, 0, 0], sizes = [1, 4, 4], strides = [1, 1, 1]} : vector<16x4x4xf32> to vector<1x4x4xf32>
    %911 = vector.shape_cast %910 : vector<1x4x4xf32> to vector<4x4xf32>
    %912 = vector.extract_strided_slice %862 {offsets = [8, 0, 0], sizes = [1, 4, 4], strides = [1, 1, 1]} : vector<16x4x4xf32> to vector<1x4x4xf32>
    %913 = vector.shape_cast %912 : vector<1x4x4xf32> to vector<4x4xf32>
    %914 = arith.mulf %911, %913 : vector<4x4xf32>
    %915 = arith.addf %909, %914 : vector<4x4xf32>
    %916 = vector.extract_strided_slice %2 {offsets = [9, 0, 0], sizes = [1, 4, 4], strides = [1, 1, 1]} : vector<16x4x4xf32> to vector<1x4x4xf32>
    %917 = vector.shape_cast %916 : vector<1x4x4xf32> to vector<4x4xf32>
    %918 = vector.extract_strided_slice %862 {offsets = [9, 0, 0], sizes = [1, 4, 4], strides = [1, 1, 1]} : vector<16x4x4xf32> to vector<1x4x4xf32>
    %919 = vector.shape_cast %918 : vector<1x4x4xf32> to vector<4x4xf32>
    %920 = arith.mulf %917, %919 : vector<4x4xf32>
    %921 = arith.addf %915, %920 : vector<4x4xf32>
    %922 = vector.extract_strided_slice %2 {offsets = [10, 0, 0], sizes = [1, 4, 4], strides = [1, 1, 1]} : vector<16x4x4xf32> to vector<1x4x4xf32>
    %923 = vector.shape_cast %922 : vector<1x4x4xf32> to vector<4x4xf32>
    %924 = vector.extract_strided_slice %862 {offsets = [10, 0, 0], sizes = [1, 4, 4], strides = [1, 1, 1]} : vector<16x4x4xf32> to vector<1x4x4xf32>
    %925 = vector.shape_cast %924 : vector<1x4x4xf32> to vector<4x4xf32>
    %926 = arith.mulf %923, %925 : vector<4x4xf32>
    %927 = arith.addf %921, %926 : vector<4x4xf32>
    %928 = vector.extract_strided_slice %2 {offsets = [11, 0, 0], sizes = [1, 4, 4], strides = [1, 1, 1]} : vector<16x4x4xf32> to vector<1x4x4xf32>
    %929 = vector.shape_cast %928 : vector<1x4x4xf32> to vector<4x4xf32>
    %930 = vector.extract_strided_slice %862 {offsets = [11, 0, 0], sizes = [1, 4, 4], strides = [1, 1, 1]} : vector<16x4x4xf32> to vector<1x4x4xf32>
    %931 = vector.shape_cast %930 : vector<1x4x4xf32> to vector<4x4xf32>
    %932 = arith.mulf %929, %931 : vector<4x4xf32>
    %933 = arith.addf %927, %932 : vector<4x4xf32>
    %934 = vector.extract_strided_slice %2 {offsets = [12, 0, 0], sizes = [1, 4, 4], strides = [1, 1, 1]} : vector<16x4x4xf32> to vector<1x4x4xf32>
    %935 = vector.shape_cast %934 : vector<1x4x4xf32> to vector<4x4xf32>
    %936 = vector.extract_strided_slice %862 {offsets = [12, 0, 0], sizes = [1, 4, 4], strides = [1, 1, 1]} : vector<16x4x4xf32> to vector<1x4x4xf32>
    %937 = vector.shape_cast %936 : vector<1x4x4xf32> to vector<4x4xf32>
    %938 = arith.mulf %935, %937 : vector<4x4xf32>
    %939 = arith.addf %933, %938 : vector<4x4xf32>
    %940 = vector.extract_strided_slice %2 {offsets = [13, 0, 0], sizes = [1, 4, 4], strides = [1, 1, 1]} : vector<16x4x4xf32> to vector<1x4x4xf32>
    %941 = vector.shape_cast %940 : vector<1x4x4xf32> to vector<4x4xf32>
    %942 = vector.extract_strided_slice %862 {offsets = [13, 0, 0], sizes = [1, 4, 4], strides = [1, 1, 1]} : vector<16x4x4xf32> to vector<1x4x4xf32>
    %943 = vector.shape_cast %942 : vector<1x4x4xf32> to vector<4x4xf32>
    %944 = arith.mulf %941, %943 : vector<4x4xf32>
    %945 = arith.addf %939, %944 : vector<4x4xf32>
    %946 = vector.extract_strided_slice %2 {offsets = [14, 0, 0], sizes = [1, 4, 4], strides = [1, 1, 1]} : vector<16x4x4xf32> to vector<1x4x4xf32>
    %947 = vector.shape_cast %946 : vector<1x4x4xf32> to vector<4x4xf32>
    %948 = vector.extract_strided_slice %862 {offsets = [14, 0, 0], sizes = [1, 4, 4], strides = [1, 1, 1]} : vector<16x4x4xf32> to vector<1x4x4xf32>
    %949 = vector.shape_cast %948 : vector<1x4x4xf32> to vector<4x4xf32>
    %950 = arith.mulf %947, %949 : vector<4x4xf32>
    %951 = arith.addf %945, %950 : vector<4x4xf32>
    %952 = vector.extract_strided_slice %2 {offsets = [15, 0, 0], sizes = [1, 4, 4], strides = [1, 1, 1]} : vector<16x4x4xf32> to vector<1x4x4xf32>
    %953 = vector.shape_cast %952 : vector<1x4x4xf32> to vector<4x4xf32>
    %954 = vector.extract_strided_slice %862 {offsets = [15, 0, 0], sizes = [1, 4, 4], strides = [1, 1, 1]} : vector<16x4x4xf32> to vector<1x4x4xf32>
    %955 = vector.shape_cast %954 : vector<1x4x4xf32> to vector<4x4xf32>
    %956 = arith.mulf %953, %955 : vector<4x4xf32>
    %957 = arith.addf %951, %956 : vector<4x4xf32>
    %cst_55 = arith.constant 6.250000e-02 : f32
    %958 = vector.broadcast %cst_55 : f32 to vector<4x4xf32>
    %959 = arith.mulf %957, %958 : vector<4x4xf32>
    %cst_56 = arith.constant 0.000000e+00 : f32
    %960 = vector.broadcast %cst_56 : f32 to vector<4x4xf32>
    %961 = arith.cmpf oge, %959, %960 : vector<4x4xf32>
    %cst_57 = arith.constant 1.000000e-01 : f32
    %962 = vector.broadcast %cst_57 : f32 to vector<4x4xf32>
    %963 = arith.mulf %959, %962 : vector<4x4xf32>
    %964 = arith.select %961, %959, %963 : vector<4x4xi1>, vector<4x4xf32>
    %965 = arith.truncf %964 : vector<4x4xf32> to vector<4x4xbf16>
    %c0_58 = arith.constant 0 : index
    %c8 = arith.constant 8 : index
    %c0_59 = arith.constant 0 : index
    %c0_60 = arith.constant 0 : index
    %966 = vector.load %arg3[%c0_58, %c8, %c0_59, %c0_60] : memref<1x9x4x4xbf16, #tpu.memory_space<vmem>>, vector<1x1x4x4xbf16>
    %967 = vector.shape_cast %966 : vector<1x1x4x4xbf16> to vector<4x4xbf16>
    %968 = vector.shape_cast %965 : vector<4x4xbf16> to vector<1x1x4x4xbf16>
    tpu.vector_store %arg3[%c0_58, %c8, %c0_59, %c0_60], %968 {strides = array<i32>} : memref<1x9x4x4xbf16, #tpu.memory_space<vmem>>, vector<1x1x4x4xbf16>,
    return
  }
  func.func @transform_0(%arg0: i32) -> (i32, i32, i32, i32) {
    %c0_i32 = arith.constant 0 : i32
    %c0_i32_0 = arith.constant 0 : i32
    %c0_i32_1 = arith.constant 0 : i32
    %c0_i32_2 = arith.constant 0 : i32
    return %arg0, %c0_i32, %c0_i32_0, %c0_i32_1 : i32, i32, i32, i32
  }
  func.func @transform_1(%arg0: i32) -> (i32, i32, i32, i32) {
    %c0_i32 = arith.constant 0 : i32
    %c0_i32_0 = arith.constant 0 : i32
    %c0_i32_1 = arith.constant 0 : i32
    %c0_i32_2 = arith.constant 0 : i32
    return %arg0, %c0_i32, %c0_i32_0, %c0_i32_1 : i32, i32, i32, i32
  }
  func.func @transform_2(%arg0: i32) -> (i32, i32, i32, i32) {
    %c0_i32 = arith.constant 0 : i32
    %c0_i32_0 = arith.constant 0 : i32
    %c0_i32_1 = arith.constant 0 : i32
    %c0_i32_2 = arith.constant 0 : i32
    return %arg0, %c0_i32, %c0_i32_0, %c0_i32_1 : i32, i32, i32, i32
  }
}

module attributes {stable_mosaic.version = 11 : i64} {
  func.func @_head_kernel(%arg0: i32, %arg1: memref<1x25x44xbf16, #tpu.memory_space<vmem>>, %arg2: memref<9x16x25xbf16, #tpu.memory_space<vmem>>, %arg3: memref<16x1xf32, #tpu.memory_space<vmem>>, %arg4: memref<9x2x16xbf16, #tpu.memory_space<vmem>>, %arg5: memref<2x1xf32, #tpu.memory_space<vmem>>, %arg6: memref<1x24xf32, #tpu.memory_space<vmem>>, %arg7: memref<1x2x24xf32, #tpu.memory_space<vmem>>, %arg8: memref<16x44xbf16, #tpu.memory_space<vmem>>) attributes {dimension_semantics = [#tpu.dimension_semantics<parallel>], iteration_bounds = array<i64: 2>, scalar_prefetch = 0 : i64, scratch_operands = 1 : i64, tpu.core_type = #tpu.core_type<tc>, window_params = [{transform_indices = @transform_0, window_bounds = array<i64: 1, 25, 44>}, {pipeline_mode = #tpu.pipeline_mode<synchronous>, transform_indices = @transform_1, window_bounds = array<i64: 9, 16, 25>}, {pipeline_mode = #tpu.pipeline_mode<synchronous>, transform_indices = @transform_2, window_bounds = array<i64: 16, 1>}, {pipeline_mode = #tpu.pipeline_mode<synchronous>, transform_indices = @transform_3, window_bounds = array<i64: 9, 2, 16>}, {pipeline_mode = #tpu.pipeline_mode<synchronous>, transform_indices = @transform_4, window_bounds = array<i64: 2, 1>}, {pipeline_mode = #tpu.pipeline_mode<synchronous>, transform_indices = @transform_5, window_bounds = array<i64: 1, 24>}, {transform_indices = @transform_6, window_bounds = array<i64: 1, 2, 24>}]} {
    %cst = arith.constant 0.000000e+00 : f32
    %0 = vector.broadcast %cst : f32 to vector<16x24xf32>
    %c0 = arith.constant 0 : index
    %c0_0 = arith.constant 0 : index
    %c0_1 = arith.constant 0 : index
    %1 = vector.load %arg1[%c0, %c0_0, %c0_1] : memref<1x25x44xbf16, #tpu.memory_space<vmem>>, vector<1x25x24xbf16>
    %2 = vector.shape_cast %1 : vector<1x25x24xbf16> to vector<25x24xbf16>
    %c0_2 = arith.constant 0 : index
    %c0_3 = arith.constant 0 : index
    %c0_4 = arith.constant 0 : index
    %3 = vector.load %arg2[%c0_2, %c0_3, %c0_4] : memref<9x16x25xbf16, #tpu.memory_space<vmem>>, vector<1x16x25xbf16>
    %4 = vector.shape_cast %3 : vector<1x16x25xbf16> to vector<16x25xbf16>
    %cst_5 = arith.constant dense<0.000000e+00> : vector<16x24xf32>
    %5 = tpu.matmul %4, %2, %cst_5 {dimension_numbers = #tpu.dot_dimension_numbers<[1], [0], [0], [1], [0, 0, 1, 1], [], []>} : vector<16x25xbf16>, vector<25x24xbf16>, vector<16x24xf32> -> vector<16x24xf32>
    %6 = arith.addf %0, %5 : vector<16x24xf32>
    %c0_6 = arith.constant 0 : index
    %c0_7 = arith.constant 0 : index
    %c1 = arith.constant 1 : index
    %7 = vector.load %arg1[%c0_6, %c0_7, %c1] : memref<1x25x44xbf16, #tpu.memory_space<vmem>>, vector<1x25x24xbf16>
    %8 = vector.shape_cast %7 : vector<1x25x24xbf16> to vector<25x24xbf16>
    %c1_8 = arith.constant 1 : index
    %c0_9 = arith.constant 0 : index
    %c0_10 = arith.constant 0 : index
    %9 = vector.load %arg2[%c1_8, %c0_9, %c0_10] : memref<9x16x25xbf16, #tpu.memory_space<vmem>>, vector<1x16x25xbf16>
    %10 = vector.shape_cast %9 : vector<1x16x25xbf16> to vector<16x25xbf16>
    %cst_11 = arith.constant dense<0.000000e+00> : vector<16x24xf32>
    %11 = tpu.matmul %10, %8, %cst_11 {dimension_numbers = #tpu.dot_dimension_numbers<[1], [0], [0], [1], [0, 0, 1, 1], [], []>} : vector<16x25xbf16>, vector<25x24xbf16>, vector<16x24xf32> -> vector<16x24xf32>
    %12 = arith.addf %6, %11 : vector<16x24xf32>
    %c0_12 = arith.constant 0 : index
    %c0_13 = arith.constant 0 : index
    %c2 = arith.constant 2 : index
    %13 = vector.load %arg1[%c0_12, %c0_13, %c2] : memref<1x25x44xbf16, #tpu.memory_space<vmem>>, vector<1x25x24xbf16>
    %14 = vector.shape_cast %13 : vector<1x25x24xbf16> to vector<25x24xbf16>
    %c2_14 = arith.constant 2 : index
    %c0_15 = arith.constant 0 : index
    %c0_16 = arith.constant 0 : index
    %15 = vector.load %arg2[%c2_14, %c0_15, %c0_16] : memref<9x16x25xbf16, #tpu.memory_space<vmem>>, vector<1x16x25xbf16>
    %16 = vector.shape_cast %15 : vector<1x16x25xbf16> to vector<16x25xbf16>
    %cst_17 = arith.constant dense<0.000000e+00> : vector<16x24xf32>
    %17 = tpu.matmul %16, %14, %cst_17 {dimension_numbers = #tpu.dot_dimension_numbers<[1], [0], [0], [1], [0, 0, 1, 1], [], []>} : vector<16x25xbf16>, vector<25x24xbf16>, vector<16x24xf32> -> vector<16x24xf32>
    %18 = arith.addf %12, %17 : vector<16x24xf32>
    %c0_18 = arith.constant 0 : index
    %c0_19 = arith.constant 0 : index
    %c6 = arith.constant 6 : index
    %19 = vector.load %arg1[%c0_18, %c0_19, %c6] : memref<1x25x44xbf16, #tpu.memory_space<vmem>>, vector<1x25x24xbf16>
    %20 = vector.shape_cast %19 : vector<1x25x24xbf16> to vector<25x24xbf16>
    %c3 = arith.constant 3 : index
    %c0_20 = arith.constant 0 : index
    %c0_21 = arith.constant 0 : index
    %21 = vector.load %arg2[%c3, %c0_20, %c0_21] : memref<9x16x25xbf16, #tpu.memory_space<vmem>>, vector<1x16x25xbf16>
    %22 = vector.shape_cast %21 : vector<1x16x25xbf16> to vector<16x25xbf16>
    %cst_22 = arith.constant dense<0.000000e+00> : vector<16x24xf32>
    %23 = tpu.matmul %22, %20, %cst_22 {dimension_numbers = #tpu.dot_dimension_numbers<[1], [0], [0], [1], [0, 0, 1, 1], [], []>} : vector<16x25xbf16>, vector<25x24xbf16>, vector<16x24xf32> -> vector<16x24xf32>
    %24 = arith.addf %18, %23 : vector<16x24xf32>
    %c0_23 = arith.constant 0 : index
    %c0_24 = arith.constant 0 : index
    %c7 = arith.constant 7 : index
    %25 = vector.load %arg1[%c0_23, %c0_24, %c7] : memref<1x25x44xbf16, #tpu.memory_space<vmem>>, vector<1x25x24xbf16>
    %26 = vector.shape_cast %25 : vector<1x25x24xbf16> to vector<25x24xbf16>
    %c4 = arith.constant 4 : index
    %c0_25 = arith.constant 0 : index
    %c0_26 = arith.constant 0 : index
    %27 = vector.load %arg2[%c4, %c0_25, %c0_26] : memref<9x16x25xbf16, #tpu.memory_space<vmem>>, vector<1x16x25xbf16>
    %28 = vector.shape_cast %27 : vector<1x16x25xbf16> to vector<16x25xbf16>
    %cst_27 = arith.constant dense<0.000000e+00> : vector<16x24xf32>
    %29 = tpu.matmul %28, %26, %cst_27 {dimension_numbers = #tpu.dot_dimension_numbers<[1], [0], [0], [1], [0, 0, 1, 1], [], []>} : vector<16x25xbf16>, vector<25x24xbf16>, vector<16x24xf32> -> vector<16x24xf32>
    %30 = arith.addf %24, %29 : vector<16x24xf32>
    %c0_28 = arith.constant 0 : index
    %c0_29 = arith.constant 0 : index
    %c8 = arith.constant 8 : index
    %31 = vector.load %arg1[%c0_28, %c0_29, %c8] : memref<1x25x44xbf16, #tpu.memory_space<vmem>>, vector<1x25x24xbf16>
    %32 = vector.shape_cast %31 : vector<1x25x24xbf16> to vector<25x24xbf16>
    %c5 = arith.constant 5 : index
    %c0_30 = arith.constant 0 : index
    %c0_31 = arith.constant 0 : index
    %33 = vector.load %arg2[%c5, %c0_30, %c0_31] : memref<9x16x25xbf16, #tpu.memory_space<vmem>>, vector<1x16x25xbf16>
    %34 = vector.shape_cast %33 : vector<1x16x25xbf16> to vector<16x25xbf16>
    %cst_32 = arith.constant dense<0.000000e+00> : vector<16x24xf32>
    %35 = tpu.matmul %34, %32, %cst_32 {dimension_numbers = #tpu.dot_dimension_numbers<[1], [0], [0], [1], [0, 0, 1, 1], [], []>} : vector<16x25xbf16>, vector<25x24xbf16>, vector<16x24xf32> -> vector<16x24xf32>
    %36 = arith.addf %30, %35 : vector<16x24xf32>
    %c0_33 = arith.constant 0 : index
    %c0_34 = arith.constant 0 : index
    %c12 = arith.constant 12 : index
    %37 = vector.load %arg1[%c0_33, %c0_34, %c12] : memref<1x25x44xbf16, #tpu.memory_space<vmem>>, vector<1x25x24xbf16>
    %38 = vector.shape_cast %37 : vector<1x25x24xbf16> to vector<25x24xbf16>
    %c6_35 = arith.constant 6 : index
    %c0_36 = arith.constant 0 : index
    %c0_37 = arith.constant 0 : index
    %39 = vector.load %arg2[%c6_35, %c0_36, %c0_37] : memref<9x16x25xbf16, #tpu.memory_space<vmem>>, vector<1x16x25xbf16>
    %40 = vector.shape_cast %39 : vector<1x16x25xbf16> to vector<16x25xbf16>
    %cst_38 = arith.constant dense<0.000000e+00> : vector<16x24xf32>
    %41 = tpu.matmul %40, %38, %cst_38 {dimension_numbers = #tpu.dot_dimension_numbers<[1], [0], [0], [1], [0, 0, 1, 1], [], []>} : vector<16x25xbf16>, vector<25x24xbf16>, vector<16x24xf32> -> vector<16x24xf32>
    %42 = arith.addf %36, %41 : vector<16x24xf32>
    %c0_39 = arith.constant 0 : index
    %c0_40 = arith.constant 0 : index
    %c13 = arith.constant 13 : index
    %43 = vector.load %arg1[%c0_39, %c0_40, %c13] : memref<1x25x44xbf16, #tpu.memory_space<vmem>>, vector<1x25x24xbf16>
    %44 = vector.shape_cast %43 : vector<1x25x24xbf16> to vector<25x24xbf16>
    %c7_41 = arith.constant 7 : index
    %c0_42 = arith.constant 0 : index
    %c0_43 = arith.constant 0 : index
    %45 = vector.load %arg2[%c7_41, %c0_42, %c0_43] : memref<9x16x25xbf16, #tpu.memory_space<vmem>>, vector<1x16x25xbf16>
    %46 = vector.shape_cast %45 : vector<1x16x25xbf16> to vector<16x25xbf16>
    %cst_44 = arith.constant dense<0.000000e+00> : vector<16x24xf32>
    %47 = tpu.matmul %46, %44, %cst_44 {dimension_numbers = #tpu.dot_dimension_numbers<[1], [0], [0], [1], [0, 0, 1, 1], [], []>} : vector<16x25xbf16>, vector<25x24xbf16>, vector<16x24xf32> -> vector<16x24xf32>
    %48 = arith.addf %42, %47 : vector<16x24xf32>
    %c0_45 = arith.constant 0 : index
    %c0_46 = arith.constant 0 : index
    %c14 = arith.constant 14 : index
    %49 = vector.load %arg1[%c0_45, %c0_46, %c14] : memref<1x25x44xbf16, #tpu.memory_space<vmem>>, vector<1x25x24xbf16>
    %50 = vector.shape_cast %49 : vector<1x25x24xbf16> to vector<25x24xbf16>
    %c8_47 = arith.constant 8 : index
    %c0_48 = arith.constant 0 : index
    %c0_49 = arith.constant 0 : index
    %51 = vector.load %arg2[%c8_47, %c0_48, %c0_49] : memref<9x16x25xbf16, #tpu.memory_space<vmem>>, vector<1x16x25xbf16>
    %52 = vector.shape_cast %51 : vector<1x16x25xbf16> to vector<16x25xbf16>
    %cst_50 = arith.constant dense<0.000000e+00> : vector<16x24xf32>
    %53 = tpu.matmul %52, %50, %cst_50 {dimension_numbers = #tpu.dot_dimension_numbers<[1], [0], [0], [1], [0, 0, 1, 1], [], []>} : vector<16x25xbf16>, vector<25x24xbf16>, vector<16x24xf32> -> vector<16x24xf32>
    %54 = arith.addf %48, %53 : vector<16x24xf32>
    %c0_51 = arith.constant 0 : index
    %c0_52 = arith.constant 0 : index
    %55 = vector.load %arg3[%c0_51, %c0_52] : memref<16x1xf32, #tpu.memory_space<vmem>>, vector<16x1xf32>
    %56 = vector.broadcast %55 : vector<16x1xf32> to vector<16x24xf32>
    %57 = arith.addf %54, %56 : vector<16x24xf32>
    %cst_53 = arith.constant 0.000000e+00 : f32
    %58 = vector.broadcast %cst_53 : f32 to vector<16x24xf32>
    %59 = arith.cmpf oge, %57, %58 : vector<16x24xf32>
    %cst_54 = arith.constant 1.000000e-01 : f32
    %60 = vector.broadcast %cst_54 : f32 to vector<16x24xf32>
    %61 = arith.mulf %57, %60 : vector<16x24xf32>
    %62 = arith.select %59, %57, %61 : vector<16x24xi1>, vector<16x24xf32>
    %c0_55 = arith.constant 0 : index
    %c0_56 = arith.constant 0 : index
    %63 = vector.load %arg6[%c0_55, %c0_56] : memref<1x24xf32, #tpu.memory_space<vmem>>, vector<1x24xf32>
    %64 = vector.broadcast %63 : vector<1x24xf32> to vector<16x24xf32>
    %65 = arith.mulf %62, %64 : vector<16x24xf32>
    %cst_57 = arith.constant 0.000000e+00 : bf16
    %66 = vector.broadcast %cst_57 : bf16 to vector<16x44xbf16>
    %c0_58 = arith.constant 0 : index
    %c0_59 = arith.constant 0 : index
    %67 = vector.load %arg8[%c0_58, %c0_59] : memref<16x44xbf16, #tpu.memory_space<vmem>>, vector<16x44xbf16>
    tpu.vector_store %arg8[%c0_58, %c0_59], %66 {strides = array<i32>} : memref<16x44xbf16, #tpu.memory_space<vmem>>, vector<16x44xbf16>,
    %68 = arith.truncf %65 : vector<16x24xf32> to vector<16x24xbf16>
    %c0_60 = arith.constant 0 : index
    %c7_61 = arith.constant 7 : index
    %69 = vector.load %arg8[%c0_60, %c7_61] : memref<16x44xbf16, #tpu.memory_space<vmem>>, vector<16x24xbf16>
    tpu.vector_store %arg8[%c0_60, %c7_61], %68 {strides = array<i32>} : memref<16x44xbf16, #tpu.memory_space<vmem>>, vector<16x24xbf16>,
    %cst_62 = arith.constant 0.000000e+00 : f32
    %70 = vector.broadcast %cst_62 : f32 to vector<2x24xf32>
    %c0_63 = arith.constant 0 : index
    %c0_64 = arith.constant 0 : index
    %71 = vector.load %arg8[%c0_63, %c0_64] : memref<16x44xbf16, #tpu.memory_space<vmem>>, vector<16x24xbf16>
    %c0_65 = arith.constant 0 : index
    %c0_66 = arith.constant 0 : index
    %c0_67 = arith.constant 0 : index
    %72 = vector.load %arg4[%c0_65, %c0_66, %c0_67] : memref<9x2x16xbf16, #tpu.memory_space<vmem>>, vector<1x2x16xbf16>
    %73 = vector.shape_cast %72 : vector<1x2x16xbf16> to vector<2x16xbf16>
    %cst_68 = arith.constant dense<0.000000e+00> : vector<2x24xf32>
    %74 = tpu.matmul %73, %71, %cst_68 {dimension_numbers = #tpu.dot_dimension_numbers<[1], [0], [0], [1], [0, 0, 1, 1], [], []>} : vector<2x16xbf16>, vector<16x24xbf16>, vector<2x24xf32> -> vector<2x24xf32>
    %75 = arith.addf %70, %74 : vector<2x24xf32>
    %c0_69 = arith.constant 0 : index
    %c1_70 = arith.constant 1 : index
    %76 = vector.load %arg8[%c0_69, %c1_70] : memref<16x44xbf16, #tpu.memory_space<vmem>>, vector<16x24xbf16>
    %c1_71 = arith.constant 1 : index
    %c0_72 = arith.constant 0 : index
    %c0_73 = arith.constant 0 : index
    %77 = vector.load %arg4[%c1_71, %c0_72, %c0_73] : memref<9x2x16xbf16, #tpu.memory_space<vmem>>, vector<1x2x16xbf16>
    %78 = vector.shape_cast %77 : vector<1x2x16xbf16> to vector<2x16xbf16>
    %cst_74 = arith.constant dense<0.000000e+00> : vector<2x24xf32>
    %79 = tpu.matmul %78, %76, %cst_74 {dimension_numbers = #tpu.dot_dimension_numbers<[1], [0], [0], [1], [0, 0, 1, 1], [], []>} : vector<2x16xbf16>, vector<16x24xbf16>, vector<2x24xf32> -> vector<2x24xf32>
    %80 = arith.addf %75, %79 : vector<2x24xf32>
    %c0_75 = arith.constant 0 : index
    %c2_76 = arith.constant 2 : index
    %81 = vector.load %arg8[%c0_75, %c2_76] : memref<16x44xbf16, #tpu.memory_space<vmem>>, vector<16x24xbf16>
    %c2_77 = arith.constant 2 : index
    %c0_78 = arith.constant 0 : index
    %c0_79 = arith.constant 0 : index
    %82 = vector.load %arg4[%c2_77, %c0_78, %c0_79] : memref<9x2x16xbf16, #tpu.memory_space<vmem>>, vector<1x2x16xbf16>
    %83 = vector.shape_cast %82 : vector<1x2x16xbf16> to vector<2x16xbf16>
    %cst_80 = arith.constant dense<0.000000e+00> : vector<2x24xf32>
    %84 = tpu.matmul %83, %81, %cst_80 {dimension_numbers = #tpu.dot_dimension_numbers<[1], [0], [0], [1], [0, 0, 1, 1], [], []>} : vector<2x16xbf16>, vector<16x24xbf16>, vector<2x24xf32> -> vector<2x24xf32>
    %85 = arith.addf %80, %84 : vector<2x24xf32>
    %c0_81 = arith.constant 0 : index
    %c6_82 = arith.constant 6 : index
    %86 = vector.load %arg8[%c0_81, %c6_82] : memref<16x44xbf16, #tpu.memory_space<vmem>>, vector<16x24xbf16>
    %c3_83 = arith.constant 3 : index
    %c0_84 = arith.constant 0 : index
    %c0_85 = arith.constant 0 : index
    %87 = vector.load %arg4[%c3_83, %c0_84, %c0_85] : memref<9x2x16xbf16, #tpu.memory_space<vmem>>, vector<1x2x16xbf16>
    %88 = vector.shape_cast %87 : vector<1x2x16xbf16> to vector<2x16xbf16>
    %cst_86 = arith.constant dense<0.000000e+00> : vector<2x24xf32>
    %89 = tpu.matmul %88, %86, %cst_86 {dimension_numbers = #tpu.dot_dimension_numbers<[1], [0], [0], [1], [0, 0, 1, 1], [], []>} : vector<2x16xbf16>, vector<16x24xbf16>, vector<2x24xf32> -> vector<2x24xf32>
    %90 = arith.addf %85, %89 : vector<2x24xf32>
    %c0_87 = arith.constant 0 : index
    %c7_88 = arith.constant 7 : index
    %91 = vector.load %arg8[%c0_87, %c7_88] : memref<16x44xbf16, #tpu.memory_space<vmem>>, vector<16x24xbf16>
    %c4_89 = arith.constant 4 : index
    %c0_90 = arith.constant 0 : index
    %c0_91 = arith.constant 0 : index
    %92 = vector.load %arg4[%c4_89, %c0_90, %c0_91] : memref<9x2x16xbf16, #tpu.memory_space<vmem>>, vector<1x2x16xbf16>
    %93 = vector.shape_cast %92 : vector<1x2x16xbf16> to vector<2x16xbf16>
    %cst_92 = arith.constant dense<0.000000e+00> : vector<2x24xf32>
    %94 = tpu.matmul %93, %91, %cst_92 {dimension_numbers = #tpu.dot_dimension_numbers<[1], [0], [0], [1], [0, 0, 1, 1], [], []>} : vector<2x16xbf16>, vector<16x24xbf16>, vector<2x24xf32> -> vector<2x24xf32>
    %95 = arith.addf %90, %94 : vector<2x24xf32>
    %c0_93 = arith.constant 0 : index
    %c8_94 = arith.constant 8 : index
    %96 = vector.load %arg8[%c0_93, %c8_94] : memref<16x44xbf16, #tpu.memory_space<vmem>>, vector<16x24xbf16>
    %c5_95 = arith.constant 5 : index
    %c0_96 = arith.constant 0 : index
    %c0_97 = arith.constant 0 : index
    %97 = vector.load %arg4[%c5_95, %c0_96, %c0_97] : memref<9x2x16xbf16, #tpu.memory_space<vmem>>, vector<1x2x16xbf16>
    %98 = vector.shape_cast %97 : vector<1x2x16xbf16> to vector<2x16xbf16>
    %cst_98 = arith.constant dense<0.000000e+00> : vector<2x24xf32>
    %99 = tpu.matmul %98, %96, %cst_98 {dimension_numbers = #tpu.dot_dimension_numbers<[1], [0], [0], [1], [0, 0, 1, 1], [], []>} : vector<2x16xbf16>, vector<16x24xbf16>, vector<2x24xf32> -> vector<2x24xf32>
    %100 = arith.addf %95, %99 : vector<2x24xf32>
    %c0_99 = arith.constant 0 : index
    %c12_100 = arith.constant 12 : index
    %101 = vector.load %arg8[%c0_99, %c12_100] : memref<16x44xbf16, #tpu.memory_space<vmem>>, vector<16x24xbf16>
    %c6_101 = arith.constant 6 : index
    %c0_102 = arith.constant 0 : index
    %c0_103 = arith.constant 0 : index
    %102 = vector.load %arg4[%c6_101, %c0_102, %c0_103] : memref<9x2x16xbf16, #tpu.memory_space<vmem>>, vector<1x2x16xbf16>
    %103 = vector.shape_cast %102 : vector<1x2x16xbf16> to vector<2x16xbf16>
    %cst_104 = arith.constant dense<0.000000e+00> : vector<2x24xf32>
    %104 = tpu.matmul %103, %101, %cst_104 {dimension_numbers = #tpu.dot_dimension_numbers<[1], [0], [0], [1], [0, 0, 1, 1], [], []>} : vector<2x16xbf16>, vector<16x24xbf16>, vector<2x24xf32> -> vector<2x24xf32>
    %105 = arith.addf %100, %104 : vector<2x24xf32>
    %c0_105 = arith.constant 0 : index
    %c13_106 = arith.constant 13 : index
    %106 = vector.load %arg8[%c0_105, %c13_106] : memref<16x44xbf16, #tpu.memory_space<vmem>>, vector<16x24xbf16>
    %c7_107 = arith.constant 7 : index
    %c0_108 = arith.constant 0 : index
    %c0_109 = arith.constant 0 : index
    %107 = vector.load %arg4[%c7_107, %c0_108, %c0_109] : memref<9x2x16xbf16, #tpu.memory_space<vmem>>, vector<1x2x16xbf16>
    %108 = vector.shape_cast %107 : vector<1x2x16xbf16> to vector<2x16xbf16>
    %cst_110 = arith.constant dense<0.000000e+00> : vector<2x24xf32>
    %109 = tpu.matmul %108, %106, %cst_110 {dimension_numbers = #tpu.dot_dimension_numbers<[1], [0], [0], [1], [0, 0, 1, 1], [], []>} : vector<2x16xbf16>, vector<16x24xbf16>, vector<2x24xf32> -> vector<2x24xf32>
    %110 = arith.addf %105, %109 : vector<2x24xf32>
    %c0_111 = arith.constant 0 : index
    %c14_112 = arith.constant 14 : index
    %111 = vector.load %arg8[%c0_111, %c14_112] : memref<16x44xbf16, #tpu.memory_space<vmem>>, vector<16x24xbf16>
    %c8_113 = arith.constant 8 : index
    %c0_114 = arith.constant 0 : index
    %c0_115 = arith.constant 0 : index
    %112 = vector.load %arg4[%c8_113, %c0_114, %c0_115] : memref<9x2x16xbf16, #tpu.memory_space<vmem>>, vector<1x2x16xbf16>
    %113 = vector.shape_cast %112 : vector<1x2x16xbf16> to vector<2x16xbf16>
    %cst_116 = arith.constant dense<0.000000e+00> : vector<2x24xf32>
    %114 = tpu.matmul %113, %111, %cst_116 {dimension_numbers = #tpu.dot_dimension_numbers<[1], [0], [0], [1], [0, 0, 1, 1], [], []>} : vector<2x16xbf16>, vector<16x24xbf16>, vector<2x24xf32> -> vector<2x24xf32>
    %115 = arith.addf %110, %114 : vector<2x24xf32>
    %c0_117 = arith.constant 0 : index
    %c0_118 = arith.constant 0 : index
    %116 = vector.load %arg5[%c0_117, %c0_118] : memref<2x1xf32, #tpu.memory_space<vmem>>, vector<2x1xf32>
    %117 = vector.broadcast %116 : vector<2x1xf32> to vector<2x24xf32>
    %118 = arith.addf %115, %117 : vector<2x24xf32>
    %c0_119 = arith.constant 0 : index
    %c0_120 = arith.constant 0 : index
    %c0_121 = arith.constant 0 : index
    %119 = vector.load %arg7[%c0_119, %c0_120, %c0_121] : memref<1x2x24xf32, #tpu.memory_space<vmem>>, vector<1x2x24xf32>
    %120 = vector.shape_cast %119 : vector<1x2x24xf32> to vector<2x24xf32>
    %121 = vector.shape_cast %118 : vector<2x24xf32> to vector<1x2x24xf32>
    tpu.vector_store %arg7[%c0_119, %c0_120, %c0_121], %121 {strides = array<i32>} : memref<1x2x24xf32, #tpu.memory_space<vmem>>, vector<1x2x24xf32>,
    return
  }
  func.func @transform_0(%arg0: i32) -> (i32, i32, i32) {
    %c0_i32 = arith.constant 0 : i32
    %c0_i32_0 = arith.constant 0 : i32
    %c0_i32_1 = arith.constant 0 : i32
    return %arg0, %c0_i32, %c0_i32_0 : i32, i32, i32
  }
  func.func @transform_1(%arg0: i32) -> (i32, i32, i32) {
    %c0_i32 = arith.constant 0 : i32
    %c0_i32_0 = arith.constant 0 : i32
    %c0_i32_1 = arith.constant 0 : i32
    %c0_i32_2 = arith.constant 0 : i32
    return %c0_i32, %c0_i32_0, %c0_i32_1 : i32, i32, i32
  }
  func.func @transform_2(%arg0: i32) -> (i32, i32) {
    %c0_i32 = arith.constant 0 : i32
    %c0_i32_0 = arith.constant 0 : i32
    %c0_i32_1 = arith.constant 0 : i32
    return %c0_i32, %c0_i32_0 : i32, i32
  }
  func.func @transform_3(%arg0: i32) -> (i32, i32, i32) {
    %c0_i32 = arith.constant 0 : i32
    %c0_i32_0 = arith.constant 0 : i32
    %c0_i32_1 = arith.constant 0 : i32
    %c0_i32_2 = arith.constant 0 : i32
    return %c0_i32, %c0_i32_0, %c0_i32_1 : i32, i32, i32
  }
  func.func @transform_4(%arg0: i32) -> (i32, i32) {
    %c0_i32 = arith.constant 0 : i32
    %c0_i32_0 = arith.constant 0 : i32
    %c0_i32_1 = arith.constant 0 : i32
    return %c0_i32, %c0_i32_0 : i32, i32
  }
  func.func @transform_5(%arg0: i32) -> (i32, i32) {
    %c0_i32 = arith.constant 0 : i32
    %c0_i32_0 = arith.constant 0 : i32
    %c0_i32_1 = arith.constant 0 : i32
    return %c0_i32, %c0_i32_0 : i32, i32
  }
  func.func @transform_6(%arg0: i32) -> (i32, i32, i32) {
    %c0_i32 = arith.constant 0 : i32
    %c0_i32_0 = arith.constant 0 : i32
    %c0_i32_1 = arith.constant 0 : i32
    return %arg0, %c0_i32, %c0_i32_0 : i32, i32, i32
  }
}

module attributes {stable_mosaic.version = 11 : i64} {
  func.func @_corr_kernel(%arg0: i32, %arg1: memref<1x8x8x8xbf16, #tpu.memory_space<vmem>>, %arg2: memref<1x8x10x10xbf16, #tpu.memory_space<vmem>>, %arg3: memref<1x9x8x8xbf16, #tpu.memory_space<vmem>>) attributes {dimension_semantics = [#tpu.dimension_semantics<parallel>], iteration_bounds = array<i64: 2>, scalar_prefetch = 0 : i64, scratch_operands = 0 : i64, tpu.core_type = #tpu.core_type<tc>, window_params = [{transform_indices = @transform_0, window_bounds = array<i64: 1, 8, 8, 8>}, {transform_indices = @transform_1, window_bounds = array<i64: 1, 8, 10, 10>}, {transform_indices = @transform_2, window_bounds = array<i64: 1, 9, 8, 8>}]} {
    %c0 = arith.constant 0 : index
    %c0_0 = arith.constant 0 : index
    %c0_1 = arith.constant 0 : index
    %c0_2 = arith.constant 0 : index
    %0 = vector.load %arg1[%c0, %c0_0, %c0_1, %c0_2] : memref<1x8x8x8xbf16, #tpu.memory_space<vmem>>, vector<1x8x8x8xbf16>
    %1 = vector.shape_cast %0 : vector<1x8x8x8xbf16> to vector<8x8x8xbf16>
    %2 = arith.extf %1 : vector<8x8x8xbf16> to vector<8x8x8xf32>
    %c0_3 = arith.constant 0 : index
    %c0_4 = arith.constant 0 : index
    %c0_5 = arith.constant 0 : index
    %c0_6 = arith.constant 0 : index
    %3 = vector.load %arg2[%c0_3, %c0_4, %c0_5, %c0_6] : memref<1x8x10x10xbf16, #tpu.memory_space<vmem>>, vector<1x8x10x10xbf16>
    %4 = vector.shape_cast %3 : vector<1x8x10x10xbf16> to vector<8x10x10xbf16>
    %5 = arith.extf %4 : vector<8x10x10xbf16> to vector<8x10x10xf32>
    %6 = vector.extract_strided_slice %5 {offsets = [0, 0, 0], sizes = [8, 8, 8], strides = [1, 1, 1]} : vector<8x10x10xf32> to vector<8x8x8xf32>
    %7 = vector.extract_strided_slice %2 {offsets = [0, 0, 0], sizes = [1, 8, 8], strides = [1, 1, 1]} : vector<8x8x8xf32> to vector<1x8x8xf32>
    %8 = vector.shape_cast %7 : vector<1x8x8xf32> to vector<8x8xf32>
    %9 = vector.extract_strided_slice %6 {offsets = [0, 0, 0], sizes = [1, 8, 8], strides = [1, 1, 1]} : vector<8x8x8xf32> to vector<1x8x8xf32>
    %10 = vector.shape_cast %9 : vector<1x8x8xf32> to vector<8x8xf32>
    %11 = arith.mulf %8, %10 : vector<8x8xf32>
    %12 = vector.extract_strided_slice %2 {offsets = [1, 0, 0], sizes = [1, 8, 8], strides = [1, 1, 1]} : vector<8x8x8xf32> to vector<1x8x8xf32>
    %13 = vector.shape_cast %12 : vector<1x8x8xf32> to vector<8x8xf32>
    %14 = vector.extract_strided_slice %6 {offsets = [1, 0, 0], sizes = [1, 8, 8], strides = [1, 1, 1]} : vector<8x8x8xf32> to vector<1x8x8xf32>
    %15 = vector.shape_cast %14 : vector<1x8x8xf32> to vector<8x8xf32>
    %16 = arith.mulf %13, %15 : vector<8x8xf32>
    %17 = arith.addf %11, %16 : vector<8x8xf32>
    %18 = vector.extract_strided_slice %2 {offsets = [2, 0, 0], sizes = [1, 8, 8], strides = [1, 1, 1]} : vector<8x8x8xf32> to vector<1x8x8xf32>
    %19 = vector.shape_cast %18 : vector<1x8x8xf32> to vector<8x8xf32>
    %20 = vector.extract_strided_slice %6 {offsets = [2, 0, 0], sizes = [1, 8, 8], strides = [1, 1, 1]} : vector<8x8x8xf32> to vector<1x8x8xf32>
    %21 = vector.shape_cast %20 : vector<1x8x8xf32> to vector<8x8xf32>
    %22 = arith.mulf %19, %21 : vector<8x8xf32>
    %23 = arith.addf %17, %22 : vector<8x8xf32>
    %24 = vector.extract_strided_slice %2 {offsets = [3, 0, 0], sizes = [1, 8, 8], strides = [1, 1, 1]} : vector<8x8x8xf32> to vector<1x8x8xf32>
    %25 = vector.shape_cast %24 : vector<1x8x8xf32> to vector<8x8xf32>
    %26 = vector.extract_strided_slice %6 {offsets = [3, 0, 0], sizes = [1, 8, 8], strides = [1, 1, 1]} : vector<8x8x8xf32> to vector<1x8x8xf32>
    %27 = vector.shape_cast %26 : vector<1x8x8xf32> to vector<8x8xf32>
    %28 = arith.mulf %25, %27 : vector<8x8xf32>
    %29 = arith.addf %23, %28 : vector<8x8xf32>
    %30 = vector.extract_strided_slice %2 {offsets = [4, 0, 0], sizes = [1, 8, 8], strides = [1, 1, 1]} : vector<8x8x8xf32> to vector<1x8x8xf32>
    %31 = vector.shape_cast %30 : vector<1x8x8xf32> to vector<8x8xf32>
    %32 = vector.extract_strided_slice %6 {offsets = [4, 0, 0], sizes = [1, 8, 8], strides = [1, 1, 1]} : vector<8x8x8xf32> to vector<1x8x8xf32>
    %33 = vector.shape_cast %32 : vector<1x8x8xf32> to vector<8x8xf32>
    %34 = arith.mulf %31, %33 : vector<8x8xf32>
    %35 = arith.addf %29, %34 : vector<8x8xf32>
    %36 = vector.extract_strided_slice %2 {offsets = [5, 0, 0], sizes = [1, 8, 8], strides = [1, 1, 1]} : vector<8x8x8xf32> to vector<1x8x8xf32>
    %37 = vector.shape_cast %36 : vector<1x8x8xf32> to vector<8x8xf32>
    %38 = vector.extract_strided_slice %6 {offsets = [5, 0, 0], sizes = [1, 8, 8], strides = [1, 1, 1]} : vector<8x8x8xf32> to vector<1x8x8xf32>
    %39 = vector.shape_cast %38 : vector<1x8x8xf32> to vector<8x8xf32>
    %40 = arith.mulf %37, %39 : vector<8x8xf32>
    %41 = arith.addf %35, %40 : vector<8x8xf32>
    %42 = vector.extract_strided_slice %2 {offsets = [6, 0, 0], sizes = [1, 8, 8], strides = [1, 1, 1]} : vector<8x8x8xf32> to vector<1x8x8xf32>
    %43 = vector.shape_cast %42 : vector<1x8x8xf32> to vector<8x8xf32>
    %44 = vector.extract_strided_slice %6 {offsets = [6, 0, 0], sizes = [1, 8, 8], strides = [1, 1, 1]} : vector<8x8x8xf32> to vector<1x8x8xf32>
    %45 = vector.shape_cast %44 : vector<1x8x8xf32> to vector<8x8xf32>
    %46 = arith.mulf %43, %45 : vector<8x8xf32>
    %47 = arith.addf %41, %46 : vector<8x8xf32>
    %48 = vector.extract_strided_slice %2 {offsets = [7, 0, 0], sizes = [1, 8, 8], strides = [1, 1, 1]} : vector<8x8x8xf32> to vector<1x8x8xf32>
    %49 = vector.shape_cast %48 : vector<1x8x8xf32> to vector<8x8xf32>
    %50 = vector.extract_strided_slice %6 {offsets = [7, 0, 0], sizes = [1, 8, 8], strides = [1, 1, 1]} : vector<8x8x8xf32> to vector<1x8x8xf32>
    %51 = vector.shape_cast %50 : vector<1x8x8xf32> to vector<8x8xf32>
    %52 = arith.mulf %49, %51 : vector<8x8xf32>
    %53 = arith.addf %47, %52 : vector<8x8xf32>
    %cst = arith.constant 1.250000e-01 : f32
    %54 = vector.broadcast %cst : f32 to vector<8x8xf32>
    %55 = arith.mulf %53, %54 : vector<8x8xf32>
    %cst_7 = arith.constant 0.000000e+00 : f32
    %56 = vector.broadcast %cst_7 : f32 to vector<8x8xf32>
    %57 = arith.cmpf oge, %55, %56 : vector<8x8xf32>
    %cst_8 = arith.constant 1.000000e-01 : f32
    %58 = vector.broadcast %cst_8 : f32 to vector<8x8xf32>
    %59 = arith.mulf %55, %58 : vector<8x8xf32>
    %60 = arith.select %57, %55, %59 : vector<8x8xi1>, vector<8x8xf32>
    %61 = arith.truncf %60 : vector<8x8xf32> to vector<8x8xbf16>
    %c0_9 = arith.constant 0 : index
    %c0_10 = arith.constant 0 : index
    %c0_11 = arith.constant 0 : index
    %c0_12 = arith.constant 0 : index
    %62 = vector.load %arg3[%c0_9, %c0_10, %c0_11, %c0_12] : memref<1x9x8x8xbf16, #tpu.memory_space<vmem>>, vector<1x1x8x8xbf16>
    %63 = vector.shape_cast %62 : vector<1x1x8x8xbf16> to vector<8x8xbf16>
    %64 = vector.shape_cast %61 : vector<8x8xbf16> to vector<1x1x8x8xbf16>
    tpu.vector_store %arg3[%c0_9, %c0_10, %c0_11, %c0_12], %64 {strides = array<i32>} : memref<1x9x8x8xbf16, #tpu.memory_space<vmem>>, vector<1x1x8x8xbf16>,
    %65 = vector.extract_strided_slice %5 {offsets = [0, 0, 1], sizes = [8, 8, 8], strides = [1, 1, 1]} : vector<8x10x10xf32> to vector<8x8x8xf32>
    %66 = vector.extract_strided_slice %2 {offsets = [0, 0, 0], sizes = [1, 8, 8], strides = [1, 1, 1]} : vector<8x8x8xf32> to vector<1x8x8xf32>
    %67 = vector.shape_cast %66 : vector<1x8x8xf32> to vector<8x8xf32>
    %68 = vector.extract_strided_slice %65 {offsets = [0, 0, 0], sizes = [1, 8, 8], strides = [1, 1, 1]} : vector<8x8x8xf32> to vector<1x8x8xf32>
    %69 = vector.shape_cast %68 : vector<1x8x8xf32> to vector<8x8xf32>
    %70 = arith.mulf %67, %69 : vector<8x8xf32>
    %71 = vector.extract_strided_slice %2 {offsets = [1, 0, 0], sizes = [1, 8, 8], strides = [1, 1, 1]} : vector<8x8x8xf32> to vector<1x8x8xf32>
    %72 = vector.shape_cast %71 : vector<1x8x8xf32> to vector<8x8xf32>
    %73 = vector.extract_strided_slice %65 {offsets = [1, 0, 0], sizes = [1, 8, 8], strides = [1, 1, 1]} : vector<8x8x8xf32> to vector<1x8x8xf32>
    %74 = vector.shape_cast %73 : vector<1x8x8xf32> to vector<8x8xf32>
    %75 = arith.mulf %72, %74 : vector<8x8xf32>
    %76 = arith.addf %70, %75 : vector<8x8xf32>
    %77 = vector.extract_strided_slice %2 {offsets = [2, 0, 0], sizes = [1, 8, 8], strides = [1, 1, 1]} : vector<8x8x8xf32> to vector<1x8x8xf32>
    %78 = vector.shape_cast %77 : vector<1x8x8xf32> to vector<8x8xf32>
    %79 = vector.extract_strided_slice %65 {offsets = [2, 0, 0], sizes = [1, 8, 8], strides = [1, 1, 1]} : vector<8x8x8xf32> to vector<1x8x8xf32>
    %80 = vector.shape_cast %79 : vector<1x8x8xf32> to vector<8x8xf32>
    %81 = arith.mulf %78, %80 : vector<8x8xf32>
    %82 = arith.addf %76, %81 : vector<8x8xf32>
    %83 = vector.extract_strided_slice %2 {offsets = [3, 0, 0], sizes = [1, 8, 8], strides = [1, 1, 1]} : vector<8x8x8xf32> to vector<1x8x8xf32>
    %84 = vector.shape_cast %83 : vector<1x8x8xf32> to vector<8x8xf32>
    %85 = vector.extract_strided_slice %65 {offsets = [3, 0, 0], sizes = [1, 8, 8], strides = [1, 1, 1]} : vector<8x8x8xf32> to vector<1x8x8xf32>
    %86 = vector.shape_cast %85 : vector<1x8x8xf32> to vector<8x8xf32>
    %87 = arith.mulf %84, %86 : vector<8x8xf32>
    %88 = arith.addf %82, %87 : vector<8x8xf32>
    %89 = vector.extract_strided_slice %2 {offsets = [4, 0, 0], sizes = [1, 8, 8], strides = [1, 1, 1]} : vector<8x8x8xf32> to vector<1x8x8xf32>
    %90 = vector.shape_cast %89 : vector<1x8x8xf32> to vector<8x8xf32>
    %91 = vector.extract_strided_slice %65 {offsets = [4, 0, 0], sizes = [1, 8, 8], strides = [1, 1, 1]} : vector<8x8x8xf32> to vector<1x8x8xf32>
    %92 = vector.shape_cast %91 : vector<1x8x8xf32> to vector<8x8xf32>
    %93 = arith.mulf %90, %92 : vector<8x8xf32>
    %94 = arith.addf %88, %93 : vector<8x8xf32>
    %95 = vector.extract_strided_slice %2 {offsets = [5, 0, 0], sizes = [1, 8, 8], strides = [1, 1, 1]} : vector<8x8x8xf32> to vector<1x8x8xf32>
    %96 = vector.shape_cast %95 : vector<1x8x8xf32> to vector<8x8xf32>
    %97 = vector.extract_strided_slice %65 {offsets = [5, 0, 0], sizes = [1, 8, 8], strides = [1, 1, 1]} : vector<8x8x8xf32> to vector<1x8x8xf32>
    %98 = vector.shape_cast %97 : vector<1x8x8xf32> to vector<8x8xf32>
    %99 = arith.mulf %96, %98 : vector<8x8xf32>
    %100 = arith.addf %94, %99 : vector<8x8xf32>
    %101 = vector.extract_strided_slice %2 {offsets = [6, 0, 0], sizes = [1, 8, 8], strides = [1, 1, 1]} : vector<8x8x8xf32> to vector<1x8x8xf32>
    %102 = vector.shape_cast %101 : vector<1x8x8xf32> to vector<8x8xf32>
    %103 = vector.extract_strided_slice %65 {offsets = [6, 0, 0], sizes = [1, 8, 8], strides = [1, 1, 1]} : vector<8x8x8xf32> to vector<1x8x8xf32>
    %104 = vector.shape_cast %103 : vector<1x8x8xf32> to vector<8x8xf32>
    %105 = arith.mulf %102, %104 : vector<8x8xf32>
    %106 = arith.addf %100, %105 : vector<8x8xf32>
    %107 = vector.extract_strided_slice %2 {offsets = [7, 0, 0], sizes = [1, 8, 8], strides = [1, 1, 1]} : vector<8x8x8xf32> to vector<1x8x8xf32>
    %108 = vector.shape_cast %107 : vector<1x8x8xf32> to vector<8x8xf32>
    %109 = vector.extract_strided_slice %65 {offsets = [7, 0, 0], sizes = [1, 8, 8], strides = [1, 1, 1]} : vector<8x8x8xf32> to vector<1x8x8xf32>
    %110 = vector.shape_cast %109 : vector<1x8x8xf32> to vector<8x8xf32>
    %111 = arith.mulf %108, %110 : vector<8x8xf32>
    %112 = arith.addf %106, %111 : vector<8x8xf32>
    %cst_13 = arith.constant 1.250000e-01 : f32
    %113 = vector.broadcast %cst_13 : f32 to vector<8x8xf32>
    %114 = arith.mulf %112, %113 : vector<8x8xf32>
    %cst_14 = arith.constant 0.000000e+00 : f32
    %115 = vector.broadcast %cst_14 : f32 to vector<8x8xf32>
    %116 = arith.cmpf oge, %114, %115 : vector<8x8xf32>
    %cst_15 = arith.constant 1.000000e-01 : f32
    %117 = vector.broadcast %cst_15 : f32 to vector<8x8xf32>
    %118 = arith.mulf %114, %117 : vector<8x8xf32>
    %119 = arith.select %116, %114, %118 : vector<8x8xi1>, vector<8x8xf32>
    %120 = arith.truncf %119 : vector<8x8xf32> to vector<8x8xbf16>
    %c0_16 = arith.constant 0 : index
    %c1 = arith.constant 1 : index
    %c0_17 = arith.constant 0 : index
    %c0_18 = arith.constant 0 : index
    %121 = vector.load %arg3[%c0_16, %c1, %c0_17, %c0_18] : memref<1x9x8x8xbf16, #tpu.memory_space<vmem>>, vector<1x1x8x8xbf16>
    %122 = vector.shape_cast %121 : vector<1x1x8x8xbf16> to vector<8x8xbf16>
    %123 = vector.shape_cast %120 : vector<8x8xbf16> to vector<1x1x8x8xbf16>
    tpu.vector_store %arg3[%c0_16, %c1, %c0_17, %c0_18], %123 {strides = array<i32>} : memref<1x9x8x8xbf16, #tpu.memory_space<vmem>>, vector<1x1x8x8xbf16>,
    %124 = vector.extract_strided_slice %5 {offsets = [0, 0, 2], sizes = [8, 8, 8], strides = [1, 1, 1]} : vector<8x10x10xf32> to vector<8x8x8xf32>
    %125 = vector.extract_strided_slice %2 {offsets = [0, 0, 0], sizes = [1, 8, 8], strides = [1, 1, 1]} : vector<8x8x8xf32> to vector<1x8x8xf32>
    %126 = vector.shape_cast %125 : vector<1x8x8xf32> to vector<8x8xf32>
    %127 = vector.extract_strided_slice %124 {offsets = [0, 0, 0], sizes = [1, 8, 8], strides = [1, 1, 1]} : vector<8x8x8xf32> to vector<1x8x8xf32>
    %128 = vector.shape_cast %127 : vector<1x8x8xf32> to vector<8x8xf32>
    %129 = arith.mulf %126, %128 : vector<8x8xf32>
    %130 = vector.extract_strided_slice %2 {offsets = [1, 0, 0], sizes = [1, 8, 8], strides = [1, 1, 1]} : vector<8x8x8xf32> to vector<1x8x8xf32>
    %131 = vector.shape_cast %130 : vector<1x8x8xf32> to vector<8x8xf32>
    %132 = vector.extract_strided_slice %124 {offsets = [1, 0, 0], sizes = [1, 8, 8], strides = [1, 1, 1]} : vector<8x8x8xf32> to vector<1x8x8xf32>
    %133 = vector.shape_cast %132 : vector<1x8x8xf32> to vector<8x8xf32>
    %134 = arith.mulf %131, %133 : vector<8x8xf32>
    %135 = arith.addf %129, %134 : vector<8x8xf32>
    %136 = vector.extract_strided_slice %2 {offsets = [2, 0, 0], sizes = [1, 8, 8], strides = [1, 1, 1]} : vector<8x8x8xf32> to vector<1x8x8xf32>
    %137 = vector.shape_cast %136 : vector<1x8x8xf32> to vector<8x8xf32>
    %138 = vector.extract_strided_slice %124 {offsets = [2, 0, 0], sizes = [1, 8, 8], strides = [1, 1, 1]} : vector<8x8x8xf32> to vector<1x8x8xf32>
    %139 = vector.shape_cast %138 : vector<1x8x8xf32> to vector<8x8xf32>
    %140 = arith.mulf %137, %139 : vector<8x8xf32>
    %141 = arith.addf %135, %140 : vector<8x8xf32>
    %142 = vector.extract_strided_slice %2 {offsets = [3, 0, 0], sizes = [1, 8, 8], strides = [1, 1, 1]} : vector<8x8x8xf32> to vector<1x8x8xf32>
    %143 = vector.shape_cast %142 : vector<1x8x8xf32> to vector<8x8xf32>
    %144 = vector.extract_strided_slice %124 {offsets = [3, 0, 0], sizes = [1, 8, 8], strides = [1, 1, 1]} : vector<8x8x8xf32> to vector<1x8x8xf32>
    %145 = vector.shape_cast %144 : vector<1x8x8xf32> to vector<8x8xf32>
    %146 = arith.mulf %143, %145 : vector<8x8xf32>
    %147 = arith.addf %141, %146 : vector<8x8xf32>
    %148 = vector.extract_strided_slice %2 {offsets = [4, 0, 0], sizes = [1, 8, 8], strides = [1, 1, 1]} : vector<8x8x8xf32> to vector<1x8x8xf32>
    %149 = vector.shape_cast %148 : vector<1x8x8xf32> to vector<8x8xf32>
    %150 = vector.extract_strided_slice %124 {offsets = [4, 0, 0], sizes = [1, 8, 8], strides = [1, 1, 1]} : vector<8x8x8xf32> to vector<1x8x8xf32>
    %151 = vector.shape_cast %150 : vector<1x8x8xf32> to vector<8x8xf32>
    %152 = arith.mulf %149, %151 : vector<8x8xf32>
    %153 = arith.addf %147, %152 : vector<8x8xf32>
    %154 = vector.extract_strided_slice %2 {offsets = [5, 0, 0], sizes = [1, 8, 8], strides = [1, 1, 1]} : vector<8x8x8xf32> to vector<1x8x8xf32>
    %155 = vector.shape_cast %154 : vector<1x8x8xf32> to vector<8x8xf32>
    %156 = vector.extract_strided_slice %124 {offsets = [5, 0, 0], sizes = [1, 8, 8], strides = [1, 1, 1]} : vector<8x8x8xf32> to vector<1x8x8xf32>
    %157 = vector.shape_cast %156 : vector<1x8x8xf32> to vector<8x8xf32>
    %158 = arith.mulf %155, %157 : vector<8x8xf32>
    %159 = arith.addf %153, %158 : vector<8x8xf32>
    %160 = vector.extract_strided_slice %2 {offsets = [6, 0, 0], sizes = [1, 8, 8], strides = [1, 1, 1]} : vector<8x8x8xf32> to vector<1x8x8xf32>
    %161 = vector.shape_cast %160 : vector<1x8x8xf32> to vector<8x8xf32>
    %162 = vector.extract_strided_slice %124 {offsets = [6, 0, 0], sizes = [1, 8, 8], strides = [1, 1, 1]} : vector<8x8x8xf32> to vector<1x8x8xf32>
    %163 = vector.shape_cast %162 : vector<1x8x8xf32> to vector<8x8xf32>
    %164 = arith.mulf %161, %163 : vector<8x8xf32>
    %165 = arith.addf %159, %164 : vector<8x8xf32>
    %166 = vector.extract_strided_slice %2 {offsets = [7, 0, 0], sizes = [1, 8, 8], strides = [1, 1, 1]} : vector<8x8x8xf32> to vector<1x8x8xf32>
    %167 = vector.shape_cast %166 : vector<1x8x8xf32> to vector<8x8xf32>
    %168 = vector.extract_strided_slice %124 {offsets = [7, 0, 0], sizes = [1, 8, 8], strides = [1, 1, 1]} : vector<8x8x8xf32> to vector<1x8x8xf32>
    %169 = vector.shape_cast %168 : vector<1x8x8xf32> to vector<8x8xf32>
    %170 = arith.mulf %167, %169 : vector<8x8xf32>
    %171 = arith.addf %165, %170 : vector<8x8xf32>
    %cst_19 = arith.constant 1.250000e-01 : f32
    %172 = vector.broadcast %cst_19 : f32 to vector<8x8xf32>
    %173 = arith.mulf %171, %172 : vector<8x8xf32>
    %cst_20 = arith.constant 0.000000e+00 : f32
    %174 = vector.broadcast %cst_20 : f32 to vector<8x8xf32>
    %175 = arith.cmpf oge, %173, %174 : vector<8x8xf32>
    %cst_21 = arith.constant 1.000000e-01 : f32
    %176 = vector.broadcast %cst_21 : f32 to vector<8x8xf32>
    %177 = arith.mulf %173, %176 : vector<8x8xf32>
    %178 = arith.select %175, %173, %177 : vector<8x8xi1>, vector<8x8xf32>
    %179 = arith.truncf %178 : vector<8x8xf32> to vector<8x8xbf16>
    %c0_22 = arith.constant 0 : index
    %c2 = arith.constant 2 : index
    %c0_23 = arith.constant 0 : index
    %c0_24 = arith.constant 0 : index
    %180 = vector.load %arg3[%c0_22, %c2, %c0_23, %c0_24] : memref<1x9x8x8xbf16, #tpu.memory_space<vmem>>, vector<1x1x8x8xbf16>
    %181 = vector.shape_cast %180 : vector<1x1x8x8xbf16> to vector<8x8xbf16>
    %182 = vector.shape_cast %179 : vector<8x8xbf16> to vector<1x1x8x8xbf16>
    tpu.vector_store %arg3[%c0_22, %c2, %c0_23, %c0_24], %182 {strides = array<i32>} : memref<1x9x8x8xbf16, #tpu.memory_space<vmem>>, vector<1x1x8x8xbf16>,
    %183 = vector.extract_strided_slice %5 {offsets = [0, 1, 0], sizes = [8, 8, 8], strides = [1, 1, 1]} : vector<8x10x10xf32> to vector<8x8x8xf32>
    %184 = vector.extract_strided_slice %2 {offsets = [0, 0, 0], sizes = [1, 8, 8], strides = [1, 1, 1]} : vector<8x8x8xf32> to vector<1x8x8xf32>
    %185 = vector.shape_cast %184 : vector<1x8x8xf32> to vector<8x8xf32>
    %186 = vector.extract_strided_slice %183 {offsets = [0, 0, 0], sizes = [1, 8, 8], strides = [1, 1, 1]} : vector<8x8x8xf32> to vector<1x8x8xf32>
    %187 = vector.shape_cast %186 : vector<1x8x8xf32> to vector<8x8xf32>
    %188 = arith.mulf %185, %187 : vector<8x8xf32>
    %189 = vector.extract_strided_slice %2 {offsets = [1, 0, 0], sizes = [1, 8, 8], strides = [1, 1, 1]} : vector<8x8x8xf32> to vector<1x8x8xf32>
    %190 = vector.shape_cast %189 : vector<1x8x8xf32> to vector<8x8xf32>
    %191 = vector.extract_strided_slice %183 {offsets = [1, 0, 0], sizes = [1, 8, 8], strides = [1, 1, 1]} : vector<8x8x8xf32> to vector<1x8x8xf32>
    %192 = vector.shape_cast %191 : vector<1x8x8xf32> to vector<8x8xf32>
    %193 = arith.mulf %190, %192 : vector<8x8xf32>
    %194 = arith.addf %188, %193 : vector<8x8xf32>
    %195 = vector.extract_strided_slice %2 {offsets = [2, 0, 0], sizes = [1, 8, 8], strides = [1, 1, 1]} : vector<8x8x8xf32> to vector<1x8x8xf32>
    %196 = vector.shape_cast %195 : vector<1x8x8xf32> to vector<8x8xf32>
    %197 = vector.extract_strided_slice %183 {offsets = [2, 0, 0], sizes = [1, 8, 8], strides = [1, 1, 1]} : vector<8x8x8xf32> to vector<1x8x8xf32>
    %198 = vector.shape_cast %197 : vector<1x8x8xf32> to vector<8x8xf32>
    %199 = arith.mulf %196, %198 : vector<8x8xf32>
    %200 = arith.addf %194, %199 : vector<8x8xf32>
    %201 = vector.extract_strided_slice %2 {offsets = [3, 0, 0], sizes = [1, 8, 8], strides = [1, 1, 1]} : vector<8x8x8xf32> to vector<1x8x8xf32>
    %202 = vector.shape_cast %201 : vector<1x8x8xf32> to vector<8x8xf32>
    %203 = vector.extract_strided_slice %183 {offsets = [3, 0, 0], sizes = [1, 8, 8], strides = [1, 1, 1]} : vector<8x8x8xf32> to vector<1x8x8xf32>
    %204 = vector.shape_cast %203 : vector<1x8x8xf32> to vector<8x8xf32>
    %205 = arith.mulf %202, %204 : vector<8x8xf32>
    %206 = arith.addf %200, %205 : vector<8x8xf32>
    %207 = vector.extract_strided_slice %2 {offsets = [4, 0, 0], sizes = [1, 8, 8], strides = [1, 1, 1]} : vector<8x8x8xf32> to vector<1x8x8xf32>
    %208 = vector.shape_cast %207 : vector<1x8x8xf32> to vector<8x8xf32>
    %209 = vector.extract_strided_slice %183 {offsets = [4, 0, 0], sizes = [1, 8, 8], strides = [1, 1, 1]} : vector<8x8x8xf32> to vector<1x8x8xf32>
    %210 = vector.shape_cast %209 : vector<1x8x8xf32> to vector<8x8xf32>
    %211 = arith.mulf %208, %210 : vector<8x8xf32>
    %212 = arith.addf %206, %211 : vector<8x8xf32>
    %213 = vector.extract_strided_slice %2 {offsets = [5, 0, 0], sizes = [1, 8, 8], strides = [1, 1, 1]} : vector<8x8x8xf32> to vector<1x8x8xf32>
    %214 = vector.shape_cast %213 : vector<1x8x8xf32> to vector<8x8xf32>
    %215 = vector.extract_strided_slice %183 {offsets = [5, 0, 0], sizes = [1, 8, 8], strides = [1, 1, 1]} : vector<8x8x8xf32> to vector<1x8x8xf32>
    %216 = vector.shape_cast %215 : vector<1x8x8xf32> to vector<8x8xf32>
    %217 = arith.mulf %214, %216 : vector<8x8xf32>
    %218 = arith.addf %212, %217 : vector<8x8xf32>
    %219 = vector.extract_strided_slice %2 {offsets = [6, 0, 0], sizes = [1, 8, 8], strides = [1, 1, 1]} : vector<8x8x8xf32> to vector<1x8x8xf32>
    %220 = vector.shape_cast %219 : vector<1x8x8xf32> to vector<8x8xf32>
    %221 = vector.extract_strided_slice %183 {offsets = [6, 0, 0], sizes = [1, 8, 8], strides = [1, 1, 1]} : vector<8x8x8xf32> to vector<1x8x8xf32>
    %222 = vector.shape_cast %221 : vector<1x8x8xf32> to vector<8x8xf32>
    %223 = arith.mulf %220, %222 : vector<8x8xf32>
    %224 = arith.addf %218, %223 : vector<8x8xf32>
    %225 = vector.extract_strided_slice %2 {offsets = [7, 0, 0], sizes = [1, 8, 8], strides = [1, 1, 1]} : vector<8x8x8xf32> to vector<1x8x8xf32>
    %226 = vector.shape_cast %225 : vector<1x8x8xf32> to vector<8x8xf32>
    %227 = vector.extract_strided_slice %183 {offsets = [7, 0, 0], sizes = [1, 8, 8], strides = [1, 1, 1]} : vector<8x8x8xf32> to vector<1x8x8xf32>
    %228 = vector.shape_cast %227 : vector<1x8x8xf32> to vector<8x8xf32>
    %229 = arith.mulf %226, %228 : vector<8x8xf32>
    %230 = arith.addf %224, %229 : vector<8x8xf32>
    %cst_25 = arith.constant 1.250000e-01 : f32
    %231 = vector.broadcast %cst_25 : f32 to vector<8x8xf32>
    %232 = arith.mulf %230, %231 : vector<8x8xf32>
    %cst_26 = arith.constant 0.000000e+00 : f32
    %233 = vector.broadcast %cst_26 : f32 to vector<8x8xf32>
    %234 = arith.cmpf oge, %232, %233 : vector<8x8xf32>
    %cst_27 = arith.constant 1.000000e-01 : f32
    %235 = vector.broadcast %cst_27 : f32 to vector<8x8xf32>
    %236 = arith.mulf %232, %235 : vector<8x8xf32>
    %237 = arith.select %234, %232, %236 : vector<8x8xi1>, vector<8x8xf32>
    %238 = arith.truncf %237 : vector<8x8xf32> to vector<8x8xbf16>
    %c0_28 = arith.constant 0 : index
    %c3 = arith.constant 3 : index
    %c0_29 = arith.constant 0 : index
    %c0_30 = arith.constant 0 : index
    %239 = vector.load %arg3[%c0_28, %c3, %c0_29, %c0_30] : memref<1x9x8x8xbf16, #tpu.memory_space<vmem>>, vector<1x1x8x8xbf16>
    %240 = vector.shape_cast %239 : vector<1x1x8x8xbf16> to vector<8x8xbf16>
    %241 = vector.shape_cast %238 : vector<8x8xbf16> to vector<1x1x8x8xbf16>
    tpu.vector_store %arg3[%c0_28, %c3, %c0_29, %c0_30], %241 {strides = array<i32>} : memref<1x9x8x8xbf16, #tpu.memory_space<vmem>>, vector<1x1x8x8xbf16>,
    %242 = vector.extract_strided_slice %5 {offsets = [0, 1, 1], sizes = [8, 8, 8], strides = [1, 1, 1]} : vector<8x10x10xf32> to vector<8x8x8xf32>
    %243 = vector.extract_strided_slice %2 {offsets = [0, 0, 0], sizes = [1, 8, 8], strides = [1, 1, 1]} : vector<8x8x8xf32> to vector<1x8x8xf32>
    %244 = vector.shape_cast %243 : vector<1x8x8xf32> to vector<8x8xf32>
    %245 = vector.extract_strided_slice %242 {offsets = [0, 0, 0], sizes = [1, 8, 8], strides = [1, 1, 1]} : vector<8x8x8xf32> to vector<1x8x8xf32>
    %246 = vector.shape_cast %245 : vector<1x8x8xf32> to vector<8x8xf32>
    %247 = arith.mulf %244, %246 : vector<8x8xf32>
    %248 = vector.extract_strided_slice %2 {offsets = [1, 0, 0], sizes = [1, 8, 8], strides = [1, 1, 1]} : vector<8x8x8xf32> to vector<1x8x8xf32>
    %249 = vector.shape_cast %248 : vector<1x8x8xf32> to vector<8x8xf32>
    %250 = vector.extract_strided_slice %242 {offsets = [1, 0, 0], sizes = [1, 8, 8], strides = [1, 1, 1]} : vector<8x8x8xf32> to vector<1x8x8xf32>
    %251 = vector.shape_cast %250 : vector<1x8x8xf32> to vector<8x8xf32>
    %252 = arith.mulf %249, %251 : vector<8x8xf32>
    %253 = arith.addf %247, %252 : vector<8x8xf32>
    %254 = vector.extract_strided_slice %2 {offsets = [2, 0, 0], sizes = [1, 8, 8], strides = [1, 1, 1]} : vector<8x8x8xf32> to vector<1x8x8xf32>
    %255 = vector.shape_cast %254 : vector<1x8x8xf32> to vector<8x8xf32>
    %256 = vector.extract_strided_slice %242 {offsets = [2, 0, 0], sizes = [1, 8, 8], strides = [1, 1, 1]} : vector<8x8x8xf32> to vector<1x8x8xf32>
    %257 = vector.shape_cast %256 : vector<1x8x8xf32> to vector<8x8xf32>
    %258 = arith.mulf %255, %257 : vector<8x8xf32>
    %259 = arith.addf %253, %258 : vector<8x8xf32>
    %260 = vector.extract_strided_slice %2 {offsets = [3, 0, 0], sizes = [1, 8, 8], strides = [1, 1, 1]} : vector<8x8x8xf32> to vector<1x8x8xf32>
    %261 = vector.shape_cast %260 : vector<1x8x8xf32> to vector<8x8xf32>
    %262 = vector.extract_strided_slice %242 {offsets = [3, 0, 0], sizes = [1, 8, 8], strides = [1, 1, 1]} : vector<8x8x8xf32> to vector<1x8x8xf32>
    %263 = vector.shape_cast %262 : vector<1x8x8xf32> to vector<8x8xf32>
    %264 = arith.mulf %261, %263 : vector<8x8xf32>
    %265 = arith.addf %259, %264 : vector<8x8xf32>
    %266 = vector.extract_strided_slice %2 {offsets = [4, 0, 0], sizes = [1, 8, 8], strides = [1, 1, 1]} : vector<8x8x8xf32> to vector<1x8x8xf32>
    %267 = vector.shape_cast %266 : vector<1x8x8xf32> to vector<8x8xf32>
    %268 = vector.extract_strided_slice %242 {offsets = [4, 0, 0], sizes = [1, 8, 8], strides = [1, 1, 1]} : vector<8x8x8xf32> to vector<1x8x8xf32>
    %269 = vector.shape_cast %268 : vector<1x8x8xf32> to vector<8x8xf32>
    %270 = arith.mulf %267, %269 : vector<8x8xf32>
    %271 = arith.addf %265, %270 : vector<8x8xf32>
    %272 = vector.extract_strided_slice %2 {offsets = [5, 0, 0], sizes = [1, 8, 8], strides = [1, 1, 1]} : vector<8x8x8xf32> to vector<1x8x8xf32>
    %273 = vector.shape_cast %272 : vector<1x8x8xf32> to vector<8x8xf32>
    %274 = vector.extract_strided_slice %242 {offsets = [5, 0, 0], sizes = [1, 8, 8], strides = [1, 1, 1]} : vector<8x8x8xf32> to vector<1x8x8xf32>
    %275 = vector.shape_cast %274 : vector<1x8x8xf32> to vector<8x8xf32>
    %276 = arith.mulf %273, %275 : vector<8x8xf32>
    %277 = arith.addf %271, %276 : vector<8x8xf32>
    %278 = vector.extract_strided_slice %2 {offsets = [6, 0, 0], sizes = [1, 8, 8], strides = [1, 1, 1]} : vector<8x8x8xf32> to vector<1x8x8xf32>
    %279 = vector.shape_cast %278 : vector<1x8x8xf32> to vector<8x8xf32>
    %280 = vector.extract_strided_slice %242 {offsets = [6, 0, 0], sizes = [1, 8, 8], strides = [1, 1, 1]} : vector<8x8x8xf32> to vector<1x8x8xf32>
    %281 = vector.shape_cast %280 : vector<1x8x8xf32> to vector<8x8xf32>
    %282 = arith.mulf %279, %281 : vector<8x8xf32>
    %283 = arith.addf %277, %282 : vector<8x8xf32>
    %284 = vector.extract_strided_slice %2 {offsets = [7, 0, 0], sizes = [1, 8, 8], strides = [1, 1, 1]} : vector<8x8x8xf32> to vector<1x8x8xf32>
    %285 = vector.shape_cast %284 : vector<1x8x8xf32> to vector<8x8xf32>
    %286 = vector.extract_strided_slice %242 {offsets = [7, 0, 0], sizes = [1, 8, 8], strides = [1, 1, 1]} : vector<8x8x8xf32> to vector<1x8x8xf32>
    %287 = vector.shape_cast %286 : vector<1x8x8xf32> to vector<8x8xf32>
    %288 = arith.mulf %285, %287 : vector<8x8xf32>
    %289 = arith.addf %283, %288 : vector<8x8xf32>
    %cst_31 = arith.constant 1.250000e-01 : f32
    %290 = vector.broadcast %cst_31 : f32 to vector<8x8xf32>
    %291 = arith.mulf %289, %290 : vector<8x8xf32>
    %cst_32 = arith.constant 0.000000e+00 : f32
    %292 = vector.broadcast %cst_32 : f32 to vector<8x8xf32>
    %293 = arith.cmpf oge, %291, %292 : vector<8x8xf32>
    %cst_33 = arith.constant 1.000000e-01 : f32
    %294 = vector.broadcast %cst_33 : f32 to vector<8x8xf32>
    %295 = arith.mulf %291, %294 : vector<8x8xf32>
    %296 = arith.select %293, %291, %295 : vector<8x8xi1>, vector<8x8xf32>
    %297 = arith.truncf %296 : vector<8x8xf32> to vector<8x8xbf16>
    %c0_34 = arith.constant 0 : index
    %c4 = arith.constant 4 : index
    %c0_35 = arith.constant 0 : index
    %c0_36 = arith.constant 0 : index
    %298 = vector.load %arg3[%c0_34, %c4, %c0_35, %c0_36] : memref<1x9x8x8xbf16, #tpu.memory_space<vmem>>, vector<1x1x8x8xbf16>
    %299 = vector.shape_cast %298 : vector<1x1x8x8xbf16> to vector<8x8xbf16>
    %300 = vector.shape_cast %297 : vector<8x8xbf16> to vector<1x1x8x8xbf16>
    tpu.vector_store %arg3[%c0_34, %c4, %c0_35, %c0_36], %300 {strides = array<i32>} : memref<1x9x8x8xbf16, #tpu.memory_space<vmem>>, vector<1x1x8x8xbf16>,
    %301 = vector.extract_strided_slice %5 {offsets = [0, 1, 2], sizes = [8, 8, 8], strides = [1, 1, 1]} : vector<8x10x10xf32> to vector<8x8x8xf32>
    %302 = vector.extract_strided_slice %2 {offsets = [0, 0, 0], sizes = [1, 8, 8], strides = [1, 1, 1]} : vector<8x8x8xf32> to vector<1x8x8xf32>
    %303 = vector.shape_cast %302 : vector<1x8x8xf32> to vector<8x8xf32>
    %304 = vector.extract_strided_slice %301 {offsets = [0, 0, 0], sizes = [1, 8, 8], strides = [1, 1, 1]} : vector<8x8x8xf32> to vector<1x8x8xf32>
    %305 = vector.shape_cast %304 : vector<1x8x8xf32> to vector<8x8xf32>
    %306 = arith.mulf %303, %305 : vector<8x8xf32>
    %307 = vector.extract_strided_slice %2 {offsets = [1, 0, 0], sizes = [1, 8, 8], strides = [1, 1, 1]} : vector<8x8x8xf32> to vector<1x8x8xf32>
    %308 = vector.shape_cast %307 : vector<1x8x8xf32> to vector<8x8xf32>
    %309 = vector.extract_strided_slice %301 {offsets = [1, 0, 0], sizes = [1, 8, 8], strides = [1, 1, 1]} : vector<8x8x8xf32> to vector<1x8x8xf32>
    %310 = vector.shape_cast %309 : vector<1x8x8xf32> to vector<8x8xf32>
    %311 = arith.mulf %308, %310 : vector<8x8xf32>
    %312 = arith.addf %306, %311 : vector<8x8xf32>
    %313 = vector.extract_strided_slice %2 {offsets = [2, 0, 0], sizes = [1, 8, 8], strides = [1, 1, 1]} : vector<8x8x8xf32> to vector<1x8x8xf32>
    %314 = vector.shape_cast %313 : vector<1x8x8xf32> to vector<8x8xf32>
    %315 = vector.extract_strided_slice %301 {offsets = [2, 0, 0], sizes = [1, 8, 8], strides = [1, 1, 1]} : vector<8x8x8xf32> to vector<1x8x8xf32>
    %316 = vector.shape_cast %315 : vector<1x8x8xf32> to vector<8x8xf32>
    %317 = arith.mulf %314, %316 : vector<8x8xf32>
    %318 = arith.addf %312, %317 : vector<8x8xf32>
    %319 = vector.extract_strided_slice %2 {offsets = [3, 0, 0], sizes = [1, 8, 8], strides = [1, 1, 1]} : vector<8x8x8xf32> to vector<1x8x8xf32>
    %320 = vector.shape_cast %319 : vector<1x8x8xf32> to vector<8x8xf32>
    %321 = vector.extract_strided_slice %301 {offsets = [3, 0, 0], sizes = [1, 8, 8], strides = [1, 1, 1]} : vector<8x8x8xf32> to vector<1x8x8xf32>
    %322 = vector.shape_cast %321 : vector<1x8x8xf32> to vector<8x8xf32>
    %323 = arith.mulf %320, %322 : vector<8x8xf32>
    %324 = arith.addf %318, %323 : vector<8x8xf32>
    %325 = vector.extract_strided_slice %2 {offsets = [4, 0, 0], sizes = [1, 8, 8], strides = [1, 1, 1]} : vector<8x8x8xf32> to vector<1x8x8xf32>
    %326 = vector.shape_cast %325 : vector<1x8x8xf32> to vector<8x8xf32>
    %327 = vector.extract_strided_slice %301 {offsets = [4, 0, 0], sizes = [1, 8, 8], strides = [1, 1, 1]} : vector<8x8x8xf32> to vector<1x8x8xf32>
    %328 = vector.shape_cast %327 : vector<1x8x8xf32> to vector<8x8xf32>
    %329 = arith.mulf %326, %328 : vector<8x8xf32>
    %330 = arith.addf %324, %329 : vector<8x8xf32>
    %331 = vector.extract_strided_slice %2 {offsets = [5, 0, 0], sizes = [1, 8, 8], strides = [1, 1, 1]} : vector<8x8x8xf32> to vector<1x8x8xf32>
    %332 = vector.shape_cast %331 : vector<1x8x8xf32> to vector<8x8xf32>
    %333 = vector.extract_strided_slice %301 {offsets = [5, 0, 0], sizes = [1, 8, 8], strides = [1, 1, 1]} : vector<8x8x8xf32> to vector<1x8x8xf32>
    %334 = vector.shape_cast %333 : vector<1x8x8xf32> to vector<8x8xf32>
    %335 = arith.mulf %332, %334 : vector<8x8xf32>
    %336 = arith.addf %330, %335 : vector<8x8xf32>
    %337 = vector.extract_strided_slice %2 {offsets = [6, 0, 0], sizes = [1, 8, 8], strides = [1, 1, 1]} : vector<8x8x8xf32> to vector<1x8x8xf32>
    %338 = vector.shape_cast %337 : vector<1x8x8xf32> to vector<8x8xf32>
    %339 = vector.extract_strided_slice %301 {offsets = [6, 0, 0], sizes = [1, 8, 8], strides = [1, 1, 1]} : vector<8x8x8xf32> to vector<1x8x8xf32>
    %340 = vector.shape_cast %339 : vector<1x8x8xf32> to vector<8x8xf32>
    %341 = arith.mulf %338, %340 : vector<8x8xf32>
    %342 = arith.addf %336, %341 : vector<8x8xf32>
    %343 = vector.extract_strided_slice %2 {offsets = [7, 0, 0], sizes = [1, 8, 8], strides = [1, 1, 1]} : vector<8x8x8xf32> to vector<1x8x8xf32>
    %344 = vector.shape_cast %343 : vector<1x8x8xf32> to vector<8x8xf32>
    %345 = vector.extract_strided_slice %301 {offsets = [7, 0, 0], sizes = [1, 8, 8], strides = [1, 1, 1]} : vector<8x8x8xf32> to vector<1x8x8xf32>
    %346 = vector.shape_cast %345 : vector<1x8x8xf32> to vector<8x8xf32>
    %347 = arith.mulf %344, %346 : vector<8x8xf32>
    %348 = arith.addf %342, %347 : vector<8x8xf32>
    %cst_37 = arith.constant 1.250000e-01 : f32
    %349 = vector.broadcast %cst_37 : f32 to vector<8x8xf32>
    %350 = arith.mulf %348, %349 : vector<8x8xf32>
    %cst_38 = arith.constant 0.000000e+00 : f32
    %351 = vector.broadcast %cst_38 : f32 to vector<8x8xf32>
    %352 = arith.cmpf oge, %350, %351 : vector<8x8xf32>
    %cst_39 = arith.constant 1.000000e-01 : f32
    %353 = vector.broadcast %cst_39 : f32 to vector<8x8xf32>
    %354 = arith.mulf %350, %353 : vector<8x8xf32>
    %355 = arith.select %352, %350, %354 : vector<8x8xi1>, vector<8x8xf32>
    %356 = arith.truncf %355 : vector<8x8xf32> to vector<8x8xbf16>
    %c0_40 = arith.constant 0 : index
    %c5 = arith.constant 5 : index
    %c0_41 = arith.constant 0 : index
    %c0_42 = arith.constant 0 : index
    %357 = vector.load %arg3[%c0_40, %c5, %c0_41, %c0_42] : memref<1x9x8x8xbf16, #tpu.memory_space<vmem>>, vector<1x1x8x8xbf16>
    %358 = vector.shape_cast %357 : vector<1x1x8x8xbf16> to vector<8x8xbf16>
    %359 = vector.shape_cast %356 : vector<8x8xbf16> to vector<1x1x8x8xbf16>
    tpu.vector_store %arg3[%c0_40, %c5, %c0_41, %c0_42], %359 {strides = array<i32>} : memref<1x9x8x8xbf16, #tpu.memory_space<vmem>>, vector<1x1x8x8xbf16>,
    %360 = vector.extract_strided_slice %5 {offsets = [0, 2, 0], sizes = [8, 8, 8], strides = [1, 1, 1]} : vector<8x10x10xf32> to vector<8x8x8xf32>
    %361 = vector.extract_strided_slice %2 {offsets = [0, 0, 0], sizes = [1, 8, 8], strides = [1, 1, 1]} : vector<8x8x8xf32> to vector<1x8x8xf32>
    %362 = vector.shape_cast %361 : vector<1x8x8xf32> to vector<8x8xf32>
    %363 = vector.extract_strided_slice %360 {offsets = [0, 0, 0], sizes = [1, 8, 8], strides = [1, 1, 1]} : vector<8x8x8xf32> to vector<1x8x8xf32>
    %364 = vector.shape_cast %363 : vector<1x8x8xf32> to vector<8x8xf32>
    %365 = arith.mulf %362, %364 : vector<8x8xf32>
    %366 = vector.extract_strided_slice %2 {offsets = [1, 0, 0], sizes = [1, 8, 8], strides = [1, 1, 1]} : vector<8x8x8xf32> to vector<1x8x8xf32>
    %367 = vector.shape_cast %366 : vector<1x8x8xf32> to vector<8x8xf32>
    %368 = vector.extract_strided_slice %360 {offsets = [1, 0, 0], sizes = [1, 8, 8], strides = [1, 1, 1]} : vector<8x8x8xf32> to vector<1x8x8xf32>
    %369 = vector.shape_cast %368 : vector<1x8x8xf32> to vector<8x8xf32>
    %370 = arith.mulf %367, %369 : vector<8x8xf32>
    %371 = arith.addf %365, %370 : vector<8x8xf32>
    %372 = vector.extract_strided_slice %2 {offsets = [2, 0, 0], sizes = [1, 8, 8], strides = [1, 1, 1]} : vector<8x8x8xf32> to vector<1x8x8xf32>
    %373 = vector.shape_cast %372 : vector<1x8x8xf32> to vector<8x8xf32>
    %374 = vector.extract_strided_slice %360 {offsets = [2, 0, 0], sizes = [1, 8, 8], strides = [1, 1, 1]} : vector<8x8x8xf32> to vector<1x8x8xf32>
    %375 = vector.shape_cast %374 : vector<1x8x8xf32> to vector<8x8xf32>
    %376 = arith.mulf %373, %375 : vector<8x8xf32>
    %377 = arith.addf %371, %376 : vector<8x8xf32>
    %378 = vector.extract_strided_slice %2 {offsets = [3, 0, 0], sizes = [1, 8, 8], strides = [1, 1, 1]} : vector<8x8x8xf32> to vector<1x8x8xf32>
    %379 = vector.shape_cast %378 : vector<1x8x8xf32> to vector<8x8xf32>
    %380 = vector.extract_strided_slice %360 {offsets = [3, 0, 0], sizes = [1, 8, 8], strides = [1, 1, 1]} : vector<8x8x8xf32> to vector<1x8x8xf32>
    %381 = vector.shape_cast %380 : vector<1x8x8xf32> to vector<8x8xf32>
    %382 = arith.mulf %379, %381 : vector<8x8xf32>
    %383 = arith.addf %377, %382 : vector<8x8xf32>
    %384 = vector.extract_strided_slice %2 {offsets = [4, 0, 0], sizes = [1, 8, 8], strides = [1, 1, 1]} : vector<8x8x8xf32> to vector<1x8x8xf32>
    %385 = vector.shape_cast %384 : vector<1x8x8xf32> to vector<8x8xf32>
    %386 = vector.extract_strided_slice %360 {offsets = [4, 0, 0], sizes = [1, 8, 8], strides = [1, 1, 1]} : vector<8x8x8xf32> to vector<1x8x8xf32>
    %387 = vector.shape_cast %386 : vector<1x8x8xf32> to vector<8x8xf32>
    %388 = arith.mulf %385, %387 : vector<8x8xf32>
    %389 = arith.addf %383, %388 : vector<8x8xf32>
    %390 = vector.extract_strided_slice %2 {offsets = [5, 0, 0], sizes = [1, 8, 8], strides = [1, 1, 1]} : vector<8x8x8xf32> to vector<1x8x8xf32>
    %391 = vector.shape_cast %390 : vector<1x8x8xf32> to vector<8x8xf32>
    %392 = vector.extract_strided_slice %360 {offsets = [5, 0, 0], sizes = [1, 8, 8], strides = [1, 1, 1]} : vector<8x8x8xf32> to vector<1x8x8xf32>
    %393 = vector.shape_cast %392 : vector<1x8x8xf32> to vector<8x8xf32>
    %394 = arith.mulf %391, %393 : vector<8x8xf32>
    %395 = arith.addf %389, %394 : vector<8x8xf32>
    %396 = vector.extract_strided_slice %2 {offsets = [6, 0, 0], sizes = [1, 8, 8], strides = [1, 1, 1]} : vector<8x8x8xf32> to vector<1x8x8xf32>
    %397 = vector.shape_cast %396 : vector<1x8x8xf32> to vector<8x8xf32>
    %398 = vector.extract_strided_slice %360 {offsets = [6, 0, 0], sizes = [1, 8, 8], strides = [1, 1, 1]} : vector<8x8x8xf32> to vector<1x8x8xf32>
    %399 = vector.shape_cast %398 : vector<1x8x8xf32> to vector<8x8xf32>
    %400 = arith.mulf %397, %399 : vector<8x8xf32>
    %401 = arith.addf %395, %400 : vector<8x8xf32>
    %402 = vector.extract_strided_slice %2 {offsets = [7, 0, 0], sizes = [1, 8, 8], strides = [1, 1, 1]} : vector<8x8x8xf32> to vector<1x8x8xf32>
    %403 = vector.shape_cast %402 : vector<1x8x8xf32> to vector<8x8xf32>
    %404 = vector.extract_strided_slice %360 {offsets = [7, 0, 0], sizes = [1, 8, 8], strides = [1, 1, 1]} : vector<8x8x8xf32> to vector<1x8x8xf32>
    %405 = vector.shape_cast %404 : vector<1x8x8xf32> to vector<8x8xf32>
    %406 = arith.mulf %403, %405 : vector<8x8xf32>
    %407 = arith.addf %401, %406 : vector<8x8xf32>
    %cst_43 = arith.constant 1.250000e-01 : f32
    %408 = vector.broadcast %cst_43 : f32 to vector<8x8xf32>
    %409 = arith.mulf %407, %408 : vector<8x8xf32>
    %cst_44 = arith.constant 0.000000e+00 : f32
    %410 = vector.broadcast %cst_44 : f32 to vector<8x8xf32>
    %411 = arith.cmpf oge, %409, %410 : vector<8x8xf32>
    %cst_45 = arith.constant 1.000000e-01 : f32
    %412 = vector.broadcast %cst_45 : f32 to vector<8x8xf32>
    %413 = arith.mulf %409, %412 : vector<8x8xf32>
    %414 = arith.select %411, %409, %413 : vector<8x8xi1>, vector<8x8xf32>
    %415 = arith.truncf %414 : vector<8x8xf32> to vector<8x8xbf16>
    %c0_46 = arith.constant 0 : index
    %c6 = arith.constant 6 : index
    %c0_47 = arith.constant 0 : index
    %c0_48 = arith.constant 0 : index
    %416 = vector.load %arg3[%c0_46, %c6, %c0_47, %c0_48] : memref<1x9x8x8xbf16, #tpu.memory_space<vmem>>, vector<1x1x8x8xbf16>
    %417 = vector.shape_cast %416 : vector<1x1x8x8xbf16> to vector<8x8xbf16>
    %418 = vector.shape_cast %415 : vector<8x8xbf16> to vector<1x1x8x8xbf16>
    tpu.vector_store %arg3[%c0_46, %c6, %c0_47, %c0_48], %418 {strides = array<i32>} : memref<1x9x8x8xbf16, #tpu.memory_space<vmem>>, vector<1x1x8x8xbf16>,
    %419 = vector.extract_strided_slice %5 {offsets = [0, 2, 1], sizes = [8, 8, 8], strides = [1, 1, 1]} : vector<8x10x10xf32> to vector<8x8x8xf32>
    %420 = vector.extract_strided_slice %2 {offsets = [0, 0, 0], sizes = [1, 8, 8], strides = [1, 1, 1]} : vector<8x8x8xf32> to vector<1x8x8xf32>
    %421 = vector.shape_cast %420 : vector<1x8x8xf32> to vector<8x8xf32>
    %422 = vector.extract_strided_slice %419 {offsets = [0, 0, 0], sizes = [1, 8, 8], strides = [1, 1, 1]} : vector<8x8x8xf32> to vector<1x8x8xf32>
    %423 = vector.shape_cast %422 : vector<1x8x8xf32> to vector<8x8xf32>
    %424 = arith.mulf %421, %423 : vector<8x8xf32>
    %425 = vector.extract_strided_slice %2 {offsets = [1, 0, 0], sizes = [1, 8, 8], strides = [1, 1, 1]} : vector<8x8x8xf32> to vector<1x8x8xf32>
    %426 = vector.shape_cast %425 : vector<1x8x8xf32> to vector<8x8xf32>
    %427 = vector.extract_strided_slice %419 {offsets = [1, 0, 0], sizes = [1, 8, 8], strides = [1, 1, 1]} : vector<8x8x8xf32> to vector<1x8x8xf32>
    %428 = vector.shape_cast %427 : vector<1x8x8xf32> to vector<8x8xf32>
    %429 = arith.mulf %426, %428 : vector<8x8xf32>
    %430 = arith.addf %424, %429 : vector<8x8xf32>
    %431 = vector.extract_strided_slice %2 {offsets = [2, 0, 0], sizes = [1, 8, 8], strides = [1, 1, 1]} : vector<8x8x8xf32> to vector<1x8x8xf32>
    %432 = vector.shape_cast %431 : vector<1x8x8xf32> to vector<8x8xf32>
    %433 = vector.extract_strided_slice %419 {offsets = [2, 0, 0], sizes = [1, 8, 8], strides = [1, 1, 1]} : vector<8x8x8xf32> to vector<1x8x8xf32>
    %434 = vector.shape_cast %433 : vector<1x8x8xf32> to vector<8x8xf32>
    %435 = arith.mulf %432, %434 : vector<8x8xf32>
    %436 = arith.addf %430, %435 : vector<8x8xf32>
    %437 = vector.extract_strided_slice %2 {offsets = [3, 0, 0], sizes = [1, 8, 8], strides = [1, 1, 1]} : vector<8x8x8xf32> to vector<1x8x8xf32>
    %438 = vector.shape_cast %437 : vector<1x8x8xf32> to vector<8x8xf32>
    %439 = vector.extract_strided_slice %419 {offsets = [3, 0, 0], sizes = [1, 8, 8], strides = [1, 1, 1]} : vector<8x8x8xf32> to vector<1x8x8xf32>
    %440 = vector.shape_cast %439 : vector<1x8x8xf32> to vector<8x8xf32>
    %441 = arith.mulf %438, %440 : vector<8x8xf32>
    %442 = arith.addf %436, %441 : vector<8x8xf32>
    %443 = vector.extract_strided_slice %2 {offsets = [4, 0, 0], sizes = [1, 8, 8], strides = [1, 1, 1]} : vector<8x8x8xf32> to vector<1x8x8xf32>
    %444 = vector.shape_cast %443 : vector<1x8x8xf32> to vector<8x8xf32>
    %445 = vector.extract_strided_slice %419 {offsets = [4, 0, 0], sizes = [1, 8, 8], strides = [1, 1, 1]} : vector<8x8x8xf32> to vector<1x8x8xf32>
    %446 = vector.shape_cast %445 : vector<1x8x8xf32> to vector<8x8xf32>
    %447 = arith.mulf %444, %446 : vector<8x8xf32>
    %448 = arith.addf %442, %447 : vector<8x8xf32>
    %449 = vector.extract_strided_slice %2 {offsets = [5, 0, 0], sizes = [1, 8, 8], strides = [1, 1, 1]} : vector<8x8x8xf32> to vector<1x8x8xf32>
    %450 = vector.shape_cast %449 : vector<1x8x8xf32> to vector<8x8xf32>
    %451 = vector.extract_strided_slice %419 {offsets = [5, 0, 0], sizes = [1, 8, 8], strides = [1, 1, 1]} : vector<8x8x8xf32> to vector<1x8x8xf32>
    %452 = vector.shape_cast %451 : vector<1x8x8xf32> to vector<8x8xf32>
    %453 = arith.mulf %450, %452 : vector<8x8xf32>
    %454 = arith.addf %448, %453 : vector<8x8xf32>
    %455 = vector.extract_strided_slice %2 {offsets = [6, 0, 0], sizes = [1, 8, 8], strides = [1, 1, 1]} : vector<8x8x8xf32> to vector<1x8x8xf32>
    %456 = vector.shape_cast %455 : vector<1x8x8xf32> to vector<8x8xf32>
    %457 = vector.extract_strided_slice %419 {offsets = [6, 0, 0], sizes = [1, 8, 8], strides = [1, 1, 1]} : vector<8x8x8xf32> to vector<1x8x8xf32>
    %458 = vector.shape_cast %457 : vector<1x8x8xf32> to vector<8x8xf32>
    %459 = arith.mulf %456, %458 : vector<8x8xf32>
    %460 = arith.addf %454, %459 : vector<8x8xf32>
    %461 = vector.extract_strided_slice %2 {offsets = [7, 0, 0], sizes = [1, 8, 8], strides = [1, 1, 1]} : vector<8x8x8xf32> to vector<1x8x8xf32>
    %462 = vector.shape_cast %461 : vector<1x8x8xf32> to vector<8x8xf32>
    %463 = vector.extract_strided_slice %419 {offsets = [7, 0, 0], sizes = [1, 8, 8], strides = [1, 1, 1]} : vector<8x8x8xf32> to vector<1x8x8xf32>
    %464 = vector.shape_cast %463 : vector<1x8x8xf32> to vector<8x8xf32>
    %465 = arith.mulf %462, %464 : vector<8x8xf32>
    %466 = arith.addf %460, %465 : vector<8x8xf32>
    %cst_49 = arith.constant 1.250000e-01 : f32
    %467 = vector.broadcast %cst_49 : f32 to vector<8x8xf32>
    %468 = arith.mulf %466, %467 : vector<8x8xf32>
    %cst_50 = arith.constant 0.000000e+00 : f32
    %469 = vector.broadcast %cst_50 : f32 to vector<8x8xf32>
    %470 = arith.cmpf oge, %468, %469 : vector<8x8xf32>
    %cst_51 = arith.constant 1.000000e-01 : f32
    %471 = vector.broadcast %cst_51 : f32 to vector<8x8xf32>
    %472 = arith.mulf %468, %471 : vector<8x8xf32>
    %473 = arith.select %470, %468, %472 : vector<8x8xi1>, vector<8x8xf32>
    %474 = arith.truncf %473 : vector<8x8xf32> to vector<8x8xbf16>
    %c0_52 = arith.constant 0 : index
    %c7 = arith.constant 7 : index
    %c0_53 = arith.constant 0 : index
    %c0_54 = arith.constant 0 : index
    %475 = vector.load %arg3[%c0_52, %c7, %c0_53, %c0_54] : memref<1x9x8x8xbf16, #tpu.memory_space<vmem>>, vector<1x1x8x8xbf16>
    %476 = vector.shape_cast %475 : vector<1x1x8x8xbf16> to vector<8x8xbf16>
    %477 = vector.shape_cast %474 : vector<8x8xbf16> to vector<1x1x8x8xbf16>
    tpu.vector_store %arg3[%c0_52, %c7, %c0_53, %c0_54], %477 {strides = array<i32>} : memref<1x9x8x8xbf16, #tpu.memory_space<vmem>>, vector<1x1x8x8xbf16>,
    %478 = vector.extract_strided_slice %5 {offsets = [0, 2, 2], sizes = [8, 8, 8], strides = [1, 1, 1]} : vector<8x10x10xf32> to vector<8x8x8xf32>
    %479 = vector.extract_strided_slice %2 {offsets = [0, 0, 0], sizes = [1, 8, 8], strides = [1, 1, 1]} : vector<8x8x8xf32> to vector<1x8x8xf32>
    %480 = vector.shape_cast %479 : vector<1x8x8xf32> to vector<8x8xf32>
    %481 = vector.extract_strided_slice %478 {offsets = [0, 0, 0], sizes = [1, 8, 8], strides = [1, 1, 1]} : vector<8x8x8xf32> to vector<1x8x8xf32>
    %482 = vector.shape_cast %481 : vector<1x8x8xf32> to vector<8x8xf32>
    %483 = arith.mulf %480, %482 : vector<8x8xf32>
    %484 = vector.extract_strided_slice %2 {offsets = [1, 0, 0], sizes = [1, 8, 8], strides = [1, 1, 1]} : vector<8x8x8xf32> to vector<1x8x8xf32>
    %485 = vector.shape_cast %484 : vector<1x8x8xf32> to vector<8x8xf32>
    %486 = vector.extract_strided_slice %478 {offsets = [1, 0, 0], sizes = [1, 8, 8], strides = [1, 1, 1]} : vector<8x8x8xf32> to vector<1x8x8xf32>
    %487 = vector.shape_cast %486 : vector<1x8x8xf32> to vector<8x8xf32>
    %488 = arith.mulf %485, %487 : vector<8x8xf32>
    %489 = arith.addf %483, %488 : vector<8x8xf32>
    %490 = vector.extract_strided_slice %2 {offsets = [2, 0, 0], sizes = [1, 8, 8], strides = [1, 1, 1]} : vector<8x8x8xf32> to vector<1x8x8xf32>
    %491 = vector.shape_cast %490 : vector<1x8x8xf32> to vector<8x8xf32>
    %492 = vector.extract_strided_slice %478 {offsets = [2, 0, 0], sizes = [1, 8, 8], strides = [1, 1, 1]} : vector<8x8x8xf32> to vector<1x8x8xf32>
    %493 = vector.shape_cast %492 : vector<1x8x8xf32> to vector<8x8xf32>
    %494 = arith.mulf %491, %493 : vector<8x8xf32>
    %495 = arith.addf %489, %494 : vector<8x8xf32>
    %496 = vector.extract_strided_slice %2 {offsets = [3, 0, 0], sizes = [1, 8, 8], strides = [1, 1, 1]} : vector<8x8x8xf32> to vector<1x8x8xf32>
    %497 = vector.shape_cast %496 : vector<1x8x8xf32> to vector<8x8xf32>
    %498 = vector.extract_strided_slice %478 {offsets = [3, 0, 0], sizes = [1, 8, 8], strides = [1, 1, 1]} : vector<8x8x8xf32> to vector<1x8x8xf32>
    %499 = vector.shape_cast %498 : vector<1x8x8xf32> to vector<8x8xf32>
    %500 = arith.mulf %497, %499 : vector<8x8xf32>
    %501 = arith.addf %495, %500 : vector<8x8xf32>
    %502 = vector.extract_strided_slice %2 {offsets = [4, 0, 0], sizes = [1, 8, 8], strides = [1, 1, 1]} : vector<8x8x8xf32> to vector<1x8x8xf32>
    %503 = vector.shape_cast %502 : vector<1x8x8xf32> to vector<8x8xf32>
    %504 = vector.extract_strided_slice %478 {offsets = [4, 0, 0], sizes = [1, 8, 8], strides = [1, 1, 1]} : vector<8x8x8xf32> to vector<1x8x8xf32>
    %505 = vector.shape_cast %504 : vector<1x8x8xf32> to vector<8x8xf32>
    %506 = arith.mulf %503, %505 : vector<8x8xf32>
    %507 = arith.addf %501, %506 : vector<8x8xf32>
    %508 = vector.extract_strided_slice %2 {offsets = [5, 0, 0], sizes = [1, 8, 8], strides = [1, 1, 1]} : vector<8x8x8xf32> to vector<1x8x8xf32>
    %509 = vector.shape_cast %508 : vector<1x8x8xf32> to vector<8x8xf32>
    %510 = vector.extract_strided_slice %478 {offsets = [5, 0, 0], sizes = [1, 8, 8], strides = [1, 1, 1]} : vector<8x8x8xf32> to vector<1x8x8xf32>
    %511 = vector.shape_cast %510 : vector<1x8x8xf32> to vector<8x8xf32>
    %512 = arith.mulf %509, %511 : vector<8x8xf32>
    %513 = arith.addf %507, %512 : vector<8x8xf32>
    %514 = vector.extract_strided_slice %2 {offsets = [6, 0, 0], sizes = [1, 8, 8], strides = [1, 1, 1]} : vector<8x8x8xf32> to vector<1x8x8xf32>
    %515 = vector.shape_cast %514 : vector<1x8x8xf32> to vector<8x8xf32>
    %516 = vector.extract_strided_slice %478 {offsets = [6, 0, 0], sizes = [1, 8, 8], strides = [1, 1, 1]} : vector<8x8x8xf32> to vector<1x8x8xf32>
    %517 = vector.shape_cast %516 : vector<1x8x8xf32> to vector<8x8xf32>
    %518 = arith.mulf %515, %517 : vector<8x8xf32>
    %519 = arith.addf %513, %518 : vector<8x8xf32>
    %520 = vector.extract_strided_slice %2 {offsets = [7, 0, 0], sizes = [1, 8, 8], strides = [1, 1, 1]} : vector<8x8x8xf32> to vector<1x8x8xf32>
    %521 = vector.shape_cast %520 : vector<1x8x8xf32> to vector<8x8xf32>
    %522 = vector.extract_strided_slice %478 {offsets = [7, 0, 0], sizes = [1, 8, 8], strides = [1, 1, 1]} : vector<8x8x8xf32> to vector<1x8x8xf32>
    %523 = vector.shape_cast %522 : vector<1x8x8xf32> to vector<8x8xf32>
    %524 = arith.mulf %521, %523 : vector<8x8xf32>
    %525 = arith.addf %519, %524 : vector<8x8xf32>
    %cst_55 = arith.constant 1.250000e-01 : f32
    %526 = vector.broadcast %cst_55 : f32 to vector<8x8xf32>
    %527 = arith.mulf %525, %526 : vector<8x8xf32>
    %cst_56 = arith.constant 0.000000e+00 : f32
    %528 = vector.broadcast %cst_56 : f32 to vector<8x8xf32>
    %529 = arith.cmpf oge, %527, %528 : vector<8x8xf32>
    %cst_57 = arith.constant 1.000000e-01 : f32
    %530 = vector.broadcast %cst_57 : f32 to vector<8x8xf32>
    %531 = arith.mulf %527, %530 : vector<8x8xf32>
    %532 = arith.select %529, %527, %531 : vector<8x8xi1>, vector<8x8xf32>
    %533 = arith.truncf %532 : vector<8x8xf32> to vector<8x8xbf16>
    %c0_58 = arith.constant 0 : index
    %c8 = arith.constant 8 : index
    %c0_59 = arith.constant 0 : index
    %c0_60 = arith.constant 0 : index
    %534 = vector.load %arg3[%c0_58, %c8, %c0_59, %c0_60] : memref<1x9x8x8xbf16, #tpu.memory_space<vmem>>, vector<1x1x8x8xbf16>
    %535 = vector.shape_cast %534 : vector<1x1x8x8xbf16> to vector<8x8xbf16>
    %536 = vector.shape_cast %533 : vector<8x8xbf16> to vector<1x1x8x8xbf16>
    tpu.vector_store %arg3[%c0_58, %c8, %c0_59, %c0_60], %536 {strides = array<i32>} : memref<1x9x8x8xbf16, #tpu.memory_space<vmem>>, vector<1x1x8x8xbf16>,
    return
  }
  func.func @transform_0(%arg0: i32) -> (i32, i32, i32, i32) {
    %c0_i32 = arith.constant 0 : i32
    %c0_i32_0 = arith.constant 0 : i32
    %c0_i32_1 = arith.constant 0 : i32
    %c0_i32_2 = arith.constant 0 : i32
    return %arg0, %c0_i32, %c0_i32_0, %c0_i32_1 : i32, i32, i32, i32
  }
  func.func @transform_1(%arg0: i32) -> (i32, i32, i32, i32) {
    %c0_i32 = arith.constant 0 : i32
    %c0_i32_0 = arith.constant 0 : i32
    %c0_i32_1 = arith.constant 0 : i32
    %c0_i32_2 = arith.constant 0 : i32
    return %arg0, %c0_i32, %c0_i32_0, %c0_i32_1 : i32, i32, i32, i32
  }
  func.func @transform_2(%arg0: i32) -> (i32, i32, i32, i32) {
    %c0_i32 = arith.constant 0 : i32
    %c0_i32_0 = arith.constant 0 : i32
    %c0_i32_1 = arith.constant 0 : i32
    %c0_i32_2 = arith.constant 0 : i32
    return %arg0, %c0_i32, %c0_i32_0, %c0_i32_1 : i32, i32, i32, i32
  }
}

module attributes {stable_mosaic.version = 11 : i64} {
  func.func @_head_kernel(%arg0: i32, %arg1: memref<1x19x108xbf16, #tpu.memory_space<vmem>>, %arg2: memref<9x16x19xbf16, #tpu.memory_space<vmem>>, %arg3: memref<16x1xf32, #tpu.memory_space<vmem>>, %arg4: memref<9x2x16xbf16, #tpu.memory_space<vmem>>, %arg5: memref<2x1xf32, #tpu.memory_space<vmem>>, %arg6: memref<1x80xf32, #tpu.memory_space<vmem>>, %arg7: memref<1x2x80xf32, #tpu.memory_space<vmem>>, %arg8: memref<16x108xbf16, #tpu.memory_space<vmem>>) attributes {dimension_semantics = [#tpu.dimension_semantics<parallel>], iteration_bounds = array<i64: 2>, scalar_prefetch = 0 : i64, scratch_operands = 1 : i64, tpu.core_type = #tpu.core_type<tc>, window_params = [{transform_indices = @transform_0, window_bounds = array<i64: 1, 19, 108>}, {pipeline_mode = #tpu.pipeline_mode<synchronous>, transform_indices = @transform_1, window_bounds = array<i64: 9, 16, 19>}, {pipeline_mode = #tpu.pipeline_mode<synchronous>, transform_indices = @transform_2, window_bounds = array<i64: 16, 1>}, {pipeline_mode = #tpu.pipeline_mode<synchronous>, transform_indices = @transform_3, window_bounds = array<i64: 9, 2, 16>}, {pipeline_mode = #tpu.pipeline_mode<synchronous>, transform_indices = @transform_4, window_bounds = array<i64: 2, 1>}, {pipeline_mode = #tpu.pipeline_mode<synchronous>, transform_indices = @transform_5, window_bounds = array<i64: 1, 80>}, {transform_indices = @transform_6, window_bounds = array<i64: 1, 2, 80>}]} {
    %cst = arith.constant 0.000000e+00 : f32
    %0 = vector.broadcast %cst : f32 to vector<16x80xf32>
    %c0 = arith.constant 0 : index
    %c0_0 = arith.constant 0 : index
    %c0_1 = arith.constant 0 : index
    %1 = vector.load %arg1[%c0, %c0_0, %c0_1] : memref<1x19x108xbf16, #tpu.memory_space<vmem>>, vector<1x19x80xbf16>
    %2 = vector.shape_cast %1 : vector<1x19x80xbf16> to vector<19x80xbf16>
    %c0_2 = arith.constant 0 : index
    %c0_3 = arith.constant 0 : index
    %c0_4 = arith.constant 0 : index
    %3 = vector.load %arg2[%c0_2, %c0_3, %c0_4] : memref<9x16x19xbf16, #tpu.memory_space<vmem>>, vector<1x16x19xbf16>
    %4 = vector.shape_cast %3 : vector<1x16x19xbf16> to vector<16x19xbf16>
    %cst_5 = arith.constant dense<0.000000e+00> : vector<16x80xf32>
    %5 = tpu.matmul %4, %2, %cst_5 {dimension_numbers = #tpu.dot_dimension_numbers<[1], [0], [0], [1], [0, 0, 1, 1], [], []>} : vector<16x19xbf16>, vector<19x80xbf16>, vector<16x80xf32> -> vector<16x80xf32>
    %6 = arith.addf %0, %5 : vector<16x80xf32>
    %c0_6 = arith.constant 0 : index
    %c0_7 = arith.constant 0 : index
    %c1 = arith.constant 1 : index
    %7 = vector.load %arg1[%c0_6, %c0_7, %c1] : memref<1x19x108xbf16, #tpu.memory_space<vmem>>, vector<1x19x80xbf16>
    %8 = vector.shape_cast %7 : vector<1x19x80xbf16> to vector<19x80xbf16>
    %c1_8 = arith.constant 1 : index
    %c0_9 = arith.constant 0 : index
    %c0_10 = arith.constant 0 : index
    %9 = vector.load %arg2[%c1_8, %c0_9, %c0_10] : memref<9x16x19xbf16, #tpu.memory_space<vmem>>, vector<1x16x19xbf16>
    %10 = vector.shape_cast %9 : vector<1x16x19xbf16> to vector<16x19xbf16>
    %cst_11 = arith.constant dense<0.000000e+00> : vector<16x80xf32>
    %11 = tpu.matmul %10, %8, %cst_11 {dimension_numbers = #tpu.dot_dimension_numbers<[1], [0], [0], [1], [0, 0, 1, 1], [], []>} : vector<16x19xbf16>, vector<19x80xbf16>, vector<16x80xf32> -> vector<16x80xf32>
    %12 = arith.addf %6, %11 : vector<16x80xf32>
    %c0_12 = arith.constant 0 : index
    %c0_13 = arith.constant 0 : index
    %c2 = arith.constant 2 : index
    %13 = vector.load %arg1[%c0_12, %c0_13, %c2] : memref<1x19x108xbf16, #tpu.memory_space<vmem>>, vector<1x19x80xbf16>
    %14 = vector.shape_cast %13 : vector<1x19x80xbf16> to vector<19x80xbf16>
    %c2_14 = arith.constant 2 : index
    %c0_15 = arith.constant 0 : index
    %c0_16 = arith.constant 0 : index
    %15 = vector.load %arg2[%c2_14, %c0_15, %c0_16] : memref<9x16x19xbf16, #tpu.memory_space<vmem>>, vector<1x16x19xbf16>
    %16 = vector.shape_cast %15 : vector<1x16x19xbf16> to vector<16x19xbf16>
    %cst_17 = arith.constant dense<0.000000e+00> : vector<16x80xf32>
    %17 = tpu.matmul %16, %14, %cst_17 {dimension_numbers = #tpu.dot_dimension_numbers<[1], [0], [0], [1], [0, 0, 1, 1], [], []>} : vector<16x19xbf16>, vector<19x80xbf16>, vector<16x80xf32> -> vector<16x80xf32>
    %18 = arith.addf %12, %17 : vector<16x80xf32>
    %c0_18 = arith.constant 0 : index
    %c0_19 = arith.constant 0 : index
    %c10 = arith.constant 10 : index
    %19 = vector.load %arg1[%c0_18, %c0_19, %c10] : memref<1x19x108xbf16, #tpu.memory_space<vmem>>, vector<1x19x80xbf16>
    %20 = vector.shape_cast %19 : vector<1x19x80xbf16> to vector<19x80xbf16>
    %c3 = arith.constant 3 : index
    %c0_20 = arith.constant 0 : index
    %c0_21 = arith.constant 0 : index
    %21 = vector.load %arg2[%c3, %c0_20, %c0_21] : memref<9x16x19xbf16, #tpu.memory_space<vmem>>, vector<1x16x19xbf16>
    %22 = vector.shape_cast %21 : vector<1x16x19xbf16> to vector<16x19xbf16>
    %cst_22 = arith.constant dense<0.000000e+00> : vector<16x80xf32>
    %23 = tpu.matmul %22, %20, %cst_22 {dimension_numbers = #tpu.dot_dimension_numbers<[1], [0], [0], [1], [0, 0, 1, 1], [], []>} : vector<16x19xbf16>, vector<19x80xbf16>, vector<16x80xf32> -> vector<16x80xf32>
    %24 = arith.addf %18, %23 : vector<16x80xf32>
    %c0_23 = arith.constant 0 : index
    %c0_24 = arith.constant 0 : index
    %c11 = arith.constant 11 : index
    %25 = vector.load %arg1[%c0_23, %c0_24, %c11] : memref<1x19x108xbf16, #tpu.memory_space<vmem>>, vector<1x19x80xbf16>
    %26 = vector.shape_cast %25 : vector<1x19x80xbf16> to vector<19x80xbf16>
    %c4 = arith.constant 4 : index
    %c0_25 = arith.constant 0 : index
    %c0_26 = arith.constant 0 : index
    %27 = vector.load %arg2[%c4, %c0_25, %c0_26] : memref<9x16x19xbf16, #tpu.memory_space<vmem>>, vector<1x16x19xbf16>
    %28 = vector.shape_cast %27 : vector<1x16x19xbf16> to vector<16x19xbf16>
    %cst_27 = arith.constant dense<0.000000e+00> : vector<16x80xf32>
    %29 = tpu.matmul %28, %26, %cst_27 {dimension_numbers = #tpu.dot_dimension_numbers<[1], [0], [0], [1], [0, 0, 1, 1], [], []>} : vector<16x19xbf16>, vector<19x80xbf16>, vector<16x80xf32> -> vector<16x80xf32>
    %30 = arith.addf %24, %29 : vector<16x80xf32>
    %c0_28 = arith.constant 0 : index
    %c0_29 = arith.constant 0 : index
    %c12 = arith.constant 12 : index
    %31 = vector.load %arg1[%c0_28, %c0_29, %c12] : memref<1x19x108xbf16, #tpu.memory_space<vmem>>, vector<1x19x80xbf16>
    %32 = vector.shape_cast %31 : vector<1x19x80xbf16> to vector<19x80xbf16>
    %c5 = arith.constant 5 : index
    %c0_30 = arith.constant 0 : index
    %c0_31 = arith.constant 0 : index
    %33 = vector.load %arg2[%c5, %c0_30, %c0_31] : memref<9x16x19xbf16, #tpu.memory_space<vmem>>, vector<1x16x19xbf16>
    %34 = vector.shape_cast %33 : vector<1x16x19xbf16> to vector<16x19xbf16>
    %cst_32 = arith.constant dense<0.000000e+00> : vector<16x80xf32>
    %35 = tpu.matmul %34, %32, %cst_32 {dimension_numbers = #tpu.dot_dimension_numbers<[1], [0], [0], [1], [0, 0, 1, 1], [], []>} : vector<16x19xbf16>, vector<19x80xbf16>, vector<16x80xf32> -> vector<16x80xf32>
    %36 = arith.addf %30, %35 : vector<16x80xf32>
    %c0_33 = arith.constant 0 : index
    %c0_34 = arith.constant 0 : index
    %c20 = arith.constant 20 : index
    %37 = vector.load %arg1[%c0_33, %c0_34, %c20] : memref<1x19x108xbf16, #tpu.memory_space<vmem>>, vector<1x19x80xbf16>
    %38 = vector.shape_cast %37 : vector<1x19x80xbf16> to vector<19x80xbf16>
    %c6 = arith.constant 6 : index
    %c0_35 = arith.constant 0 : index
    %c0_36 = arith.constant 0 : index
    %39 = vector.load %arg2[%c6, %c0_35, %c0_36] : memref<9x16x19xbf16, #tpu.memory_space<vmem>>, vector<1x16x19xbf16>
    %40 = vector.shape_cast %39 : vector<1x16x19xbf16> to vector<16x19xbf16>
    %cst_37 = arith.constant dense<0.000000e+00> : vector<16x80xf32>
    %41 = tpu.matmul %40, %38, %cst_37 {dimension_numbers = #tpu.dot_dimension_numbers<[1], [0], [0], [1], [0, 0, 1, 1], [], []>} : vector<16x19xbf16>, vector<19x80xbf16>, vector<16x80xf32> -> vector<16x80xf32>
    %42 = arith.addf %36, %41 : vector<16x80xf32>
    %c0_38 = arith.constant 0 : index
    %c0_39 = arith.constant 0 : index
    %c21 = arith.constant 21 : index
    %43 = vector.load %arg1[%c0_38, %c0_39, %c21] : memref<1x19x108xbf16, #tpu.memory_space<vmem>>, vector<1x19x80xbf16>
    %44 = vector.shape_cast %43 : vector<1x19x80xbf16> to vector<19x80xbf16>
    %c7 = arith.constant 7 : index
    %c0_40 = arith.constant 0 : index
    %c0_41 = arith.constant 0 : index
    %45 = vector.load %arg2[%c7, %c0_40, %c0_41] : memref<9x16x19xbf16, #tpu.memory_space<vmem>>, vector<1x16x19xbf16>
    %46 = vector.shape_cast %45 : vector<1x16x19xbf16> to vector<16x19xbf16>
    %cst_42 = arith.constant dense<0.000000e+00> : vector<16x80xf32>
    %47 = tpu.matmul %46, %44, %cst_42 {dimension_numbers = #tpu.dot_dimension_numbers<[1], [0], [0], [1], [0, 0, 1, 1], [], []>} : vector<16x19xbf16>, vector<19x80xbf16>, vector<16x80xf32> -> vector<16x80xf32>
    %48 = arith.addf %42, %47 : vector<16x80xf32>
    %c0_43 = arith.constant 0 : index
    %c0_44 = arith.constant 0 : index
    %c22 = arith.constant 22 : index
    %49 = vector.load %arg1[%c0_43, %c0_44, %c22] : memref<1x19x108xbf16, #tpu.memory_space<vmem>>, vector<1x19x80xbf16>
    %50 = vector.shape_cast %49 : vector<1x19x80xbf16> to vector<19x80xbf16>
    %c8 = arith.constant 8 : index
    %c0_45 = arith.constant 0 : index
    %c0_46 = arith.constant 0 : index
    %51 = vector.load %arg2[%c8, %c0_45, %c0_46] : memref<9x16x19xbf16, #tpu.memory_space<vmem>>, vector<1x16x19xbf16>
    %52 = vector.shape_cast %51 : vector<1x16x19xbf16> to vector<16x19xbf16>
    %cst_47 = arith.constant dense<0.000000e+00> : vector<16x80xf32>
    %53 = tpu.matmul %52, %50, %cst_47 {dimension_numbers = #tpu.dot_dimension_numbers<[1], [0], [0], [1], [0, 0, 1, 1], [], []>} : vector<16x19xbf16>, vector<19x80xbf16>, vector<16x80xf32> -> vector<16x80xf32>
    %54 = arith.addf %48, %53 : vector<16x80xf32>
    %c0_48 = arith.constant 0 : index
    %c0_49 = arith.constant 0 : index
    %55 = vector.load %arg3[%c0_48, %c0_49] : memref<16x1xf32, #tpu.memory_space<vmem>>, vector<16x1xf32>
    %56 = vector.broadcast %55 : vector<16x1xf32> to vector<16x80xf32>
    %57 = arith.addf %54, %56 : vector<16x80xf32>
    %cst_50 = arith.constant 0.000000e+00 : f32
    %58 = vector.broadcast %cst_50 : f32 to vector<16x80xf32>
    %59 = arith.cmpf oge, %57, %58 : vector<16x80xf32>
    %cst_51 = arith.constant 1.000000e-01 : f32
    %60 = vector.broadcast %cst_51 : f32 to vector<16x80xf32>
    %61 = arith.mulf %57, %60 : vector<16x80xf32>
    %62 = arith.select %59, %57, %61 : vector<16x80xi1>, vector<16x80xf32>
    %c0_52 = arith.constant 0 : index
    %c0_53 = arith.constant 0 : index
    %63 = vector.load %arg6[%c0_52, %c0_53] : memref<1x80xf32, #tpu.memory_space<vmem>>, vector<1x80xf32>
    %64 = vector.broadcast %63 : vector<1x80xf32> to vector<16x80xf32>
    %65 = arith.mulf %62, %64 : vector<16x80xf32>
    %cst_54 = arith.constant 0.000000e+00 : bf16
    %66 = vector.broadcast %cst_54 : bf16 to vector<16x108xbf16>
    %c0_55 = arith.constant 0 : index
    %c0_56 = arith.constant 0 : index
    %67 = vector.load %arg8[%c0_55, %c0_56] : memref<16x108xbf16, #tpu.memory_space<vmem>>, vector<16x108xbf16>
    tpu.vector_store %arg8[%c0_55, %c0_56], %66 {strides = array<i32>} : memref<16x108xbf16, #tpu.memory_space<vmem>>, vector<16x108xbf16>,
    %68 = arith.truncf %65 : vector<16x80xf32> to vector<16x80xbf16>
    %c0_57 = arith.constant 0 : index
    %c11_58 = arith.constant 11 : index
    %69 = vector.load %arg8[%c0_57, %c11_58] : memref<16x108xbf16, #tpu.memory_space<vmem>>, vector<16x80xbf16>
    tpu.vector_store %arg8[%c0_57, %c11_58], %68 {strides = array<i32>} : memref<16x108xbf16, #tpu.memory_space<vmem>>, vector<16x80xbf16>,
    %cst_59 = arith.constant 0.000000e+00 : f32
    %70 = vector.broadcast %cst_59 : f32 to vector<2x80xf32>
    %c0_60 = arith.constant 0 : index
    %c0_61 = arith.constant 0 : index
    %71 = vector.load %arg8[%c0_60, %c0_61] : memref<16x108xbf16, #tpu.memory_space<vmem>>, vector<16x80xbf16>
    %c0_62 = arith.constant 0 : index
    %c0_63 = arith.constant 0 : index
    %c0_64 = arith.constant 0 : index
    %72 = vector.load %arg4[%c0_62, %c0_63, %c0_64] : memref<9x2x16xbf16, #tpu.memory_space<vmem>>, vector<1x2x16xbf16>
    %73 = vector.shape_cast %72 : vector<1x2x16xbf16> to vector<2x16xbf16>
    %cst_65 = arith.constant dense<0.000000e+00> : vector<2x80xf32>
    %74 = tpu.matmul %73, %71, %cst_65 {dimension_numbers = #tpu.dot_dimension_numbers<[1], [0], [0], [1], [0, 0, 1, 1], [], []>} : vector<2x16xbf16>, vector<16x80xbf16>, vector<2x80xf32> -> vector<2x80xf32>
    %75 = arith.addf %70, %74 : vector<2x80xf32>
    %c0_66 = arith.constant 0 : index
    %c1_67 = arith.constant 1 : index
    %76 = vector.load %arg8[%c0_66, %c1_67] : memref<16x108xbf16, #tpu.memory_space<vmem>>, vector<16x80xbf16>
    %c1_68 = arith.constant 1 : index
    %c0_69 = arith.constant 0 : index
    %c0_70 = arith.constant 0 : index
    %77 = vector.load %arg4[%c1_68, %c0_69, %c0_70] : memref<9x2x16xbf16, #tpu.memory_space<vmem>>, vector<1x2x16xbf16>
    %78 = vector.shape_cast %77 : vector<1x2x16xbf16> to vector<2x16xbf16>
    %cst_71 = arith.constant dense<0.000000e+00> : vector<2x80xf32>
    %79 = tpu.matmul %78, %76, %cst_71 {dimension_numbers = #tpu.dot_dimension_numbers<[1], [0], [0], [1], [0, 0, 1, 1], [], []>} : vector<2x16xbf16>, vector<16x80xbf16>, vector<2x80xf32> -> vector<2x80xf32>
    %80 = arith.addf %75, %79 : vector<2x80xf32>
    %c0_72 = arith.constant 0 : index
    %c2_73 = arith.constant 2 : index
    %81 = vector.load %arg8[%c0_72, %c2_73] : memref<16x108xbf16, #tpu.memory_space<vmem>>, vector<16x80xbf16>
    %c2_74 = arith.constant 2 : index
    %c0_75 = arith.constant 0 : index
    %c0_76 = arith.constant 0 : index
    %82 = vector.load %arg4[%c2_74, %c0_75, %c0_76] : memref<9x2x16xbf16, #tpu.memory_space<vmem>>, vector<1x2x16xbf16>
    %83 = vector.shape_cast %82 : vector<1x2x16xbf16> to vector<2x16xbf16>
    %cst_77 = arith.constant dense<0.000000e+00> : vector<2x80xf32>
    %84 = tpu.matmul %83, %81, %cst_77 {dimension_numbers = #tpu.dot_dimension_numbers<[1], [0], [0], [1], [0, 0, 1, 1], [], []>} : vector<2x16xbf16>, vector<16x80xbf16>, vector<2x80xf32> -> vector<2x80xf32>
    %85 = arith.addf %80, %84 : vector<2x80xf32>
    %c0_78 = arith.constant 0 : index
    %c10_79 = arith.constant 10 : index
    %86 = vector.load %arg8[%c0_78, %c10_79] : memref<16x108xbf16, #tpu.memory_space<vmem>>, vector<16x80xbf16>
    %c3_80 = arith.constant 3 : index
    %c0_81 = arith.constant 0 : index
    %c0_82 = arith.constant 0 : index
    %87 = vector.load %arg4[%c3_80, %c0_81, %c0_82] : memref<9x2x16xbf16, #tpu.memory_space<vmem>>, vector<1x2x16xbf16>
    %88 = vector.shape_cast %87 : vector<1x2x16xbf16> to vector<2x16xbf16>
    %cst_83 = arith.constant dense<0.000000e+00> : vector<2x80xf32>
    %89 = tpu.matmul %88, %86, %cst_83 {dimension_numbers = #tpu.dot_dimension_numbers<[1], [0], [0], [1], [0, 0, 1, 1], [], []>} : vector<2x16xbf16>, vector<16x80xbf16>, vector<2x80xf32> -> vector<2x80xf32>
    %90 = arith.addf %85, %89 : vector<2x80xf32>
    %c0_84 = arith.constant 0 : index
    %c11_85 = arith.constant 11 : index
    %91 = vector.load %arg8[%c0_84, %c11_85] : memref<16x108xbf16, #tpu.memory_space<vmem>>, vector<16x80xbf16>
    %c4_86 = arith.constant 4 : index
    %c0_87 = arith.constant 0 : index
    %c0_88 = arith.constant 0 : index
    %92 = vector.load %arg4[%c4_86, %c0_87, %c0_88] : memref<9x2x16xbf16, #tpu.memory_space<vmem>>, vector<1x2x16xbf16>
    %93 = vector.shape_cast %92 : vector<1x2x16xbf16> to vector<2x16xbf16>
    %cst_89 = arith.constant dense<0.000000e+00> : vector<2x80xf32>
    %94 = tpu.matmul %93, %91, %cst_89 {dimension_numbers = #tpu.dot_dimension_numbers<[1], [0], [0], [1], [0, 0, 1, 1], [], []>} : vector<2x16xbf16>, vector<16x80xbf16>, vector<2x80xf32> -> vector<2x80xf32>
    %95 = arith.addf %90, %94 : vector<2x80xf32>
    %c0_90 = arith.constant 0 : index
    %c12_91 = arith.constant 12 : index
    %96 = vector.load %arg8[%c0_90, %c12_91] : memref<16x108xbf16, #tpu.memory_space<vmem>>, vector<16x80xbf16>
    %c5_92 = arith.constant 5 : index
    %c0_93 = arith.constant 0 : index
    %c0_94 = arith.constant 0 : index
    %97 = vector.load %arg4[%c5_92, %c0_93, %c0_94] : memref<9x2x16xbf16, #tpu.memory_space<vmem>>, vector<1x2x16xbf16>
    %98 = vector.shape_cast %97 : vector<1x2x16xbf16> to vector<2x16xbf16>
    %cst_95 = arith.constant dense<0.000000e+00> : vector<2x80xf32>
    %99 = tpu.matmul %98, %96, %cst_95 {dimension_numbers = #tpu.dot_dimension_numbers<[1], [0], [0], [1], [0, 0, 1, 1], [], []>} : vector<2x16xbf16>, vector<16x80xbf16>, vector<2x80xf32> -> vector<2x80xf32>
    %100 = arith.addf %95, %99 : vector<2x80xf32>
    %c0_96 = arith.constant 0 : index
    %c20_97 = arith.constant 20 : index
    %101 = vector.load %arg8[%c0_96, %c20_97] : memref<16x108xbf16, #tpu.memory_space<vmem>>, vector<16x80xbf16>
    %c6_98 = arith.constant 6 : index
    %c0_99 = arith.constant 0 : index
    %c0_100 = arith.constant 0 : index
    %102 = vector.load %arg4[%c6_98, %c0_99, %c0_100] : memref<9x2x16xbf16, #tpu.memory_space<vmem>>, vector<1x2x16xbf16>
    %103 = vector.shape_cast %102 : vector<1x2x16xbf16> to vector<2x16xbf16>
    %cst_101 = arith.constant dense<0.000000e+00> : vector<2x80xf32>
    %104 = tpu.matmul %103, %101, %cst_101 {dimension_numbers = #tpu.dot_dimension_numbers<[1], [0], [0], [1], [0, 0, 1, 1], [], []>} : vector<2x16xbf16>, vector<16x80xbf16>, vector<2x80xf32> -> vector<2x80xf32>
    %105 = arith.addf %100, %104 : vector<2x80xf32>
    %c0_102 = arith.constant 0 : index
    %c21_103 = arith.constant 21 : index
    %106 = vector.load %arg8[%c0_102, %c21_103] : memref<16x108xbf16, #tpu.memory_space<vmem>>, vector<16x80xbf16>
    %c7_104 = arith.constant 7 : index
    %c0_105 = arith.constant 0 : index
    %c0_106 = arith.constant 0 : index
    %107 = vector.load %arg4[%c7_104, %c0_105, %c0_106] : memref<9x2x16xbf16, #tpu.memory_space<vmem>>, vector<1x2x16xbf16>
    %108 = vector.shape_cast %107 : vector<1x2x16xbf16> to vector<2x16xbf16>
    %cst_107 = arith.constant dense<0.000000e+00> : vector<2x80xf32>
    %109 = tpu.matmul %108, %106, %cst_107 {dimension_numbers = #tpu.dot_dimension_numbers<[1], [0], [0], [1], [0, 0, 1, 1], [], []>} : vector<2x16xbf16>, vector<16x80xbf16>, vector<2x80xf32> -> vector<2x80xf32>
    %110 = arith.addf %105, %109 : vector<2x80xf32>
    %c0_108 = arith.constant 0 : index
    %c22_109 = arith.constant 22 : index
    %111 = vector.load %arg8[%c0_108, %c22_109] : memref<16x108xbf16, #tpu.memory_space<vmem>>, vector<16x80xbf16>
    %c8_110 = arith.constant 8 : index
    %c0_111 = arith.constant 0 : index
    %c0_112 = arith.constant 0 : index
    %112 = vector.load %arg4[%c8_110, %c0_111, %c0_112] : memref<9x2x16xbf16, #tpu.memory_space<vmem>>, vector<1x2x16xbf16>
    %113 = vector.shape_cast %112 : vector<1x2x16xbf16> to vector<2x16xbf16>
    %cst_113 = arith.constant dense<0.000000e+00> : vector<2x80xf32>
    %114 = tpu.matmul %113, %111, %cst_113 {dimension_numbers = #tpu.dot_dimension_numbers<[1], [0], [0], [1], [0, 0, 1, 1], [], []>} : vector<2x16xbf16>, vector<16x80xbf16>, vector<2x80xf32> -> vector<2x80xf32>
    %115 = arith.addf %110, %114 : vector<2x80xf32>
    %c0_114 = arith.constant 0 : index
    %c0_115 = arith.constant 0 : index
    %116 = vector.load %arg5[%c0_114, %c0_115] : memref<2x1xf32, #tpu.memory_space<vmem>>, vector<2x1xf32>
    %117 = vector.broadcast %116 : vector<2x1xf32> to vector<2x80xf32>
    %118 = arith.addf %115, %117 : vector<2x80xf32>
    %c0_116 = arith.constant 0 : index
    %c0_117 = arith.constant 0 : index
    %c0_118 = arith.constant 0 : index
    %119 = vector.load %arg7[%c0_116, %c0_117, %c0_118] : memref<1x2x80xf32, #tpu.memory_space<vmem>>, vector<1x2x80xf32>
    %120 = vector.shape_cast %119 : vector<1x2x80xf32> to vector<2x80xf32>
    %121 = vector.shape_cast %118 : vector<2x80xf32> to vector<1x2x80xf32>
    tpu.vector_store %arg7[%c0_116, %c0_117, %c0_118], %121 {strides = array<i32>} : memref<1x2x80xf32, #tpu.memory_space<vmem>>, vector<1x2x80xf32>,
    return
  }
  func.func @transform_0(%arg0: i32) -> (i32, i32, i32) {
    %c0_i32 = arith.constant 0 : i32
    %c0_i32_0 = arith.constant 0 : i32
    %c0_i32_1 = arith.constant 0 : i32
    return %arg0, %c0_i32, %c0_i32_0 : i32, i32, i32
  }
  func.func @transform_1(%arg0: i32) -> (i32, i32, i32) {
    %c0_i32 = arith.constant 0 : i32
    %c0_i32_0 = arith.constant 0 : i32
    %c0_i32_1 = arith.constant 0 : i32
    %c0_i32_2 = arith.constant 0 : i32
    return %c0_i32, %c0_i32_0, %c0_i32_1 : i32, i32, i32
  }
  func.func @transform_2(%arg0: i32) -> (i32, i32) {
    %c0_i32 = arith.constant 0 : i32
    %c0_i32_0 = arith.constant 0 : i32
    %c0_i32_1 = arith.constant 0 : i32
    return %c0_i32, %c0_i32_0 : i32, i32
  }
  func.func @transform_3(%arg0: i32) -> (i32, i32, i32) {
    %c0_i32 = arith.constant 0 : i32
    %c0_i32_0 = arith.constant 0 : i32
    %c0_i32_1 = arith.constant 0 : i32
    %c0_i32_2 = arith.constant 0 : i32
    return %c0_i32, %c0_i32_0, %c0_i32_1 : i32, i32, i32
  }
  func.func @transform_4(%arg0: i32) -> (i32, i32) {
    %c0_i32 = arith.constant 0 : i32
    %c0_i32_0 = arith.constant 0 : i32
    %c0_i32_1 = arith.constant 0 : i32
    return %c0_i32, %c0_i32_0 : i32, i32
  }
  func.func @transform_5(%arg0: i32) -> (i32, i32) {
    %c0_i32 = arith.constant 0 : i32
    %c0_i32_0 = arith.constant 0 : i32
    %c0_i32_1 = arith.constant 0 : i32
    return %c0_i32, %c0_i32_0 : i32, i32
  }
  func.func @transform_6(%arg0: i32) -> (i32, i32, i32) {
    %c0_i32 = arith.constant 0 : i32
    %c0_i32_0 = arith.constant 0 : i32
    %c0_i32_1 = arith.constant 0 : i32
    return %arg0, %c0_i32, %c0_i32_0 : i32, i32, i32
  }
}

</mosaic_0001>

<bundles_post_ra>
// kernel: pwcnet_forward.8
= control target key start
LH: loop header
LB: loop body
LE: loop exit
PB: predicated region body
PF: predicated region fallthrough
CT: control target
= control target key end

     0   :  { %s554_s12 = smov 0   ;;  %s634_s0 = inlined_call_operand.vmem [shape: bf16[2,4,3,90], index: 0, kind: input, shape index: {}]   ;;  %s635_s1 = inlined_call_operand.vmem [shape: bf16[9,8,3], index: 1, kind: input, shape index: {}]   ;;  %s636_s2 = inlined_call_operand.vmem [shape: f32[8,1], index: 2, kind: input, shape index: {}]   ;;  %s637_s3 = inlined_call_operand.vmem [shape: bf16[2,8,72], index: 3, kind: output, shape index: {}]  }
   0x1 LB: > { %s474_s13 = sadd.s32 4294967295, %s527_s12   ;;  %p478_p0 = scmp.ge.s32.totalorder %s527_s12, 1  ;;  %s527_s12 = sphi %s554_s12, %s13_s12  }
   0x2   : > { %p137_p1 = scmp.lt.s32.totalorder %s527_s12, 3 }
   0x4   : > { %p138_p2 = pnand %p478_p0, %p137_p1 }
   0x5   : > { %p160_p3 = scmp.lt.s32.totalorder (!%p138_p2), %s474_s13, 1  ;;  %s529_s18 = smov (!%p138_p2), 127  }
   0x6   : > { %141 = sbr.rel (%p138_p2) target bundleno = 317 (0x13d), region = 32  ;;  %s531_s21 = smov (!%p138_p2), 119  }
   0x7   : > { %s532_s22 = smov (!%p138_p2), 118  }
   0xb   : > { %s639_s13 = smov (!%p160_p3, %s474_s13), 1  ;;  %vm180_vm0 = vcmask 1040384   ;;  %vm181_vm1 = vcmask 1041408   ;;  %v530_v4 = vmov 65535   ;;  %v483_v9 = vld [vmem:[%s635_s1 + $0x4] sm:$0xf] }
   0xc   : > { %s505_s14 = sshll.u32 %s639_s13, 3  ;;  %v182_v5 = vsel %vm180_vm0, 4294967295, %v530_v4  ;;  %vm176_vm2 = vcmask 23552   ;;  %v489_v18 = vld [vmem:[%s635_s1 + $0xc] sm:$0xf]  ;;  %v408_v26 = vld [vmem:[%s636_s2] sm:$0xff] }
   0xd   : > { %s568_s17 = scalar_lea.vmem %s634_s0, %s505_s14  ;;  %v573_v6 = vsel %vm181_vm1, %v182_v5, 0  ;;  %v171_v19 = vld [vmem:[%s635_s1] sm:$0xf]  ;;  %v492_v22 = vld [vmem:[%s635_s1 + $0x10] sm:$0xf]  ;;  %v533_v27 = vmov 0  }
   0xe   : > { %v170_v0 = vld [vmem:[%s568_s17] sm:$0x3]  ;;  %v488_v1 = vld [vmem:[%s568_s17 + $0x4] sm:$0x3]  ;;  %v482_v3 = vld [vmem:[%s568_s17 + $0x2] sm:$0x3]  ;;  %519 = vset.pattern.permute.xlu2 %v533_v27  ;;  %520 = vset.pattern.permute.xlu0 %v533_v27 }
   0xf   : > { %221 = vst [vmem:[#allocation1] ss:$4 sm:$0xff] %v170_v0  ;;  %v185_v7 = vand.u32 %v482_v3, %v573_v6  ;;  %v321_v8 = vld [vmem:[%s568_s17] sm:$0x3]  ;;  %v498_v11 = vld [vmem:[%s568_s17 + $0x2] sm:$0x3]  ;;  %v254_v16 = vand.u32 %v488_v1, %v573_v6  ;;  %v204_v17 = vand.u32 %v573_v6, %v170_v0 }
  0x10   : > { %v379_v13 = vld [vmem:[%s568_s17] sm:$0x3]  ;;  %v491_v20 = vld [vmem:[%s568_s17 + $0x6] sm:$0x3]  ;;  %v486_v25 = vld [vmem:[%s635_s1 + $0x8] sm:$0xf] }
  0x11   : > { %194 = vmatpush.bf16.msra.mxu0 %v185_v7  ;;  %263 = vmatpush.bf16.msra.mxu3 %v254_v16  ;;  %v278_v21 = vand.u32 %v491_v20, %v573_v6  ;;  %v501_v30 = vld [vmem:[%s635_s1 + $0x20] sm:$0xf]  ;;  %v496_v33 = vld [vmem:[%s635_s1 + $0x18] sm:$0xf]  ;;  %v499_v37 = vld [vmem:[%s635_s1 + $0x1c] sm:$0xf] }
  0x12   : > { %213 = vmatpush.bf16.msra.mxu1 %v204_v17  ;;  %v494_v41 = vld [vmem:[%s635_s1 + $0x14] sm:$0xf]  ;;  %s481_s16 = sshll.u32 %s639_s13, 2  ;;  %vm419_vm4 = vcmask 584704  }
  0x13   : > { %s168_s19 = scalar_lea.vmem %s637_s3, %s481_s16 }
  0x14   : > { %484 = vmatmul.msk.bf16.vlgmr.msra.gmra.mxu0 %vm176_vm2, %v483_v9  ;;  %490 = vmatmul.msk.bf16.vlgmr.msra.gmra.mxu3 %vm176_vm2, %v489_v18 }
  0x15   : > { %485 = vmatmul.msk.bf16.vlgmr.msra.gmra.mxu1 %vm176_vm2, %v171_v19  ;;  %287 = vmatpush.bf16.msrb.mxu0 %v278_v21 }
  0x16   : > { %v222_v2 = vld.sshfl [vmem:[#allocation1] sm:$0xff pattern:$0x73625140] }
  0x17   : > { %224 = vrot.lane.b32.xlu0 %v222_v2, %s529_s18  ;;  %296 = vst [vmem:[#allocation1] ss:$4 sm:$0xff] %v488_v1 }
  0x1e   : > { %v297_v10 = vld.sshfl [vmem:[#allocation1] sm:$0xff pattern:$0x73625140] }
  0x1f   : > { %325 = vst [vmem:[#allocation1] ss:$4 sm:$0xff] %v321_v8 }
  0x24   : > { %493 = vmatmul.msk.bf16.vlgmr.msrb.gmra.mxu0 %vm176_vm2, %v492_v22 }
  0x26   : > { %v326_v12 = vld.sshfl [vmem:[#allocation1] sm:$0xff pattern:$0x73625140] }
  0x27   : > { %354 = vst [vmem:[#allocation1] ss:$4 sm:$0xff] %v498_v11  ;;  %328 = vrot.lane.b32.xlu0 %v326_v12, %s531_s21 }
  0x2e   : > { %v355_v14 = vld.sshfl [vmem:[#allocation1] sm:$0xff pattern:$0x73625140] }
  0x2f   : > { %357 = vrot.lane.b32.xlu1 %v355_v14, %s531_s21  ;;  %383 = vst [vmem:[#allocation1] ss:$4 sm:$0xff] %v379_v13 }
  0x36   : > { %v384_v15 = vld.sshfl [vmem:[#allocation1] sm:$0xff pattern:$0x73625140] }
  0x37   : > { %299 = vrot.lane.b32.xlu1 %v297_v10, %s529_s18  ;;  %386 = vrot.lane.b32.xlu2 %v384_v15, %s532_s22 }
  0x3f   : > { %411 = vperm.xlu2 %519, %v408_v26  }
  0x89   : > { %v225_v23 = vpop.permute.xlu0 %224 }
  0x8a   : > { %v230_v24 = vand.u32 %v225_v23, %v573_v6 }
  0x8c   : > { %239 = vmatpush.bf16.msra.mxu2 %v230_v24 }
  0x8f   : > { %487 = vmatmul.msk.bf16.vlgmr.msra.gmra.mxu2 %vm176_vm2, %v486_v25 }
  0x91   : > { %v387_v28 = vpop.permute.xlu2 %386  ;;  %v196_v34 = vpop.f32.mrf.mxu0 }
  0x92   : > { %v392_v29 = vand.u32 %v387_v28, %v573_v6  ;;  %v215_v42 = vpop.f32.mrf.mxu1 }
  0x93   : > { %v216_v52 = vadd.f32 %v215_v42, %v196_v34 }
  0x94   : > { %401 = vmatpush.bf16.msra.mxu0 %v392_v29 }
  0x97   : > { %502 = vmatmul.msk.bf16.vlgmr.msra.gmra.mxu0 %vm176_vm2, %v501_v30  ;;  %v265_v43 = vpop.f32.mrf.mxu3 }
  0x99   : > { %v329_v31 = vpop.permute.xlu0 %328  ;;  %v198_v38 = vpop.f32.mrf.mxu0 }
  0x9a   : > { %v334_v32 = vand.u32 %v329_v31, %v573_v6  ;;  %v217_v45 = vpop.f32.mrf.mxu1  ;;  %v412_v63 = vpop.permute.xlu2 %411 }
  0x9c   : > { %343 = vmatpush.bf16.msrb.mxu2 %v334_v32 }
  0x9f   : > { %497 = vmatmul.msk.bf16.vlgmr.msrb.gmra.mxu2 %vm176_vm2, %v496_v33  ;;  %v267_v46 = vpop.f32.mrf.mxu3 }
  0xa1   : > { %v358_v35 = vpop.permute.xlu1 %357  ;;  %v289_v44 = vpop.f32.mrf.mxu0 }
  0xa2   : > { %v363_v36 = vand.u32 %v358_v35, %v573_v6 }
  0xa4   : > { %372 = vmatpush.bf16.msrb.mxu3 %v363_v36 }
  0xa7   : > { %500 = vmatmul.msk.bf16.vlgmr.msrb.gmra.mxu3 %vm176_vm2, %v499_v37 }
  0xa9   : > { %v300_v39 = vpop.permute.xlu1 %299  ;;  %v291_v47 = vpop.f32.mrf.mxu0 }
  0xaa   : > { %v305_v40 = vand.u32 %v300_v39, %v573_v6 }
  0xac   : > { %314 = vmatpush.bf16.msrb.mxu1 %v305_v40 }
  0xaf   : > { %495 = vmatmul.msk.bf16.vlgmr.msrb.gmra.mxu1 %vm176_vm2, %v494_v41 }
 0x112   : > { %v241_v48 = vpop.f32.mrf.mxu2 }
 0x113   : > { %v245_v54 = vadd.f32 %v241_v48, %v216_v52 }
 0x114   : > { %v403_v49 = vpop.f32.mrf.mxu0 }
 0x115   : > { %v269_v55 = vadd.f32 %v265_v43, %v245_v54 }
 0x117   : > { %v293_v58 = vadd.f32 %v289_v44, %v269_v55 }
 0x11a   : > { %v243_v50 = vpop.f32.mrf.mxu2 }
 0x11c   : > { %v405_v51 = vpop.f32.mrf.mxu0 }
 0x122   : > { %v345_v53 = vpop.f32.mrf.mxu2 }
 0x12a   : > { %v374_v56 = vpop.f32.mrf.mxu3  ;;  %v347_v57 = vpop.f32.mrf.mxu2 }
 0x12c   : > { %v316_v59 = vpop.f32.mrf.mxu1 }
 0x12d   : > { %v320_v60 = vadd.f32 %v316_v59, %v293_v58 }
 0x12f   : > { %v349_v61 = vadd.f32 %v345_v53, %v320_v60 }
 0x131   : > { %v378_v62 = vadd.f32 %v374_v56, %v349_v61 }
 0x132   : > { %v376_v0 = vpop.f32.mrf.mxu3 }
 0x133   : > { %v407_v1 = vadd.f32 %v403_v49, %v378_v62 }
 0x134   : > { %v318_v2 = vpop.f32.mrf.mxu1 }
 0x135   : > { %v414_v3 = vadd.f32 %v412_v63, %v407_v1 }
 0x137   : > { %vm415_vm3 = vcmp.ge.f32.partialorder %v414_v3, 0.0  ;;  %v416_v4 = vmul.f32 0.1, %v414_v3 }
 0x139   : > { %v417_v5 = vsel %vm415_vm3, %v414_v3, %v416_v4 }
 0x13a   : > { %v418_v6 = vpack.c.bf16 %v417_v5, %v417_v5 }
 0x13c   : > { %420 = vst.msk [vmem:[%s168_s19] sm:$0xf] %vm419_vm4, %v418_v6 }
 0x13d PF: > { %s13_s12 = sadd.s32 1, %s527_s12  }
 0x13e   : > { %p10_p4 = scmp.ge.s32.totalorder %s13_s12, 4  }
 0x140   :  { %12 = sbr.rel (!%p10_p4) target bundleno = 1 (0x1), region = 73 }

// kernel: pwcnet_forward.9
= control target key start
LH: loop header
LB: loop body
LE: loop exit
PB: predicated region body
PF: predicated region fallthrough
CT: control target
= control target key end

     0   :  { %s677_s12 = smov 0   ;;  %s755_s0 = inlined_call_operand.vmem [shape: bf16[2,4,8,34], index: 0, kind: input, shape index: {}]   ;;  %s756_s1 = inlined_call_operand.vmem [shape: bf16[9,16,8], index: 1, kind: input, shape index: {}]   ;;  %s757_s2 = inlined_call_operand.vmem [shape: f32[16,1], index: 2, kind: input, shape index: {}]   ;;  %s758_s3 = inlined_call_operand.vmem [shape: bf16[2,16,20], index: 3, kind: output, shape index: {}]  }
   0x1 LB: > { %s545_s13 = sadd.s32 4294967295, %s651_s12   ;;  %p549_p0 = scmp.ge.s32.totalorder %s651_s12, 1  ;;  %s651_s12 = sphi %s677_s12, %s13_s12  }
   0x2   : > { %p137_p1 = scmp.lt.s32.totalorder %s651_s12, 3 }
   0x4   : > { %p138_p2 = pnand %p549_p0, %p137_p1 }
   0x5   : > { %p161_p3 = scmp.lt.s32.totalorder (!%p138_p2), %s545_s13, 1  ;;  %s653_s22 = smov (!%p138_p2), 127  }
   0x6   : > { %141 = sbr.rel (%p138_p2) target bundleno = 308 (0x134), region = 32  ;;  %s654_s23 = smov (!%p138_p2), 123  }
   0x7   : > { %s655_s24 = smov (!%p138_p2), 122  }
   0xb   : > { %s760_s13 = smov (!%p161_p3, %s545_s13), 1  ;;  %vm189_vm0 = vcmask 1043456   ;;  %v623_v7 = vld [vmem:[%s756_s1 + $0x8] sm:$0xff]  ;;  %vm185_vm1 = vcmask 64512   ;;  %v622_v10 = vld [vmem:[%s756_s1] sm:$0xff]  ;;  %v625_v14 = vld [vmem:[%s756_s1 + $0x18] sm:$0xff] }
   0xc   : > { %s620_s14 = sshll.u32 %s760_s13, 4  ;;  %v626_v17 = vld [vmem:[%s756_s1 + $0x20] sm:$0xff]  ;;  %v466_v21 = vld [vmem:[%s757_s2 + $0x8] sm:$0xff]  ;;  %v656_v23 = vmov 0   ;;  %v624_v27 = vld [vmem:[%s756_s1 + $0x10] sm:$0xff]  ;;  %s621_s18 = sshll.u32 %s760_s13, 3 }
   0xd   : > { %s691_s17 = scalar_lea.vmem %s755_s0, %s620_s14  ;;  %v630_v20 = vld [vmem:[%s756_s1 + $0x40] sm:$0xff]  ;;  %644 = vset.pattern.permute.xlu0 %v656_v23  ;;  %643 = vset.pattern.permute.xlu2 %v656_v23  ;;  %v629_v29 = vld [vmem:[%s756_s1 + $0x38] sm:$0xff]  ;;  %v627_v34 = vld [vmem:[%s756_s1 + $0x28] sm:$0xff]  ;;  %s170_s21 = scalar_lea.vmem %s758_s3, %s621_s18  ;;  %vm487_vm3 = vcmask 158720  }
   0xe   : > { %v172_v0 = vld [vmem:[%s691_s17] sm:$0xf]  ;;  %v554_v1 = vld [vmem:[%s691_s17 + $0x4] sm:$0xf]  ;;  %v574_v5 = vld [vmem:[%s691_s17 + $0x8] sm:$0xf] }
   0xf   : > { %v241_v2 = vunpack.c.l.b16 %v172_v0  ;;  %v407_v3 = vunpack.c.l.b16 %v554_v1  ;;  %v191_v4 = vsel %vm189_vm0, %v554_v1, 0  ;;  %v216_v6 = vsel %vm189_vm0, %v172_v0, 0  ;;  %v582_v15 = vld [vmem:[%s691_s17 + $0xc] sm:$0xf]  ;;  %v465_v22 = vld [vmem:[%s757_s2] sm:$0xff]  ;;  %v628_v35 = vld [vmem:[%s756_s1 + $0x30] sm:$0xff] }
  0x10   : > { %200 = vmatpush.bf16.msra.mxu0 %v191_v4  ;;  %225 = vmatpush.bf16.msra.mxu1 %v216_v6  ;;  %v340_v11 = vunpack.c.l.b16 %v574_v5  ;;  %v281_v13 = vsel %vm189_vm0, %v574_v5, 0  ;;  %v313_v16 = vsel %vm189_vm0, %v582_v15, 0 }
  0x11   : > { %v242_v8 = vpack.c.b16 %v241_v2, %v241_v2  ;;  %v408_v9 = vpack.c.b16 %v407_v3, %v407_v3  ;;  %290 = vmatpush.bf16.msra.mxu3 %v281_v13 }
  0x12   : > { %v341_v12 = vpack.c.b16 %v340_v11, %v340_v11 }
  0x13   : > { %243 = vrot.lane.b32.xlu0 %v242_v8, %s653_s22  ;;  %409 = vrot.lane.b32.xlu1 %v408_v9, %s654_s23 }
  0x14   : > { %441 = vrot.lane.b32.xlu2 %v242_v8, %s655_s24  ;;  %561 = vmatmul.msk.bf16.vlgmr.msra.gmra.mxu0 %vm185_vm1, %v623_v7 }
  0x15   : > { %566 = vmatmul.msk.bf16.vlgmr.msra.gmra.mxu1 %vm185_vm1, %v622_v10  ;;  %581 = vmatmul.msk.bf16.vlgmr.msra.gmra.mxu3 %vm185_vm1, %v625_v14 }
  0x16   : > { %322 = vmatpush.bf16.msrb.mxu0 %v313_v16 }
  0x1b   : > { %374 = vrot.lane.b32.xlu0 %v242_v8, %s654_s23  ;;  %342 = vrot.lane.b32.xlu1 %v341_v12, %s653_s22 }
  0x1c   : > { %469 = vperm.xlu2 %643, %v465_v22  }
  0x23   : > { %474 = vperm.xlu0 %644, %v466_v21  }
  0x24   : > { %589 = vmatmul.msk.bf16.vlgmr.msrb.gmra.mxu0 %vm185_vm1, %v626_v17 }
  0x6e   : > { %v442_v18 = vpop.permute.xlu2 %441 }
  0x6f   : > { %v447_v19 = vsel %vm189_vm0, %v442_v18, 0 }
  0x70   : > { %456 = vmatpush.bf16.msra.mxu0 %v447_v19 }
  0x73   : > { %617 = vmatmul.msk.bf16.vlgmr.msra.gmra.mxu0 %vm185_vm1, %v630_v20 }
  0x76   : > { %v470_v62 = vpop.permute.xlu2 %469 }
  0x85   : > { %v244_v24 = vpop.permute.xlu0 %243  ;;  %v410_v25 = vpop.permute.xlu1 %409 }
  0x86   : > { %v249_v26 = vsel %vm189_vm0, %v244_v24, 0  ;;  %v415_v28 = vsel %vm189_vm0, %v410_v25, 0 }
  0x87   : > { %258 = vmatpush.bf16.msra.mxu2 %v249_v26  ;;  %424 = vmatpush.bf16.msrb.mxu3 %v415_v28 }
  0x8a   : > { %573 = vmatmul.msk.bf16.vlgmr.msra.gmra.mxu2 %vm185_vm1, %v624_v27  ;;  %610 = vmatmul.msk.bf16.vlgmr.msrb.gmra.mxu3 %vm185_vm1, %v629_v29 }
  0x8d   : > { %v375_v30 = vpop.permute.xlu0 %374  ;;  %v343_v31 = vpop.permute.xlu1 %342 }
  0x8e   : > { %v380_v32 = vsel %vm189_vm0, %v375_v30, 0  ;;  %v348_v33 = vsel %vm189_vm0, %v343_v31, 0 }
  0x8f   : > { %389 = vmatpush.bf16.msrb.mxu2 %v380_v32  ;;  %357 = vmatpush.bf16.msrb.mxu1 %v348_v33 }
  0x91   : > { %v202_v36 = vpop.f32.mrf.mxu0 }
  0x92   : > { %596 = vmatmul.msk.bf16.vlgmr.msrb.gmra.mxu1 %vm185_vm1, %v627_v34  ;;  %v227_v38 = vpop.f32.mrf.mxu1 }
  0x93   : > { %v228_v42 = vadd.f32 %v227_v38, %v202_v36 }
  0x95   : > { %v475_v10 = vpop.permute.xlu0 %474 }
  0x98   : > { %v292_v39 = vpop.f32.mrf.mxu3 }
  0x99   : > { %v204_v37 = vpop.f32.mrf.mxu0 }
  0x9a   : > { %603 = vmatmul.msk.bf16.vlgmr.msrb.gmra.mxu2 %vm185_vm1, %v628_v35  ;;  %v229_v43 = vpop.f32.mrf.mxu1 }
  0x9b   : > { %v230_v49 = vadd.f32 %v229_v43, %v204_v37 }
  0xa0   : > { %v294_v45 = vpop.f32.mrf.mxu3 }
  0xa1   : > { %v324_v40 = vpop.f32.mrf.mxu0 }
  0xa9   : > { %v326_v48 = vpop.f32.mrf.mxu0 }
  0xf0   : > { %v458_v58 = vpop.f32.mrf.mxu0 }
  0xf8   : > { %v460_v9 = vpop.f32.mrf.mxu0 }
 0x10d   : > { %v260_v41 = vpop.f32.mrf.mxu2  ;;  %v426_v55 = vpop.f32.mrf.mxu3 }
 0x10e   : > { %v265_v44 = vadd.f32 %v260_v41, %v228_v42 }
 0x10f   : > { %v359_v50 = vpop.f32.mrf.mxu1 }
 0x110   : > { %v297_v46 = vadd.f32 %v292_v39, %v265_v44 }
 0x112   : > { %v329_v51 = vadd.f32 %v324_v40, %v297_v46 }
 0x114   : > { %v364_v53 = vadd.f32 %v359_v50, %v329_v51 }
 0x115   : > { %v262_v47 = vpop.f32.mrf.mxu2  ;;  %v428_v5 = vpop.f32.mrf.mxu3 }
 0x116   : > { %v266_v52 = vadd.f32 %v262_v47, %v230_v49 }
 0x117   : > { %v361_v61 = vpop.f32.mrf.mxu1 }
 0x118   : > { %v298_v54 = vadd.f32 %v294_v45, %v266_v52 }
 0x11a   : > { %v330_v59 = vadd.f32 %v326_v48, %v298_v54 }
 0x11c   : > { %v365_v0 = vadd.f32 %v361_v61, %v330_v59 }
 0x11d   : > { %v391_v56 = vpop.f32.mrf.mxu2 }
 0x11e   : > { %v396_v57 = vadd.f32 %v391_v56, %v364_v53 }
 0x120   : > { %v431_v60 = vadd.f32 %v426_v55, %v396_v57 }
 0x122   : > { %v463_v63 = vadd.f32 %v458_v58, %v431_v60 }
 0x124   : > { %v477_v1 = vadd.f32 %v470_v62, %v463_v63 }
 0x125   : > { %v393_v2 = vpop.f32.mrf.mxu2 }
 0x126   : > { %vm479_vm2 = vcmp.ge.f32.partialorder %v477_v1, 0.0  ;;  %v481_v3 = vmul.f32 0.1, %v477_v1  ;;  %v397_v4 = vadd.f32 %v393_v2, %v365_v0 }
 0x128   : > { %v483_v6 = vsel %vm479_vm2, %v477_v1, %v481_v3  ;;  %v432_v7 = vadd.f32 %v428_v5, %v397_v4 }
 0x129   : > { %v485_v8 = vpack.c.bf16 %v483_v6, %v483_v6 }
 0x12a   : > { %v464_v11 = vadd.f32 %v460_v9, %v432_v7 }
 0x12b   : > { %488 = vst.msk [vmem:[%s170_s21] sm:$0xf] %vm487_vm3, %v485_v8 }
 0x12c   : > { %v478_v12 = vadd.f32 %v475_v10, %v464_v11 }
 0x12e   : > { %vm480_vm4 = vcmp.ge.f32.partialorder %v478_v12, 0.0  ;;  %v482_v13 = vmul.f32 0.1, %v478_v12 }
 0x130   : > { %v484_v14 = vsel %vm480_vm4, %v478_v12, %v482_v13 }
 0x131   : > { %v486_v15 = vpack.c.bf16 %v484_v14, %v484_v14 }
 0x133   : > { %489 = vst.msk [vmem:[%s170_s21 + $0x4] sm:$0xf] %vm487_vm3, %v486_v15 }
 0x134 PF: > { %s13_s12 = sadd.s32 1, %s651_s12  }
 0x135   : > { %p10_p4 = scmp.ge.s32.totalorder %s13_s12, 4  }
 0x137   :  { %12 = sbr.rel (!%p10_p4) target bundleno = 1 (0x1), region = 73 }

// kernel: pwcnet_forward.13
= control target key start
LH: loop header
LB: loop body
LE: loop exit
PB: predicated region body
PF: predicated region fallthrough
CT: control target
= control target key end

     0   :  { %s1071_s21 = smov 0   ;;  %s1200_s0 = inlined_call_operand.vmem [shape: bf16[2,25,44], index: 0, kind: input, shape index: {}]   ;;  %s1201_s1 = inlined_call_operand.vmem [shape: bf16[9,16,25], index: 1, kind: input, shape index: {}]   ;;  %s1202_s2 = inlined_call_operand.vmem [shape: f32[16,1], index: 2, kind: input, shape index: {}]   ;;  %s1203_s3 = inlined_call_operand.vmem [shape: bf16[9,2,16], index: 3, kind: input, shape index: {}]   ;;  %s1204_s4 = inlined_call_operand.vmem [shape: f32[2,1], index: 4, kind: input, shape index: {}]   ;;  %s1205_s5 = inlined_call_operand.vmem [shape: f32[1,24], index: 5, kind: input, shape index: {}]   ;;  %s1206_s6 = inlined_call_operand.vmem [shape: f32[2,2,24], index: 6, kind: output, shape index: {}]  }
   0x1 LB: > { %s881_s22 = sadd.s32 4294967295, %s1023_s21   ;;  %p885_p0 = scmp.ge.s32.totalorder %s1023_s21, 1  ;;  %s1023_s21 = sphi %s1071_s21, %s16_s21  }
   0x2   : > { %p212_p1 = scmp.lt.s32.totalorder %s1023_s21, 3 }
   0x4   : > { %p213_p2 = pnand %p885_p0, %p212_p1 }
   0x5   : > { %p241_p3 = scmp.lt.s32.totalorder (!%p213_p2), %s881_s22, 1  ;;  %s1025_s27 = smov (!%p213_p2), 126  }
   0x6   : > { %216 = sbr.rel (%p213_p2) target bundleno = 720 (0x2d0), region = 44  ;;  %s1026_s28 = smov (!%p213_p2), 127  }
   0x7   : > { %s1027_s29 = smov (!%p213_p2), 122   ;;  %s1028_s30 = smov (!%p213_p2), 116  }
   0x8   : > { %s1029_s7 = smov (!%p213_p2), 121   ;;  %s1030_s8 = smov (!%p213_p2), 120  }
   0x9   : > { %s1031_s9 = smov (!%p213_p2), 115   ;;  %s1032_s10 = smov (!%p213_p2), 114  }
   0xb   : > { %s1208_s22 = smov (!%p241_p3, %s881_s22), 1  ;;  %vm284_vm0 = vcmask 1043456   ;;  %vm285_vm1 = vcmask 1044480   ;;  %v1033_v4 = vmov 65535   ;;  %v984_v8 = vld [vmem:[%s1201_s1] sm:$0xff]  ;;  %vm280_vm2 = vcmask 203776  }
   0xc   : > { %s981_s23 = sshll.u32 %s1208_s22, 4  ;;  %v286_v5 = vsel %vm284_vm0, 4294967295, %v1033_v4  ;;  %v986_v17 = vld [vmem:[%s1201_s1 + $0x10] sm:$0xff]  ;;  %v985_v20 = vld [vmem:[%s1201_s1 + $0x8] sm:$0xff]  ;;  %v576_v23 = vld [vmem:[%s1202_s2] sm:$0xff]  ;;  %v1034_v25 = vmov 0  }
   0xd   : > { %s245_s26 = scalar_lea.vmem %s1200_s0, %s981_s23  ;;  %v287_v6 = vsel %vm285_vm1, %v286_v5, 0  ;;  %v577_v24 = vld [vmem:[%s1202_s2 + $0x8] sm:$0xff]  ;;  %1013 = vset.pattern.permute.xlu1 %v1034_v25  ;;  %1014 = vset.pattern.permute.xlu2 %v1034_v25  ;;  %v987_v26 = vld [vmem:[%s1201_s1 + $0x18] sm:$0xff]  ;;  %v990_v32 = vld [vmem:[%s1201_s1 + $0x30] sm:$0xff]  ;;  %vm602_vm3 = vcmask 355328   ;;  %s1035_s23 = smov 7  }
   0xe   : > { %v901_v0 = vld [vmem:[%s245_s26 + $0x8] sm:$0xf]  ;;  %v983_v1 = vld [vmem:[%s245_s26 + $0x8] sm:$0x10]  ;;  %v982_v2 = vld [vmem:[%s245_s26] sm:$0xff]  ;;  %1015 = vset.pattern.permute.xlu0 %v1034_v25  ;;  %vm615_vm6 = vcmask 248888  }
   0xf   : > { %v902_v3 = vor.u32 %v983_v1, %v901_v0  ;;  %339 = vrot.lane.b32.xlu2 %v982_v2, %s1025_s27  ;;  %v988_v35 = vld [vmem:[%s1201_s1 + $0x20] sm:$0xff]  ;;  %v989_v40 = vld [vmem:[%s1201_s1 + $0x28] sm:$0xff]  ;;  %v991_v41 = vld [vmem:[%s1201_s1 + $0x38] sm:$0xff]  ;;  %603 = vst.msk [vmem:[#allocation2] sm:$0xf] %vm602_vm3, %v1034_v25  ;;  %vm631_vm7 = vcmask 130048  }
  0x10   : > { %v992_v43 = vld [vmem:[%s1201_s1 + $0x40] sm:$0xff]  ;;  %604 = vst.msk [vmem:[#allocation2 + $0x4] sm:$0xf] %vm602_vm3, %v1034_v25  ;;  %s888_s20 = sshll.u32 %s1208_s22, 1  ;;  %vm826_vm8 = vcmask 189440  }
  0x11   : > { %341 = vrot.lane.b32.xlu1 %v902_v3, %s1025_s27  ;;  %277 = vrot.lane.b32.xlu0 %v902_v3, %s1026_s28  ;;  %v315_v7 = vand.u32 %v902_v3, %v287_v6  ;;  %s249_s25 = scalar_lea.vmem %s1206_s6, %s888_s20 }
  0x13   : > { %323 = vmatpush.bf16.msra.mxu1 %v315_v7 }
  0x17   : > { %374 = vrot.lane.b32.xlu2 %v982_v2, %s1027_s29  ;;  %324 = vmatpush.bf16.msra.mxu1 %v982_v2 }
  0x19   : > { %376 = vrot.lane.b32.xlu1 %v902_v3, %s1027_s29  ;;  %275 = vrot.lane.b32.xlu0 %v982_v2, %s1026_s28 }
  0x1a   : > { %908 = vmatmul.msk.bf16.vlgmr.msra.gmra.mxu1 %vm280_vm2, %v984_v8 }
  0x1f   : > { %481 = vrot.lane.b32.xlu2 %v902_v3, %s1028_s30 }
  0x21   : > { %409 = vrot.lane.b32.xlu1 %v982_v2, %s1029_s7  ;;  %411 = vrot.lane.b32.xlu0 %v902_v3, %s1029_s7 }
  0x27   : > { %479 = vrot.lane.b32.xlu2 %v982_v2, %s1028_s30 }
  0x29   : > { %446 = vrot.lane.b32.xlu1 %v902_v3, %s1030_s8  ;;  %516 = vrot.lane.b32.xlu0 %v902_v3, %s1031_s9 }
  0x2f   : > { %551 = vrot.lane.b32.xlu2 %v902_v3, %s1032_s10 }
  0x31   : > { %444 = vrot.lane.b32.xlu1 %v982_v2, %s1030_s8  ;;  %514 = vrot.lane.b32.xlu0 %v982_v2, %s1031_s9 }
  0x37   : > { %585 = vperm.xlu2 %1014, %v577_v24  }
  0x39   : > { %549 = vrot.lane.b32.xlu0 %v982_v2, %s1032_s10  ;;  %580 = vperm.xlu1 %1013, %v576_v23  }
  0x69   : > { %v340_v9 = vpop.permute.xlu2 %339 }
  0x71   : > { %v375_v10 = vpop.permute.xlu2 %374 }
  0x79   : > { %v482_v11 = vpop.permute.xlu2 %481 }
  0x7a   : > { %v488_v16 = vand.u32 %v482_v11, %v287_v6  ;;  %v1016_v11 = vld [vmem:[%s1205_s5] ss:$0 sm:$0xff] }
  0x81   : > { %v480_v22 = vpop.permute.xlu2 %479 }
  0x83   : > { %v342_v12 = vpop.permute.xlu1 %341  ;;  %v278_v13 = vpop.permute.xlu0 %277 }
  0x84   : > { %v289_v14 = vand.u32 %v287_v6, %v278_v13  ;;  %v348_v15 = vand.u32 %v342_v12, %v287_v6 }
  0x86   : > { %297 = vmatpush.bf16.msra.mxu0 %v289_v14  ;;  %356 = vmatpush.bf16.msra.mxu2 %v348_v15 }
  0x89   : > { %v552_v30 = vpop.permute.xlu2 %551 }
  0x8a   : > { %357 = vmatpush.bf16.msra.mxu2 %v340_v9  ;;  %v558_v31 = vand.u32 %v552_v30, %v287_v6 }
  0x8b   : > { %v377_v18 = vpop.permute.xlu1 %376  ;;  %v276_v19 = vpop.permute.xlu0 %275 }
  0x8c   : > { %298 = vmatpush.bf16.msra.mxu0 %v276_v19  ;;  %v383_v21 = vand.u32 %v377_v18, %v287_v6 }
  0x8d   : > { %915 = vmatmul.msk.bf16.vlgmr.msra.gmra.mxu2 %vm280_vm2, %v986_v17 }
  0x8e   : > { %496 = vmatpush.bf16.msrb.mxu2 %v488_v16  ;;  %391 = vmatpush.bf16.msra.mxu3 %v383_v21 }
  0x8f   : > { %903 = vmatmul.msk.bf16.vlgmr.msra.gmra.mxu0 %vm280_vm2, %v985_v20 }
  0x91   : > { %v586_v18 = vpop.permute.xlu2 %585 }
  0x92   : > { %497 = vmatpush.bf16.msrb.mxu2 %v480_v22  ;;  %392 = vmatpush.bf16.msra.mxu3 %v375_v10 }
  0x93   : > { %v410_v27 = vpop.permute.xlu1 %409  ;;  %v412_v28 = vpop.permute.xlu0 %411 }
  0x94   : > { %v418_v29 = vand.u32 %v412_v28, %v287_v6 }
  0x95   : > { %922 = vmatmul.msk.bf16.vlgmr.msra.gmra.mxu3 %vm280_vm2, %v987_v26 }
  0x96   : > { %426 = vmatpush.bf16.msrb.mxu0 %v418_v29 }
  0x97   : > { %v326_v45 = vpop.f32.mrf.mxu1 }
  0x9a   : > { %427 = vmatpush.bf16.msrb.mxu0 %v410_v27 }
  0x9b   : > { %v447_v33 = vpop.permute.xlu1 %446  ;;  %v517_v34 = vpop.permute.xlu0 %516 }
  0x9c   : > { %v453_v36 = vand.u32 %v447_v33, %v287_v6  ;;  %v523_v37 = vand.u32 %v517_v34, %v287_v6  ;;  %v620_v33 = vld [vmem:[%s1203_s3] sm:$0x1] }
  0x9d   : > { %943 = vmatmul.msk.bf16.vlgmr.msrb.gmra.mxu2 %vm280_vm2, %v990_v32  ;;  %v819_v32 = vld [vmem:[%s1204_s4] sm:$0x3] }
  0x9e   : > { %566 = vmatpush.bf16.msra.mxu0 %v558_v31  ;;  %531 = vmatpush.bf16.msrb.mxu3 %v523_v37  ;;  %v969_v37 = vld [vmem:[%s1203_s3 + $0x4] sm:$0x1] }
  0x9f   : > { %461 = vmatpush.bf16.msrb.mxu1 %v453_v36  ;;  %929 = vmatmul.msk.bf16.vlgmr.msrb.gmra.mxu0 %vm280_vm2, %v988_v35  ;;  %v328_v49 = vpop.f32.mrf.mxu1  ;;  %v958_v35 = vld [vmem:[%s1203_s3 + $0x1] sm:$0x1] }
  0xa3   : > { %v445_v38 = vpop.permute.xlu1 %444  ;;  %v515_v39 = vpop.permute.xlu0 %514 }
  0xa4   : > { %462 = vmatpush.bf16.msrb.mxu1 %v445_v38  ;;  %532 = vmatpush.bf16.msrb.mxu3 %v515_v39 }
  0xa7   : > { %936 = vmatmul.msk.bf16.vlgmr.msrb.gmra.mxu1 %vm280_vm2, %v989_v40  ;;  %950 = vmatmul.msk.bf16.vlgmr.msrb.gmra.mxu3 %vm280_vm2, %v991_v41  ;;  %v965_v41 = vld [vmem:[%s1203_s3 + $0x2] sm:$0x1] }
  0xab   : > { %v550_v42 = vpop.permute.xlu0 %549  ;;  %v581_v4 = vpop.permute.xlu1 %580 }
  0xac   : > { %567 = vmatpush.bf16.msra.mxu0 %v550_v42  ;;  %v967_v42 = vld [vmem:[%s1203_s3 + $0x3] sm:$0x1] }
  0xaf   : > { %957 = vmatmul.msk.bf16.vlgmr.msra.gmra.mxu0 %vm280_vm2, %v992_v43 }
 0x10c   : > { %v300_v44 = vpop.f32.mrf.mxu0 }
 0x10d   : > { %v327_v52 = vadd.f32 %v326_v45, %v300_v44  ;;  %v971_v45 = vld [vmem:[%s1203_s3 + $0x5] sm:$0x1] }
 0x110   : > { %v359_v46 = vpop.f32.mrf.mxu2 }
 0x111   : > { %v364_v53 = vadd.f32 %v359_v46, %v327_v52 }
 0x114   : > { %v302_v47 = vpop.f32.mrf.mxu0 }
 0x115   : > { %v329_v59 = vadd.f32 %v328_v49, %v302_v47  ;;  %v973_v47 = vld [vmem:[%s1203_s3 + $0x6] sm:$0x1]  ;;  %v977_v49 = vld [vmem:[%s1203_s3 + $0x8] sm:$0x1] }
 0x118   : > { %v394_v48 = vpop.f32.mrf.mxu3  ;;  %v361_v50 = vpop.f32.mrf.mxu2 }
 0x119   : > { %v399_v54 = vadd.f32 %v394_v48, %v364_v53  ;;  %v365_v62 = vadd.f32 %v361_v50, %v329_v59  ;;  %v975_v48 = vld [vmem:[%s1203_s3 + $0x7] sm:$0x1] }
 0x11c   : > { %v429_v51 = vpop.f32.mrf.mxu0 }
 0x11d   : > { %v434_v56 = vadd.f32 %v429_v51, %v399_v54 }
 0x120   : > { %v396_v55 = vpop.f32.mrf.mxu3  ;;  %v499_v61 = vpop.f32.mrf.mxu2 }
 0x121   : > { %v400_v63 = vadd.f32 %v396_v55, %v365_v62 }
 0x124   : > { %v431_v57 = vpop.f32.mrf.mxu0  ;;  %v464_v58 = vpop.f32.mrf.mxu1 }
 0x125   : > { %v469_v60 = vadd.f32 %v464_v58, %v434_v56  ;;  %v435_v2 = vadd.f32 %v431_v57, %v400_v63 }
 0x127   : > { %v504_v0 = vadd.f32 %v499_v61, %v469_v60 }
 0x128   : > { %v501_v10 = vpop.f32.mrf.mxu2 }
 0x12a   : > { %v534_v1 = vpop.f32.mrf.mxu3 }
 0x12b   : > { %v539_v3 = vadd.f32 %v534_v1, %v504_v0 }
 0x12c   : > { %v466_v5 = vpop.f32.mrf.mxu1  ;;  %v569_v6 = vpop.f32.mrf.mxu0 }
 0x12d   : > { %v470_v7 = vadd.f32 %v466_v5, %v435_v2  ;;  %v574_v8 = vadd.f32 %v569_v6, %v539_v3 }
 0x12f   : > { %v588_v9 = vadd.f32 %v581_v4, %v574_v8  ;;  %v505_v13 = vadd.f32 %v501_v10, %v470_v7 }
 0x131   : > { %vm590_vm4 = vcmp.ge.f32.partialorder %v588_v9, 0.0  ;;  %v592_v12 = vmul.f32 0.1, %v588_v9 }
 0x132   : > { %v536_v14 = vpop.f32.mrf.mxu3 }
 0x133   : > { %v594_v15 = vsel %vm590_vm4, %v588_v9, %v592_v12  ;;  %v540_v16 = vadd.f32 %v536_v14, %v505_v13 }
 0x134   : > { %v571_v17 = vpop.f32.mrf.mxu0  ;;  %v600_v19 = vmul.f32 %v1016_v11, %v594_v15 }
 0x135   : > { %v575_v20 = vadd.f32 %v571_v17, %v540_v16 }
 0x136   : > { %v605_v21 = vpack.c.bf16 %v600_v19, %v600_v19 }
 0x137   : > { %v589_v22 = vadd.f32 %v586_v18, %v575_v20 }
 0x138   : > { %609 = vrot.lane.b32.xlu0 %v605_v21, %s1035_s23 }
 0x139   : > { %vm591_vm5 = vcmp.ge.f32.partialorder %v589_v22, 0.0  ;;  %v593_v23 = vmul.f32 0.1, %v589_v22 }
 0x13b   : > { %v595_v24 = vsel %vm591_vm5, %v589_v22, %v593_v23 }
 0x13c   : > { %v601_v25 = vmul.f32 %v1016_v11, %v595_v24 }
 0x13e   : > { %v606_v26 = vpack.c.bf16 %v601_v25, %v601_v25 }
 0x140   : > { %611 = vrot.lane.b32.xlu1 %v606_v26, %s1035_s23 }
 0x1aa   : > { %v610_v27 = vpop.permute.xlu0 %609 }
 0x1ab   : > { %616 = vst.msk [vmem:[#allocation2] sm:$0xf] %vm615_vm6, %v610_v27 }
 0x1b2   : > { %v612_v28 = vpop.permute.xlu1 %611  ;;  %v961_v29 = vld [vmem:[#allocation2] sm:$0xf] }
 0x1b3   : > { %617 = vst.msk [vmem:[#allocation2 + $0x4] sm:$0xf] %vm615_vm6, %v612_v28 }
 0x1ba   : > { %v993_v30 = vld [vmem:[#allocation2] sm:$0xf0] }
 0x1bb   : > { %v962_v31 = vor.u32 %v993_v30, %v961_v29 }
 0x1bd   : > { %689 = vrot.lane.b32.xlu1 %v962_v31, %s1027_s29  ;;  %667 = vrot.lane.b32.xlu0 %v962_v31, %s1025_s27 }
 0x1be   : > { %628 = vrot.lane.b32.xlu2 %v962_v31, %s1026_s28  ;;  %659 = vmatpush.bf16.msra.mxu2 %v962_v31 }
 0x1c1   : > { %964 = vmatmul.msk.bf16.vlgmr.msra.gmra.mxu2 %vm631_vm7, %v620_v33 }
 0x1c5   : > { %755 = vrot.lane.b32.xlu1 %v962_v31, %s1028_s30  ;;  %733 = vrot.lane.b32.xlu0 %v962_v31, %s1030_s8 }
 0x1c6   : > { %711 = vrot.lane.b32.xlu2 %v962_v31, %s1029_s7 }
 0x1cd   : > { %822 = vperm.xlu1 %1013, %v819_v32   ;;  %799 = vrot.lane.b32.xlu0 %v962_v31, %s1032_s10 }
 0x1ce   : > { %777 = vrot.lane.b32.xlu2 %v962_v31, %s1031_s9 }
 0x218   : > { %v629_v34 = vpop.permute.xlu2 %628 }
 0x219   : > { %642 = vmatpush.bf16.msra.mxu1 %v629_v34 }
 0x21c   : > { %963 = vmatmul.msk.bf16.vlgmr.msra.gmra.mxu1 %vm631_vm7, %v958_v35 }
 0x220   : > { %v712_v36 = vpop.permute.xlu2 %711 }
 0x221   : > { %724 = vmatpush.bf16.msrb.mxu1 %v712_v36 }
 0x228   : > { %v778_v40 = vpop.permute.xlu2 %777 }
 0x22c   : > { %970 = vmatmul.msk.bf16.vlgmr.msrb.gmra.mxu1 %vm631_vm7, %v969_v37 }
 0x22f   : > { %v690_v38 = vpop.permute.xlu1 %689  ;;  %v668_v39 = vpop.permute.xlu0 %667 }
 0x230   : > { %680 = vmatpush.bf16.msra.mxu3 %v668_v39  ;;  %702 = vmatpush.bf16.msrb.mxu0 %v690_v38 }
 0x233   : > { %966 = vmatmul.msk.bf16.vlgmr.msra.gmra.mxu3 %vm631_vm7, %v965_v41  ;;  %968 = vmatmul.msk.bf16.vlgmr.msrb.gmra.mxu0 %vm631_vm7, %v967_v42 }
 0x234   : > { %790 = vmatpush.bf16.msra.mxu0 %v778_v40 }
 0x237   : > { %v756_v43 = vpop.permute.xlu1 %755  ;;  %v734_v44 = vpop.permute.xlu0 %733 }
 0x238   : > { %746 = vmatpush.bf16.msrb.mxu2 %v734_v44  ;;  %768 = vmatpush.bf16.msrb.mxu3 %v756_v43 }
 0x23b   : > { %972 = vmatmul.msk.bf16.vlgmr.msrb.gmra.mxu2 %vm631_vm7, %v971_v45 }
 0x23f   : > { %v800_v46 = vpop.permute.xlu0 %799  ;;  %v823_v11 = vpop.permute.xlu1 %822 }
 0x240   : > { %812 = vmatpush.bf16.msra.mxu1 %v800_v46 }
 0x243   : > { %974 = vmatmul.msk.bf16.vlgmr.msrb.gmra.mxu3 %vm631_vm7, %v973_v47  ;;  %976 = vmatmul.msk.bf16.vlgmr.msra.gmra.mxu0 %vm631_vm7, %v975_v48 }
 0x244   : > { %978 = vmatmul.msk.bf16.vlgmr.msra.gmra.mxu1 %vm631_vm7, %v977_v49  ;;  %v661_v50 = vpop.f32.mrf.mxu2 }
 0x24c   : > { %v663_v51 = vpop.f32.mrf.mxu2 }
 0x299   : > { %v644_v52 = vpop.f32.mrf.mxu1 }
 0x29a   : > { %v662_v59 = vadd.f32 %v661_v50, %v644_v52 }
 0x2a1   : > { %v646_v53 = vpop.f32.mrf.mxu1 }
 0x2a9   : > { %v726_v54 = vpop.f32.mrf.mxu1 }
 0x2b0   : > { %v704_v55 = vpop.f32.mrf.mxu0 }
 0x2b1   : > { %v728_v56 = vpop.f32.mrf.mxu1 }
 0x2b6   : > { %v682_v57 = vpop.f32.mrf.mxu3 }
 0x2b7   : > { %v686_v60 = vadd.f32 %v682_v57, %v662_v59 }
 0x2b8   : > { %v706_v58 = vpop.f32.mrf.mxu0 }
 0x2b9   : > { %v708_v63 = vadd.f32 %v704_v55, %v686_v60 }
 0x2bb   : > { %v730_v2 = vadd.f32 %v726_v54, %v708_v63 }
 0x2be   : > { %v684_v61 = vpop.f32.mrf.mxu3  ;;  %v748_v62 = vpop.f32.mrf.mxu2 }
 0x2bf   : > { %v752_v3 = vadd.f32 %v748_v62, %v730_v2 }
 0x2c0   : > { %v792_v0 = vpop.f32.mrf.mxu0 }
 0x2c1   : > { %v814_v1 = vpop.f32.mrf.mxu1 }
 0x2c6   : > { %v770_v4 = vpop.f32.mrf.mxu3  ;;  %v750_v5 = vpop.f32.mrf.mxu2 }
 0x2c7   : > { %v774_v6 = vadd.f32 %v770_v4, %v752_v3 }
 0x2c8   : > { %v794_v7 = vpop.f32.mrf.mxu0 }
 0x2c9   : > { %v796_v8 = vadd.f32 %v792_v0, %v774_v6  ;;  %v816_v9 = vpop.f32.mrf.mxu1 }
 0x2cb   : > { %v818_v10 = vadd.f32 %v814_v1, %v796_v8 }
 0x2cd   : > { %v825_v12 = vadd.f32 %v823_v11, %v818_v10 }
 0x2ce   : > { %v772_v13 = vpop.f32.mrf.mxu3 }
 0x2cf   : > { %827 = vst.msk [vmem:[%s249_s25] sm:$0x3] %vm826_vm8, %v825_v12 }
 0x2d0 PF: > { %s16_s21 = sadd.s32 1, %s1023_s21  }
 0x2d1   : > { %p13_p4 = scmp.ge.s32.totalorder %s16_s21, 4  }
 0x2d3   :  { %15 = sbr.rel (!%p13_p4) target bundleno = 1 (0x1), region = 90 }

// kernel: pwcnet_forward.12
= control target key start
LH: loop header
LB: loop body
LE: loop exit
PB: predicated region body
PF: predicated region fallthrough
CT: control target
= control target key end

     0   :  { %s1453_s9 = smov 0   ;;  %s2098_s0 = inlined_call_operand.vmem [shape: bf16[2,16,4,4], index: 0, kind: input, shape index: {}]   ;;  %s2099_s1 = inlined_call_operand.vmem [shape: bf16[2,16,6,6], index: 1, kind: input, shape index: {}]   ;;  %s2100_s2 = inlined_call_operand.vmem [shape: bf16[2,9,4,4], index: 2, kind: output, shape index: {}]  }
   0x1 LB: > { %s1123_s10 = sadd.s32 4294967295, %s1434_s9   ;;  %p1127_p0 = scmp.ge.s32.totalorder %s1434_s9, 1  ;;  %s1434_s9 = sphi %s1453_s9, %s12_s9  }
   0x2   : > { %p122_p1 = scmp.lt.s32.totalorder %s1434_s9, 3 }
   0x4   : > { %p123_p2 = pnand %p1127_p0, %p122_p1 }
   0x5   : > { %p149_p3 = scmp.lt.s32.totalorder (!%p123_p2), %s1123_s10, 1  ;;  %s1436_s19 = smov (!%p123_p2), 127  }
   0x6   : > { %126 = sbr.rel (%p123_p2) target bundleno = 275 (0x113), region = 28  ;;  %s1437_s20 = smov (!%p123_p2), 126  }
   0xb   : > { %s2130_s10 = smov (!%p149_p3, %s1123_s10), 1  ;;  %vm455_vm0 = vcmask 1042432   ;;  %vm456_vm1 = vcmask 1046532   ;;  %vm264_vm4 = vcmask 25600   ;;  %vm763_vm5 = vcmask 1041408  }
   0xc   : > { %s1176_s11 = sshll.u32 %s2130_s10, 6  ;;  %s1175_s12 = sshll.u32 %s2130_s10, 5  ;;  %vm1650_vm2 = vmor %vm455_vm0, %vm456_vm1  ;;  %vm764_vm6 = vcmask 1045508  }
   0xd   : > { %s1468_s15 = scalar_lea.vmem %s2099_s1, %s1176_s11  ;;  %s1473_s18 = scalar_lea.vmem %s2098_s0, %s1175_s12  ;;  %vm1799_vm7 = vmor %vm763_vm5, %vm764_vm6 }
   0xe   : > { %v200_v0 = vld [vmem:[%s1468_s15 + $0x10] sm:$0x7]  ;;  %v201_v1 = vld [vmem:[%s1468_s15 + $0x14] sm:$0x7]  ;;  %v196_v4 = vld [vmem:[%s1468_s15] sm:$0x7] }
   0xf   : > { %v1477_v2 = vunpack.c.l.bf16 %v200_v0  ;;  %v1479_v3 = vunpack.c.l.bf16 %v201_v1  ;;  %v197_v5 = vld [vmem:[%s1468_s15 + $0x4] sm:$0x7]  ;;  %v1483_v6 = vunpack.c.l.bf16 %v196_v4  ;;  %v164_v8 = vld [vmem:[%s1473_s18] sm:$0x3]  ;;  %v165_v9 = vld [vmem:[%s1473_s18 + $0x2] sm:$0x3] }
  0x10   : > { %v1485_v7 = vunpack.c.l.bf16 %v197_v5  ;;  %v202_v10 = vld [vmem:[%s1468_s15 + $0x18] sm:$0x7]  ;;  %v1494_v12 = vunpack.c.l.bf16 %v164_v8  ;;  %v1496_v13 = vunpack.c.l.bf16 %v165_v9  ;;  %v203_v14 = vld [vmem:[%s1468_s15 + $0x1c] sm:$0x7]  ;;  %v198_v16 = vld [vmem:[%s1468_s15 + $0x8] sm:$0x7] }
  0x11   : > { %v1492_v11 = vpack.i.bf16 %v1479_v3, %v1477_v2  ;;  %v199_v17 = vld [vmem:[%s1468_s15 + $0xc] sm:$0x7]  ;;  %v166_v18 = vld [vmem:[%s1473_s18 + $0x4] sm:$0x3]  ;;  %v168_v19 = vld [vmem:[%s1473_s18 + $0x8] sm:$0x3]  ;;  %v1513_v22 = vunpack.c.l.bf16 %v202_v10  ;;  %v1515_v23 = vunpack.c.l.bf16 %v203_v14  ;;  %v1520_v25 = vunpack.c.l.bf16 %v198_v16 }
  0x12   : > { %v1501_v15 = vpack.i.bf16 %v1485_v7, %v1483_v6  ;;  %v228_v20 = vmul.f32 %v1483_v6, %v1494_v12  ;;  %v229_v21 = vmul.f32 %v1485_v7, %v1496_v13  ;;  %v167_v24 = vld [vmem:[%s1473_s18 + $0x6] sm:$0x3]  ;;  %v1522_v26 = vunpack.c.l.bf16 %v199_v17  ;;  %v169_v28 = vld [vmem:[%s1473_s18 + $0xa] sm:$0x3]  ;;  %v170_v32 = vld [vmem:[%s1473_s18 + $0xc] sm:$0x3] }
  0x13   : > { %1199 = vrot.lane.b32.xlu1 %v1492_v11, %s1436_s19  ;;  %v1524_v27 = vunpack.c.l.bf16 %v166_v18  ;;  %v1527_v30 = vunpack.c.l.bf16 %v167_v24  ;;  %v1529_v31 = vunpack.c.l.bf16 %v168_v19  ;;  %v204_v34 = vld [vmem:[%s1468_s15 + $0x20] sm:$0x7]  ;;  %v1537_v35 = vpack.i.bf16 %v1515_v23, %v1513_v22  ;;  %v205_v37 = vld [vmem:[%s1468_s15 + $0x24] sm:$0x7]  ;;  %v171_v40 = vld [vmem:[%s1473_s18 + $0xe] sm:$0x3] }
  0x14   : > { %1189 = vrot.lane.b32.xlu0 %v1501_v15, %s1436_s19  ;;  %v230_v29 = vadd.f32 %v229_v21, %v228_v20  ;;  %v1542_v38 = vunpack.c.l.bf16 %v169_v28  ;;  %v1549_v41 = vpack.i.bf16 %v1522_v26, %v1520_v25  ;;  %v210_v43 = vld [vmem:[%s1468_s15 + $0x38] sm:$0x7]  ;;  %v211_v44 = vld [vmem:[%s1468_s15 + $0x3c] sm:$0x7]  ;;  %v1553_v45 = vunpack.c.l.bf16 %v170_v32  ;;  %v208_v46 = vld [vmem:[%s1468_s15 + $0x30] sm:$0x7] }
  0x15   : > { %v231_v33 = vmul.f32 %v1520_v25, %v1524_v27  ;;  %v233_v36 = vmul.f32 %v1522_v26, %v1527_v30  ;;  %v235_v39 = vmul.f32 %v1477_v2, %v1529_v31  ;;  %v209_v47 = vld [vmem:[%s1468_s15 + $0x34] sm:$0x7]  ;;  %v1557_v48 = vunpack.c.l.bf16 %v204_v34  ;;  %v172_v56 = vld [vmem:[%s1473_s18 + $0x10] sm:$0x3]  ;;  %v206_v57 = vld [vmem:[%s1468_s15 + $0x28] sm:$0x7] }
  0x16   : > { %v237_v49 = vmul.f32 %v1479_v3, %v1542_v38  ;;  %v1561_v51 = vunpack.c.l.bf16 %v205_v37  ;;  %v1565_v52 = vunpack.c.l.bf16 %v171_v40  ;;  %v239_v53 = vmul.f32 %v1513_v22, %v1553_v45  ;;  %v207_v58 = vld [vmem:[%s1468_s15 + $0x2c] sm:$0x7]  ;;  %v173_v0 = vld [vmem:[%s1473_s18 + $0x12] sm:$0x3]  ;;  %v174_v10 = vld [vmem:[%s1473_s18 + $0x14] sm:$0x3] }
  0x17   : > { %v232_v42 = vadd.f32 %v231_v33, %v230_v29  ;;  %v1569_v54 = vunpack.c.l.bf16 %v210_v43  ;;  %v1571_v55 = vunpack.c.l.bf16 %v211_v44  ;;  %v1578_v60 = vunpack.c.l.bf16 %v208_v46  ;;  %v175_v19 = vld [vmem:[%s1473_s18 + $0x16] sm:$0x3]  ;;  %v176_v29 = vld [vmem:[%s1473_s18 + $0x18] sm:$0x3]  ;;  %v178_v44 = vld [vmem:[%s1473_s18 + $0x1c] sm:$0x3] }
  0x18   : > { %v1580_v61 = vunpack.c.l.bf16 %v209_v47  ;;  %v1584_v62 = vpack.i.bf16 %v1561_v51, %v1557_v48  ;;  %v241_v63 = vmul.f32 %v1515_v23, %v1565_v52  ;;  %v1591_v1 = vunpack.c.l.bf16 %v172_v56  ;;  %v179_v46 = vld [vmem:[%s1473_s18 + $0x1e] sm:$0x3]  ;;  %s1177_s21 = smul.u32 18, %s2130_s10 }
  0x19   : > { %v234_v50 = vadd.f32 %v233_v36, %v232_v42  ;;  %v1593_v5 = vunpack.c.l.bf16 %v206_v57  ;;  %v1595_v8 = vunpack.c.l.bf16 %v207_v58  ;;  %v1599_v9 = vpack.i.bf16 %v1571_v55, %v1569_v54  ;;  %v177_v36 = vld [vmem:[%s1473_s18 + $0x1a] sm:$0x3] }
  0x1a   : > { %1209 = vrot.lane.b32.xlu2 %v1584_v62, %s1436_s19  ;;  %v1604_v14 = vpack.i.bf16 %v1580_v61, %v1578_v60  ;;  %v1606_v16 = vunpack.c.l.bf16 %v173_v0  ;;  %v243_v18 = vmul.f32 %v1557_v48, %v1591_v1  ;;  %v1615_v28 = vunpack.c.l.bf16 %v174_v10  ;;  %s1743_s24 = scalar_lea.vmem %s2100_s2, %s1177_s21 }
  0x1b   : > { %1204 = vrot.lane.b32.xlu1 %v1537_v35, %s1436_s19  ;;  %v236_v59 = vadd.f32 %v235_v39, %v234_v50  ;;  %v1213_v24 = vpack.i.bf16 %v1595_v8, %v1593_v5  ;;  %v1622_v33 = vunpack.c.l.bf16 %v175_v19  ;;  %v2103_v37 = vrot.slane %v1483_v6, 4 }
  0x1c   : > { %1194 = vrot.lane.b32.xlu0 %v1549_v41, %s1436_s19  ;;  %v245_v21 = vmul.f32 %v1561_v51, %v1606_v16  ;;  %v247_v34 = vmul.f32 %v1593_v5, %v1615_v28  ;;  %v2101_v39 = vrot.slane %v1485_v7, 4  ;;  %v1629_v40 = vunpack.c.l.bf16 %v176_v29 }
  0x1d   : > { %v238_v4 = vadd.f32 %v237_v49, %v236_v59  ;;  %v249_v43 = vmul.f32 %v1595_v8, %v1622_v33  ;;  %v1636_v47 = vunpack.c.l.bf16 %v177_v36  ;;  %v460_v56 = vrot.slane %v2103_v37, 5 }
  0x1e   : > { %v251_v49 = vmul.f32 %v1578_v60, %v1629_v40  ;;  %v1136_v57 = vrot.slane %v1485_v7, 9  ;;  %v467_v58 = vrot.slane %v2101_v39, 5  ;;  %v1646_v59 = vunpack.c.l.bf16 %v178_v44 }
  0x1f   : > { %v240_v17 = vadd.f32 %v239_v53, %v238_v4  ;;  %v1135_v53 = vrot.slane %v1483_v6, 9  ;;  %v1654_v10 = vunpack.c.l.bf16 %v179_v46  ;;  %v488_v19 = vrot.slane %v1477_v2, 4 }
  0x20   : > { %v468_v29 = vsel %vm1650_vm2, %v1136_v57, %v467_v58  ;;  %v2108_v36 = vrot.slane %v1520_v25, 4  ;;  %v1140_v46 = vrot.slane %v1479_v3, 9  ;;  %v1143_v37 = vrot.slane %v1557_v48, 9 }
  0x21   : > { %v242_v20 = vadd.f32 %v241_v63, %v240_v17  ;;  %v253_v63 = vmul.f32 %v1580_v61, %v1636_v47  ;;  %v255_v17 = vmul.f32 %v1569_v54, %v1646_v59  ;;  %v491_v44 = vrot.slane %v488_v19, 5 }
  0x22   : > { %1214 = vrot.lane.b32.xlu2 %v1213_v24, %s1436_s19 }
  0x23   : > { %1224 = vrot.lane.b32.xlu1 %v1599_v9, %s1436_s19  ;;  %v244_v32 = vadd.f32 %v243_v18, %v242_v20  ;;  %v257_v20 = vmul.f32 %v1571_v55, %v1654_v10 }
  0x24   : > { %1219 = vrot.lane.b32.xlu0 %v1604_v14, %s1436_s19 }
  0x25   : > { %v246_v42 = vadd.f32 %v245_v21, %v244_v32  ;;  %v461_v21 = vsel %vm1650_vm2, %v1135_v53, %v460_v56  ;;  %v475_v53 = vrot.slane %v2108_v36, 5  ;;  %v2107_v56 = vrot.slane %v1522_v26, 4 }
  0x26   : > { %v1697_v39 = vpack.i.bf16 %v468_v29, %v461_v21  ;;  %v1147_v36 = vrot.slane %v1578_v60, 9 }
  0x27   : > { %v248_v50 = vadd.f32 %v247_v34, %v246_v42  ;;  %v470_v34 = vmul.f32 %v468_v29, %v1496_v13  ;;  %v1139_v42 = vrot.slane %v1477_v2, 9 }
  0x29   : > { %v250_v0 = vadd.f32 %v249_v43, %v248_v50 }
  0x2a   : > { %1229 = vrot.lane.b32.xlu2 %v1501_v15, %s1437_s20  ;;  %v1137_v15 = vrot.slane %v1520_v25, 9 }
  0x2b   : > { %1239 = vrot.lane.b32.xlu1 %v1492_v11, %s1437_s20  ;;  %v252_v18 = vadd.f32 %v251_v49, %v250_v0  ;;  %v496_v11 = vrot.slane %v1479_v3, 4  ;;  %v2102_v49 = vrot.slane %v1513_v22, 4  ;;  %v2104_v0 = vrot.slane %v1515_v23, 4 }
  0x2c   : > { %1234 = vrot.lane.b32.xlu0 %v1549_v41, %s1437_s20  ;;  %v463_v41 = vmul.f32 %v461_v21, %v1494_v12 }
  0x2d   : > { %v254_v32 = vadd.f32 %v253_v63, %v252_v18  ;;  %v499_v50 = vrot.slane %v496_v11, 5  ;;  %v1138_v63 = vrot.slane %v1522_v26, 9  ;;  %v483_v18 = vrot.slane %v2107_v56, 5 }
  0x2e   : > { %v471_v58 = vadd.f32 %v470_v34, %v463_v41  ;;  %v492_v41 = vsel %vm1650_vm2, %v1139_v42, %v491_v44  ;;  %v1142_v44 = vrot.slane %v1515_v23, 9 }
  0x2f   : > { %v256_v43 = vadd.f32 %v255_v17, %v254_v32  ;;  %v1691_v17 = vsel %vm1650_vm2, %v1137_v15, %v475_v53  ;;  %v500_v34 = vsel %vm1650_vm2, %v1140_v46, %v499_v50  ;;  %v2106_v15 = vrot.slane %v1557_v48, 4 }
  0x30   : > { %v484_v21 = vsel %vm1650_vm2, %v1138_v63, %v483_v18  ;;  %v494_v42 = vmul.f32 %v492_v41, %v1529_v31  ;;  %v515_v46 = vrot.slane %v2104_v0, 5  ;;  %v2110_v18 = vrot.slane %v1593_v5, 4 }
  0x31   : > { %v258_v57 = vadd.f32 %v257_v20, %v256_v43  ;;  %v1141_v20 = vrot.slane %v1513_v22, 9  ;;  %v507_v43 = vrot.slane %v2102_v49, 5  ;;  %v486_v50 = vmul.f32 %v484_v21, %v1527_v30 }
  0x32   : > { %1244 = vrot.lane.b32.xlu2 %v1537_v35, %s1437_s20  ;;  %v2105_v49 = vrot.slane %v1561_v51, 4  ;;  %v523_v0 = vrot.slane %v2106_v15, 5 }
  0x33   : > { %1254 = vrot.lane.b32.xlu1 %v1213_v24, %s1437_s20  ;;  %v259_v32 = vmul.f32 0.0625, %v258_v57  ;;  %v478_v24 = vmul.f32 %v1691_v17, %v1524_v27  ;;  %v502_v57 = vmul.f32 %v500_v34, %v1542_v38  ;;  %v508_v63 = vsel %vm1650_vm2, %v1141_v20, %v507_v43 }
  0x34   : > { %1249 = vrot.lane.b32.xlu0 %v1584_v62, %s1437_s20  ;;  %v552_v20 = vrot.slane %v1578_v60, 4  ;;  %v524_v56 = vsel %vm1650_vm2, %v1143_v37, %v523_v0 }
  0x35   : > { %vm260_vm3 = vcmp.ge.f32.partialorder %v259_v32, 0.0  ;;  %v261_v62 = vmul.f32 0.1, %v259_v32  ;;  %v479_v29 = vadd.f32 %v478_v24, %v471_v58  ;;  %v2109_v24 = vrot.slane %v1595_v8, 4 }
  0x37   : > { %v262_v53 = vsel %vm260_vm3, %v259_v32, %v261_v62  ;;  %v487_v58 = vadd.f32 %v486_v50, %v479_v29  ;;  %v516_v32 = vsel %vm1650_vm2, %v1142_v44, %v515_v46  ;;  %v510_v62 = vmul.f32 %v508_v63, %v1553_v45 }
  0x38   : > { %v263_v35 = vpack.c.bf16 %v262_v53, %v262_v53  ;;  %v560_v29 = vrot.slane %v1580_v61, 4  ;;  %v1144_v50 = vrot.slane %v1561_v51, 9  ;;  %v531_v53 = vrot.slane %v2105_v49, 5 }
  0x39   : > { %v495_v43 = vadd.f32 %v494_v42, %v487_v58  ;;  %v518_v44 = vmul.f32 %v516_v32, %v1565_v52  ;;  %v1145_v42 = vrot.slane %v1593_v5, 9  ;;  %v1750_v58 = vpack.i.bf16 %v516_v32, %v508_v63 }
  0x3a   : > { %265 = vst.msk [vmem:[%s1743_s24] sm:$0x3] %vm264_vm4, %v263_v35  ;;  %1259 = vrot.lane.b32.xlu2 %v1604_v14, %s1437_s20  ;;  %v539_v49 = vrot.slane %v2110_v18, 5  ;;  %v547_v15 = vrot.slane %v2109_v24, 5  ;;  %v526_v63 = vmul.f32 %v524_v56, %v1591_v1  ;;  %v1764_v32 = vpack.i.bf16 %v500_v34, %v492_v41 }
  0x3b   : > { %1269 = vrot.lane.b32.xlu1 %v1697_v39, %s1436_s19  ;;  %v503_v46 = vadd.f32 %v502_v57, %v495_v43  ;;  %v555_v57 = vrot.slane %v552_v20, 5  ;;  %v1148_v14 = vrot.slane %v1580_v61, 9  ;;  %v563_v43 = vrot.slane %v560_v29, 5 }
  0x3c   : > { %1264 = vrot.lane.b32.xlu0 %v1599_v9, %s1437_s20  ;;  %v1146_v9 = vrot.slane %v1595_v8, 9  ;;  %v532_v24 = vsel %vm1650_vm2, %v1144_v50, %v531_v53  ;;  %v540_v0 = vsel %vm1650_vm2, %v1145_v42, %v539_v49 }
  0x3d   : > { %v511_v35 = vadd.f32 %v510_v62, %v503_v46  ;;  %v534_v37 = vmul.f32 %v532_v24, %v1606_v16  ;;  %v1273_v62 = vpack.i.bf16 %v484_v21, %v1691_v17  ;;  %v2111_v46 = vrot.slane %v1569_v54, 4 }
  0x3e   : > { %v548_v41 = vsel %vm1650_vm2, %v1146_v9, %v547_v15  ;;  %v542_v34 = vmul.f32 %v540_v0, %v1615_v28  ;;  %v556_v50 = vsel %vm1650_vm2, %v1147_v36, %v555_v57  ;;  %v564_v49 = vsel %vm1650_vm2, %v1148_v14, %v563_v43 }
  0x3f   : > { %v519_v18 = vadd.f32 %v518_v44, %v511_v35  ;;  %v2112_v17 = vrot.slane %v1571_v55, 4  ;;  %v550_v21 = vmul.f32 %v548_v41, %v1622_v33  ;;  %v1789_v15 = vpack.i.bf16 %v548_v41, %v540_v0 }
  0x40   : > { %v558_v42 = vmul.f32 %v556_v50, %v1629_v40  ;;  %v1149_v36 = vrot.slane %v1569_v54, 9  ;;  %v1796_v9 = vpack.i.bf16 %v564_v49, %v556_v50  ;;  %v1150_v35 = vrot.slane %v1571_v55, 9 }
  0x41   : > { %v527_v53 = vadd.f32 %v526_v63, %v519_v18  ;;  %v571_v18 = vrot.slane %v2111_v46, 5  ;;  %v1158_v14 = vrot.slane %v1477_v2, 10  ;;  %v579_v43 = vrot.slane %v2112_v17, 5 }
  0x42   : > { %1274 = vrot.lane.b32.xlu2 %v1273_v62, %s1436_s19  ;;  %v1159_v0 = vrot.slane %v1479_v3, 10  ;;  %v802_v41 = vrot.slane %v496_v11, 6 }
  0x43   : > { %1284 = vrot.lane.b32.xlu1 %v1750_v58, %s1436_s19  ;;  %v535_v44 = vadd.f32 %v534_v37, %v527_v53  ;;  %v795_v37 = vrot.slane %v488_v19, 6  ;;  %v1288_v53 = vpack.i.bf16 %v532_v24, %v524_v56  ;;  %v580_v11 = vsel %vm1650_vm2, %v1150_v35, %v579_v43 }
  0x44   : > { %1279 = vrot.lane.b32.xlu0 %v1764_v32, %s1436_s19  ;;  %v803_v17 = vsel %vm1799_vm7, %v1159_v0, %v802_v41  ;;  %v582_v24 = vmul.f32 %v580_v11, %v1654_v10  ;;  %v1154_v35 = vrot.slane %v1483_v6, 10  ;;  %v2119_v43 = vrot.slane %v1483_v6, 4 }
  0x45   : > { %v543_v57 = vadd.f32 %v542_v34, %v535_v44  ;;  %v566_v34 = vmul.f32 %v564_v49, %v1636_v47  ;;  %v572_v44 = vsel %vm1650_vm2, %v1149_v36, %v571_v18  ;;  %v796_v46 = vsel %vm1799_vm7, %v1158_v14, %v795_v37 }
  0x46   : > { %v574_v3 = vmul.f32 %v572_v44, %v1646_v59  ;;  %v1821_v19 = vpack.i.bf16 %v803_v17, %v796_v46  ;;  %v2117_v18 = vrot.slane %v1520_v25, 4  ;;  %v1157_v14 = vrot.slane %v1522_v26, 10 }
  0x47   : > { %v551_v50 = vadd.f32 %v550_v21, %v543_v57  ;;  %v1303_v21 = vpack.i.bf16 %v580_v11, %v572_v44  ;;  %v2118_v37 = vrot.slane %v1522_v26, 4  ;;  %v768_v41 = vrot.slane %v2119_v43, 6 }
  0x48   : > { %v781_v57 = vrot.slane %v2117_v18, 6  ;;  %v2121_v18 = vrot.slane %v1513_v22, 4  ;;  %v798_v43 = vmul.f32 %v796_v46, %v1529_v31 }
  0x49   : > { %v559_v2 = vadd.f32 %v558_v42, %v551_v50  ;;  %v1156_v42 = vrot.slane %v1520_v25, 10  ;;  %v788_v0 = vrot.slane %v2118_v37, 6  ;;  %v2120_v25 = vrot.slane %v1485_v7, 4 }
  0x4a   : > { %1289 = vrot.lane.b32.xlu2 %v1288_v53, %s1436_s19  ;;  %v769_v6 = vsel %vm1799_vm7, %v1154_v35, %v768_v41 }
  0x4b   : > { %1299 = vrot.lane.b32.xlu1 %v1796_v9, %s1436_s19  ;;  %v567_v56 = vadd.f32 %v566_v34, %v559_v2  ;;  %v1155_v34 = vrot.slane %v1485_v7, 10  ;;  %v774_v50 = vrot.slane %v2120_v25, 6  ;;  %v782_v26 = vsel %vm1799_vm7, %v1156_v42, %v781_v57 }
  0x4c   : > { %1294 = vrot.lane.b32.xlu0 %v1789_v15, %s1436_s19  ;;  %v784_v7 = vmul.f32 %v782_v26, %v1524_v27  ;;  %v809_v57 = vrot.slane %v2121_v18, 6 }
  0x4d   : > { %v575_v49 = vadd.f32 %v574_v3, %v567_v56  ;;  %v771_v3 = vmul.f32 %v769_v6, %v1494_v12 }
  0x4f   : > { %v583_v36 = vadd.f32 %v582_v24, %v575_v49  ;;  %v1160_v49 = vrot.slane %v1513_v22, 10  ;;  %v1161_v22 = vrot.slane %v1515_v23, 10 }
  0x51   : > { %v584_v4 = vmul.f32 0.0625, %v583_v36  ;;  %v1162_v36 = vrot.slane %v1557_v48, 10  ;;  %v810_v46 = vsel %vm1799_vm7, %v1160_v49, %v809_v57 }
  0x52   : > { %1304 = vrot.lane.b32.xlu2 %v1303_v21, %s1436_s19 }
  0x53   : > { %1314 = vrot.lane.b32.xlu1 %v1273_v62, %s1437_s20  ;;  %vm585_vm8 = vcmp.ge.f32.partialorder %v584_v4, 0.0  ;;  %v586_v44 = vmul.f32 0.1, %v584_v4  ;;  %v775_v62 = vsel %vm1799_vm7, %v1155_v34, %v774_v50  ;;  %v805_v50 = vmul.f32 %v803_v17, %v1542_v38 }
  0x54   : > { %1309 = vrot.lane.b32.xlu0 %v1697_v39, %s1437_s20  ;;  %v789_v39 = vsel %vm1799_vm7, %v1157_v14, %v788_v0  ;;  %v777_v11 = vmul.f32 %v775_v62, %v1496_v13  ;;  %v2122_v14 = vrot.slane %v1557_v48, 4  ;;  %v1163_v0 = vrot.slane %v1561_v51, 10 }
  0x55   : > { %v587_v2 = vsel %vm585_vm8, %v584_v4, %v586_v44  ;;  %v791_v24 = vmul.f32 %v789_v39, %v1527_v30  ;;  %v2123_v4 = vrot.slane %v1561_v51, 4  ;;  %v2124_v48 = vrot.slane %v1515_v23, 4 }
  0x56   : > { %v588_v56 = vpack.c.bf16 %v587_v2, %v587_v2  ;;  %v778_v42 = vadd.f32 %v777_v11, %v771_v3  ;;  %v823_v37 = vrot.slane %v2122_v14, 6  ;;  %v2125_v2 = vrot.slane %v1593_v5, 4 }
  0x57   : > { %v830_v35 = vrot.slane %v2123_v4, 6  ;;  %v816_v25 = vrot.slane %v2124_v48, 6  ;;  %v2126_v3 = vrot.slane %v1595_v8, 4  ;;  %v1166_v4 = vrot.slane %v1578_v60, 10 }
  0x58   : > { %1151 = vst.msk [vmem:[%s1743_s24 + $0x6] sm:$0x3] %vm264_vm4, %v588_v56  ;;  %v785_v41 = vadd.f32 %v784_v7, %v778_v42  ;;  %v824_v34 = vsel %vm1799_vm7, %v1162_v36, %v823_v37  ;;  %v837_v23 = vrot.slane %v2125_v2, 6  ;;  %v1165_v7 = vrot.slane %v1595_v8, 10 }
  0x59   : > { %v831_v51 = vsel %vm1799_vm7, %v1163_v0, %v830_v35  ;;  %v844_v11 = vrot.slane %v2126_v3, 6  ;;  %v812_v56 = vmul.f32 %v810_v46, %v1553_v45  ;;  %v826_v18 = vmul.f32 %v824_v34, %v1591_v1 }
  0x5a   : > { %v1882_v44 = vpack.i.bf16 %v831_v51, %v824_v34  ;;  %1319 = vrot.lane.b32.xlu2 %v1764_v32, %s1437_s20  ;;  %v833_v14 = vmul.f32 %v831_v51, %v1606_v16  ;;  %v1353_v35 = vpack.i.bf16 %v789_v39, %v782_v26  ;;  %v2127_v48 = vrot.slane %v1569_v54, 4 }
  0x5b   : > { %1329 = vrot.lane.b32.xlu1 %v1288_v53, %s1437_s20  ;;  %v792_v53 = vadd.f32 %v791_v24, %v785_v41  ;;  %v817_v24 = vsel %vm1799_vm7, %v1161_v22, %v816_v25  ;;  %v845_v32 = vsel %vm1799_vm7, %v1165_v7, %v844_v11  ;;  %v1348_v22 = vpack.i.bf16 %v775_v62, %v769_v6 }
  0x5c   : > { %1324 = vrot.lane.b32.xlu0 %v1750_v58, %s1437_s20  ;;  %v1164_v58 = vrot.slane %v1593_v5, 10  ;;  %v819_v5 = vmul.f32 %v817_v24, %v1565_v52  ;;  %v847_v34 = vmul.f32 %v845_v32, %v1622_v33  ;;  %v865_v25 = vrot.slane %v2127_v48, 6 }
  0x5d   : > { %v799_v17 = vadd.f32 %v798_v43, %v792_v53  ;;  %v1167_v43 = vrot.slane %v1580_v61, 10  ;;  %v1169_v26 = vrot.slane %v1571_v55, 10  ;;  %v2128_v39 = vrot.slane %v1571_v55, 4 }
  0x5e   : > { %v838_v49 = vsel %vm1799_vm7, %v1164_v58, %v837_v23  ;;  %v1383_v11 = vpack.i.bf16 %v817_v24, %v810_v46 }
  0x5f   : > { %v806_v36 = vadd.f32 %v805_v50, %v799_v17  ;;  %v1398_v42 = vpack.i.bf16 %v845_v32, %v838_v49  ;;  %v840_v0 = vmul.f32 %v838_v49, %v1615_v28 }
  0x61   : > { %v813_v8 = vadd.f32 %v812_v56, %v806_v36 }
  0x62   : > { %1334 = vrot.lane.b32.xlu2 %v1789_v15, %s1437_s20  ;;  %v1168_v15 = vrot.slane %v1569_v54, 10  ;;  %v872_v54 = vrot.slane %v2128_v39, 6 }
  0x63   : > { %1344 = vrot.lane.b32.xlu1 %v1303_v21, %s1437_s20  ;;  %v820_v57 = vadd.f32 %v819_v5, %v813_v8  ;;  %v851_v21 = vrot.slane %v552_v20, 6 }
  0x64   : > { %1339 = vrot.lane.b32.xlu0 %v1796_v9, %s1437_s20  ;;  %v858_v9 = vrot.slane %v560_v29, 6  ;;  %v866_v51 = vsel %vm1799_vm7, %v1168_v15, %v865_v25  ;;  %v873_v58 = vsel %vm1799_vm7, %v1169_v26, %v872_v54 }
  0x65   : > { %v827_v37 = vadd.f32 %v826_v18, %v820_v57  ;;  %v852_v20 = vsel %vm1799_vm7, %v1166_v4, %v851_v21  ;;  %v868_v53 = vmul.f32 %v866_v51, %v1646_v59  ;;  %v875_v23 = vmul.f32 %v873_v58, %v1654_v10 }
  0x66   : > { %v859_v61 = vsel %vm1799_vm7, %v1167_v43, %v858_v9  ;;  %v854_v29 = vmul.f32 %v852_v20, %v1629_v40  ;;  %v1418_v32 = vpack.i.bf16 %v873_v58, %v866_v51 }
  0x67   : > { %v834_v41 = vadd.f32 %v833_v14, %v827_v37  ;;  %v861_v62 = vmul.f32 %v859_v61, %v1636_v47  ;;  %v1413_v36 = vpack.i.bf16 %v859_v61, %v852_v20 }
  0x69   : > { %v841_v60 = vadd.f32 %v840_v0, %v834_v41 }
  0x6a   : > { %1349 = vrot.lane.b32.xlu2 %v1348_v22, %s1436_s19 }
  0x6b   : > { %1359 = vrot.lane.b32.xlu1 %v1821_v19, %s1436_s19  ;;  %v848_v6 = vadd.f32 %v847_v34, %v841_v60 }
  0x6c   : > { %1354 = vrot.lane.b32.xlu0 %v1353_v35, %s1436_s19 }
  0x6d   : > { %v855_v50 = vadd.f32 %v854_v29, %v848_v6 }
  0x6f   : > { %v862_v2 = vadd.f32 %v861_v62, %v855_v50 }
  0x71   : > { %v869_v55 = vadd.f32 %v868_v53, %v862_v2 }
  0x72   : > { %1364 = vrot.lane.b32.xlu2 %v1348_v22, %s1437_s20 }
  0x73   : > { %1374 = vrot.lane.b32.xlu1 %v1821_v19, %s1437_s20  ;;  %v876_v7 = vadd.f32 %v875_v23, %v869_v55 }
  0x74   : > { %1369 = vrot.lane.b32.xlu0 %v1353_v35, %s1437_s20  ;;  %v1210_v17 = vpop.permute.xlu2 %1209 }
  0x75   : > { %v877_v3 = vmul.f32 0.0625, %v876_v7  ;;  %v1211_v26 = vunpack.i.l.bf16 %v1210_v17  ;;  %v1212_v50 = vunpack.i.h.bf16 %v1210_v17 }
  0x77   : > { %vm878_vm9 = vcmp.ge.f32.partialorder %v877_v3, 0.0  ;;  %v879_v56 = vmul.f32 0.1, %v877_v3  ;;  %v317_v23 = vmul.f32 %v1211_v26, %v1591_v1 }
  0x79   : > { %v880_v63 = vsel %vm878_vm9, %v877_v3, %v879_v56  ;;  %v323_v56 = vmul.f32 %v1212_v50, %v1606_v16 }
  0x7a   : > { %v881_v49 = vpack.c.bf16 %v880_v63, %v880_v63  ;;  %1379 = vrot.lane.b32.xlu2 %v1383_v11, %s1436_s19 }
  0x7b   : > { %1389 = vrot.lane.b32.xlu1 %v1882_v44, %s1436_s19 }
  0x7c   : > { %1384 = vrot.lane.b32.xlu0 %v1383_v11, %s1437_s20  ;;  %1170 = vst.msk [vmem:[%s1743_s24 + $0xc] sm:$0x3] %vm264_vm4, %v881_v49  ;;  %v1947_v19 = vpop.permute.xlu2 %1214 }
  0x7d   : > { %v1216_v2 = vunpack.i.l.bf16 %v1947_v19  ;;  %v1217_v63 = vunpack.i.h.bf16 %v1947_v19 }
  0x82   : > { %1394 = vrot.lane.b32.xlu2 %v1882_v44, %s1437_s20 }
  0x83   : > { %1404 = vrot.lane.b32.xlu1 %v1398_v42, %s1437_s20 }
  0x84   : > { %1399 = vrot.lane.b32.xlu0 %v1398_v42, %s1436_s19  ;;  %v1230_v5 = vpop.permute.xlu2 %1229 }
  0x85   : > { %v1200_v46 = vpop.permute.xlu1 %1199  ;;  %v1232_v62 = vunpack.i.h.bf16 %v1230_v5  ;;  %v1231_v51 = vunpack.i.l.bf16 %v1230_v5 }
  0x86   : > { %v1190_v24 = vpop.permute.xlu0 %1189  ;;  %v1201_v21 = vunpack.i.l.bf16 %v1200_v46  ;;  %v1202_v9 = vunpack.i.h.bf16 %v1200_v46 }
  0x87   : > { %v1192_v8 = vunpack.i.h.bf16 %v1190_v24  ;;  %v1191_v18 = vunpack.i.l.bf16 %v1190_v24  ;;  %v371_v7 = vmul.f32 %v1231_v51, %v1494_v12  ;;  %v375_v3 = vmul.f32 %v1232_v62, %v1496_v13 }
  0x88   : > { %v293_v22 = vmul.f32 %v1201_v21, %v1529_v31  ;;  %v299_v20 = vmul.f32 %v1202_v9, %v1542_v38 }
  0x89   : > { %v270_v57 = vmul.f32 %v1191_v18, %v1494_v12  ;;  %v275_v14 = vmul.f32 %v1192_v8, %v1496_v13  ;;  %v376_v8 = vadd.f32 %v375_v3, %v371_v7 }
  0x8a   : > { %1409 = vrot.lane.b32.xlu2 %v1413_v36, %s1436_s19 }
  0x8b   : > { %1419 = vrot.lane.b32.xlu1 %v1418_v32, %s1436_s19  ;;  %v276_v35 = vadd.f32 %v275_v14, %v270_v57 }
  0x8c   : > { %1414 = vrot.lane.b32.xlu0 %v1413_v36, %s1437_s20  ;;  %v1958_v44 = vpop.permute.xlu2 %1244  ;;  %v329_v36 = vmul.f32 %v1216_v2, %v1615_v28 }
  0x8d   : > { %v1205_v37 = vpop.permute.xlu1 %1204 }
  0x8e   : > { %v1195_v42 = vpop.permute.xlu0 %1194  ;;  %v1206_v15 = vunpack.i.l.bf16 %v1205_v37  ;;  %v1207_v61 = vunpack.i.h.bf16 %v1205_v37  ;;  %v335_v37 = vmul.f32 %v1217_v63, %v1622_v33 }
  0x8f   : > { %v1197_v0 = vunpack.i.h.bf16 %v1195_v42  ;;  %v1196_v4 = vunpack.i.l.bf16 %v1195_v42 }
  0x90   : > { %v305_v54 = vmul.f32 %v1206_v15, %v1553_v45  ;;  %v311_v53 = vmul.f32 %v1207_v61, %v1565_v52 }
  0x91   : > { %v281_v43 = vmul.f32 %v1196_v4, %v1524_v27  ;;  %v287_v34 = vmul.f32 %v1197_v0, %v1527_v30 }
  0x92   : > { %1424 = vrot.lane.b32.xlu2 %v1418_v32, %s1437_s20 }
  0x93   : > { %v282_v41 = vadd.f32 %v281_v43, %v276_v35  ;;  %v1246_v43 = vunpack.i.l.bf16 %v1958_v44 }
  0x94   : > { %v1965_v39 = vpop.permute.xlu2 %1259 }
  0x95   : > { %v288_v48 = vadd.f32 %v287_v34, %v282_v41  ;;  %v1225_v25 = vpop.permute.xlu1 %1224 }
  0x96   : > { %v1220_v60 = vpop.permute.xlu0 %1219  ;;  %v1226_v9 = vunpack.i.l.bf16 %v1225_v25 }
  0x97   : > { %v294_v29 = vadd.f32 %v293_v22, %v288_v48  ;;  %v1221_v18 = vunpack.i.l.bf16 %v1220_v60  ;;  %v1222_v42 = vunpack.i.h.bf16 %v1220_v60  ;;  %v1227_v48 = vunpack.i.h.bf16 %v1225_v25 }
  0x98   : > { %v353_v51 = vmul.f32 %v1226_v9, %v1646_v59 }
  0x99   : > { %v300_v6 = vadd.f32 %v299_v20, %v294_v29  ;;  %v341_v34 = vmul.f32 %v1221_v18, %v1629_v40  ;;  %v1247_v20 = vunpack.i.h.bf16 %v1958_v44  ;;  %v347_v29 = vmul.f32 %v1222_v42, %v1636_v47 }
  0x9a   : > { %v359_v44 = vmul.f32 %v1227_v48, %v1654_v10 }
  0x9b   : > { %v306_v58 = vadd.f32 %v305_v54, %v300_v6  ;;  %v400_v6 = vmul.f32 %v1246_v43, %v1553_v45  ;;  %v405_v25 = vmul.f32 %v1247_v20, %v1565_v52  ;;  %v1262_v43 = vunpack.i.h.bf16 %v1965_v39 }
  0x9c   : > { %v1976_v5 = vpop.permute.xlu2 %1274 }
  0x9d   : > { %v312_v55 = vadd.f32 %v311_v53, %v306_v58  ;;  %v1240_v11 = vpop.permute.xlu1 %1239  ;;  %v1276_v7 = vunpack.i.l.bf16 %v1976_v5 }
  0x9e   : > { %v1235_v49 = vpop.permute.xlu0 %1234  ;;  %v1241_v17 = vunpack.i.l.bf16 %v1240_v11  ;;  %v1242_v0 = vunpack.i.h.bf16 %v1240_v11 }
  0x9f   : > { %v318_v46 = vadd.f32 %v317_v23, %v312_v55  ;;  %v1237_v24 = vunpack.i.h.bf16 %v1235_v49  ;;  %v1236_v32 = vunpack.i.l.bf16 %v1235_v49 }
  0xa0   : > { %v390_v19 = vmul.f32 %v1241_v17, %v1529_v31  ;;  %v395_v26 = vmul.f32 %v1242_v0, %v1542_v38 }
  0xa1   : > { %v324_v57 = vadd.f32 %v323_v56, %v318_v46  ;;  %v380_v14 = vmul.f32 %v1236_v32, %v1524_v27  ;;  %v385_v35 = vmul.f32 %v1237_v24, %v1527_v30  ;;  %v1261_v46 = vunpack.i.l.bf16 %v1965_v39 }
  0xa3   : > { %v330_v4 = vadd.f32 %v329_v36, %v324_v57  ;;  %v381_v21 = vadd.f32 %v380_v14, %v376_v8  ;;  %v1277_v14 = vunpack.i.h.bf16 %v1976_v5 }
  0xa4   : > { %v1988_v62 = vpop.permute.xlu2 %1289 }
  0xa5   : > { %v336_v41 = vadd.f32 %v335_v37, %v330_v4  ;;  %v386_v22 = vadd.f32 %v385_v35, %v381_v21  ;;  %v1255_v15 = vpop.permute.xlu1 %1254  ;;  %v603_v37 = vmul.f32 %v1276_v7, %v1524_v27  ;;  %v608_v20 = vmul.f32 %v1277_v14, %v1527_v30 }
  0xa6   : > { %v1250_v61 = vpop.permute.xlu0 %1249  ;;  %v1256_v11 = vunpack.i.l.bf16 %v1255_v15  ;;  %v1257_v8 = vunpack.i.h.bf16 %v1255_v15  ;;  %v430_v15 = vmul.f32 %v1261_v46, %v1629_v40 }
  0xa7   : > { %v342_v60 = vadd.f32 %v341_v34, %v336_v41  ;;  %v391_v54 = vadd.f32 %v390_v19, %v386_v22  ;;  %v1251_v58 = vunpack.i.l.bf16 %v1250_v61  ;;  %v1252_v23 = vunpack.i.h.bf16 %v1250_v61 }
  0xa8   : > { %v420_v21 = vmul.f32 %v1256_v11, %v1615_v28  ;;  %v425_v5 = vmul.f32 %v1257_v8, %v1622_v33  ;;  %v1292_v8 = vunpack.i.h.bf16 %v1988_v62 }
  0xa9   : > { %v348_v50 = vadd.f32 %v347_v29, %v342_v60  ;;  %v396_v53 = vadd.f32 %v395_v26, %v391_v54  ;;  %v410_v63 = vmul.f32 %v1251_v58, %v1591_v1  ;;  %v415_v57 = vmul.f32 %v1252_v23, %v1606_v16 }
  0xaa   : > { %v435_v26 = vmul.f32 %v1262_v43, %v1636_v47  ;;  %v638_v43 = vmul.f32 %v1292_v8, %v1606_v16 }
  0xab   : > { %v354_v2 = vadd.f32 %v353_v51, %v348_v50  ;;  %v401_v55 = vadd.f32 %v400_v6, %v396_v53 }
  0xac   : > { %v2001_v4 = vpop.permute.xlu2 %1304 }
  0xad   : > { %v360_v3 = vadd.f32 %v359_v44, %v354_v2  ;;  %v406_v56 = vadd.f32 %v405_v25, %v401_v55  ;;  %v1270_v49 = vpop.permute.xlu1 %1269 }
  0xae   : > { %v1265_v17 = vpop.permute.xlu0 %1264  ;;  %v1272_v24 = vunpack.i.h.bf16 %v1270_v49  ;;  %v1271_v32 = vunpack.i.l.bf16 %v1270_v49  ;;  %v1291_v49 = vunpack.i.l.bf16 %v1988_v62 }
  0xaf   : > { %v361_v36 = vmul.f32 0.0625, %v360_v3  ;;  %v411_v18 = vadd.f32 %v410_v63, %v406_v56  ;;  %v1266_v61 = vunpack.i.l.bf16 %v1265_v17  ;;  %v1267_v54 = vunpack.i.h.bf16 %v1265_v17 }
  0xb0   : > { %v594_v42 = vmul.f32 %v1271_v32, %v1494_v12  ;;  %v598_v0 = vmul.f32 %v1272_v24, %v1496_v13  ;;  %v633_v14 = vmul.f32 %v1291_v49, %v1591_v1 }
  0xb1   : > { %vm362_vm10 = vcmp.ge.f32.partialorder %v361_v36, 0.0  ;;  %v363_v19 = vmul.f32 0.1, %v361_v36  ;;  %v416_v35 = vadd.f32 %v415_v57, %v411_v18  ;;  %v440_v44 = vmul.f32 %v1266_v61, %v1646_v59 }
  0xb2   : > { %v599_v9 = vadd.f32 %v598_v0, %v594_v42  ;;  %v445_v55 = vmul.f32 %v1267_v54, %v1654_v10 }
  0xb3   : > { %v364_v41 = vsel %vm362_vm10, %v361_v36, %v363_v19  ;;  %v421_v34 = vadd.f32 %v420_v21, %v416_v35 }
  0xb4   : > { %v365_v22 = vpack.c.bf16 %v364_v41, %v364_v41  ;;  %v604_v60 = vadd.f32 %v603_v37, %v599_v9  ;;  %v2011_v58 = vpop.permute.xlu2 %1319 }
  0xb5   : > { %v426_v48 = vadd.f32 %v425_v5, %v421_v34  ;;  %v1285_v29 = vpop.permute.xlu1 %1284  ;;  %v1322_v49 = vunpack.i.h.bf16 %v2011_v58 }
  0xb6   : > { %1133 = vst.msk [vmem:[%s1743_s24 + $0x2] sm:$0x3] %vm264_vm4, %v365_v22  ;;  %v1280_v39 = vpop.permute.xlu0 %1279  ;;  %v1286_v53 = vunpack.i.l.bf16 %v1285_v29  ;;  %v609_v2 = vadd.f32 %v608_v20, %v604_v60  ;;  %v1287_v7 = vunpack.i.h.bf16 %v1285_v29 }
  0xb7   : > { %v431_v6 = vadd.f32 %v430_v15, %v426_v48  ;;  %v1282_v51 = vunpack.i.h.bf16 %v1280_v39  ;;  %v1281_v50 = vunpack.i.l.bf16 %v1280_v39  ;;  %v1306_v39 = vunpack.i.l.bf16 %v2001_v4 }
  0xb8   : > { %v623_v63 = vmul.f32 %v1286_v53, %v1553_v45  ;;  %v628_v57 = vmul.f32 %v1287_v7, %v1565_v52 }
  0xb9   : > { %v436_v25 = vadd.f32 %v435_v26, %v431_v6  ;;  %v613_v23 = vmul.f32 %v1281_v50, %v1529_v31  ;;  %v618_v56 = vmul.f32 %v1282_v51, %v1542_v38 }
  0xbb   : > { %v441_v3 = vadd.f32 %v440_v44, %v436_v25  ;;  %v614_v11 = vadd.f32 %v613_v23, %v609_v2  ;;  %v1307_v44 = vunpack.i.h.bf16 %v2001_v4  ;;  %v1321_v2 = vunpack.i.l.bf16 %v2011_v58 }
  0xbc   : > { %v2022_v21 = vpop.permute.xlu2 %1334 }
  0xbd   : > { %v446_v46 = vadd.f32 %v445_v55, %v441_v3  ;;  %v619_v17 = vadd.f32 %v618_v56, %v614_v11  ;;  %v1300_v24 = vpop.permute.xlu1 %1299  ;;  %v663_v56 = vmul.f32 %v1306_v39, %v1646_v59 }
  0xbe   : > { %v1295_v32 = vpop.permute.xlu0 %1294  ;;  %v1301_v5 = vunpack.i.l.bf16 %v1300_v24  ;;  %v1302_v48 = vunpack.i.h.bf16 %v1300_v24  ;;  %v668_v24 = vmul.f32 %v1307_v44, %v1654_v10 }
  0xbf   : > { %v447_v36 = vmul.f32 0.0625, %v446_v46  ;;  %v624_v18 = vadd.f32 %v623_v63, %v619_v17  ;;  %v1296_v0 = vunpack.i.l.bf16 %v1295_v32  ;;  %v1297_v19 = vunpack.i.h.bf16 %v1295_v32 }
  0xc0   : > { %v653_v6 = vmul.f32 %v1301_v5, %v1629_v40  ;;  %v658_v55 = vmul.f32 %v1302_v48, %v1636_v47  ;;  %v1336_v48 = vunpack.i.l.bf16 %v2022_v21 }
  0xc1   : > { %vm448_vm11 = vcmp.ge.f32.partialorder %v447_v36, 0.0  ;;  %v449_v37 = vmul.f32 0.1, %v447_v36  ;;  %v629_v42 = vadd.f32 %v628_v57, %v624_v18  ;;  %v643_v34 = vmul.f32 %v1296_v0, %v1615_v28 }
  0xc2   : > { %v648_v15 = vmul.f32 %v1297_v19, %v1622_v33 }
  0xc3   : > { %v450_v35 = vsel %vm448_vm11, %v447_v36, %v449_v37  ;;  %v634_v9 = vadd.f32 %v633_v14, %v629_v42  ;;  %v699_v36 = vmul.f32 %v1321_v2, %v1529_v31  ;;  %v704_v14 = vmul.f32 %v1322_v49, %v1542_v38 }
  0xc4   : > { %v451_v41 = vpack.c.bf16 %v450_v35, %v450_v35  ;;  %v1350_v11 = vpop.permute.xlu2 %1349 }
  0xc5   : > { %v639_v62 = vadd.f32 %v638_v43, %v634_v9  ;;  %v1315_v22 = vpop.permute.xlu1 %1314 }
  0xc6   : > { %1134 = vst.msk [vmem:[%s1743_s24 + $0x4] sm:$0x3] %vm264_vm4, %v451_v41  ;;  %v1310_v20 = vpop.permute.xlu0 %1309  ;;  %v1316_v61 = vunpack.i.l.bf16 %v1315_v22  ;;  %v1317_v54 = vunpack.i.h.bf16 %v1315_v22 }
  0xc7   : > { %v644_v60 = vadd.f32 %v643_v34, %v639_v62  ;;  %v1312_v29 = vunpack.i.h.bf16 %v1310_v20  ;;  %v1311_v26 = vunpack.i.l.bf16 %v1310_v20 }
  0xc8   : > { %v689_v25 = vmul.f32 %v1316_v61, %v1524_v27  ;;  %v694_v3 = vmul.f32 %v1317_v54, %v1527_v30  ;;  %v1337_v54 = vunpack.i.h.bf16 %v2022_v21 }
  0xc9   : > { %v649_v51 = vadd.f32 %v648_v15, %v644_v60  ;;  %v680_v50 = vmul.f32 %v1311_v26, %v1494_v12  ;;  %v684_v53 = vmul.f32 %v1312_v29, %v1496_v13  ;;  %v1352_v29 = vunpack.i.h.bf16 %v1350_v11 }
  0xca   : > { %v1351_v26 = vunpack.i.l.bf16 %v1350_v11  ;;  %v734_v2 = vmul.f32 %v1337_v54, %v1622_v33 }
  0xcb   : > { %v654_v23 = vadd.f32 %v653_v6, %v649_v51  ;;  %v685_v7 = vadd.f32 %v684_v53, %v680_v50  ;;  %v729_v50 = vmul.f32 %v1336_v48, %v1615_v28  ;;  %v891_v44 = vmul.f32 %v1352_v29, %v1496_v13 }
  0xcc   : > { %v1365_v22 = vpop.permute.xlu2 %1364 }
  0xcd   : > { %v659_v63 = vadd.f32 %v658_v55, %v654_v23  ;;  %v690_v46 = vadd.f32 %v689_v25, %v685_v7  ;;  %v1330_v17 = vpop.permute.xlu1 %1329  ;;  %v887_v25 = vmul.f32 %v1351_v26, %v1494_v12 }
  0xce   : > { %v1325_v32 = vpop.permute.xlu0 %1324  ;;  %v1331_v58 = vunpack.i.l.bf16 %v1330_v17  ;;  %v1332_v43 = vunpack.i.h.bf16 %v1330_v17 }
  0xcf   : > { %v664_v4 = vadd.f32 %v663_v56, %v659_v63  ;;  %v695_v8 = vadd.f32 %v694_v3, %v690_v46  ;;  %v1326_v18 = vunpack.i.l.bf16 %v1325_v32  ;;  %v1327_v42 = vunpack.i.h.bf16 %v1325_v32 }
  0xd0   : > { %v719_v61 = vmul.f32 %v1331_v58, %v1591_v1  ;;  %v724_v6 = vmul.f32 %v1332_v43, %v1606_v16  ;;  %v892_v17 = vadd.f32 %v891_v44, %v887_v25  ;;  %v1366_v32 = vunpack.i.l.bf16 %v1365_v22 }
  0xd1   : > { %v669_v57 = vadd.f32 %v668_v24, %v664_v4  ;;  %v700_v37 = vadd.f32 %v699_v36, %v695_v8  ;;  %v709_v35 = vmul.f32 %v1326_v18, %v1553_v45  ;;  %v714_v5 = vmul.f32 %v1327_v42, %v1565_v52 }
  0xd2   : > { %v1367_v24 = vunpack.i.h.bf16 %v1365_v22 }
  0xd3   : > { %v670_v0 = vmul.f32 0.0625, %v669_v57  ;;  %v705_v19 = vadd.f32 %v704_v14, %v700_v37 }
  0xd4   : > { %v1380_v4 = vpop.permute.xlu2 %1379 }
  0xd5   : > { %vm671_vm12 = vcmp.ge.f32.partialorder %v670_v0, 0.0  ;;  %v672_v9 = vmul.f32 0.1, %v670_v0  ;;  %v710_v41 = vadd.f32 %v709_v35, %v705_v19  ;;  %v1345_v62 = vpop.permute.xlu1 %1344  ;;  %v973_v35 = vmul.f32 %v1366_v32, %v1494_v12 }
  0xd6   : > { %v1340_v34 = vpop.permute.xlu0 %1339  ;;  %v1346_v3 = vunpack.i.l.bf16 %v1345_v62  ;;  %v1347_v18 = vunpack.i.h.bf16 %v1345_v62 }
  0xd7   : > { %v673_v15 = vsel %vm671_vm12, %v670_v0, %v672_v9  ;;  %v715_v20 = vadd.f32 %v714_v5, %v710_v41  ;;  %v1341_v51 = vunpack.i.l.bf16 %v1340_v34  ;;  %v1342_v55 = vunpack.i.h.bf16 %v1340_v34 }
  0xd8   : > { %v674_v60 = vpack.c.bf16 %v673_v15, %v673_v15  ;;  %v749_v14 = vmul.f32 %v1346_v3, %v1646_v59  ;;  %v754_v9 = vmul.f32 %v1347_v18, %v1654_v10  ;;  %v977_v41 = vmul.f32 %v1367_v24, %v1496_v13 }
  0xd9   : > { %v720_v39 = vadd.f32 %v719_v61, %v715_v20  ;;  %v739_v21 = vmul.f32 %v1341_v51, %v1629_v40  ;;  %v744_v8 = vmul.f32 %v1342_v55, %v1636_v47  ;;  %v1381_v34 = vunpack.i.l.bf16 %v1380_v4 }
  0xda   : > { %1152 = vst.msk [vmem:[%s1743_s24 + $0x8] sm:$0x3] %vm264_vm4, %v674_v60  ;;  %v978_v12 = vadd.f32 %v977_v41, %v973_v35 }
  0xdb   : > { %v725_v53 = vadd.f32 %v724_v6, %v720_v39  ;;  %v1382_v39 = vunpack.i.h.bf16 %v1380_v4  ;;  %v916_v13 = vmul.f32 %v1381_v34, %v1553_v45 }
  0xdc   : > { %v1395_v26 = vpop.permute.xlu2 %1394 }
  0xdd   : > { %v730_v23 = vadd.f32 %v729_v50, %v725_v53  ;;  %v1360_v7 = vpop.permute.xlu1 %1359  ;;  %v921_v55 = vmul.f32 %v1382_v39, %v1565_v52 }
  0xde   : > { %v1355_v11 = vpop.permute.xlu0 %1354  ;;  %v1361_v46 = vunpack.i.l.bf16 %v1360_v7  ;;  %v1362_v58 = vunpack.i.h.bf16 %v1360_v7 }
  0xdf   : > { %v735_v56 = vadd.f32 %v734_v2, %v730_v23  ;;  %v1357_v63 = vunpack.i.h.bf16 %v1355_v11  ;;  %v1356_v49 = vunpack.i.l.bf16 %v1355_v11 }
  0xe0   : > { %v906_v19 = vmul.f32 %v1361_v46, %v1529_v31  ;;  %v911_v29 = vmul.f32 %v1362_v58, %v1542_v38 }
  0xe1   : > { %v740_v36 = vadd.f32 %v739_v21, %v735_v56  ;;  %v896_v57 = vmul.f32 %v1356_v49, %v1524_v27  ;;  %v901_v0 = vmul.f32 %v1357_v63, %v1527_v30  ;;  %v1396_v63 = vunpack.i.l.bf16 %v1395_v26 }
  0xe3   : > { %v745_v37 = vadd.f32 %v744_v8, %v740_v36  ;;  %v897_v42 = vadd.f32 %v896_v57, %v892_v17  ;;  %v1397_v8 = vunpack.i.h.bf16 %v1395_v26 }
  0xe4   : > { %v1410_v18 = vpop.permute.xlu2 %1409 }
  0xe5   : > { %v750_v43 = vadd.f32 %v749_v14, %v745_v37  ;;  %v902_v5 = vadd.f32 %v901_v0, %v897_v42  ;;  %v1375_v62 = vpop.permute.xlu1 %1374  ;;  %v1012_v37 = vmul.f32 %v1396_v63, %v1591_v1  ;;  %v1017_v35 = vmul.f32 %v1397_v8, %v1606_v16 }
  0xe6   : > { %v1370_v22 = vpop.permute.xlu0 %1369  ;;  %v1376_v15 = vunpack.i.l.bf16 %v1375_v62  ;;  %v1377_v50 = vunpack.i.h.bf16 %v1375_v62 }
  0xe7   : > { %v755_v48 = vadd.f32 %v754_v9, %v750_v43  ;;  %v907_v20 = vadd.f32 %v906_v19, %v902_v5  ;;  %v1372_v61 = vunpack.i.h.bf16 %v1370_v22  ;;  %v1371_v60 = vunpack.i.l.bf16 %v1370_v22 }
  0xe8   : > { %v992_v53 = vmul.f32 %v1376_v15, %v1529_v31  ;;  %v997_v46 = vmul.f32 %v1377_v50, %v1542_v38  ;;  %v1411_v5 = vunpack.i.l.bf16 %v1410_v18  ;;  %v1412_v15 = vunpack.i.h.bf16 %v1410_v18 }
  0xe9   : > { %v756_v54 = vmul.f32 0.0625, %v755_v48  ;;  %v982_v6 = vmul.f32 %v1371_v60, %v1524_v27  ;;  %v912_v51 = vadd.f32 %v911_v29, %v907_v20  ;;  %v987_v2 = vmul.f32 %v1372_v61, %v1527_v30 }
  0xea   : > { %v946_v61 = vmul.f32 %v1411_v5, %v1629_v40 }
  0xeb   : > { %vm757_vm13 = vcmp.ge.f32.partialorder %v756_v54, 0.0  ;;  %v758_v25 = vmul.f32 0.1, %v756_v54  ;;  %v983_v44 = vadd.f32 %v982_v6, %v978_v12  ;;  %v917_v11 = vadd.f32 %v916_v13, %v912_v51 }
  0xec   : > { %v951_v12 = vmul.f32 %v1412_v15, %v1636_v47 }
  0xed   : > { %v759_v23 = vsel %vm757_vm13, %v756_v54, %v758_v25  ;;  %v988_v7 = vadd.f32 %v987_v2, %v983_v44  ;;  %v1390_v21 = vpop.permute.xlu1 %1389  ;;  %v922_v36 = vadd.f32 %v921_v55, %v917_v11 }
  0xee   : > { %v760_v3 = vpack.c.bf16 %v759_v23, %v759_v23  ;;  %v1385_v27 = vpop.permute.xlu0 %1384  ;;  %v1391_v56 = vunpack.i.l.bf16 %v1390_v21  ;;  %v1392_v24 = vunpack.i.h.bf16 %v1390_v21 }
  0xef   : > { %v993_v49 = vadd.f32 %v992_v53, %v988_v7  ;;  %v1387_v31 = vunpack.i.h.bf16 %v1385_v27  ;;  %v1386_v17 = vunpack.i.l.bf16 %v1385_v27 }
  0xf0   : > { %1153 = vst.msk [vmem:[%s1743_s24 + $0xa] sm:$0x3] %vm264_vm4, %v760_v3  ;;  %v926_v30 = vmul.f32 %v1391_v56, %v1591_v1  ;;  %v931_v38 = vmul.f32 %v1392_v24, %v1606_v16  ;;  %v1425_v16 = vpop.permute.xlu2 %1424 }
  0xf1   : > { %v998_v32 = vadd.f32 %v997_v46, %v993_v49  ;;  %v1002_v4 = vmul.f32 %v1386_v17, %v1553_v45  ;;  %v1007_v14 = vmul.f32 %v1387_v31, %v1565_v52  ;;  %v1426_v53 = vunpack.i.l.bf16 %v1425_v16 }
  0xf2   : > { %v927_v42 = vadd.f32 %v926_v30, %v922_v36  ;;  %v1427_v7 = vunpack.i.h.bf16 %v1425_v16 }
  0xf3   : > { %v1003_v57 = vadd.f32 %v1002_v4, %v998_v32  ;;  %v1042_v11 = vmul.f32 %v1426_v53, %v1646_v59 }
  0xf4   : > { %v932_v62 = vadd.f32 %v931_v38, %v927_v42  ;;  %v1047_v46 = vmul.f32 %v1427_v7, %v1654_v10 }
  0xf5   : > { %v1008_v0 = vadd.f32 %v1007_v14, %v1003_v57  ;;  %v1405_v19 = vpop.permute.xlu1 %1404 }
  0xf6   : > { %v1400_v58 = vpop.permute.xlu0 %1399  ;;  %v1406_v43 = vunpack.i.l.bf16 %v1405_v19  ;;  %v1407_v52 = vunpack.i.h.bf16 %v1405_v19 }
  0xf7   : > { %v1013_v9 = vadd.f32 %v1012_v37, %v1008_v0  ;;  %v1402_v41 = vunpack.i.h.bf16 %v1400_v58  ;;  %v1401_v45 = vunpack.i.l.bf16 %v1400_v58 }
  0xf8   : > { %v1022_v1 = vmul.f32 %v1406_v43, %v1615_v28  ;;  %v1027_v26 = vmul.f32 %v1407_v52, %v1622_v33 }
  0xf9   : > { %v1018_v34 = vadd.f32 %v1017_v35, %v1013_v9  ;;  %v936_v22 = vmul.f32 %v1401_v45, %v1615_v28  ;;  %v941_v20 = vmul.f32 %v1402_v41, %v1622_v33 }
  0xfb   : > { %v937_v48 = vadd.f32 %v936_v22, %v932_v62  ;;  %v1023_v29 = vadd.f32 %v1022_v1, %v1018_v34 }
  0xfd   : > { %v942_v60 = vadd.f32 %v941_v20, %v937_v48  ;;  %v1420_v54 = vpop.permute.xlu1 %1419  ;;  %v1028_v44 = vadd.f32 %v1027_v26, %v1023_v29 }
  0xfe   : > { %v1415_v39 = vpop.permute.xlu0 %1414  ;;  %v1422_v6 = vunpack.i.h.bf16 %v1420_v54  ;;  %v1421_v51 = vunpack.i.l.bf16 %v1420_v54 }
  0xff   : > { %v947_v13 = vadd.f32 %v946_v61, %v942_v60  ;;  %v1417_v50 = vunpack.i.h.bf16 %v1415_v39  ;;  %v1416_v28 = vunpack.i.l.bf16 %v1415_v39 }
 0x100   : > { %v956_v25 = vmul.f32 %v1421_v51, %v1646_v59  ;;  %v961_v55 = vmul.f32 %v1422_v6, %v1654_v10 }
 0x101   : > { %v952_v2 = vadd.f32 %v951_v12, %v947_v13  ;;  %v1032_v23 = vmul.f32 %v1416_v28, %v1629_v40  ;;  %v1037_v21 = vmul.f32 %v1417_v50, %v1636_v47 }
 0x103   : > { %v1033_v33 = vadd.f32 %v1032_v23, %v1028_v44  ;;  %v957_v3 = vadd.f32 %v956_v25, %v952_v2 }
 0x105   : > { %v1038_v27 = vadd.f32 %v1037_v21, %v1033_v33  ;;  %v962_v56 = vadd.f32 %v961_v55, %v957_v3 }
 0x107   : > { %v963_v63 = vmul.f32 0.0625, %v962_v56  ;;  %v1043_v49 = vadd.f32 %v1042_v11, %v1038_v27 }
 0x109   : > { %vm964_vm14 = vcmp.ge.f32.partialorder %v963_v63, 0.0  ;;  %v965_v31 = vmul.f32 0.1, %v963_v63  ;;  %v1048_v40 = vadd.f32 %v1047_v46, %v1043_v49 }
 0x10b   : > { %v966_v17 = vsel %vm964_vm14, %v963_v63, %v965_v31  ;;  %v1049_v24 = vmul.f32 0.0625, %v1048_v40 }
 0x10c   : > { %v967_v30 = vpack.c.bf16 %v966_v17, %v966_v17 }
 0x10d   : > { %vm1050_vm15 = vcmp.ge.f32.partialorder %v1049_v24, 0.0  ;;  %v1051_v32 = vmul.f32 0.1, %v1049_v24 }
 0x10e   : > { %1171 = vst.msk [vmem:[%s1743_s24 + $0xe] sm:$0x3] %vm264_vm4, %v967_v30 }
 0x10f   : > { %v1052_v47 = vsel %vm1050_vm15, %v1049_v24, %v1051_v32 }
 0x110   : > { %v1053_v4 = vpack.c.bf16 %v1052_v47, %v1052_v47 }
 0x112   : > { %1172 = vst.msk [vmem:[%s1743_s24 + $0x10] sm:$0x3] %vm264_vm4, %v1053_v4 }
 0x113 PF: > { %s12_s9 = sadd.s32 1, %s1434_s9  }
 0x114   : > { %p9_p4 = scmp.ge.s32.totalorder %s12_s9, 4  }
 0x116   :  { %11 = sbr.rel (!%p9_p4) target bundleno = 1 (0x1), region = 69 }

// kernel: pwcnet_forward.14
= control target key start
LH: loop header
LB: loop body
LE: loop exit
PB: predicated region body
PF: predicated region fallthrough
CT: control target
= control target key end

     0   :  { %s900_s9 = smov 0   ;;  %s1202_s0 = inlined_call_operand.vmem [shape: bf16[2,8,8,8], index: 0, kind: input, shape index: {}]   ;;  %s1203_s1 = inlined_call_operand.vmem [shape: bf16[2,8,10,10], index: 1, kind: input, shape index: {}]   ;;  %s1204_s2 = inlined_call_operand.vmem [shape: bf16[2,9,8,8], index: 2, kind: output, shape index: {}]  }
   0x1 LB: > { %s703_s10 = sadd.s32 4294967295, %s881_s9   ;;  %p707_p0 = scmp.ge.s32.totalorder %s881_s9, 1  ;;  %s881_s9 = sphi %s900_s9, %s12_s9  }
   0x2   : > { %p122_p1 = scmp.lt.s32.totalorder %s881_s9, 3 }
   0x4   : > { %p123_p2 = pnand %p707_p0, %p122_p1 }
   0x5   : > { %p149_p3 = scmp.lt.s32.totalorder (!%p123_p2), %s703_s10, 1  ;;  %s883_s19 = smov (!%p123_p2), 127  }
   0x6   : > { %126 = sbr.rel (%p123_p2) target bundleno = 208 (0xd0), region = 28  ;;  %s884_s20 = smov (!%p123_p2), 126  }
   0xb   : > { %s1206_s10 = smov (!%p149_p3, %s703_s10), 1  ;;  %vm335_vm0 = vcmask 1046528   ;;  %vm489_vm1 = vcmask 1045504   ;;  %vm232_vm3 = vcmask 60416  }
   0xc   : > { %s724_s11 = sshll.u32 %s1206_s10, 6  ;;  %s723_s12 = sshll.u32 %s1206_s10, 5 }
   0xd   : > { %s915_s15 = scalar_lea.vmem %s1203_s1, %s724_s11  ;;  %s153_s18 = scalar_lea.vmem %s1202_s0, %s723_s12 }
   0xe   : > { %v188_v0 = vld [vmem:[%s915_s15 + $0x20] sm:$0xf]  ;;  %v190_v1 = vld [vmem:[%s915_s15 + $0x28] sm:$0xf]  ;;  %v742_v7 = vld [vmem:[%s153_s18 + $0x10] sm:$0xff]   ;;  %s744_s21 = smul.u32 36, %s1206_s10 }
   0xf   : > { %v922_v2 = vunpack.c.l.bf16 %v188_v0  ;;  %v924_v3 = vunpack.c.l.bf16 %v190_v1  ;;  %v180_v4 = vld [vmem:[%s915_s15] sm:$0xf]  ;;  %v182_v5 = vld [vmem:[%s915_s15 + $0x8] sm:$0xf]  ;;  %v192_v12 = vld [vmem:[%s915_s15 + $0x30] sm:$0xf]  ;;  %v956_v24 = vunpack.c.l.bf16 %v742_v7  ;;  %v958_v25 = vunpack.c.h.bf16 %v742_v7 }
  0x10   : > { %v726_v6 = vld [vmem:[%s153_s18] sm:$0xff]   ;;  %v928_v8 = vunpack.c.l.bf16 %v180_v4  ;;  %v930_v9 = vunpack.c.l.bf16 %v182_v5  ;;  %v194_v13 = vld [vmem:[%s915_s15 + $0x38] sm:$0xf]  ;;  %v942_v15 = vunpack.c.l.bf16 %v192_v12  ;;  %v184_v16 = vld [vmem:[%s915_s15 + $0x10] sm:$0xf]  ;;  %s1089_s24 = scalar_lea.vmem %s1204_s2, %s744_s21 }
  0x11   : > { %v932_v10 = vunpack.c.l.bf16 %v726_v6  ;;  %v934_v11 = vunpack.c.h.bf16 %v726_v6  ;;  %v940_v14 = vpack.i.bf16 %v924_v3, %v922_v2  ;;  %v186_v17 = vld [vmem:[%s915_s15 + $0x18] sm:$0xf]  ;;  %v741_v18 = vld [vmem:[%s153_s18 + $0x8] sm:$0xff]   ;;  %v952_v22 = vunpack.c.l.bf16 %v194_v13  ;;  %v970_v31 = vld [vmem:[%s915_s15 + $0x24] sm:$0x1] }
  0x12   : > { %v755_v19 = vpack.i.bf16 %v930_v9, %v928_v8  ;;  %v743_v23 = vld [vmem:[%s153_s18 + $0x18] sm:$0xff]   ;;  %v960_v26 = vunpack.c.l.bf16 %v184_v16  ;;  %v963_v28 = vunpack.c.l.bf16 %v186_v17  ;;  %v965_v29 = vunpack.c.l.bf16 %v741_v18  ;;  %v973_v32 = vld [vmem:[%s915_s15 + $0x2c] sm:$0x1]  ;;  %v185_v37 = vld [vmem:[%s915_s15 + $0x14] sm:$0x1] }
  0x13   : > { %v212_v20 = vmul.f32 %v932_v10, %v928_v8  ;;  %v213_v21 = vmul.f32 %v934_v11, %v930_v9  ;;  %766 = vrot.lane.b32.xlu1 %v940_v14, %s883_s19  ;;  %v967_v30 = vunpack.c.h.bf16 %v741_v18  ;;  %v219_v33 = vmul.f32 %v956_v24, %v922_v2  ;;  %v985_v38 = vld [vmem:[%s915_s15 + $0x1c] sm:$0x1]  ;;  %v181_v46 = vld [vmem:[%s915_s15 + $0x4] sm:$0x1]  ;;  %v183_v51 = vld [vmem:[%s915_s15 + $0xc] sm:$0x1] }
  0x14   : > { %756 = vrot.lane.b32.xlu0 %v755_v19, %s883_s19  ;;  %v221_v34 = vmul.f32 %v958_v25, %v924_v3  ;;  %v979_v35 = vunpack.c.l.bf16 %v743_v23  ;;  %v981_v36 = vunpack.c.h.bf16 %v743_v23  ;;  %v770_v39 = vpack.i.bf16 %v952_v22, %v942_v15  ;;  %776 = vrot.lane.b32.xlu2 %v755_v19, %s884_s20 }
  0x15   : > { %v214_v27 = vadd.f32 %v213_v21, %v212_v20  ;;  %v215_v40 = vmul.f32 %v965_v29, %v960_v26  ;;  %v217_v41 = vmul.f32 %v967_v30, %v963_v28  ;;  %v205_v42 = vunpack.c.l.bf16 %v970_v31 }
  0x16   : > { %v207_v43 = vunpack.c.l.bf16 %v973_v32  ;;  %v363_v44 = vrot.slane %v922_v2, 1  ;;  %v370_v45 = vrot.slane %v924_v3, 1  ;;  %v760_v47 = vpack.i.bf16 %v963_v28, %v960_v26 }
  0x17   : > { %v216_v48 = vadd.f32 %v215_v40, %v214_v27  ;;  %v201_v49 = vunpack.c.l.bf16 %v185_v37  ;;  %v203_v50 = vunpack.c.l.bf16 %v985_v38  ;;  %v364_v52 = vrot.slane %v205_v42, 1 }
  0x18   : > { %v371_v53 = vrot.slane %v207_v43, 1  ;;  %v349_v54 = vrot.slane %v960_v26, 1  ;;  %v356_v55 = vrot.slane %v963_v28, 1  ;;  %v197_v59 = vunpack.c.l.bf16 %v181_v46 }
  0x19   : > { %v218_v56 = vadd.f32 %v217_v41, %v216_v48  ;;  %v350_v57 = vrot.slane %v201_v49, 1  ;;  %v357_v58 = vrot.slane %v203_v50, 1  ;;  %v1011_v60 = vsel %vm335_vm0, %v363_v44, %v364_v52 }
  0x1a   : > { %v1014_v61 = vsel %vm335_vm0, %v370_v45, %v371_v53  ;;  %v199_v62 = vunpack.c.l.bf16 %v183_v51  ;;  %v336_v63 = vrot.slane %v928_v8, 1  ;;  %v223_v0 = vmul.f32 %v979_v35, %v942_v15 }
  0x1b   : > { %771 = vrot.lane.b32.xlu1 %v770_v39, %s883_s19  ;;  %v220_v1 = vadd.f32 %v219_v33, %v218_v56  ;;  %v225_v4 = vmul.f32 %v981_v36, %v952_v22  ;;  %v337_v5 = vrot.slane %v197_v59, 1  ;;  %v342_v6 = vrot.slane %v930_v9, 1 }
  0x1c   : > { %761 = vrot.lane.b32.xlu0 %v760_v47, %s883_s19  ;;  %v805_v12 = vpack.i.bf16 %v1014_v61, %v1011_v60  ;;  %v1027_v13 = vmul.f32 %v956_v24, %v1011_v60  ;;  %v351_v16 = vsel %vm335_vm0, %v349_v54, %v350_v57  ;;  %v358_v17 = vsel %vm335_vm0, %v356_v55, %v357_v58  ;;  %v193_v55 = vld [vmem:[%s915_s15 + $0x34] sm:$0x1] }
  0x1d   : > { %v222_v7 = vadd.f32 %v221_v34, %v220_v1  ;;  %v338_v18 = vsel %vm335_vm0, %v336_v63, %v337_v5  ;;  %v343_v19 = vrot.slane %v199_v62, 1  ;;  %781 = vrot.lane.b32.xlu2 %v760_v47, %s884_s20  ;;  %v501_v23 = vrot.slane %v960_v26, 2 }
  0x1e   : > { %v340_v21 = vmul.f32 %v932_v10, %v338_v18  ;;  %v502_v27 = vrot.slane %v201_v49, 2  ;;  %v1037_v33 = vmul.f32 %v958_v25, %v1014_v61  ;;  %v490_v37 = vrot.slane %v928_v8, 2 }
  0x1f   : > { %v224_v20 = vadd.f32 %v223_v0, %v222_v7  ;;  %v344_v34 = vsel %vm335_vm0, %v342_v6, %v343_v19  ;;  %v1041_v40 = vpack.i.bf16 %v358_v17, %v351_v16  ;;  %v353_v41 = vmul.f32 %v965_v29, %v351_v16  ;;  %v195_v0 = vld [vmem:[%s915_s15 + $0x3c] sm:$0x1] }
  0x20   : > { %v346_v44 = vmul.f32 %v934_v11, %v344_v34  ;;  %v360_v26 = vmul.f32 %v967_v30, %v358_v17  ;;  %v507_v45 = vrot.slane %v963_v28, 2  ;;  %v491_v46 = vrot.slane %v197_v59, 2 }
  0x21   : > { %v226_v38 = vadd.f32 %v225_v4, %v224_v20  ;;  %v495_v47 = vrot.slane %v930_v9, 2  ;;  %v1052_v49 = vsel %vm489_vm1, %v501_v23, %v502_v27  ;;  %v508_v51 = vrot.slane %v203_v50, 2 }
  0x22   : > { %v347_v8 = vadd.f32 %v346_v44, %v340_v21  ;;  %v496_v52 = vrot.slane %v199_v62, 2  ;;  %v795_v53 = vpack.i.bf16 %v344_v34, %v338_v18  ;;  %v513_v28 = vrot.slane %v922_v2, 2 }
  0x23   : > { %791 = vrot.lane.b32.xlu1 %v770_v39, %s884_s20  ;;  %v227_v48 = vmul.f32 0.125, %v226_v38  ;;  %v1055_v39 = vsel %vm489_vm1, %v490_v37, %v491_v46  ;;  %v514_v50 = vrot.slane %v205_v42, 2  ;;  %v519_v57 = vrot.slane %v924_v3, 2 }
  0x24   : > { %786 = vrot.lane.b32.xlu0 %v940_v14, %s884_s20  ;;  %v354_v54 = vadd.f32 %v353_v41, %v347_v8  ;;  %v494_v14 = vmul.f32 %v932_v10, %v1055_v39  ;;  %v497_v56 = vsel %vm489_vm1, %v495_v47, %v496_v52  ;;  %v520_v58 = vrot.slane %v207_v43, 2 }
  0x25   : > { %vm228_vm2 = vcmp.ge.f32.partialorder %v227_v48, 0.0  ;;  %v229_v9 = vmul.f32 0.1, %v227_v48  ;;  %v505_v62 = vmul.f32 %v965_v29, %v1052_v49  ;;  %v499_v63 = vmul.f32 %v934_v11, %v497_v56  ;;  %796 = vrot.lane.b32.xlu2 %v795_v53, %s883_s19 }
  0x26   : > { %v361_v59 = vadd.f32 %v360_v26, %v354_v54  ;;  %v509_v31 = vsel %vm489_vm1, %v507_v45, %v508_v51  ;;  %v1075_v42 = vsel %vm489_vm1, %v513_v28, %v514_v50  ;;  %v209_v3 = vunpack.c.l.bf16 %v193_v55 }
  0x27   : > { %v230_v2 = vsel %vm228_vm2, %v227_v48, %v229_v9  ;;  %v511_v32 = vmul.f32 %v967_v30, %v509_v31  ;;  %v500_v43 = vadd.f32 %v499_v63, %v494_v14  ;;  %v1079_v4 = vsel %vm489_vm1, %v519_v57, %v520_v58 }
  0x28   : > { %v231_v1 = vpack.c.bf16 %v230_v2, %v230_v2  ;;  %v517_v5 = vmul.f32 %v956_v24, %v1075_v42  ;;  %v523_v6 = vmul.f32 %v958_v25, %v1079_v4  ;;  %v211_v7 = vunpack.c.l.bf16 %v195_v0 }
  0x29   : > { %v377_v16 = vrot.slane %v942_v15, 1  ;;  %v506_v17 = vadd.f32 %v505_v62, %v500_v43  ;;  %v378_v18 = vrot.slane %v209_v3, 1  ;;  %v368_v19 = vadd.f32 %v1027_v13, %v361_v59 }
  0x2a   : > { %233 = vst.msk [vmem:[%s1089_s24] sm:$0xf] %vm232_vm3, %v231_v1  ;;  %v385_v20 = vrot.slane %v211_v7, 1  ;;  %v525_v21 = vrot.slane %v942_v15, 2  ;;  %v526_v23 = vrot.slane %v209_v3, 2  ;;  %v531_v27 = vrot.slane %v952_v22, 2 }
  0x2b   : > { %806 = vrot.lane.b32.xlu1 %v805_v12, %s883_s19  ;;  %v384_v12 = vrot.slane %v952_v22, 1  ;;  %v512_v34 = vadd.f32 %v511_v32, %v506_v17  ;;  %v379_v37 = vsel %vm335_vm0, %v377_v16, %v378_v18  ;;  %v375_v38 = vadd.f32 %v1037_v33, %v368_v19 }
  0x2c   : > { %801 = vrot.lane.b32.xlu0 %v1041_v40, %s883_s19  ;;  %v532_v41 = vrot.slane %v211_v7, 2  ;;  %v381_v26 = vmul.f32 %v979_v35, %v379_v37  ;;  %v527_v47 = vsel %vm489_vm1, %v525_v21, %v526_v23  ;;  %v825_v54 = vpack.i.bf16 %v497_v56, %v1055_v39 }
  0x2d   : > { %v386_v44 = vsel %vm335_vm0, %v384_v12, %v385_v20  ;;  %v518_v45 = vadd.f32 %v517_v5, %v512_v34  ;;  %v529_v22 = vmul.f32 %v979_v35, %v527_v47  ;;  %v835_v14 = vpack.i.bf16 %v509_v31, %v1052_v49 }
  0x2e   : > { %v810_v46 = vpack.i.bf16 %v386_v44, %v379_v37  ;;  %v388_v13 = vmul.f32 %v981_v36, %v386_v44  ;;  %v382_v15 = vadd.f32 %v381_v26, %v375_v38  ;;  %v533_v48 = vsel %vm489_vm1, %v531_v27, %v532_v41 }
  0x2f   : > { %v524_v8 = vadd.f32 %v523_v6, %v518_v45  ;;  %v535_v33 = vmul.f32 %v981_v36, %v533_v48  ;;  %v850_v49 = vpack.i.bf16 %v1079_v4, %v1075_v42  ;;  %v855_v56 = vpack.i.bf16 %v1079_v4, %v1014_v61 }
  0x30   : > { %811 = vrot.lane.b32.xlu2 %v810_v46, %s883_s19  ;;  %v389_v51 = vadd.f32 %v388_v13, %v382_v15  ;;  %v865_v59 = vpack.i.bf16 %v533_v48, %v527_v47  ;;  %v860_v62 = vpack.i.bf16 %v527_v47, %v379_v37  ;;  %v870_v63 = vpack.i.bf16 %v533_v48, %v386_v44 }
  0x31   : > { %v530_v52 = vadd.f32 %v529_v22, %v524_v8 }
  0x32   : > { %v390_v28 = vmul.f32 0.125, %v389_v51 }
  0x33   : > { %821 = vrot.lane.b32.xlu1 %v1041_v40, %s884_s20  ;;  %v536_v9 = vadd.f32 %v535_v33, %v530_v52 }
  0x34   : > { %816 = vrot.lane.b32.xlu0 %v795_v53, %s884_s20  ;;  %vm391_vm4 = vcmp.ge.f32.partialorder %v390_v28, 0.0  ;;  %v392_v55 = vmul.f32 0.1, %v390_v28  ;;  %v845_v53 = vpack.i.bf16 %v1075_v42, %v1011_v60 }
  0x35   : > { %v537_v50 = vmul.f32 0.125, %v536_v9 }
  0x36   : > { %v393_v57 = vsel %vm391_vm4, %v390_v28, %v392_v55 }
  0x37   : > { %v394_v58 = vpack.c.bf16 %v393_v57, %v393_v57  ;;  %vm538_vm5 = vcmp.ge.f32.partialorder %v537_v50, 0.0  ;;  %v539_v2 = vmul.f32 0.1, %v537_v50 }
  0x38   : > { %826 = vrot.lane.b32.xlu2 %v825_v54, %s883_s19 }
  0x39   : > { %715 = vst.msk [vmem:[%s1089_s24 + $0xc] sm:$0xf] %vm232_vm3, %v394_v58  ;;  %v540_v40 = vsel %vm538_vm5, %v537_v50, %v539_v2 }
  0x3a   : > { %v541_v39 = vpack.c.bf16 %v540_v40, %v540_v40 }
  0x3b   : > { %836 = vrot.lane.b32.xlu1 %v835_v14, %s883_s19 }
  0x3c   : > { %831 = vrot.lane.b32.xlu0 %v825_v54, %s884_s20  ;;  %718 = vst.msk [vmem:[%s1089_s24 + $0x18] sm:$0xf] %vm232_vm3, %v541_v39 }
  0x40   : > { %841 = vrot.lane.b32.xlu2 %v835_v14, %s884_s20 }
  0x43   : > { %851 = vrot.lane.b32.xlu1 %v850_v49, %s883_s19 }
  0x44   : > { %846 = vrot.lane.b32.xlu0 %v845_v53, %s884_s20 }
  0x48   : > { %856 = vrot.lane.b32.xlu2 %v855_v56, %s884_s20 }
  0x4b   : > { %866 = vrot.lane.b32.xlu1 %v865_v59, %s883_s19 }
  0x4c   : > { %861 = vrot.lane.b32.xlu0 %v860_v62, %s884_s20 }
  0x50   : > { %871 = vrot.lane.b32.xlu2 %v870_v63, %s884_s20 }
  0x6e   : > { %v777_v60 = vpop.permute.xlu2 %776 }
  0x6f   : > { %v779_v3 = vunpack.i.h.bf16 %v777_v60  ;;  %v778_v32 = vunpack.i.l.bf16 %v777_v60 }
  0x71   : > { %v291_v4 = vmul.f32 %v778_v32, %v932_v10  ;;  %v295_v5 = vmul.f32 %v779_v3, %v934_v11 }
  0x73   : > { %v296_v20 = vadd.f32 %v295_v5, %v291_v4 }
  0x77   : > { %v782_v0 = vpop.permute.xlu2 %781 }
  0x78   : > { %v783_v6 = vunpack.i.l.bf16 %v782_v0  ;;  %v784_v21 = vunpack.i.h.bf16 %v782_v0 }
  0x7a   : > { %v300_v23 = vmul.f32 %v783_v6, %v965_v29  ;;  %v305_v46 = vmul.f32 %v784_v21, %v967_v30 }
  0x7c   : > { %v301_v45 = vadd.f32 %v300_v23, %v296_v20 }
  0x7e   : > { %v306_v9 = vadd.f32 %v305_v46, %v301_v45 }
  0x7f   : > { %v797_v42 = vpop.permute.xlu2 %796 }
  0x80   : > { %v799_v54 = vunpack.i.h.bf16 %v797_v42  ;;  %v798_v14 = vunpack.i.l.bf16 %v797_v42 }
  0x82   : > { %v400_v59 = vmul.f32 %v798_v14, %v932_v10  ;;  %v404_v62 = vmul.f32 %v799_v54, %v934_v11 }
  0x84   : > { %v405_v4 = vadd.f32 %v404_v62, %v400_v59 }
  0x85   : > { %v767_v1 = vpop.permute.xlu1 %766 }
  0x86   : > { %v757_v31 = vpop.permute.xlu0 %756  ;;  %v768_v27 = vunpack.i.l.bf16 %v767_v1  ;;  %v769_v41 = vunpack.i.h.bf16 %v767_v1 }
  0x87   : > { %v759_v43 = vunpack.i.h.bf16 %v757_v31  ;;  %v758_v61 = vunpack.i.l.bf16 %v757_v31 }
  0x88   : > { %v261_v13 = vmul.f32 %v768_v27, %v956_v24  ;;  %v267_v22 = vmul.f32 %v769_v41, %v958_v25 }
  0x89   : > { %v238_v7 = vmul.f32 %v758_v61, %v932_v10  ;;  %v243_v16 = vmul.f32 %v759_v43, %v934_v11 }
  0x8a   : > { %v1141_v38 = vpop.permute.xlu2 %811 }
  0x8b   : > { %v244_v34 = vadd.f32 %v243_v16, %v238_v7  ;;  %v813_v23 = vunpack.i.l.bf16 %v1141_v38 }
  0x8d   : > { %v772_v17 = vpop.permute.xlu1 %771 }
  0x8e   : > { %v762_v18 = vpop.permute.xlu0 %761  ;;  %v773_v47 = vunpack.i.l.bf16 %v772_v17  ;;  %v774_v33 = vunpack.i.h.bf16 %v772_v17 }
  0x8f   : > { %v764_v12 = vunpack.i.h.bf16 %v762_v18  ;;  %v763_v19 = vunpack.i.l.bf16 %v762_v18 }
  0x90   : > { %v273_v55 = vmul.f32 %v773_v47, %v979_v35  ;;  %v279_v40 = vmul.f32 %v774_v33, %v981_v36  ;;  %v814_v47 = vunpack.i.h.bf16 %v1141_v38 }
  0x91   : > { %v249_v37 = vmul.f32 %v763_v19, %v965_v29  ;;  %v255_v26 = vmul.f32 %v764_v12, %v967_v30 }
  0x92   : > { %v827_v56 = vpop.permute.xlu2 %826 }
  0x93   : > { %v250_v44 = vadd.f32 %v249_v37, %v244_v34 }
  0x95   : > { %v256_v15 = vadd.f32 %v255_v26, %v250_v44  ;;  %v792_v48 = vpop.permute.xlu1 %791 }
  0x96   : > { %v787_v8 = vpop.permute.xlu0 %786  ;;  %v793_v57 = vunpack.i.l.bf16 %v792_v48  ;;  %v794_v2 = vunpack.i.h.bf16 %v792_v48 }
  0x97   : > { %v262_v51 = vadd.f32 %v261_v13, %v256_v15  ;;  %v789_v52 = vunpack.i.h.bf16 %v787_v8  ;;  %v788_v28 = vunpack.i.l.bf16 %v787_v8 }
  0x98   : > { %v320_v60 = vmul.f32 %v793_v57, %v979_v35  ;;  %v325_v31 = vmul.f32 %v794_v2, %v981_v36 }
  0x99   : > { %v268_v50 = vadd.f32 %v267_v22, %v262_v51  ;;  %v310_v58 = vmul.f32 %v788_v28, %v956_v24  ;;  %v315_v53 = vmul.f32 %v789_v52, %v958_v25  ;;  %v429_v22 = vmul.f32 %v813_v23, %v979_v35 }
  0x9a   : > { %v842_v44 = vpop.permute.xlu2 %841  ;;  %v434_v51 = vmul.f32 %v814_v47, %v981_v36  ;;  %v829_v28 = vunpack.i.h.bf16 %v827_v56 }
  0x9b   : > { %v274_v39 = vadd.f32 %v273_v55, %v268_v50  ;;  %v311_v49 = vadd.f32 %v310_v58, %v306_v9  ;;  %v828_v9 = vunpack.i.l.bf16 %v827_v56  ;;  %v843_v38 = vunpack.i.l.bf16 %v842_v44 }
  0x9c   : > { %v551_v62 = vmul.f32 %v829_v28, %v934_v11 }
  0x9d   : > { %v280_v63 = vadd.f32 %v279_v40, %v274_v39  ;;  %v316_v0 = vadd.f32 %v315_v53, %v311_v49  ;;  %v807_v1 = vpop.permute.xlu1 %806  ;;  %v547_v59 = vmul.f32 %v828_v9, %v932_v10 }
  0x9e   : > { %v802_v42 = vpop.permute.xlu0 %801  ;;  %v808_v5 = vunpack.i.l.bf16 %v807_v1  ;;  %v809_v17 = vunpack.i.h.bf16 %v807_v1 }
  0x9f   : > { %v281_v3 = vmul.f32 0.125, %v280_v63  ;;  %v321_v32 = vadd.f32 %v320_v60, %v316_v0  ;;  %v804_v43 = vunpack.i.h.bf16 %v802_v42  ;;  %v803_v61 = vunpack.i.l.bf16 %v802_v42 }
  0xa0   : > { %v419_v34 = vmul.f32 %v808_v5, %v956_v24  ;;  %v424_v46 = vmul.f32 %v809_v17, %v958_v25 }
  0xa1   : > { %vm282_vm6 = vcmp.ge.f32.partialorder %v281_v3, 0.0  ;;  %v283_v6 = vmul.f32 0.1, %v281_v3  ;;  %v326_v7 = vadd.f32 %v325_v31, %v321_v32  ;;  %v409_v16 = vmul.f32 %v803_v61, %v965_v29 }
  0xa2   : > { %v414_v20 = vmul.f32 %v804_v43, %v967_v30  ;;  %v857_v49 = vpop.permute.xlu2 %856  ;;  %v552_v43 = vadd.f32 %v551_v62, %v547_v59 }
  0xa3   : > { %v284_v18 = vsel %vm282_vm6, %v281_v3, %v283_v6  ;;  %v327_v12 = vmul.f32 0.125, %v326_v7  ;;  %v410_v19 = vadd.f32 %v409_v16, %v405_v4  ;;  %v602_v3 = vmul.f32 %v843_v38, %v965_v29 }
  0xa4   : > { %v285_v21 = vpack.c.bf16 %v284_v18, %v284_v18  ;;  %v844_v4 = vunpack.i.h.bf16 %v842_v44 }
  0xa5   : > { %vm328_vm7 = vcmp.ge.f32.partialorder %v327_v12, 0.0  ;;  %v329_v27 = vmul.f32 0.1, %v327_v12  ;;  %v415_v37 = vadd.f32 %v414_v20, %v410_v19  ;;  %v822_v41 = vpop.permute.xlu1 %821 }
  0xa6   : > { %713 = vst.msk [vmem:[%s1089_s24 + $0x4] sm:$0xf] %vm232_vm3, %v285_v21  ;;  %v817_v26 = vpop.permute.xlu0 %816  ;;  %v823_v53 = vunpack.i.l.bf16 %v822_v41  ;;  %v824_v5 = vunpack.i.h.bf16 %v822_v41  ;;  %v607_v21 = vmul.f32 %v844_v4, %v967_v30  ;;  %v858_v41 = vunpack.i.l.bf16 %v857_v49 }
  0xa7   : > { %v330_v45 = vsel %vm328_vm7, %v327_v12, %v329_v27  ;;  %v420_v13 = vadd.f32 %v419_v34, %v415_v37  ;;  %v818_v8 = vunpack.i.l.bf16 %v817_v26  ;;  %v819_v52 = vunpack.i.h.bf16 %v817_v26 }
  0xa8   : > { %v331_v15 = vpack.c.bf16 %v330_v45, %v330_v45  ;;  %v455_v6 = vmul.f32 %v823_v53, %v965_v29  ;;  %v859_v27 = vunpack.i.h.bf16 %v857_v49  ;;  %v460_v34 = vmul.f32 %v824_v5, %v967_v30 }
  0xa9   : > { %v425_v48 = vadd.f32 %v424_v46, %v420_v13  ;;  %v446_v55 = vmul.f32 %v818_v8, %v932_v10  ;;  %v450_v2 = vmul.f32 %v819_v52, %v934_v11 }
  0xaa   : > { %714 = vst.msk [vmem:[%s1089_s24 + $0x8] sm:$0xf] %vm232_vm3, %v331_v15  ;;  %v872_v44 = vpop.permute.xlu2 %871 }
  0xab   : > { %v430_v33 = vadd.f32 %v429_v22, %v425_v48  ;;  %v451_v31 = vadd.f32 %v450_v2, %v446_v55  ;;  %v874_v15 = vunpack.i.h.bf16 %v872_v44  ;;  %v873_v48 = vunpack.i.l.bf16 %v872_v44 }
  0xad   : > { %v435_v54 = vadd.f32 %v434_v51, %v430_v33  ;;  %v837_v14 = vpop.permute.xlu1 %836  ;;  %v456_v17 = vadd.f32 %v455_v6, %v451_v31  ;;  %v470_v33 = vmul.f32 %v858_v41, %v958_v25  ;;  %v617_v51 = vmul.f32 %v859_v27, %v958_v25 }
  0xae   : > { %v838_v50 = vunpack.i.l.bf16 %v837_v14  ;;  %v832_v57 = vpop.permute.xlu0 %831  ;;  %v839_v61 = vunpack.i.h.bf16 %v837_v14  ;;  %v627_v38 = vmul.f32 %v874_v15, %v981_v36 }
  0xaf   : > { %v436_v58 = vmul.f32 0.125, %v435_v54  ;;  %v834_v40 = vunpack.i.h.bf16 %v832_v57  ;;  %v833_v39 = vunpack.i.l.bf16 %v832_v57  ;;  %v461_v13 = vadd.f32 %v460_v34, %v456_v17 }
  0xb0   : > { %v556_v0 = vmul.f32 %v838_v50, %v965_v29  ;;  %v561_v20 = vmul.f32 %v839_v61, %v967_v30  ;;  %v480_v57 = vmul.f32 %v873_v48, %v981_v36 }
  0xb1   : > { %vm437_vm8 = vcmp.ge.f32.partialorder %v436_v58, 0.0  ;;  %v438_v56 = vmul.f32 0.1, %v436_v58  ;;  %v593_v63 = vmul.f32 %v833_v39, %v932_v10  ;;  %v597_v60 = vmul.f32 %v834_v40, %v934_v11 }
  0xb2   : > { %v557_v10 = vadd.f32 %v556_v0, %v552_v43 }
  0xb3   : > { %v439_v1 = vsel %vm437_vm8, %v436_v58, %v438_v56  ;;  %v598_v42 = vadd.f32 %v597_v60, %v593_v63 }
  0xb4   : > { %v440_v32 = vpack.c.bf16 %v439_v1, %v439_v1  ;;  %v562_v26 = vadd.f32 %v561_v20, %v557_v10 }
  0xb5   : > { %v852_v7 = vpop.permute.xlu1 %851  ;;  %v603_v18 = vadd.f32 %v602_v3, %v598_v42 }
  0xb6   : > { %716 = vst.msk [vmem:[%s1089_s24 + $0x10] sm:$0xf] %vm232_vm3, %v440_v32  ;;  %v853_v16 = vunpack.i.l.bf16 %v852_v7  ;;  %v847_v11 = vpop.permute.xlu0 %846  ;;  %v854_v45 = vunpack.i.h.bf16 %v852_v7 }
  0xb7   : > { %v849_v12 = vunpack.i.h.bf16 %v847_v11  ;;  %v848_v19 = vunpack.i.l.bf16 %v847_v11  ;;  %v608_v46 = vadd.f32 %v607_v21, %v603_v18 }
  0xb8   : > { %v566_v23 = vmul.f32 %v853_v16, %v956_v24  ;;  %v571_v52 = vmul.f32 %v854_v45, %v958_v25 }
  0xb9   : > { %v465_v29 = vmul.f32 %v848_v19, %v956_v24  ;;  %v612_v37 = vmul.f32 %v849_v12, %v956_v24 }
  0xba   : > { %v567_v47 = vadd.f32 %v566_v23, %v562_v26 }
  0xbb   : > { %v466_v22 = vadd.f32 %v465_v29, %v461_v13  ;;  %v613_v8 = vadd.f32 %v612_v37, %v608_v46 }
  0xbc   : > { %v572_v55 = vadd.f32 %v571_v52, %v567_v47 }
  0xbd   : > { %v867_v30 = vpop.permute.xlu1 %866  ;;  %v471_v58 = vadd.f32 %v470_v33, %v466_v22  ;;  %v618_v2 = vadd.f32 %v617_v51, %v613_v8 }
  0xbe   : > { %v869_v28 = vunpack.i.h.bf16 %v867_v30  ;;  %v868_v24 = vunpack.i.l.bf16 %v867_v30  ;;  %v862_v9 = vpop.permute.xlu0 %861 }
  0xbf   : > { %v864_v54 = vunpack.i.h.bf16 %v862_v9  ;;  %v863_v14 = vunpack.i.l.bf16 %v862_v9 }
  0xc0   : > { %v576_v50 = vmul.f32 %v868_v24, %v979_v35  ;;  %v581_v25 = vmul.f32 %v869_v28, %v981_v36 }
  0xc1   : > { %v475_v40 = vmul.f32 %v863_v14, %v979_v35  ;;  %v622_v39 = vmul.f32 %v864_v54, %v979_v35 }
  0xc2   : > { %v577_v49 = vadd.f32 %v576_v50, %v572_v55 }
  0xc3   : > { %v476_v53 = vadd.f32 %v475_v40, %v471_v58  ;;  %v623_v59 = vadd.f32 %v622_v39, %v618_v2 }
  0xc4   : > { %v582_v62 = vadd.f32 %v581_v25, %v577_v49 }
  0xc5   : > { %v481_v56 = vadd.f32 %v480_v57, %v476_v53  ;;  %v628_v63 = vadd.f32 %v627_v38, %v623_v59 }
  0xc6   : > { %v583_v60 = vmul.f32 0.125, %v582_v62 }
  0xc7   : > { %v482_v0 = vmul.f32 0.125, %v481_v56  ;;  %v629_v1 = vmul.f32 0.125, %v628_v63 }
  0xc8   : > { %vm584_vm9 = vcmp.ge.f32.partialorder %v583_v60, 0.0  ;;  %v585_v31 = vmul.f32 0.1, %v583_v60 }
  0xc9   : > { %vm483_vm10 = vcmp.ge.f32.partialorder %v482_v0, 0.0  ;;  %v484_v42 = vmul.f32 0.1, %v482_v0  ;;  %vm630_vm11 = vcmp.ge.f32.partialorder %v629_v1, 0.0  ;;  %v631_v35 = vmul.f32 0.1, %v629_v1 }
  0xca   : > { %v586_v3 = vsel %vm584_vm9, %v583_v60, %v585_v31 }
  0xcb   : > { %v587_v32 = vpack.c.bf16 %v586_v3, %v586_v3  ;;  %v485_v36 = vsel %vm483_vm10, %v482_v0, %v484_v42  ;;  %v632_v43 = vsel %vm630_vm11, %v629_v1, %v631_v35 }
  0xcc   : > { %v486_v61 = vpack.c.bf16 %v485_v36, %v485_v36  ;;  %v633_v4 = vpack.c.bf16 %v632_v43, %v632_v43 }
  0xcd   : > { %719 = vst.msk [vmem:[%s1089_s24 + $0x1c] sm:$0xf] %vm232_vm3, %v587_v32 }
  0xce   : > { %717 = vst.msk [vmem:[%s1089_s24 + $0x14] sm:$0xf] %vm232_vm3, %v486_v61 }
  0xcf   : > { %720 = vst.msk [vmem:[%s1089_s24 + $0x20] sm:$0xf] %vm232_vm3, %v633_v4 }
  0xd0 PF: > { %s12_s9 = sadd.s32 1, %s881_s9  }
  0xd1   : > { %p9_p4 = scmp.ge.s32.totalorder %s12_s9, 4  }
  0xd3   :  { %11 = sbr.rel (!%p9_p4) target bundleno = 1 (0x1), region = 69 }

// kernel: pwcnet_forward.15
= control target key start
LH: loop header
LB: loop body
LE: loop exit
PB: predicated region body
PF: predicated region fallthrough
CT: control target
= control target key end

     0   :  { %s1062_s21 = smov 0   ;;  %s1191_s0 = inlined_call_operand.vmem [shape: bf16[2,19,108], index: 0, kind: input, shape index: {}]   ;;  %s1192_s1 = inlined_call_operand.vmem [shape: bf16[9,16,19], index: 1, kind: input, shape index: {}]   ;;  %s1193_s2 = inlined_call_operand.vmem [shape: f32[16,1], index: 2, kind: input, shape index: {}]   ;;  %s1194_s3 = inlined_call_operand.vmem [shape: bf16[9,2,16], index: 3, kind: input, shape index: {}]   ;;  %s1195_s4 = inlined_call_operand.vmem [shape: f32[2,1], index: 4, kind: input, shape index: {}]   ;;  %s1196_s5 = inlined_call_operand.vmem [shape: f32[1,80], index: 5, kind: input, shape index: {}]   ;;  %s1197_s6 = inlined_call_operand.vmem [shape: f32[2,2,80], index: 6, kind: output, shape index: {}]  }
   0x1 LB: > { %s878_s22 = sadd.s32 4294967295, %s1014_s21   ;;  %p882_p0 = scmp.ge.s32.totalorder %s1014_s21, 1  ;;  %s1014_s21 = sphi %s1062_s21, %s16_s21  }
   0x2   : > { %p212_p1 = scmp.lt.s32.totalorder %s1014_s21, 3 }
   0x4   : > { %p213_p2 = pnand %p882_p0, %p212_p1 }
   0x5   : > { %p241_p3 = scmp.lt.s32.totalorder (!%p213_p2), %s878_s22, 1  ;;  %s1016_s27 = smov (!%p213_p2), 126  }
   0x6   : > { %216 = sbr.rel (%p213_p2) target bundleno = 723 (0x2d3), region = 44  ;;  %s1017_s28 = smov (!%p213_p2), 127  }
   0x7   : > { %s1018_s29 = smov (!%p213_p2), 118   ;;  %s1019_s30 = smov (!%p213_p2), 108  }
   0x8   : > { %s1020_s7 = smov (!%p213_p2), 117   ;;  %s1021_s8 = smov (!%p213_p2), 116  }
   0x9   : > { %s1022_s9 = smov (!%p213_p2), 107   ;;  %s1023_s10 = smov (!%p213_p2), 106  }
   0xb   : > { %s1199_s22 = smov (!%p241_p3, %s878_s22), 1  ;;  %vm281_vm0 = vcmask 1040384   ;;  %vm282_vm1 = vcmask 1041408   ;;  %v1024_v4 = vmov 65535   ;;  %v974_v8 = vld [vmem:[%s1192_s1] sm:$0xff]  ;;  %vm277_vm2 = vcmask 154624  }
   0xc   : > { %s984_s23 = smul.u32 12, %s1199_s22  ;;  %v283_v5 = vsel %vm281_vm0, 4294967295, %v1024_v4  ;;  %v976_v17 = vld [vmem:[%s1192_s1 + $0x10] sm:$0xff]  ;;  %v975_v20 = vld [vmem:[%s1192_s1 + $0x8] sm:$0xff]  ;;  %v573_v23 = vld [vmem:[%s1193_s2] sm:$0xff]  ;;  %v1025_v25 = vmov 0  }
   0xd   : > { %v284_v6 = vsel %vm282_vm1, %v283_v5, 0  ;;  %v574_v24 = vld [vmem:[%s1193_s2 + $0x8] sm:$0xff]  ;;  %1004 = vset.pattern.permute.xlu1 %v1025_v25  ;;  %1005 = vset.pattern.permute.xlu2 %v1025_v25  ;;  %v977_v26 = vld [vmem:[%s1192_s1 + $0x18] sm:$0xff]  ;;  %v980_v32 = vld [vmem:[%s1192_s1 + $0x30] sm:$0xff]  ;;  %vm599_vm3 = vcmask 879616   ;;  %vm612_vm6 = vcmask 740440  }
   0xe   : > { %s245_s26 = scalar_lea.vmem %s1191_s0, %s984_s23  ;;  %1006 = vset.pattern.permute.xlu0 %v1025_v25  ;;  %v978_v35 = vld [vmem:[%s1192_s1 + $0x20] sm:$0xff]  ;;  %v979_v40 = vld [vmem:[%s1192_s1 + $0x28] sm:$0xff]  ;;  %v981_v41 = vld [vmem:[%s1192_s1 + $0x38] sm:$0xff]  ;;  %600 = vst.msk [vmem:[#allocation2] sm:$0xf] %vm599_vm3, %v1025_v25  ;;  %s1026_s23 = smov 11  }
   0xf   : > { %v253_v0 = vld [vmem:[%s245_s26 + $0x8] sm:$0x3]  ;;  %v973_v1 = vld [vmem:[%s245_s26] sm:$0xff]  ;;  %601 = vst.msk [vmem:[#allocation2 + $0x4] sm:$0xf] %vm599_vm3, %v1025_v25  ;;  %vm628_vm7 = vcmask 130048  }
  0x10   : > { %v269_v2 = vunpack.c.l.b16 %v253_v0  ;;  %336 = vrot.lane.b32.xlu2 %v973_v1, %s1016_s27  ;;  %v982_v43 = vld [vmem:[%s1192_s1 + $0x40] sm:$0xff]  ;;  %s884_s20 = sshll.u32 %s1199_s22, 1  ;;  %vm823_vm8 = vcmask 648192  }
  0x11   : > { %s249_s25 = scalar_lea.vmem %s1197_s6, %s884_s20 }
  0x12   : > { %v271_v3 = vpack.c.b16 %v269_v2, %v269_v2 }
  0x14   : > { %338 = vrot.lane.b32.xlu1 %v271_v3, %s1016_s27  ;;  %274 = vrot.lane.b32.xlu0 %v271_v3, %s1017_s28  ;;  %v312_v7 = vand.u32 %v284_v6, %v271_v3 }
  0x16   : > { %320 = vmatpush.bf16.msra.mxu1 %v312_v7 }
  0x18   : > { %371 = vrot.lane.b32.xlu2 %v973_v1, %s1018_s29 }
  0x1a   : > { %321 = vmatpush.bf16.msra.mxu1 %v973_v1 }
  0x1c   : > { %373 = vrot.lane.b32.xlu1 %v271_v3, %s1018_s29  ;;  %272 = vrot.lane.b32.xlu0 %v973_v1, %s1017_s28 }
  0x1d   : > { %900 = vmatmul.msk.bf16.vlgmr.msra.gmra.mxu1 %vm277_vm2, %v974_v8 }
  0x20   : > { %478 = vrot.lane.b32.xlu2 %v271_v3, %s1019_s30 }
  0x24   : > { %406 = vrot.lane.b32.xlu1 %v973_v1, %s1020_s7  ;;  %408 = vrot.lane.b32.xlu0 %v271_v3, %s1020_s7 }
  0x28   : > { %476 = vrot.lane.b32.xlu2 %v973_v1, %s1019_s30 }
  0x2c   : > { %443 = vrot.lane.b32.xlu1 %v271_v3, %s1021_s8  ;;  %513 = vrot.lane.b32.xlu0 %v271_v3, %s1022_s9 }
  0x30   : > { %548 = vrot.lane.b32.xlu2 %v271_v3, %s1023_s10 }
  0x34   : > { %441 = vrot.lane.b32.xlu1 %v973_v1, %s1021_s8  ;;  %511 = vrot.lane.b32.xlu0 %v973_v1, %s1022_s9 }
  0x38   : > { %582 = vperm.xlu2 %1005, %v574_v24  }
  0x3c   : > { %546 = vrot.lane.b32.xlu0 %v973_v1, %s1023_s10  ;;  %577 = vperm.xlu1 %1004, %v573_v23  }
  0x6a   : > { %v337_v9 = vpop.permute.xlu2 %336 }
  0x72   : > { %v372_v10 = vpop.permute.xlu2 %371 }
  0x7a   : > { %v479_v11 = vpop.permute.xlu2 %478 }
  0x7b   : > { %v485_v16 = vand.u32 %v479_v11, %v284_v6  ;;  %v1007_v11 = vld [vmem:[%s1196_s5] ss:$0 sm:$0xff] }
  0x82   : > { %v477_v22 = vpop.permute.xlu2 %476 }
  0x86   : > { %v339_v12 = vpop.permute.xlu1 %338  ;;  %v275_v13 = vpop.permute.xlu0 %274 }
  0x87   : > { %v286_v14 = vand.u32 %v284_v6, %v275_v13  ;;  %v345_v15 = vand.u32 %v339_v12, %v284_v6 }
  0x89   : > { %294 = vmatpush.bf16.msra.mxu0 %v286_v14  ;;  %353 = vmatpush.bf16.msra.mxu2 %v345_v15 }
  0x8a   : > { %v549_v30 = vpop.permute.xlu2 %548 }
  0x8b   : > { %v555_v31 = vand.u32 %v549_v30, %v284_v6 }
  0x8d   : > { %354 = vmatpush.bf16.msra.mxu2 %v337_v9 }
  0x8e   : > { %v374_v18 = vpop.permute.xlu1 %373  ;;  %v273_v19 = vpop.permute.xlu0 %272 }
  0x8f   : > { %295 = vmatpush.bf16.msra.mxu0 %v273_v19  ;;  %v380_v21 = vand.u32 %v374_v18, %v284_v6 }
  0x90   : > { %907 = vmatmul.msk.bf16.vlgmr.msra.gmra.mxu2 %vm277_vm2, %v976_v17 }
  0x91   : > { %493 = vmatpush.bf16.msrb.mxu2 %v485_v16  ;;  %388 = vmatpush.bf16.msra.mxu3 %v380_v21 }
  0x92   : > { %895 = vmatmul.msk.bf16.vlgmr.msra.gmra.mxu0 %vm277_vm2, %v975_v20  ;;  %v583_v18 = vpop.permute.xlu2 %582 }
  0x95   : > { %494 = vmatpush.bf16.msrb.mxu2 %v477_v22  ;;  %389 = vmatpush.bf16.msra.mxu3 %v372_v10 }
  0x96   : > { %v407_v27 = vpop.permute.xlu1 %406  ;;  %v409_v28 = vpop.permute.xlu0 %408 }
  0x97   : > { %v415_v29 = vand.u32 %v409_v28, %v284_v6 }
  0x98   : > { %914 = vmatmul.msk.bf16.vlgmr.msra.gmra.mxu3 %vm277_vm2, %v977_v26 }
  0x99   : > { %423 = vmatpush.bf16.msrb.mxu0 %v415_v29 }
  0x9a   : > { %v323_v45 = vpop.f32.mrf.mxu1 }
  0x9d   : > { %424 = vmatpush.bf16.msrb.mxu0 %v407_v27 }
  0x9e   : > { %v444_v33 = vpop.permute.xlu1 %443  ;;  %v514_v34 = vpop.permute.xlu0 %513 }
  0x9f   : > { %v450_v36 = vand.u32 %v444_v33, %v284_v6  ;;  %v520_v37 = vand.u32 %v514_v34, %v284_v6  ;;  %v617_v33 = vld [vmem:[%s1194_s3] sm:$0x1] }
  0xa0   : > { %935 = vmatmul.msk.bf16.vlgmr.msrb.gmra.mxu2 %vm277_vm2, %v980_v32  ;;  %v816_v32 = vld [vmem:[%s1195_s4] sm:$0x3] }
  0xa1   : > { %563 = vmatpush.bf16.msra.mxu0 %v555_v31  ;;  %528 = vmatpush.bf16.msrb.mxu3 %v520_v37  ;;  %v961_v37 = vld [vmem:[%s1194_s3 + $0x4] sm:$0x1] }
  0xa2   : > { %458 = vmatpush.bf16.msrb.mxu1 %v450_v36  ;;  %921 = vmatmul.msk.bf16.vlgmr.msrb.gmra.mxu0 %vm277_vm2, %v978_v35  ;;  %v325_v49 = vpop.f32.mrf.mxu1  ;;  %v950_v35 = vld [vmem:[%s1194_s3 + $0x1] sm:$0x1] }
  0xa6   : > { %v442_v38 = vpop.permute.xlu1 %441  ;;  %v512_v39 = vpop.permute.xlu0 %511 }
  0xa7   : > { %459 = vmatpush.bf16.msrb.mxu1 %v442_v38  ;;  %529 = vmatpush.bf16.msrb.mxu3 %v512_v39 }
  0xaa   : > { %928 = vmatmul.msk.bf16.vlgmr.msrb.gmra.mxu1 %vm277_vm2, %v979_v40  ;;  %942 = vmatmul.msk.bf16.vlgmr.msrb.gmra.mxu3 %vm277_vm2, %v981_v41  ;;  %v957_v41 = vld [vmem:[%s1194_s3 + $0x2] sm:$0x1] }
  0xae   : > { %v547_v42 = vpop.permute.xlu0 %546  ;;  %v578_v4 = vpop.permute.xlu1 %577 }
  0xaf   : > { %564 = vmatpush.bf16.msra.mxu0 %v547_v42  ;;  %v959_v42 = vld [vmem:[%s1194_s3 + $0x3] sm:$0x1] }
  0xb2   : > { %949 = vmatmul.msk.bf16.vlgmr.msra.gmra.mxu0 %vm277_vm2, %v982_v43 }
 0x10f   : > { %v297_v44 = vpop.f32.mrf.mxu0 }
 0x110   : > { %v324_v52 = vadd.f32 %v323_v45, %v297_v44  ;;  %v963_v45 = vld [vmem:[%s1194_s3 + $0x5] sm:$0x1] }
 0x113   : > { %v356_v46 = vpop.f32.mrf.mxu2 }
 0x114   : > { %v361_v53 = vadd.f32 %v356_v46, %v324_v52 }
 0x117   : > { %v299_v47 = vpop.f32.mrf.mxu0 }
 0x118   : > { %v326_v59 = vadd.f32 %v325_v49, %v299_v47  ;;  %v965_v47 = vld [vmem:[%s1194_s3 + $0x6] sm:$0x1]  ;;  %v969_v49 = vld [vmem:[%s1194_s3 + $0x8] sm:$0x1] }
 0x11b   : > { %v391_v48 = vpop.f32.mrf.mxu3  ;;  %v358_v50 = vpop.f32.mrf.mxu2 }
 0x11c   : > { %v396_v54 = vadd.f32 %v391_v48, %v361_v53  ;;  %v362_v62 = vadd.f32 %v358_v50, %v326_v59  ;;  %v967_v48 = vld [vmem:[%s1194_s3 + $0x7] sm:$0x1] }
 0x11f   : > { %v426_v51 = vpop.f32.mrf.mxu0 }
 0x120   : > { %v431_v56 = vadd.f32 %v426_v51, %v396_v54 }
 0x123   : > { %v393_v55 = vpop.f32.mrf.mxu3  ;;  %v496_v61 = vpop.f32.mrf.mxu2 }
 0x124   : > { %v397_v63 = vadd.f32 %v393_v55, %v362_v62 }
 0x127   : > { %v428_v57 = vpop.f32.mrf.mxu0  ;;  %v461_v58 = vpop.f32.mrf.mxu1 }
 0x128   : > { %v466_v60 = vadd.f32 %v461_v58, %v431_v56  ;;  %v432_v2 = vadd.f32 %v428_v57, %v397_v63 }
 0x12a   : > { %v501_v0 = vadd.f32 %v496_v61, %v466_v60 }
 0x12b   : > { %v498_v10 = vpop.f32.mrf.mxu2 }
 0x12d   : > { %v531_v1 = vpop.f32.mrf.mxu3 }
 0x12e   : > { %v536_v3 = vadd.f32 %v531_v1, %v501_v0 }
 0x12f   : > { %v463_v5 = vpop.f32.mrf.mxu1  ;;  %v566_v6 = vpop.f32.mrf.mxu0 }
 0x130   : > { %v467_v7 = vadd.f32 %v463_v5, %v432_v2  ;;  %v571_v8 = vadd.f32 %v566_v6, %v536_v3 }
 0x132   : > { %v585_v9 = vadd.f32 %v578_v4, %v571_v8  ;;  %v502_v13 = vadd.f32 %v498_v10, %v467_v7 }
 0x134   : > { %vm587_vm4 = vcmp.ge.f32.partialorder %v585_v9, 0.0  ;;  %v589_v12 = vmul.f32 0.1, %v585_v9 }
 0x135   : > { %v533_v14 = vpop.f32.mrf.mxu3 }
 0x136   : > { %v591_v15 = vsel %vm587_vm4, %v585_v9, %v589_v12  ;;  %v537_v16 = vadd.f32 %v533_v14, %v502_v13 }
 0x137   : > { %v568_v17 = vpop.f32.mrf.mxu0  ;;  %v597_v19 = vmul.f32 %v1007_v11, %v591_v15 }
 0x138   : > { %v572_v20 = vadd.f32 %v568_v17, %v537_v16 }
 0x139   : > { %v602_v21 = vpack.c.bf16 %v597_v19, %v597_v19 }
 0x13a   : > { %v586_v22 = vadd.f32 %v583_v18, %v572_v20 }
 0x13b   : > { %606 = vrot.lane.b32.xlu0 %v602_v21, %s1026_s23 }
 0x13c   : > { %vm588_vm5 = vcmp.ge.f32.partialorder %v586_v22, 0.0  ;;  %v590_v23 = vmul.f32 0.1, %v586_v22 }
 0x13e   : > { %v592_v24 = vsel %vm588_vm5, %v586_v22, %v590_v23 }
 0x13f   : > { %v598_v25 = vmul.f32 %v1007_v11, %v592_v24 }
 0x141   : > { %v603_v26 = vpack.c.bf16 %v598_v25, %v598_v25 }
 0x143   : > { %608 = vrot.lane.b32.xlu1 %v603_v26, %s1026_s23 }
 0x1ad   : > { %v607_v27 = vpop.permute.xlu0 %606 }
 0x1ae   : > { %613 = vst.msk [vmem:[#allocation2] sm:$0xf] %vm612_vm6, %v607_v27 }
 0x1b5   : > { %v609_v28 = vpop.permute.xlu1 %608  ;;  %v953_v29 = vld [vmem:[#allocation2] sm:$0xf] }
 0x1b6   : > { %614 = vst.msk [vmem:[#allocation2 + $0x4] sm:$0xf] %vm612_vm6, %v609_v28 }
 0x1bd   : > { %v983_v30 = vld [vmem:[#allocation2] sm:$0xf0] }
 0x1be   : > { %v954_v31 = vor.u32 %v983_v30, %v953_v29 }
 0x1c0   : > { %686 = vrot.lane.b32.xlu1 %v954_v31, %s1018_s29  ;;  %664 = vrot.lane.b32.xlu0 %v954_v31, %s1016_s27 }
 0x1c1   : > { %625 = vrot.lane.b32.xlu2 %v954_v31, %s1017_s28  ;;  %656 = vmatpush.bf16.msra.mxu2 %v954_v31 }
 0x1c4   : > { %956 = vmatmul.msk.bf16.vlgmr.msra.gmra.mxu2 %vm628_vm7, %v617_v33 }
 0x1c8   : > { %752 = vrot.lane.b32.xlu1 %v954_v31, %s1019_s30  ;;  %730 = vrot.lane.b32.xlu0 %v954_v31, %s1021_s8 }
 0x1c9   : > { %708 = vrot.lane.b32.xlu2 %v954_v31, %s1020_s7 }
 0x1d0   : > { %819 = vperm.xlu1 %1004, %v816_v32   ;;  %796 = vrot.lane.b32.xlu0 %v954_v31, %s1023_s10 }
 0x1d1   : > { %774 = vrot.lane.b32.xlu2 %v954_v31, %s1022_s9 }
 0x21b   : > { %v626_v34 = vpop.permute.xlu2 %625 }
 0x21c   : > { %639 = vmatpush.bf16.msra.mxu1 %v626_v34 }
 0x21f   : > { %955 = vmatmul.msk.bf16.vlgmr.msra.gmra.mxu1 %vm628_vm7, %v950_v35 }
 0x223   : > { %v709_v36 = vpop.permute.xlu2 %708 }
 0x224   : > { %721 = vmatpush.bf16.msrb.mxu1 %v709_v36 }
 0x22b   : > { %v775_v40 = vpop.permute.xlu2 %774 }
 0x22f   : > { %962 = vmatmul.msk.bf16.vlgmr.msrb.gmra.mxu1 %vm628_vm7, %v961_v37 }
 0x232   : > { %v687_v38 = vpop.permute.xlu1 %686  ;;  %v665_v39 = vpop.permute.xlu0 %664 }
 0x233   : > { %677 = vmatpush.bf16.msra.mxu3 %v665_v39  ;;  %699 = vmatpush.bf16.msrb.mxu0 %v687_v38 }
 0x236   : > { %958 = vmatmul.msk.bf16.vlgmr.msra.gmra.mxu3 %vm628_vm7, %v957_v41  ;;  %960 = vmatmul.msk.bf16.vlgmr.msrb.gmra.mxu0 %vm628_vm7, %v959_v42 }
 0x237   : > { %787 = vmatpush.bf16.msra.mxu0 %v775_v40 }
 0x23a   : > { %v753_v43 = vpop.permute.xlu1 %752  ;;  %v731_v44 = vpop.permute.xlu0 %730 }
 0x23b   : > { %743 = vmatpush.bf16.msrb.mxu2 %v731_v44  ;;  %765 = vmatpush.bf16.msrb.mxu3 %v753_v43 }
 0x23e   : > { %964 = vmatmul.msk.bf16.vlgmr.msrb.gmra.mxu2 %vm628_vm7, %v963_v45 }
 0x242   : > { %v797_v46 = vpop.permute.xlu0 %796  ;;  %v820_v11 = vpop.permute.xlu1 %819 }
 0x243   : > { %809 = vmatpush.bf16.msra.mxu1 %v797_v46 }
 0x246   : > { %966 = vmatmul.msk.bf16.vlgmr.msrb.gmra.mxu3 %vm628_vm7, %v965_v47  ;;  %968 = vmatmul.msk.bf16.vlgmr.msra.gmra.mxu0 %vm628_vm7, %v967_v48 }
 0x247   : > { %970 = vmatmul.msk.bf16.vlgmr.msra.gmra.mxu1 %vm628_vm7, %v969_v49  ;;  %v658_v50 = vpop.f32.mrf.mxu2 }
 0x24f   : > { %v660_v51 = vpop.f32.mrf.mxu2 }
 0x29c   : > { %v641_v52 = vpop.f32.mrf.mxu1 }
 0x29d   : > { %v659_v59 = vadd.f32 %v658_v50, %v641_v52 }
 0x2a4   : > { %v643_v53 = vpop.f32.mrf.mxu1 }
 0x2ac   : > { %v723_v54 = vpop.f32.mrf.mxu1 }
 0x2b3   : > { %v701_v55 = vpop.f32.mrf.mxu0 }
 0x2b4   : > { %v725_v56 = vpop.f32.mrf.mxu1 }
 0x2b9   : > { %v679_v57 = vpop.f32.mrf.mxu3 }
 0x2ba   : > { %v683_v60 = vadd.f32 %v679_v57, %v659_v59 }
 0x2bb   : > { %v703_v58 = vpop.f32.mrf.mxu0 }
 0x2bc   : > { %v705_v63 = vadd.f32 %v701_v55, %v683_v60 }
 0x2be   : > { %v727_v2 = vadd.f32 %v723_v54, %v705_v63 }
 0x2c1   : > { %v681_v61 = vpop.f32.mrf.mxu3  ;;  %v745_v62 = vpop.f32.mrf.mxu2 }
 0x2c2   : > { %v749_v3 = vadd.f32 %v745_v62, %v727_v2 }
 0x2c3   : > { %v789_v0 = vpop.f32.mrf.mxu0 }
 0x2c4   : > { %v811_v1 = vpop.f32.mrf.mxu1 }
 0x2c9   : > { %v767_v4 = vpop.f32.mrf.mxu3  ;;  %v747_v5 = vpop.f32.mrf.mxu2 }
 0x2ca   : > { %v771_v6 = vadd.f32 %v767_v4, %v749_v3 }
 0x2cb   : > { %v791_v7 = vpop.f32.mrf.mxu0 }
 0x2cc   : > { %v793_v8 = vadd.f32 %v789_v0, %v771_v6  ;;  %v813_v9 = vpop.f32.mrf.mxu1 }
 0x2ce   : > { %v815_v10 = vadd.f32 %v811_v1, %v793_v8 }
 0x2d0   : > { %v822_v12 = vadd.f32 %v820_v11, %v815_v10 }
 0x2d1   : > { %v769_v13 = vpop.f32.mrf.mxu3 }
 0x2d2   : > { %824 = vst.msk [vmem:[%s249_s25] sm:$0x3] %vm823_vm8, %v822_v12 }
 0x2d3 PF: > { %s16_s21 = sadd.s32 1, %s1014_s21  }
 0x2d4   : > { %p13_p4 = scmp.ge.s32.totalorder %s16_s21, 4  }
 0x2d6   :  { %15 = sbr.rel (!%p13_p4) target bundleno = 1 (0x1), region = 90 }

</bundles_post_ra>
